<compile_context>
chip_gen: v6e
topology: v6e:2x2x1
jax: 0.10.0
libtpu: 0.0.40
codegen_flags: <defaults>
</compile_context>

<pallas_src>
import functools

import jax
import jax.numpy as jnp
from jax import lax
from jax.experimental import pallas as pl
from jax.experimental.pallas import tpu as pltpu

K = 5            # conv kernel size (both convs)
C_IN = 3         # in_channels of conv1 (matches module)
C_MID = 80       # out_channels of both convs (matches module)
CP = 128         # lane-padded channel count
NUM_CLASSES = 2  # matches module default
NCP = 128        # lane-padded class count


# ----------------------------------------------------------------------------
# Fused kernel: conv1 -> relu -> conv2 -> relu -> maxpool(2,2) -> fc
# ----------------------------------------------------------------------------
def _cnn_fused_kernel(x_ref, w1_ref, b1_ref, w2_ref, b2_ref, wfc_ref, bfc_ref,
                      o_ref, *, H, W):
    # x_ref  : (1, H*W, C_IN)        bf16   flattened NHWC rows
    # w1_ref : (K*K*C_IN, CP)        bf16   (kh, kw, cin) x padded cout
    # w2_ref : (K*K*CP, CP)          bf16   (kh, kw, padded cin) x padded cout
    # b1_ref, b2_ref : (1, CP)       f32
    # wfc_ref: (Hp*Wp, CP, NCP)      f32    pre-permuted to NCHW flatten order
    # bfc_ref: (1, NCP)              f32
    # o_ref  : (1, 1, NCP)           f32
    H1, W1 = H - K + 1, W - K + 1          # after conv1 (VALID)
    H2, W2 = H1 - K + 1, W1 - K + 1        # after conv2 (VALID)
    Hp, Wp = H2 // 2, W2 // 2              # after 2x2 maxpool
    M1 = (H1 - 1) * W + W1                 # flattened conv1 rows we need
    M2 = (H2 - 1) * W + W2                 # flattened conv2 rows we need

    # ---- conv1 + relu: one im2col matmul --------------------------------
    xf = x_ref[0].astype(jnp.float32)                         # (H*W, C_IN)
    taps1 = [xf[kh * W + kw: kh * W + kw + M1, :]
             for kh in range(K) for kw in range(K)]           # 25 x (M1, C_IN)
    p1 = jnp.concatenate(taps1, axis=1).astype(jnp.bfloat16)  # (M1, K*K*C_IN)
    a1 = jnp.dot(p1, w1_ref[...], preferred_element_type=jnp.float32)
    a1 = jnp.maximum(a1 + b1_ref[...], 0.0)                   # (M1, CP) f32

    # ---- conv2 + relu: one im2col matmul (128-lane aligned concat) ------
    taps2 = [a1[kh * W + kw: kh * W + kw + M2, :]
             for kh in range(K) for kw in range(K)]           # 25 x (M2, CP)
    p2 = jnp.concatenate(taps2, axis=1).astype(jnp.bfloat16)  # (M2, K*K*CP)
    a2 = jnp.dot(p2, w2_ref[...], preferred_element_type=jnp.float32)
    a2 = jnp.maximum(a2 + b2_ref[...], 0.0)                   # (M2, CP) f32

    # ---- maxpool 2x2 stride 2: two shifted VPU maxes ---------------------
    # pmax[i*W + j, :] = max over the 2x2 conv2 window anchored at (i, j)
    hmax = jnp.maximum(a2[:M2 - 1, :], a2[1:, :])             # cols j, j+1
    pmax = jnp.maximum(hmax[:M2 - 1 - W, :], hmax[W:, :])     # rows i, i+1

    # ---- fused FC (weights carry the torch NCHW-flatten ordering) --------
    acc = bfc_ref[...]                                        # (1, NCP) f32
    for p in range(Hp):
        for q in range(Wp):
            s = (2 * p) * W + (2 * q)
            acc = acc + jnp.dot(pmax[s:s + 1, :], wfc_ref[p * Wp + q],
                                preferred_element_type=jnp.float32)
    o_ref[0] = acc


# ----------------------------------------------------------------------------
# Wrapper
# ----------------------------------------------------------------------------
def cnn_forward(x_nchw, params):
    w1, b1, w2, b2, wfc, bfc = params
    N, _, H, W = x_nchw.shape
    H1, W1 = H - K + 1, W - K + 1
    H2, W2 = H1 - K + 1, W1 - K + 1
    Hp, Wp = H2 // 2, W2 // 2

    # glue: NCHW -> flattened NHWC rows (channels minor), bf16 for DMA/MXU
    xf = jnp.transpose(x_nchw, (0, 2, 3, 1)).reshape(N, H * W, C_IN)
    xf = xf.astype(jnp.bfloat16)

    # pack conv weights, lane-padding 80 -> 128 output (and input) channels
    w1p = jnp.pad(w1.reshape(K * K * C_IN, C_MID),
                  ((0, 0), (0, CP - C_MID))).astype(jnp.bfloat16)
    w2p = jnp.pad(w2, ((0, 0), (0, 0), (0, CP - C_MID), (0, CP - C_MID)))
    w2p = w2p.reshape(K * K * CP, CP).astype(jnp.bfloat16)
    b1p = jnp.pad(b1, ((0, 0), (0, CP - C_MID))).astype(jnp.float32)
    b2p = jnp.pad(b2, ((0, 0), (0, CP - C_MID))).astype(jnp.float32)

    # FC weight pre-permuted so torch.flatten(NCHW) ordering is baked in:
    # wfc3[p*Wp+q, c, k] = wfc[c*Hp*Wp + p*Wp + q, k]
    wfc3 = wfc.reshape(C_MID, Hp * Wp, NUM_CLASSES).transpose(1, 0, 2)
    wfc3 = jnp.pad(wfc3, ((0, 0), (0, CP - C_MID),
                          (0, NCP - NUM_CLASSES))).astype(jnp.float32)
    bfcp = jnp.pad(bfc, ((0, 0), (0, NCP - NUM_CLASSES))).astype(jnp.float32)

    kernel = functools.partial(_cnn_fused_kernel, H=H, W=W)
    out_p = pl.pallas_call(
        kernel,
        out_shape=jax.ShapeDtypeStruct((N, 1, NCP), jnp.float32),
        grid=(N,),
        in_specs=[
            pl.BlockSpec((1, H * W, C_IN), lambda n: (n, 0, 0)),
            pl.BlockSpec((K * K * C_IN, CP), lambda n: (0, 0)),
            pl.BlockSpec((1, CP), lambda n: (0, 0)),
            pl.BlockSpec((K * K * CP, CP), lambda n: (0, 0)),
            pl.BlockSpec((1, CP), lambda n: (0, 0)),
            pl.BlockSpec((Hp * Wp, CP, NCP), lambda n: (0, 0, 0)),
            pl.BlockSpec((1, NCP), lambda n: (0, 0)),
        ],
        out_specs=pl.BlockSpec((1, 1, NCP), lambda n: (n, 0, 0)),
        compiler_params=pltpu.CompilerParams(
            dimension_semantics=("parallel",)),
    )(xf, w1p, b1p, w2p, b2p, wfc3, bfcp)

    # glue: drop the lane padding on the class dim
    return out_p[:, 0, :NUM_CLASSES]


def init_params(key, fc_in, num_classes=NUM_CLASSES):
    ks = jax.random.split(key, 6)
    s1 = 1.0 / (K * K * C_IN) ** 0.5
    w1 = jax.random.uniform(ks[0], (K, K, C_IN, C_MID), jnp.float32, -s1, s1)
    b1 = jax.random.uniform(ks[1], (1, C_MID), jnp.float32, -s1, s1)
    s2 = 1.0 / (K * K * C_MID) ** 0.5
    w2 = jax.random.uniform(ks[2], (K, K, C_MID, C_MID), jnp.float32, -s2, s2)
    b2 = jax.random.uniform(ks[3], (1, C_MID), jnp.float32, -s2, s2)
    s3 = 1.0 / fc_in ** 0.5
    wfc = jax.random.uniform(ks[4], (fc_in, num_classes), jnp.float32, -s3, s3)
    bfc = jax.random.uniform(ks[5], (1, num_classes), jnp.float32, -s3, s3)
    return w1, b1, w2, b2, wfc, bfc


def reference_forward(x_nchw, params):
    """Pure-JAX f32 reference of the PyTorch forward (NCHW)."""
    w1, b1, w2, b2, wfc, bfc = params
    dn = ("NCHW", "HWIO", "NCHW")
    y = lax.conv_general_dilated(x_nchw, w1, (1, 1), "VALID",
                                 dimension_numbers=dn,
                                 precision=lax.Precision.HIGHEST)
    y = jnp.maximum(y + b1.reshape(1, C_MID, 1, 1), 0.0)
    y = lax.conv_general_dilated(y, w2, (1, 1), "VALID",
                                 dimension_numbers=dn,
                                 precision=lax.Precision.HIGHEST)
    y = jnp.maximum(y + b2.reshape(1, C_MID, 1, 1), 0.0)
    y = lax.reduce_window(y, -jnp.inf, lax.max,
                          (1, 1, 2, 2), (1, 1, 2, 2), "VALID")
    y = y.reshape(y.shape[0], -1)
    return jnp.dot(y, wfc, precision=lax.Precision.HIGHEST) + bfc


if __name__ == "__main__":
    N, H, W = 2, 14, 14                      # 14x14 -> 10x10 -> 6x6 -> pool 3x3
    Hp = Wp = (H - 2 * (K - 1)) // 2
    fc_in = C_MID * Hp * Wp                  # 80 * 3 * 3 = 720

    key = jax.random.PRNGKey(0)
    kx, kp = jax.random.split(key)
    x = jax.random.normal(kx, (N, C_IN, H, W), jnp.float32)
    params = init_params(kp, fc_in)

    out = jax.block_until_ready(cnn_forward(x, params))
    assert out.shape == (N, NUM_CLASSES), out.shape

    ref = jax.block_until_ready(reference_forward(x, params))
    err = float(jnp.max(jnp.abs(out - ref)))
    # explicit error budget for bf16 matmuls with f32 accumulation
    assert err < 2e-2, f"mismatch vs reference: {err}"

    print("KERNEL_OK")
</pallas_src>

<mosaic_0001>
module attributes {stable_mosaic.version = 11 : i64} {
  func.func @_cnn_fused_kernel(%arg0: i32, %arg1: memref<1x196x3xbf16, #tpu.memory_space<vmem>>, %arg2: memref<75x128xbf16, #tpu.memory_space<vmem>>, %arg3: memref<1x128xf32, #tpu.memory_space<vmem>>, %arg4: memref<3200x128xbf16, #tpu.memory_space<vmem>>, %arg5: memref<1x128xf32, #tpu.memory_space<vmem>>, %arg6: memref<9x128x128xf32, #tpu.memory_space<vmem>>, %arg7: memref<1x128xf32, #tpu.memory_space<vmem>>, %arg8: memref<1x1x128xf32, #tpu.memory_space<vmem>>) attributes {dimension_semantics = [#tpu.dimension_semantics<parallel>], iteration_bounds = array<i64: 2>, scalar_prefetch = 0 : i64, scratch_operands = 0 : i64, tpu.core_type = #tpu.core_type<tc>, window_params = [{transform_indices = @transform_0, window_bounds = array<i64: 1, 196, 3>}, {pipeline_mode = #tpu.pipeline_mode<synchronous>, transform_indices = @transform_1, window_bounds = array<i64: 75, 128>}, {pipeline_mode = #tpu.pipeline_mode<synchronous>, transform_indices = @transform_2, window_bounds = array<i64: 1, 128>}, {pipeline_mode = #tpu.pipeline_mode<synchronous>, transform_indices = @transform_3, window_bounds = array<i64: 3200, 128>}, {pipeline_mode = #tpu.pipeline_mode<synchronous>, transform_indices = @transform_4, window_bounds = array<i64: 1, 128>}, {pipeline_mode = #tpu.pipeline_mode<synchronous>, transform_indices = @transform_5, window_bounds = array<i64: 9, 128, 128>}, {pipeline_mode = #tpu.pipeline_mode<synchronous>, transform_indices = @transform_6, window_bounds = array<i64: 1, 128>}, {transform_indices = @transform_7, window_bounds = array<i64: 1, 1, 128>}]} {
    %c0 = arith.constant 0 : index
    %c0_0 = arith.constant 0 : index
    %c0_1 = arith.constant 0 : index
    %0 = vector.load %arg1[%c0, %c0_0, %c0_1] : memref<1x196x3xbf16, #tpu.memory_space<vmem>>, vector<1x196x3xbf16>
    %1 = vector.shape_cast %0 : vector<1x196x3xbf16> to vector<196x3xbf16>
    %2 = arith.extf %1 : vector<196x3xbf16> to vector<196x3xf32>
    %3 = vector.extract_strided_slice %2 {offsets = [0, 0], sizes = [136, 3], strides = [1, 1]} : vector<196x3xf32> to vector<136x3xf32>
    %4 = vector.extract_strided_slice %2 {offsets = [1, 0], sizes = [136, 3], strides = [1, 1]} : vector<196x3xf32> to vector<136x3xf32>
    %5 = vector.extract_strided_slice %2 {offsets = [2, 0], sizes = [136, 3], strides = [1, 1]} : vector<196x3xf32> to vector<136x3xf32>
    %6 = vector.extract_strided_slice %2 {offsets = [3, 0], sizes = [136, 3], strides = [1, 1]} : vector<196x3xf32> to vector<136x3xf32>
    %7 = vector.extract_strided_slice %2 {offsets = [4, 0], sizes = [136, 3], strides = [1, 1]} : vector<196x3xf32> to vector<136x3xf32>
    %8 = vector.extract_strided_slice %2 {offsets = [14, 0], sizes = [136, 3], strides = [1, 1]} : vector<196x3xf32> to vector<136x3xf32>
    %9 = vector.extract_strided_slice %2 {offsets = [15, 0], sizes = [136, 3], strides = [1, 1]} : vector<196x3xf32> to vector<136x3xf32>
    %10 = vector.extract_strided_slice %2 {offsets = [16, 0], sizes = [136, 3], strides = [1, 1]} : vector<196x3xf32> to vector<136x3xf32>
    %11 = vector.extract_strided_slice %2 {offsets = [17, 0], sizes = [136, 3], strides = [1, 1]} : vector<196x3xf32> to vector<136x3xf32>
    %12 = vector.extract_strided_slice %2 {offsets = [18, 0], sizes = [136, 3], strides = [1, 1]} : vector<196x3xf32> to vector<136x3xf32>
    %13 = vector.extract_strided_slice %2 {offsets = [28, 0], sizes = [136, 3], strides = [1, 1]} : vector<196x3xf32> to vector<136x3xf32>
    %14 = vector.extract_strided_slice %2 {offsets = [29, 0], sizes = [136, 3], strides = [1, 1]} : vector<196x3xf32> to vector<136x3xf32>
    %15 = vector.extract_strided_slice %2 {offsets = [30, 0], sizes = [136, 3], strides = [1, 1]} : vector<196x3xf32> to vector<136x3xf32>
    %16 = vector.extract_strided_slice %2 {offsets = [31, 0], sizes = [136, 3], strides = [1, 1]} : vector<196x3xf32> to vector<136x3xf32>
    %17 = vector.extract_strided_slice %2 {offsets = [32, 0], sizes = [136, 3], strides = [1, 1]} : vector<196x3xf32> to vector<136x3xf32>
    %18 = vector.extract_strided_slice %2 {offsets = [42, 0], sizes = [136, 3], strides = [1, 1]} : vector<196x3xf32> to vector<136x3xf32>
    %19 = vector.extract_strided_slice %2 {offsets = [43, 0], sizes = [136, 3], strides = [1, 1]} : vector<196x3xf32> to vector<136x3xf32>
    %20 = vector.extract_strided_slice %2 {offsets = [44, 0], sizes = [136, 3], strides = [1, 1]} : vector<196x3xf32> to vector<136x3xf32>
    %21 = vector.extract_strided_slice %2 {offsets = [45, 0], sizes = [136, 3], strides = [1, 1]} : vector<196x3xf32> to vector<136x3xf32>
    %22 = vector.extract_strided_slice %2 {offsets = [46, 0], sizes = [136, 3], strides = [1, 1]} : vector<196x3xf32> to vector<136x3xf32>
    %23 = vector.extract_strided_slice %2 {offsets = [56, 0], sizes = [136, 3], strides = [1, 1]} : vector<196x3xf32> to vector<136x3xf32>
    %24 = vector.extract_strided_slice %2 {offsets = [57, 0], sizes = [136, 3], strides = [1, 1]} : vector<196x3xf32> to vector<136x3xf32>
    %25 = vector.extract_strided_slice %2 {offsets = [58, 0], sizes = [136, 3], strides = [1, 1]} : vector<196x3xf32> to vector<136x3xf32>
    %26 = vector.extract_strided_slice %2 {offsets = [59, 0], sizes = [136, 3], strides = [1, 1]} : vector<196x3xf32> to vector<136x3xf32>
    %27 = vector.extract_strided_slice %2 {offsets = [60, 0], sizes = [136, 3], strides = [1, 1]} : vector<196x3xf32> to vector<136x3xf32>
    %28 = tpu.concatenate %3, %4, %5, %6, %7, %8, %9, %10, %11, %12, %13, %14, %15, %16, %17, %18 in 1 : vector<136x3xf32>, vector<136x3xf32>, vector<136x3xf32>, vector<136x3xf32>, vector<136x3xf32>, vector<136x3xf32>, vector<136x3xf32>, vector<136x3xf32>, vector<136x3xf32>, vector<136x3xf32>, vector<136x3xf32>, vector<136x3xf32>, vector<136x3xf32>, vector<136x3xf32>, vector<136x3xf32>, vector<136x3xf32> -> vector<136x48xf32>
    %29 = tpu.concatenate %19, %20, %21, %22, %23, %24, %25, %26, %27 in 1 : vector<136x3xf32>, vector<136x3xf32>, vector<136x3xf32>, vector<136x3xf32>, vector<136x3xf32>, vector<136x3xf32>, vector<136x3xf32>, vector<136x3xf32>, vector<136x3xf32> -> vector<136x27xf32>
    %30 = tpu.concatenate %28, %29 in 1 : vector<136x48xf32>, vector<136x27xf32> -> vector<136x75xf32>
    %31 = arith.truncf %30 : vector<136x75xf32> to vector<136x75xbf16>
    %c0_2 = arith.constant 0 : index
    %c0_3 = arith.constant 0 : index
    %32 = vector.load %arg2[%c0_2, %c0_3] : memref<75x128xbf16, #tpu.memory_space<vmem>>, vector<75x128xbf16>
    %cst = arith.constant dense<0.000000e+00> : vector<136x128xf32>
    %33 = tpu.matmul %31, %32, %cst {dimension_numbers = #tpu.dot_dimension_numbers<[1], [0], [0], [1], [0, 0, 1, 1], [], []>} : vector<136x75xbf16>, vector<75x128xbf16>, vector<136x128xf32> -> vector<136x128xf32>
    %c0_4 = arith.constant 0 : index
    %c0_5 = arith.constant 0 : index
    %34 = vector.load %arg3[%c0_4, %c0_5] : memref<1x128xf32, #tpu.memory_space<vmem>>, vector<1x128xf32>
    %35 = vector.broadcast %34 : vector<1x128xf32> to vector<136x128xf32>
    %36 = arith.addf %33, %35 : vector<136x128xf32>
    %cst_6 = arith.constant 0.000000e+00 : f32
    %37 = vector.broadcast %cst_6 : f32 to vector<136x128xf32>
    %38 = arith.maximumf %36, %37 : vector<136x128xf32>
    %39 = vector.extract_strided_slice %38 {offsets = [0, 0], sizes = [76, 128], strides = [1, 1]} : vector<136x128xf32> to vector<76x128xf32>
    %40 = vector.extract_strided_slice %38 {offsets = [1, 0], sizes = [76, 128], strides = [1, 1]} : vector<136x128xf32> to vector<76x128xf32>
    %41 = vector.extract_strided_slice %38 {offsets = [2, 0], sizes = [76, 128], strides = [1, 1]} : vector<136x128xf32> to vector<76x128xf32>
    %42 = vector.extract_strided_slice %38 {offsets = [3, 0], sizes = [76, 128], strides = [1, 1]} : vector<136x128xf32> to vector<76x128xf32>
    %43 = vector.extract_strided_slice %38 {offsets = [4, 0], sizes = [76, 128], strides = [1, 1]} : vector<136x128xf32> to vector<76x128xf32>
    %44 = vector.extract_strided_slice %38 {offsets = [14, 0], sizes = [76, 128], strides = [1, 1]} : vector<136x128xf32> to vector<76x128xf32>
    %45 = vector.extract_strided_slice %38 {offsets = [15, 0], sizes = [76, 128], strides = [1, 1]} : vector<136x128xf32> to vector<76x128xf32>
    %46 = vector.extract_strided_slice %38 {offsets = [16, 0], sizes = [76, 128], strides = [1, 1]} : vector<136x128xf32> to vector<76x128xf32>
    %47 = vector.extract_strided_slice %38 {offsets = [17, 0], sizes = [76, 128], strides = [1, 1]} : vector<136x128xf32> to vector<76x128xf32>
    %48 = vector.extract_strided_slice %38 {offsets = [18, 0], sizes = [76, 128], strides = [1, 1]} : vector<136x128xf32> to vector<76x128xf32>
    %49 = vector.extract_strided_slice %38 {offsets = [28, 0], sizes = [76, 128], strides = [1, 1]} : vector<136x128xf32> to vector<76x128xf32>
    %50 = vector.extract_strided_slice %38 {offsets = [29, 0], sizes = [76, 128], strides = [1, 1]} : vector<136x128xf32> to vector<76x128xf32>
    %51 = vector.extract_strided_slice %38 {offsets = [30, 0], sizes = [76, 128], strides = [1, 1]} : vector<136x128xf32> to vector<76x128xf32>
    %52 = vector.extract_strided_slice %38 {offsets = [31, 0], sizes = [76, 128], strides = [1, 1]} : vector<136x128xf32> to vector<76x128xf32>
    %53 = vector.extract_strided_slice %38 {offsets = [32, 0], sizes = [76, 128], strides = [1, 1]} : vector<136x128xf32> to vector<76x128xf32>
    %54 = vector.extract_strided_slice %38 {offsets = [42, 0], sizes = [76, 128], strides = [1, 1]} : vector<136x128xf32> to vector<76x128xf32>
    %55 = vector.extract_strided_slice %38 {offsets = [43, 0], sizes = [76, 128], strides = [1, 1]} : vector<136x128xf32> to vector<76x128xf32>
    %56 = vector.extract_strided_slice %38 {offsets = [44, 0], sizes = [76, 128], strides = [1, 1]} : vector<136x128xf32> to vector<76x128xf32>
    %57 = vector.extract_strided_slice %38 {offsets = [45, 0], sizes = [76, 128], strides = [1, 1]} : vector<136x128xf32> to vector<76x128xf32>
    %58 = vector.extract_strided_slice %38 {offsets = [46, 0], sizes = [76, 128], strides = [1, 1]} : vector<136x128xf32> to vector<76x128xf32>
    %59 = vector.extract_strided_slice %38 {offsets = [56, 0], sizes = [76, 128], strides = [1, 1]} : vector<136x128xf32> to vector<76x128xf32>
    %60 = vector.extract_strided_slice %38 {offsets = [57, 0], sizes = [76, 128], strides = [1, 1]} : vector<136x128xf32> to vector<76x128xf32>
    %61 = vector.extract_strided_slice %38 {offsets = [58, 0], sizes = [76, 128], strides = [1, 1]} : vector<136x128xf32> to vector<76x128xf32>
    %62 = vector.extract_strided_slice %38 {offsets = [59, 0], sizes = [76, 128], strides = [1, 1]} : vector<136x128xf32> to vector<76x128xf32>
    %63 = vector.extract_strided_slice %38 {offsets = [60, 0], sizes = [76, 128], strides = [1, 1]} : vector<136x128xf32> to vector<76x128xf32>
    %64 = tpu.concatenate %39, %40, %41, %42, %43, %44, %45, %46, %47, %48, %49, %50, %51, %52, %53, %54 in 1 : vector<76x128xf32>, vector<76x128xf32>, vector<76x128xf32>, vector<76x128xf32>, vector<76x128xf32>, vector<76x128xf32>, vector<76x128xf32>, vector<76x128xf32>, vector<76x128xf32>, vector<76x128xf32>, vector<76x128xf32>, vector<76x128xf32>, vector<76x128xf32>, vector<76x128xf32>, vector<76x128xf32>, vector<76x128xf32> -> vector<76x2048xf32>
    %65 = tpu.concatenate %55, %56, %57, %58, %59, %60, %61, %62, %63 in 1 : vector<76x128xf32>, vector<76x128xf32>, vector<76x128xf32>, vector<76x128xf32>, vector<76x128xf32>, vector<76x128xf32>, vector<76x128xf32>, vector<76x128xf32>, vector<76x128xf32> -> vector<76x1152xf32>
    %66 = tpu.concatenate %64, %65 in 1 : vector<76x2048xf32>, vector<76x1152xf32> -> vector<76x3200xf32>
    %67 = arith.truncf %66 : vector<76x3200xf32> to vector<76x3200xbf16>
    %c0_7 = arith.constant 0 : index
    %c0_8 = arith.constant 0 : index
    %68 = vector.load %arg4[%c0_7, %c0_8] : memref<3200x128xbf16, #tpu.memory_space<vmem>>, vector<3200x128xbf16>
    %cst_9 = arith.constant dense<0.000000e+00> : vector<76x128xf32>
    %69 = tpu.matmul %67, %68, %cst_9 {dimension_numbers = #tpu.dot_dimension_numbers<[1], [0], [0], [1], [0, 0, 1, 1], [], []>} : vector<76x3200xbf16>, vector<3200x128xbf16>, vector<76x128xf32> -> vector<76x128xf32>
    %c0_10 = arith.constant 0 : index
    %c0_11 = arith.constant 0 : index
    %70 = vector.load %arg5[%c0_10, %c0_11] : memref<1x128xf32, #tpu.memory_space<vmem>>, vector<1x128xf32>
    %71 = vector.broadcast %70 : vector<1x128xf32> to vector<76x128xf32>
    %72 = arith.addf %69, %71 : vector<76x128xf32>
    %cst_12 = arith.constant 0.000000e+00 : f32
    %73 = vector.broadcast %cst_12 : f32 to vector<76x128xf32>
    %74 = arith.maximumf %72, %73 : vector<76x128xf32>
    %75 = vector.extract_strided_slice %74 {offsets = [0, 0], sizes = [75, 128], strides = [1, 1]} : vector<76x128xf32> to vector<75x128xf32>
    %76 = vector.extract_strided_slice %74 {offsets = [1, 0], sizes = [75, 128], strides = [1, 1]} : vector<76x128xf32> to vector<75x128xf32>
    %77 = arith.maximumf %75, %76 : vector<75x128xf32>
    %78 = vector.extract_strided_slice %77 {offsets = [0, 0], sizes = [61, 128], strides = [1, 1]} : vector<75x128xf32> to vector<61x128xf32>
    %79 = vector.extract_strided_slice %77 {offsets = [14, 0], sizes = [61, 128], strides = [1, 1]} : vector<75x128xf32> to vector<61x128xf32>
    %80 = arith.maximumf %78, %79 : vector<61x128xf32>
    %c0_13 = arith.constant 0 : index
    %c0_14 = arith.constant 0 : index
    %81 = vector.load %arg7[%c0_13, %c0_14] : memref<1x128xf32, #tpu.memory_space<vmem>>, vector<1x128xf32>
    %82 = vector.extract_strided_slice %80 {offsets = [0, 0], sizes = [1, 128], strides = [1, 1]} : vector<61x128xf32> to vector<1x128xf32>
    %c0_15 = arith.constant 0 : index
    %c0_16 = arith.constant 0 : index
    %c0_17 = arith.constant 0 : index
    %83 = vector.load %arg6[%c0_15, %c0_16, %c0_17] : memref<9x128x128xf32, #tpu.memory_space<vmem>>, vector<1x128x128xf32>
    %84 = vector.shape_cast %83 : vector<1x128x128xf32> to vector<128x128xf32>
    %cst_18 = arith.constant dense<0.000000e+00> : vector<1x128xf32>
    %85 = tpu.matmul %82, %84, %cst_18 {dimension_numbers = #tpu.dot_dimension_numbers<[1], [0], [0], [1], [0, 0, 1, 1], [], []>} : vector<1x128xf32>, vector<128x128xf32>, vector<1x128xf32> -> vector<1x128xf32>
    %86 = arith.addf %81, %85 : vector<1x128xf32>
    %87 = vector.extract_strided_slice %80 {offsets = [2, 0], sizes = [1, 128], strides = [1, 1]} : vector<61x128xf32> to vector<1x128xf32>
    %c1 = arith.constant 1 : index
    %c0_19 = arith.constant 0 : index
    %c0_20 = arith.constant 0 : index
    %88 = vector.load %arg6[%c1, %c0_19, %c0_20] : memref<9x128x128xf32, #tpu.memory_space<vmem>>, vector<1x128x128xf32>
    %89 = vector.shape_cast %88 : vector<1x128x128xf32> to vector<128x128xf32>
    %cst_21 = arith.constant dense<0.000000e+00> : vector<1x128xf32>
    %90 = tpu.matmul %87, %89, %cst_21 {dimension_numbers = #tpu.dot_dimension_numbers<[1], [0], [0], [1], [0, 0, 1, 1], [], []>} : vector<1x128xf32>, vector<128x128xf32>, vector<1x128xf32> -> vector<1x128xf32>
    %91 = arith.addf %86, %90 : vector<1x128xf32>
    %92 = vector.extract_strided_slice %80 {offsets = [4, 0], sizes = [1, 128], strides = [1, 1]} : vector<61x128xf32> to vector<1x128xf32>
    %c2 = arith.constant 2 : index
    %c0_22 = arith.constant 0 : index
    %c0_23 = arith.constant 0 : index
    %93 = vector.load %arg6[%c2, %c0_22, %c0_23] : memref<9x128x128xf32, #tpu.memory_space<vmem>>, vector<1x128x128xf32>
    %94 = vector.shape_cast %93 : vector<1x128x128xf32> to vector<128x128xf32>
    %cst_24 = arith.constant dense<0.000000e+00> : vector<1x128xf32>
    %95 = tpu.matmul %92, %94, %cst_24 {dimension_numbers = #tpu.dot_dimension_numbers<[1], [0], [0], [1], [0, 0, 1, 1], [], []>} : vector<1x128xf32>, vector<128x128xf32>, vector<1x128xf32> -> vector<1x128xf32>
    %96 = arith.addf %91, %95 : vector<1x128xf32>
    %97 = vector.extract_strided_slice %80 {offsets = [28, 0], sizes = [1, 128], strides = [1, 1]} : vector<61x128xf32> to vector<1x128xf32>
    %c3 = arith.constant 3 : index
    %c0_25 = arith.constant 0 : index
    %c0_26 = arith.constant 0 : index
    %98 = vector.load %arg6[%c3, %c0_25, %c0_26] : memref<9x128x128xf32, #tpu.memory_space<vmem>>, vector<1x128x128xf32>
    %99 = vector.shape_cast %98 : vector<1x128x128xf32> to vector<128x128xf32>
    %cst_27 = arith.constant dense<0.000000e+00> : vector<1x128xf32>
    %100 = tpu.matmul %97, %99, %cst_27 {dimension_numbers = #tpu.dot_dimension_numbers<[1], [0], [0], [1], [0, 0, 1, 1], [], []>} : vector<1x128xf32>, vector<128x128xf32>, vector<1x128xf32> -> vector<1x128xf32>
    %101 = arith.addf %96, %100 : vector<1x128xf32>
    %102 = vector.extract_strided_slice %80 {offsets = [30, 0], sizes = [1, 128], strides = [1, 1]} : vector<61x128xf32> to vector<1x128xf32>
    %c4 = arith.constant 4 : index
    %c0_28 = arith.constant 0 : index
    %c0_29 = arith.constant 0 : index
    %103 = vector.load %arg6[%c4, %c0_28, %c0_29] : memref<9x128x128xf32, #tpu.memory_space<vmem>>, vector<1x128x128xf32>
    %104 = vector.shape_cast %103 : vector<1x128x128xf32> to vector<128x128xf32>
    %cst_30 = arith.constant dense<0.000000e+00> : vector<1x128xf32>
    %105 = tpu.matmul %102, %104, %cst_30 {dimension_numbers = #tpu.dot_dimension_numbers<[1], [0], [0], [1], [0, 0, 1, 1], [], []>} : vector<1x128xf32>, vector<128x128xf32>, vector<1x128xf32> -> vector<1x128xf32>
    %106 = arith.addf %101, %105 : vector<1x128xf32>
    %107 = vector.extract_strided_slice %80 {offsets = [32, 0], sizes = [1, 128], strides = [1, 1]} : vector<61x128xf32> to vector<1x128xf32>
    %c5 = arith.constant 5 : index
    %c0_31 = arith.constant 0 : index
    %c0_32 = arith.constant 0 : index
    %108 = vector.load %arg6[%c5, %c0_31, %c0_32] : memref<9x128x128xf32, #tpu.memory_space<vmem>>, vector<1x128x128xf32>
    %109 = vector.shape_cast %108 : vector<1x128x128xf32> to vector<128x128xf32>
    %cst_33 = arith.constant dense<0.000000e+00> : vector<1x128xf32>
    %110 = tpu.matmul %107, %109, %cst_33 {dimension_numbers = #tpu.dot_dimension_numbers<[1], [0], [0], [1], [0, 0, 1, 1], [], []>} : vector<1x128xf32>, vector<128x128xf32>, vector<1x128xf32> -> vector<1x128xf32>
    %111 = arith.addf %106, %110 : vector<1x128xf32>
    %112 = vector.extract_strided_slice %80 {offsets = [56, 0], sizes = [1, 128], strides = [1, 1]} : vector<61x128xf32> to vector<1x128xf32>
    %c6 = arith.constant 6 : index
    %c0_34 = arith.constant 0 : index
    %c0_35 = arith.constant 0 : index
    %113 = vector.load %arg6[%c6, %c0_34, %c0_35] : memref<9x128x128xf32, #tpu.memory_space<vmem>>, vector<1x128x128xf32>
    %114 = vector.shape_cast %113 : vector<1x128x128xf32> to vector<128x128xf32>
    %cst_36 = arith.constant dense<0.000000e+00> : vector<1x128xf32>
    %115 = tpu.matmul %112, %114, %cst_36 {dimension_numbers = #tpu.dot_dimension_numbers<[1], [0], [0], [1], [0, 0, 1, 1], [], []>} : vector<1x128xf32>, vector<128x128xf32>, vector<1x128xf32> -> vector<1x128xf32>
    %116 = arith.addf %111, %115 : vector<1x128xf32>
    %117 = vector.extract_strided_slice %80 {offsets = [58, 0], sizes = [1, 128], strides = [1, 1]} : vector<61x128xf32> to vector<1x128xf32>
    %c7 = arith.constant 7 : index
    %c0_37 = arith.constant 0 : index
    %c0_38 = arith.constant 0 : index
    %118 = vector.load %arg6[%c7, %c0_37, %c0_38] : memref<9x128x128xf32, #tpu.memory_space<vmem>>, vector<1x128x128xf32>
    %119 = vector.shape_cast %118 : vector<1x128x128xf32> to vector<128x128xf32>
    %cst_39 = arith.constant dense<0.000000e+00> : vector<1x128xf32>
    %120 = tpu.matmul %117, %119, %cst_39 {dimension_numbers = #tpu.dot_dimension_numbers<[1], [0], [0], [1], [0, 0, 1, 1], [], []>} : vector<1x128xf32>, vector<128x128xf32>, vector<1x128xf32> -> vector<1x128xf32>
    %121 = arith.addf %116, %120 : vector<1x128xf32>
    %122 = vector.extract_strided_slice %80 {offsets = [60, 0], sizes = [1, 128], strides = [1, 1]} : vector<61x128xf32> to vector<1x128xf32>
    %c8 = arith.constant 8 : index
    %c0_40 = arith.constant 0 : index
    %c0_41 = arith.constant 0 : index
    %123 = vector.load %arg6[%c8, %c0_40, %c0_41] : memref<9x128x128xf32, #tpu.memory_space<vmem>>, vector<1x128x128xf32>
    %124 = vector.shape_cast %123 : vector<1x128x128xf32> to vector<128x128xf32>
    %cst_42 = arith.constant dense<0.000000e+00> : vector<1x128xf32>
    %125 = tpu.matmul %122, %124, %cst_42 {dimension_numbers = #tpu.dot_dimension_numbers<[1], [0], [0], [1], [0, 0, 1, 1], [], []>} : vector<1x128xf32>, vector<128x128xf32>, vector<1x128xf32> -> vector<1x128xf32>
    %126 = arith.addf %121, %125 : vector<1x128xf32>
    %c0_43 = arith.constant 0 : index
    %c0_44 = arith.constant 0 : index
    %c0_45 = arith.constant 0 : index
    %127 = vector.load %arg8[%c0_43, %c0_44, %c0_45] : memref<1x1x128xf32, #tpu.memory_space<vmem>>, vector<1x1x128xf32>
    %128 = vector.shape_cast %127 : vector<1x1x128xf32> to vector<1x128xf32>
    %129 = vector.shape_cast %126 : vector<1x128xf32> to vector<1x1x128xf32>
    tpu.vector_store %arg8[%c0_43, %c0_44, %c0_45], %129 {strides = array<i32>} : memref<1x1x128xf32, #tpu.memory_space<vmem>>, vector<1x1x128xf32>,
    return
  }
  func.func @transform_0(%arg0: i32) -> (i32, i32, i32) {
    %c0_i32 = arith.constant 0 : i32
    %c0_i32_0 = arith.constant 0 : i32
    %c0_i32_1 = arith.constant 0 : i32
    return %arg0, %c0_i32, %c0_i32_0 : i32, i32, i32
  }
  func.func @transform_1(%arg0: i32) -> (i32, i32) {
    %c0_i32 = arith.constant 0 : i32
    %c0_i32_0 = arith.constant 0 : i32
    %c0_i32_1 = arith.constant 0 : i32
    return %c0_i32, %c0_i32_0 : i32, i32
  }
  func.func @transform_2(%arg0: i32) -> (i32, i32) {
    %c0_i32 = arith.constant 0 : i32
    %c0_i32_0 = arith.constant 0 : i32
    %c0_i32_1 = arith.constant 0 : i32
    return %c0_i32, %c0_i32_0 : i32, i32
  }
  func.func @transform_3(%arg0: i32) -> (i32, i32) {
    %c0_i32 = arith.constant 0 : i32
    %c0_i32_0 = arith.constant 0 : i32
    %c0_i32_1 = arith.constant 0 : i32
    return %c0_i32, %c0_i32_0 : i32, i32
  }
  func.func @transform_4(%arg0: i32) -> (i32, i32) {
    %c0_i32 = arith.constant 0 : i32
    %c0_i32_0 = arith.constant 0 : i32
    %c0_i32_1 = arith.constant 0 : i32
    return %c0_i32, %c0_i32_0 : i32, i32
  }
  func.func @transform_5(%arg0: i32) -> (i32, i32, i32) {
    %c0_i32 = arith.constant 0 : i32
    %c0_i32_0 = arith.constant 0 : i32
    %c0_i32_1 = arith.constant 0 : i32
    %c0_i32_2 = arith.constant 0 : i32
    return %c0_i32, %c0_i32_0, %c0_i32_1 : i32, i32, i32
  }
  func.func @transform_6(%arg0: i32) -> (i32, i32) {
    %c0_i32 = arith.constant 0 : i32
    %c0_i32_0 = arith.constant 0 : i32
    %c0_i32_1 = arith.constant 0 : i32
    return %c0_i32, %c0_i32_0 : i32, i32
  }
  func.func @transform_7(%arg0: i32) -> (i32, i32, i32) {
    %c0_i32 = arith.constant 0 : i32
    %c0_i32_0 = arith.constant 0 : i32
    %c0_i32_1 = arith.constant 0 : i32
    return %arg0, %c0_i32, %c0_i32_0 : i32, i32, i32
  }
}

</mosaic_0001>

<bundles_post_ra>
// kernel: tpu_custom_call.1
= control target key start
LH: loop header
LB: loop body
LE: loop exit
PB: predicated region body
PF: predicated region fallthrough
CT: control target
= control target key end

     0   :  { %12 = vsyncpa [#allocation3], 0  ;;  %s13463_s0 = inlined_call_operand.vmem [shape: bf16[2,196,3], index: 0, kind: input, shape index: {}]   ;;  %s13464_s1 = inlined_call_operand.vmem [shape: bf16[75,128], index: 1, kind: input, shape index: {}]   ;;  %s13465_s2 = inlined_call_operand.vmem [shape: f32[1,128], index: 2, kind: input, shape index: {}]   ;;  %s13466_s3 = inlined_call_operand.hbm [shape: bf16[3200,128], index: 3, kind: input, shape index: {}]   ;;  %s13467_s4 = inlined_call_operand.vmem [shape: f32[1,128], index: 4, kind: input, shape index: {}]   ;;  %s13468_s5 = inlined_call_operand.hbm [shape: f32[9,128,128], index: 5, kind: input, shape index: {}]   ;;  %s13469_s6 = inlined_call_operand.vmem [shape: f32[1,128], index: 6, kind: input, shape index: {}]   ;;  %s13470_s7 = inlined_call_operand.hbm [shape: f32[2,1,128], index: 7, kind: output, shape index: {}]  }
   0x1   :  { %13 = vsyncpa [#allocation6], 0 }
   0x2   :  { %14 = vsyncpa [#allocation4], 0 }
   0x3   :  { %16 = vsyncpa [#allocation4 + $0x1], 0  ;;  %s9189_s24 = smov 0   ;;  %s9191_s25 = smov 0  }
   0x4   :  { %s9193_s26 = smov 0   ;;  %s9195_s27 = smov 0  }
   0x5 LB: > { %s9210_s28 = sadd.s32 4294967295, %s9121_s27   ;;  %s6509_s29 = sadd.s32 4294967294, %s9121_s27   ;;  %s9121_s27 = sphi %s9195_s27, %s14640_s27   ;;  %s9117_s26 = sphi %s9193_s26, %s14639_s26   ;;  %s9113_s25 = sphi %s9191_s25, %s14638_s25   ;;  %s9109_s24 = sphi %s9189_s24, %s14637_s24  }
   0x6   : > { %s9214_s30 = sadd.s32 1, %s9121_s27   ;;  %s181_s8 = sadd.s32 1, %s9117_s26 }
   0x7   : > { %s178_s9 = ssub.s32 %s9121_s27, %s9214_s30  ;;  %p191_p0 = scmp.ne.s32.totalorder %s9117_s26, %s9113_s25 }
   0x8   : > { %p179_p1 = scmp.eq.s32.totalorder %s178_s9, 0  ;;  %p192_p2 = scmp.eq.s32.totalorder %s9210_s28, 1 }
   0x9   : > { %p197_p3 = scmp.ne.s32.totalorder %s9113_s25, %s9109_s24  ;;  %p198_p4 = scmp.eq.s32.totalorder %s6509_s29, 1 }
   0xa   : > { %s9225_s10 = scalar_select %p179_p1, %s9117_s26, %s181_s8  }
   0xb   : > { %p9227_p5 = por %p192_p2, %p191_p0  ;;  %p9231_p6 = por %p198_p4, %p197_p3 }
   0xc   : > { %p6510_p7 = scmp.ge.s32.totalorder %s9121_s27, 1  ;;  %p205_p8 = scmp.lt.s32.totalorder %s9121_s27, 3 }
   0xd   : > { %s13772_s12 = scalar_select %p9231_p6, 1, 0 }
   0xe   : > { %p13471_p9 = scmp.eq.s32.totalorder %s9210_s28, 0  ;;  %p9238_p10 = pnand %p6510_p7, %p205_p8 }
   0xf   : > { %s9123_s14 = smov [#allocation2]   ;;  %s9124_s17 = smov [#allocation5]  }
  0x10   : > { %s223_s15 = sshll.u32 %s9123_s14, 4  ;;  %p7936_p11 = pneg %p9238_p10  ;;  %s224_s15 = int_to_ptr.vmem [resolvable:$true] %s223_s15 }
  0x11   : > { %s239_s18 = sshll.u32 %s9124_s17, 4  ;;  %s9012_s19 = scalar_lea.vmem %s224_s15, 25600  ;;  %s240_s18 = int_to_ptr.vmem [resolvable:$true] %s239_s18 }
  0x12   : > { %p9246_p12 = pnand %p13471_p9, %p7936_p11  ;;  %p9013_p0 = scmp.ne.s32.totalorder %s224_s15, %s9012_s19 }
  0x13   : > { %p9020_p3 = scmp.lt.s32.totalorder %s224_s15, %s224_s15  ;;  %p9021_p4 = scmp.lt.s32.totalorder %s9012_s19, %s9012_s19 }
  0x14   : > { %p9003_p13 = pneg %p9246_p12 }
  0x15   : > { %p9022_p7 = por %p9021_p4, %p9020_p3 }
  0x16   : > { %p9015_p1 = pnand %p9013_p0, %p9003_p13 }
  0x18   : > { %p9016_p2 = pneg %p9015_p1 }
  0x1a   : > { %p9023_p8 = pnand %p9022_p7, %p9016_p2 }
  0x1c   : > { %9026 = shalt.err (!%p9023_p8)
}
  0x1d   : > { %s9125_s20 = smov 64   ;;  %s9126_s21 = smov 4  }
  0x1e   : > { %7939 = dma.hbm_to_vmem [thread:$0]  (!%p9246_p12), %s13466_s3, 25600, %s224_s15, [#allocation3], %s9125_s20, %s9125_s20, %s9126_s21  }
  0x1f   : > { %s9038_s29 = scalar_lea.vmem %s240_s18, 18432  ;;  %p9046_p9 = scmp.lt.s32.totalorder %s240_s18, %s240_s18 }
  0x20   : > { %p9039_p11 = scmp.ne.s32.totalorder %s240_s18, %s9038_s29  ;;  %p9047_p6 = scmp.lt.s32.totalorder %s9038_s29, %s9038_s29 }
  0x22   : > { %p9041_p0 = pnand %p9039_p11, %p9003_p13  ;;  %p9048_p3 = por %p9047_p6, %p9046_p9 }
  0x24   : > { %p9042_p1 = pneg %p9041_p0 }
  0x26   : > { %p9049_p2 = pnand %p9048_p3, %p9042_p1 }
  0x28   : > { %9052 = shalt.err (!%p9049_p2)
}
  0x29   : > { %s9127_s8 = smov 128   ;;  %s9128_s9 = smov 8  }
  0x2a   : > { %7942 = dma.hbm_to_vmem [thread:$0]  (!%p9246_p12), %s13468_s5, 18432, %s240_s18, [#allocation6], %s9127_s8, %s9127_s8, %s9128_s9  }
  0x2b   : > { %266 = sbr.rel (%p9238_p10) target bundleno = 1576 (0x628), region = 48 }
  0x30   : > { %p13775_p4 = scmp.eq.s32.totalorder %s9210_s28, 0 }
  0x32   : > { %9096 = dma.done.wait (%p13775_p4), [#allocation3], 25600   ;;  %p13776_p13 = pmov %p13775_p4 }
  0x33   : > { %p13777_p6 = pmov %p13775_p4 }
  0x34   : > { %9098 = vsyncadd (%p13776_p13), [#allocation3], 4294941696 }
  0x35   : > { %9100 = dma.done.wait (%p13777_p6), [#allocation6], 18432   ;;  %p13778_p9 = pmov %p13775_p4 }
  0x36   : > { %p301_p7 = scmp.lt.s32.totalorder %s9210_s28, 1  ;;  %vm13653_vm0 = vcmask 1045504   ;;  %vm13655_vm1 = vcmask 1046528   ;;  %vm13669_vm2 = vcmask 1044480   ;;  %vm13645_vm3 = vcmask 1042432   ;;  %s13524_s20 = smov 6  }
  0x37   : > { %9102 = vsyncadd (%p13778_p9), [#allocation6], 4294948864  ;;  %s13534_s21 = smov 3   ;;  %vm13658_vm4 = vcmask 1041408   ;;  %vm13643_vm5 = vcmask 1040384   ;;  %s13519_s22 = smov 9  }
  0x38   : > { %s302_s15 = scalar_select %p301_p7, %s9210_s28, 1  ;;  %vm13654_vm6 = vcmask 1043456   ;;  %vm13660_vm7 = vcmask 23552   ;;  %vm13671_vm8 = vcmask 48128   ;;  %vm13668_vm9 = vcmask 72704  }
  0x39   : > { %s13611_s23 = smov 12   ;;  %s13607_s29 = smov 15   ;;  %vm13667_vm10 = vcmask 97280   ;;  %vm13666_vm11 = vcmask 121856   ;;  %vm1515_vm12 = vcmask 146432   ;;  %vm13659_vm13 = vcmask 171008  }
  0x3a   : > { %s7925_s16 = smul.u32 100, %s302_s15  ;;  %s13541_s8 = smov 18   ;;  %vm1551_vm14 = vcmask 195584   ;;  %vm13656_vm15 = vmmov 0  }
  0x3b   : > { %s13603_s9 = smov 21   ;;  %s13562_s14 = smov 24  }
  0x3c   : > { %s9283_s19 = scalar_lea.vmem %s13463_s0, %s7925_s16  ;;  %s9137_s17 = smov 27  }
  0x3d   : > { %v9286_v0 = vld [vmem:[%s9283_s19 + $0x10] sm:$0xff]   ;;  %v6787_v1 = vld [vmem:[%s9283_s19 + $0x18] sm:$0xff]   ;;  %v6788_v2 = vld [vmem:[%s9283_s19 + $0x20] sm:$0xff]   ;;  %s13674_s15 = smov 30   ;;  %s13569_s16 = smov 33  }
  0x3e   : > { %v9291_v3 = vunpack.c.h.bf16 %v9286_v0  ;;  %v9293_v4 = vunpack.c.l.bf16 %v6787_v1  ;;  %v9295_v5 = vunpack.c.h.bf16 %v6787_v1  ;;  %v9297_v6 = vunpack.c.l.bf16 %v6788_v2  ;;  %v9300_v7 = vld [vmem:[%s9283_s19 + $0x28] sm:$0xff]   ;;  %v6790_v57 = vld [vmem:[%s9283_s19 + $0x30] sm:$0xff]   ;;  %s13664_s18 = smov 39   ;;  %s13881_s13 = smov 18  }
  0x3f   : > { %v9302_v8 = vunpack.c.h.bf16 %v6788_v2  ;;  %v9305_v9 = vunpack.c.l.bf16 %v9300_v7  ;;  %v9409_v60 = vunpack.c.h.bf16 %v9300_v7 }
  0x40   : > { %v13473_v10 = vrot.slane %v9291_v3, 2  ;;  %v474_v11 = vrot.slane %v9293_v4, 2  ;;  %v476_v12 = vrot.slane %v9295_v5, 2  ;;  %v13474_v13 = vrot.slane %v9291_v3, 1 }
  0x41   : > { %v387_v14 = vrot.slane %v9293_v4, 1  ;;  %v389_v15 = vrot.slane %v9295_v5, 1  ;;  %v478_v16 = vrot.slane %v9297_v6, 2  ;;  %v480_v17 = vrot.slane %v9302_v8, 2 }
  0x42   : > { %v9318_v18 = vsel %vm13653_vm0, %v13473_v10, %v474_v11  ;;  %v9321_v19 = vsel %vm13653_vm0, %v474_v11, %v476_v12  ;;  %v391_v20 = vrot.slane %v9297_v6, 1  ;;  %v393_v21 = vrot.slane %v9302_v8, 1 }
  0x43   : > { %v9327_v22 = vpack.i.bf16 %v9321_v19, %v9318_v18  ;;  %v388_v23 = vsel %vm13655_vm1, %v13474_v13, %v387_v14  ;;  %v390_v24 = vsel %vm13655_vm1, %v387_v14, %v389_v15  ;;  %v9334_v25 = vsel %vm13653_vm0, %v476_v12, %v478_v16 }
  0x44   : > { %v9336_v26 = vpack.i.bf16 %v390_v24, %v388_v23  ;;  %v9341_v27 = vsel %vm13653_vm0, %v478_v16, %v480_v17  ;;  %v392_v28 = vsel %vm13655_vm1, %v389_v15, %v391_v20  ;;  %v394_v30 = vsel %vm13655_vm1, %v391_v20, %v393_v21 }
  0x45   : > { %13779 = vst [vmem:[#allocation11_spill] sm:$0xff] %v9341_v27  ;;  %8020 = vrot.lane.b32.xlu1 %v9327_v22, %s13524_s20  ;;  %v9348_v29 = vpack.i.bf16 %v9341_v27, %v9334_v25  ;;  %v563_v31 = vrot.slane %v9295_v5, 3  ;;  %v565_v32 = vrot.slane %v9297_v6, 3  ;;  %v9357_v33 = vpack.i.bf16 %v394_v30, %v392_v28 }
  0x46   : > { %8010 = vrot.lane.b32.xlu0 %v9336_v26, %s13534_s21  ;;  %v567_v34 = vrot.slane %v9302_v8, 3  ;;  %v13472_v35 = vrot.slane %v9291_v3, 3  ;;  %v561_v36 = vrot.slane %v9293_v4, 3  ;;  %v1128_v38 = vrot.slane %v9297_v6, 5 }
  0x47   : > { %v566_v37 = vsel %vm13669_vm2, %v563_v31, %v565_v32  ;;  %v1130_v39 = vrot.slane %v9302_v8, 5  ;;  %v1132_v40 = vrot.slane %v9305_v9, 5  ;;  %v9374_v44 = vrot.slane %v9295_v5, 5 }
  0x48   : > { %v568_v41 = vsel %vm13669_vm2, %v565_v32, %v567_v34  ;;  %v562_v42 = vsel %vm13669_vm2, %v13472_v35, %v561_v36  ;;  %v564_v43 = vsel %vm13669_vm2, %v561_v36, %v563_v31  ;;  %v740_v49 = vrot.slane %v9302_v8, 6 }
  0x49   : > { %8025 = vrot.lane.b32.xlu1 %v9348_v29, %s13524_s20  ;;  %v8034_v45 = vpack.i.bf16 %v568_v41, %v566_v37  ;;  %v8029_v46 = vpack.i.bf16 %v564_v43, %v562_v42  ;;  %v9381_v47 = vsel %vm13645_vm3, %v1128_v38, %v1130_v39  ;;  %v9384_v48 = vsel %vm13645_vm3, %v1130_v39, %v1132_v40 }
  0x4a   : > { %8015 = vrot.lane.b32.xlu0 %v9357_v33, %s13534_s21  ;;  %13780 = vst [vmem:[#allocation12_spill] sm:$0xff] %v9384_v48  ;;  %v9389_v50 = vsel %vm13645_vm3, %v9374_v44, %v1128_v38  ;;  %v9392_v51 = vrot.slane %v9295_v5, 6  ;;  %v742_v52 = vrot.slane %v9305_v9, 6  ;;  %v738_v53 = vrot.slane %v9297_v6, 6 }
  0x4b   : > { %v8044_v54 = vpack.i.bf16 %v9384_v48, %v9381_v47  ;;  %v827_v55 = vrot.slane %v9302_v8, 7  ;;  %v829_v56 = vrot.slane %v9305_v9, 7  ;;  %v8039_v58 = vpack.i.bf16 %v9389_v50, %v9374_v44 }
  0x4c   : > { %v9406_v59 = vsel %vm13658_vm4, %v740_v49, %v742_v52  ;;  %v739_v61 = vsel %vm13658_vm4, %v9392_v51, %v738_v53  ;;  %v741_v62 = vsel %vm13658_vm4, %v738_v53, %v740_v49  ;;  %v9415_v63 = vrot.slane %v9295_v5, 7 }
  0x4d   : > { %8035 = vrot.lane.b32.xlu1 %v8034_v45, %s13519_s22  ;;  %13781 = vst [vmem:[#allocation13_spill] sm:$0xff] %v9406_v59  ;;  %v825_v1 = vrot.slane %v9297_v6, 7  ;;  %v8054_v2 = vpack.i.bf16 %v9406_v59, %v9392_v51  ;;  %v1134_v11 = vrot.slane %v9409_v60, 5  ;;  %v9423_v7 = vpack.i.bf16 %v741_v62, %v739_v61 }
  0x4e   : > { %8030 = vrot.lane.b32.xlu0 %v8029_v46, %s13519_s22  ;;  %v9426_v12 = vsel %vm13643_vm5, %v827_v55, %v829_v56  ;;  %v9428_v14 = vunpack.c.l.bf16 %v6790_v57  ;;  %v831_v24 = vrot.slane %v9409_v60, 7  ;;  %v395_v30 = vrot.slane %v9305_v9, 1 }
  0x4f   : > { %13782 = vst [vmem:[#allocation14_spill] sm:$0xff] %v9426_v12  ;;  %v826_v15 = vsel %vm13643_vm5, %v9415_v63, %v825_v1  ;;  %v828_v16 = vsel %vm13643_vm5, %v825_v1, %v827_v55  ;;  %v9434_v20 = vsel %vm13645_vm3, %v1132_v40, %v1134_v11  ;;  %v8064_v28 = vpack.i.bf16 %v9426_v12, %v9415_v63  ;;  %v6791_v55 = vld [vmem:[%s9283_s19 + $0x38] sm:$0xff]  }
  0x50   : > { %13783 = vst [vmem:[#allocation15_spill] sm:$0xff] %v9434_v20  ;;  %v744_v31 = vrot.slane %v9409_v60, 6  ;;  %v9446_v32 = vpack.i.bf16 %v828_v16, %v826_v15  ;;  %v397_v36 = vrot.slane %v9409_v60, 1  ;;  %v1136_v37 = vrot.slane %v9428_v14, 5 }
  0x51   : > { %8045 = vrot.lane.b32.xlu1 %v8044_v54, %s13611_s23  ;;  %v9451_v38 = vsel %vm13643_vm5, %v829_v56, %v831_v24  ;;  %v9460_v42 = vunpack.c.h.bf16 %v6790_v57  ;;  %v8074_v43 = vpack.i.bf16 %v9305_v9, %v9302_v8  ;;  %v8069_v45 = vpack.i.bf16 %v9297_v6, %v9295_v5 }
  0x52   : > { %8040 = vrot.lane.b32.xlu0 %v8039_v58, %s13611_s23  ;;  %13784 = vst [vmem:[#allocation16_spill] sm:$0xff] %v9451_v38  ;;  %v9456_v40 = vsel %vm13658_vm4, %v742_v52, %v744_v31  ;;  %v482_v46 = vrot.slane %v9305_v9, 2  ;;  %v13476_v49 = vrot.slane %v9409_v60, 2  ;;  %v396_v52 = vsel %vm13655_vm1, %v393_v21, %v395_v30 }
  0x53   : > { %13785 = vst [vmem:[#allocation17_spill] sm:$0xff] %v9456_v40  ;;  %v398_v53 = vsel %vm13655_vm1, %v395_v30, %v397_v36  ;;  %v833_v54 = vrot.slane %v9428_v14, 7  ;;  %v1138_v56 = vrot.slane %v9460_v42, 5  ;;  %v835_v57 = vrot.slane %v9460_v42, 7 }
  0x54   : > { %v9482_v58 = vsel %vm13645_vm3, %v1134_v11, %v1136_v37  ;;  %v746_v61 = vrot.slane %v9428_v14, 6  ;;  %v8084_v21 = vpack.i.bf16 %v398_v53, %v396_v52  ;;  %v9492_v1 = vsel %vm13653_vm0, %v480_v17, %v482_v46 }
  0x55   : > { %8055 = vrot.lane.b32.xlu1 %v8054_v2, %s13607_s29  ;;  %13786 = vst [vmem:[#allocation18_spill] sm:$0xff] %v9482_v58  ;;  %v9486_v62 = vsel %vm13645_vm3, %v1136_v37, %v1138_v56  ;;  %13788 = vst [vmem:[#allocation20_spill] sm:$0xff] %v9492_v1  ;;  %v9494_v2 = vunpack.c.l.bf16 %v6791_v55  ;;  %v9502_v15 = vsel %vm13653_vm0, %v482_v46, %v13476_v49  ;;  %v748_v17 = vrot.slane %v9460_v42, 6 }
  0x56   : > { %8050 = vrot.lane.b32.xlu0 %v9423_v7, %s13607_s29  ;;  %13787 = vst [vmem:[#allocation19_spill] sm:$0xff] %v9486_v62  ;;  %13790 = vst [vmem:[#allocation22_spill] sm:$0xff] %v9502_v15  ;;  %v9505_v16 = vsel %vm13643_vm5, %v831_v24, %v833_v54  ;;  %v569_v30 = vrot.slane %v9305_v9, 3  ;;  %v13475_v37 = vrot.slane %v9409_v60, 3  ;;  %v9524_v24 = vpack.i.bf16 %v9502_v15, %v9492_v1 }
  0x57   : > { %13789 = vst [vmem:[#allocation21_spill] sm:$0xff] %v9494_v2  ;;  %13791 = vst [vmem:[#allocation23_spill] sm:$0xff] %v9505_v16  ;;  %v9519_v46 = vsel %vm13658_vm4, %v746_v61, %v748_v17  ;;  %v1140_v52 = vrot.slane %v9494_v2, 5  ;;  %v399_v11 = vrot.slane %v9428_v14, 1  ;;  %v837_v53 = vrot.slane %v9494_v2, 7 }
  0x58   : > { %13794 = vst [vmem:[#allocation26_spill] sm:$0xff] %v9519_v46  ;;  %13795 = vst [vmem:[#allocation27_spill] sm:$0xff] %v9524_v24  ;;  %v401_v23 = vrot.slane %v9460_v42, 1  ;;  %v8114_v10 = vpack.i.bf16 %v9505_v16, %v9451_v38  ;;  %v575_v15 = vrot.slane %v9460_v42, 3 }
  0x59   : > { %8065 = vrot.lane.b32.xlu1 %v8064_v28, %s13541_s8  ;;  %v9508_v28 = vsel %vm13643_vm5, %v833_v54, %v835_v57  ;;  %v9529_v54 = vunpack.c.h.bf16 %v6791_v55  ;;  %v750_v55 = vrot.slane %v9494_v2, 6  ;;  %v9573_v35 = vsel %vm13643_vm5, %v835_v57, %v837_v53 }
  0x5a   : > { %8060 = vrot.lane.b32.xlu0 %v9446_v32, %s13541_s8  ;;  %13792 = vst [vmem:[#allocation24_spill] sm:$0xff] %v9508_v28  ;;  %13799 = vst [vmem:[#allocation31_spill] sm:$0xff] %v9573_v35  ;;  %v13803_v57 = vrot.slane %v9409_v60, 2 }
  0x5b   : > { %13796 = vst [vmem:[#allocation28_spill] sm:$0xff] %v9529_v54  ;;  %v1142_v39 = vrot.slane %v9529_v54, 5  ;;  %v9576_v49 = vsel %vm13658_vm4, %v748_v17, %v750_v55 }
  0x5c   : > { %13800 = vst [vmem:[#allocation32_spill] sm:$0xff] %v9576_v49 }
  0x5d   : > { %8075 = vrot.lane.b32.xlu1 %v8074_v43, %s13603_s9  ;;  %v572_v43 = vsel %vm13669_vm2, %v569_v30, %v13475_v37  ;;  %v9552_v41 = vsel %vm13645_vm3, %v1140_v52, %v1142_v39  ;;  %v839_v37 = vrot.slane %v9529_v54, 7 }
  0x5e   : > { %8070 = vrot.lane.b32.xlu0 %v8069_v45, %s13603_s9  ;;  %v9516_v45 = vsel %vm13658_vm4, %v744_v31, %v746_v61  ;;  %v6792_v31 = vld [vmem:[%s9283_s19 + $0x40] sm:$0xff]   ;;  %v570_v61 = vsel %vm13669_vm2, %v567_v34, %v569_v30  ;;  %v9549_v34 = vsel %vm13645_vm3, %v1138_v56, %v1140_v52  ;;  %13798 = vst [vmem:[#allocation30_spill] sm:$0xff] %v9552_v41  ;;  %v752_v56 = vrot.slane %v9529_v54, 6 }
  0x5f   : > { %13793 = vst [vmem:[#allocation25_spill] sm:$0xff] %v9516_v45  ;;  %13797 = vst [vmem:[#allocation29_spill] sm:$0xff] %v9549_v34  ;;  %v8099_v30 = vpack.i.bf16 %v572_v43, %v570_v61  ;;  %v9560_v13 = vunpack.c.l.bf16 %v6792_v31  ;;  %v8109_v52 = vpack.i.bf16 %v9516_v45, %v9456_v40  ;;  %v486_v43 = vrot.slane %v9428_v14, 2 }
  0x60   : > { %v488_v61 = vrot.slane %v9460_v42, 2  ;;  %v9579_v16 = vsel %vm13643_vm5, %v837_v53, %v839_v37 }
  0x61   : > { %8085 = vrot.lane.b32.xlu1 %v8084_v21, %s13562_s14  ;;  %13801 = vst [vmem:[#allocation33_spill] sm:$0xff] %v9579_v16  ;;  %v1144_v17 = vrot.slane %v9560_v13, 5 }
  0x62   : > { %8080 = vrot.lane.b32.xlu0 %v9357_v33, %s13562_s14  ;;  %v8104_v33 = vpack.i.bf16 %v9482_v58, %v9434_v20  ;;  %v9582_v58 = vsel %vm13658_vm4, %v750_v55, %v752_v56  ;;  %v9606_v45 = vsel %vm13653_vm0, %v486_v43, %v488_v61 }
  0x63   : > { %13802 = vst [vmem:[#allocation34_spill] sm:$0xff] %v9582_v58  ;;  %13805 = vst [vmem:[#allocation36_spill] sm:$0xff] %v9606_v45 }
  0x65   : > { %8095 = vrot.lane.b32.xlu1 %v9524_v24, %s13524_s20 }
  0x66   : > { %8090 = vrot.lane.b32.xlu0 %v8084_v21, %s13534_s21  ;;  %v400_v21 = vsel %vm13655_vm1, %v397_v36, %v399_v11  ;;  %v402_v36 = vsel %vm13655_vm1, %v399_v11, %v401_v23  ;;  %v573_v11 = vrot.slane %v9428_v14, 3 }
  0x67   : > { %v8124_v55 = vpack.i.bf16 %v402_v36, %v400_v21  ;;  %v9611_v36 = vsel %vm13645_vm3, %v1142_v39, %v1144_v17  ;;  %v13809_v39 = vrot.slane %v9409_v60, 3 }
  0x68   : > { %13806 = vst [vmem:[#allocation37_spill] sm:$0xff] %v9611_v36 }
  0x69   : > { %8105 = vrot.lane.b32.xlu1 %v8104_v33, %s13611_s23  ;;  %v9590_v33 = vunpack.c.h.bf16 %v6792_v31  ;;  %v9603_v31 = vsel %vm13653_vm0, %v13803_v57, %v486_v43  ;;  %v754_v57 = vrot.slane %v9560_v13, 6  ;;  %v574_v21 = vsel %vm13669_vm2, %v13809_v39, %v573_v11 }
  0x6a   : > { %8100 = vrot.lane.b32.xlu0 %v8099_v30, %s13519_s22  ;;  %v8119_v30 = vpack.i.bf16 %v9428_v14, %v9409_v60  ;;  %13804 = vst [vmem:[#allocation35_spill] sm:$0xff] %v9603_v31  ;;  %v9623_v43 = vpack.i.bf16 %v9606_v45, %v9603_v31  ;;  %v405_v39 = vrot.slane %v9529_v54, 1  ;;  %v8159_v45 = vpack.i.bf16 %v9494_v2, %v9460_v42 }
  0x6b   : > { %v13482_v53 = vrot.slane %v9590_v33, 5  ;;  %v13486_v31 = vrot.slane %v9590_v33, 6 }
  0x6c   : > { %13808 = vst [vmem:[#allocation39_spill] sm:$0xff] %v9623_v43 }
  0x6d   : > { %8115 = vrot.lane.b32.xlu1 %v8114_v10, %s13541_s8  ;;  %v841_v10 = vrot.slane %v9560_v13, 7  ;;  %v9616_v12 = vsel %vm13645_vm3, %v1144_v17, %v13482_v53  ;;  %v576_v17 = vsel %vm13669_vm2, %v573_v11, %v575_v15 }
  0x6e   : > { %8110 = vrot.lane.b32.xlu0 %v8109_v52, %s13607_s29  ;;  %13807 = vst [vmem:[#allocation38_spill] sm:$0xff] %v9616_v12  ;;  %v13811_v52 = vrot.slane %v9590_v33, 7  ;;  %v8139_v11 = vpack.i.bf16 %v576_v17, %v574_v21  ;;  %v490_v21 = vrot.slane %v9494_v2, 2  ;;  %v492_v17 = vrot.slane %v9529_v54, 2 }
  0x6f   : > { %v9632_v53 = vsel %vm13643_vm5, %v839_v37, %v841_v10  ;;  %v403_v37 = vrot.slane %v9494_v2, 1 }
  0x70   : > { %13810 = vst [vmem:[#allocation40_spill] sm:$0xff] %v9632_v53  ;;  %v9637_v38 = vsel %vm13643_vm5, %v841_v10, %v13811_v52  ;;  %v9650_v10 = vsel %vm13658_vm4, %v752_v56, %v754_v57  ;;  %v9655_v52 = vsel %vm13658_vm4, %v754_v57, %v13486_v31  ;;  %v8149_v56 = vpack.i.bf16 %v9576_v49, %v9519_v46  ;;  %v6738_v49 = vld [vmem:[%s9283_s19] sm:$0xff]  }
  0x71   : > { %8125 = vrot.lane.b32.xlu1 %v8124_v55, %s13562_s14  ;;  %13812 = vst [vmem:[#allocation41_spill] sm:$0xff] %v9637_v38  ;;  %13813 = vst [vmem:[#allocation42_spill] sm:$0xff] %v9650_v10  ;;  %v404_v57 = vsel %vm13655_vm1, %v401_v23, %v403_v37  ;;  %v406_v31 = vsel %vm13655_vm1, %v403_v37, %v405_v39  ;;  %v577_v23 = vrot.slane %v9494_v2, 3  ;;  %v13491_v37 = vrot.slane %v9529_v54, 3 }
  0x72   : > { %8120 = vrot.lane.b32.xlu0 %v8119_v30, %s13603_s9  ;;  %v8144_v30 = vpack.i.bf16 %v9549_v34, %v9486_v62  ;;  %13814 = vst [vmem:[#allocation43_spill] sm:$0xff] %v9655_v52  ;;  %v407_v34 = vrot.slane %v9560_v13, 1  ;;  %v13505_v46 = vrot.slane %v9293_v4, 6 }
  0x75   : > { %8135 = vrot.lane.b32.xlu1 %v9623_v43, %s13524_s20 }
  0x76   : > { %8130 = vrot.lane.b32.xlu0 %v8124_v55, %s13534_s21  ;;  %v8154_v55 = vpack.i.bf16 %v9573_v35, %v9508_v28  ;;  %v9674_v35 = vsel %vm13653_vm0, %v488_v61, %v490_v21  ;;  %v578_v61 = vsel %vm13669_vm2, %v575_v15, %v577_v23 }
  0x77   : > { %13815 = vst [vmem:[#allocation44_spill] sm:$0xff] %v9674_v35 }
  0x79   : > { %8145 = vrot.lane.b32.xlu1 %v8144_v30, %s13611_s23  ;;  %v8164_v30 = vpack.i.bf16 %v406_v31, %v404_v57  ;;  %v6785_v57 = vld [vmem:[%s9283_s19 + $0x8] sm:$0xff]  }
  0x7a   : > { %8140 = vrot.lane.b32.xlu0 %v8139_v11, %s13519_s22  ;;  %v9677_v11 = vsel %vm13653_vm0, %v490_v21, %v492_v17  ;;  %v9692_v21 = vunpack.c.l.bf16 %v6738_v49 }
  0x7b   : > { %13816 = vst [vmem:[#allocation45_spill] sm:$0xff] %v9677_v11  ;;  %v9685_v31 = vpack.i.bf16 %v9677_v11, %v9674_v35  ;;  %v8184_v11 = vpack.i.bf16 %v9611_v36, %v9552_v41  ;;  %v9712_v41 = vunpack.c.l.bf16 %v6785_v57 }
  0x7c   : > { %13818 = vst [vmem:[#allocation47_spill] sm:$0xff] %v9692_v21  ;;  %v376_v36 = vrot.slane %v9692_v21, 1  ;;  %v637_v35 = vrot.slane %v9692_v21, 4 }
  0x7d   : > { %8155 = vrot.lane.b32.xlu1 %v8154_v55, %s13541_s8  ;;  %13817 = vst [vmem:[#allocation46_spill] sm:$0xff] %v9685_v31  ;;  %v580_v55 = vsel %vm13669_vm2, %v577_v23, %v13491_v37  ;;  %v409_v23 = vrot.slane %v9590_v33, 1  ;;  %13820 = vst [vmem:[#allocation49_spill] sm:$0xff] %v9712_v41  ;;  %v408_v37 = vsel %vm13655_vm1, %v405_v39, %v407_v34  ;;  %v9756_v39 = vunpack.c.h.bf16 %v6785_v57 }
  0x7e   : > { %8150 = vrot.lane.b32.xlu0 %v8149_v56, %s13607_s29  ;;  %v9694_v56 = vunpack.c.h.bf16 %v6738_v49  ;;  %v8179_v15 = vpack.i.bf16 %v580_v55, %v578_v61  ;;  %v463_v49 = vrot.slane %v9692_v21, 2  ;;  %v8189_v61 = vpack.i.bf16 %v9650_v10, %v9582_v58 }
  0x7f   : > { %v13823_v58 = vrot.slane %v9560_v13, 2  ;;  %13826 = vst [vmem:[#allocation52_spill] sm:$0xff] %v9756_v39 }
  0x80   : > { %13819 = vst [vmem:[#allocation48_spill] sm:$0xff] %v9694_v56  ;;  %v13822_v10 = vrot.slane %v9694_v56, 2  ;;  %v13831_v57 = vrot.slane %v9694_v56, 4  ;;  %v13844_v43 = vrot.slane %v9694_v56, 2  ;;  %v13847_v20 = vrot.slane %v9694_v56, 3 }
  0x81   : > { %8165 = vrot.lane.b32.xlu1 %v8164_v30, %s13562_s14 }
  0x82   : > { %8160 = vrot.lane.b32.xlu0 %v8159_v45, %s13603_s9  ;;  %v9703_v45 = vld [vmem:[%s9283_s19 + $0x48] sm:$0xff]   ;;  %v465_v55 = vsel %vm13653_vm0, %v463_v49, %v13822_v10  ;;  %v13504_v10 = vrot.slane %v9293_v4, 7 }
  0x83   : > { %v9715_v28 = vunpack.c.l.bf16 %v9703_v45 }
  0x85   : > { %8175 = vrot.lane.b32.xlu1 %v9685_v31, %s13524_s20  ;;  %13821 = vst [vmem:[#allocation50_spill] sm:$0xff] %v9715_v28  ;;  %v9727_v31 = vsel %vm13655_vm1, %v407_v34, %v409_v23  ;;  %v13506_v49 = vrot.slane %v9715_v28, 6 }
  0x86   : > { %8170 = vrot.lane.b32.xlu0 %v8164_v30, %s13534_s21  ;;  %v8194_v30 = vpack.i.bf16 %v9632_v53, %v9579_v16  ;;  %v812_v16 = vrot.slane %v9694_v56, 7  ;;  %v8204_v62 = vpack.i.bf16 %v9727_v31, %v408_v37  ;;  %v13825_v53 = vrot.slane %v9694_v56, 1 }
  0x89   : > { %8185 = vrot.lane.b32.xlu1 %v8184_v11, %s13611_s23  ;;  %v550_v11 = vrot.slane %v9692_v21, 3  ;;  %v378_v21 = vsel %vm13655_vm1, %v376_v36, %v13825_v53  ;;  %v725_v53 = vrot.slane %v9694_v56, 6  ;;  %v13835_v36 = vrot.slane %v9529_v54, 3 }
  0x8a   : > { %8180 = vrot.lane.b32.xlu0 %v8179_v15, %s13519_s22  ;;  %v9739_v15 = vsel %vm13653_vm0, %v492_v17, %v13823_v58  ;;  %v8199_v58 = vpack.i.bf16 %v9560_v13, %v9529_v54  ;;  %v8209_v34 = vpack.i.bf16 %v378_v21, %v408_v37  ;;  %v13827_v37 = vrot.slane %v9590_v33, 6 }
  0x8b   : > { %13824 = vst [vmem:[#allocation51_spill] sm:$0xff] %v9739_v15  ;;  %v8214_v17 = vpack.i.bf16 %v465_v55, %v9739_v15  ;;  %v9771_v55 = vsel %vm13643_vm5, %v13504_v10, %v9415_v63  ;;  %v639_v63 = vsel %vm13654_vm6, %v637_v35, %v13831_v57  ;;  %v13832_v10 = vrot.slane %v9715_v28, 1 }
  0x8c   : > { %v9778_v21 = vsel %vm13658_vm4, %v13827_v37, %v13506_v49  ;;  %v379_v37 = vrot.slane %v9712_v41, 1  ;;  %v381_v49 = vrot.slane %v9756_v39, 1 }
  0x8d   : > { %8195 = vrot.lane.b32.xlu1 %v8194_v30, %s13541_s8  ;;  %v13507_v30 = vrot.slane %v9715_v28, 7  ;;  %13828 = vst [vmem:[#allocation53_spill] sm:$0xff] %v9778_v21 }
  0x8e   : > { %8190 = vrot.lane.b32.xlu0 %v8189_v61, %s13607_s29  ;;  %v9765_v61 = vsel %vm13658_vm4, %v13505_v46, %v9392_v51  ;;  %v9794_v46 = vsel %vm13655_vm1, %v409_v23, %v13832_v10  ;;  %v13836_v10 = vrot.slane %v9712_v41, 7  ;;  %v1148_v23 = vrot.slane %v9715_v28, 5 }
  0x90   : > { %v814_v57 = vsel %vm13643_vm5, %v812_v16, %v13836_v10  ;;  %v9824_v16 = vunpack.c.h.bf16 %v9703_v45  ;;  %v9836_v45 = vunpack.c.l.bf16 %v9286_v0  ;;  %v13845_v0 = vrot.slane %v9694_v56, 1 }
  0x91   : > { %8205 = vrot.lane.b32.xlu1 %v8204_v62, %s13562_s14  ;;  %v13829_v62 = vrot.slane %v9590_v33, 7  ;;  %v8234_v10 = vpack.i.bf16 %v814_v57, %v9637_v38  ;;  %v815_v57 = vrot.slane %v9756_v39, 7 }
  0x92   : > { %8200 = vrot.lane.b32.xlu0 %v8199_v58, %s13603_s9  ;;  %v13834_v58 = vrot.slane %v9560_v13, 3  ;;  %13838 = vst [vmem:[#allocation55_spill] sm:$0xff] %v9824_v16  ;;  %13839 = vst [vmem:[#allocation56_spill] sm:$0xff] %v9836_v45 }
  0x93   : > { %v9785_v51 = vsel %vm13643_vm5, %v13829_v62, %v13507_v30  ;;  %v13833_v62 = vrot.slane %v9694_v56, 3 }
  0x94   : > { %13830 = vst [vmem:[#allocation54_spill] sm:$0xff] %v9785_v51  ;;  %v582_v35 = vsel %vm13669_vm2, %v13835_v36, %v13834_v58  ;;  %v466_v58 = vrot.slane %v9712_v41, 2 }
  0x95   : > { %v552_v30 = vsel %vm13669_vm2, %v550_v11, %v13833_v62  ;;  %8215 = vrot.lane.b32.xlu1 %v8214_v17, %s13524_s20  ;;  %v8224_v11 = vpack.i.bf16 %v639_v63, %v9616_v12  ;;  %v13837_v62 = vrot.slane %v9712_v41, 6  ;;  %v382_v63 = vsel %vm13655_vm1, %v379_v37, %v381_v49 }
  0x96   : > { %8210 = vrot.lane.b32.xlu0 %v8209_v34, %s13534_s21  ;;  %v8219_v36 = vpack.i.bf16 %v552_v30, %v582_v35  ;;  %v468_v12 = vrot.slane %v9756_v39, 2  ;;  %v640_v34 = vrot.slane %v9712_v41, 4  ;;  %v642_v30 = vrot.slane %v9756_v39, 4 }
  0x97   : > { %v727_v15 = vsel %vm13658_vm4, %v725_v53, %v13837_v62  ;;  %v553_v35 = vrot.slane %v9712_v41, 3  ;;  %v13840_v62 = vrot.slane %v9590_v33, 5 }
  0x98   : > { %v8229_v17 = vpack.i.bf16 %v727_v15, %v9655_v52  ;;  %v728_v52 = vrot.slane %v9756_v39, 6  ;;  %v643_v48 = vsel %vm13654_vm6, %v640_v34, %v642_v30 }
  0x99   : > { %8225 = vrot.lane.b32.xlu1 %v8224_v11, %s13611_s23  ;;  %v9844_v53 = vsel %vm13645_vm3, %v13840_v62, %v1148_v23  ;;  %v13842_v11 = vrot.slane %v9824_v16, 5  ;;  %v8239_v62 = vpack.i.bf16 %v9712_v41, %v9590_v33 }
  0x9a   : > { %8220 = vrot.lane.b32.xlu0 %v8219_v36, %s13519_s22  ;;  %13841 = vst [vmem:[#allocation57_spill] sm:$0xff] %v9844_v53  ;;  %v8244_v36 = vpack.i.bf16 %v382_v63, %v9794_v46 }
  0x9b   : > { %v9849_v38 = vsel %vm13645_vm3, %v1148_v23, %v13842_v11  ;;  %v467_v23 = vsel %vm13653_vm0, %v13844_v43, %v466_v58  ;;  %v469_v11 = vsel %vm13653_vm0, %v466_v58, %v468_v12  ;;  %v730_v43 = vrot.slane %v9836_v45, 6 }
  0x9c   : > { %13843 = vst [vmem:[#allocation58_spill] sm:$0xff] %v9849_v38  ;;  %v8254_v15 = vpack.i.bf16 %v469_v11, %v467_v23  ;;  %v383_v58 = vrot.slane %v9836_v45, 1 }
  0x9d   : > { %8235 = vrot.lane.b32.xlu1 %v8234_v10, %s13541_s8  ;;  %v380_v10 = vsel %vm13655_vm1, %v13845_v0, %v379_v37  ;;  %v554_v37 = vsel %vm13669_vm2, %v13847_v20, %v553_v35  ;;  %v13848_v0 = vrot.slane %v9756_v39, 3  ;;  %v13851_v20 = vrot.slane %v9712_v41, 6 }
  0x9e   : > { %8230 = vrot.lane.b32.xlu0 %v8229_v17, %s13607_s29  ;;  %v8249_v59 = vpack.i.bf16 %v382_v63, %v380_v10  ;;  %v13846_v17 = vrot.slane %v9694_v56, 4  ;;  %v13850_v10 = vrot.slane %v9836_v45, 7 }
  0x9f   : > { %v556_v63 = vsel %vm13669_vm2, %v553_v35, %v13848_v0  ;;  %v729_v56 = vsel %vm13658_vm4, %v13851_v20, %v728_v52  ;;  %v731_v35 = vsel %vm13658_vm4, %v728_v52, %v730_v43  ;;  %v1119_v52 = vrot.slane %v9756_v39, 5 }
  0xa0   : > { %v641_v40 = vsel %vm13654_vm6, %v13846_v17, %v640_v34  ;;  %v13849_v34 = vrot.slane %v9712_v41, 7  ;;  %v9889_v17 = vsel %vm13643_vm5, %v815_v57, %v13850_v10  ;;  %v13853_v20 = vrot.slane %v9291_v3, 2 }
  0xa1   : > { %8245 = vrot.lane.b32.xlu1 %v8244_v36, %s13562_s14  ;;  %v8264_v36 = vpack.i.bf16 %v643_v48, %v641_v40  ;;  %v470_v48 = vrot.slane %v9836_v45, 2 }
  0xa2   : > { %8240 = vrot.lane.b32.xlu0 %v8239_v62, %s13603_s9  ;;  %v8259_v62 = vpack.i.bf16 %v556_v63, %v554_v37  ;;  %v816_v23 = vsel %vm13643_vm5, %v13849_v34, %v815_v57  ;;  %v384_v57 = vsel %vm13655_vm1, %v381_v49, %v383_v58  ;;  %v13852_v37 = vrot.slane %v9291_v3, 1 }
  0xa3   : > { %v8274_v40 = vpack.i.bf16 %v9889_v17, %v816_v23  ;;  %v644_v63 = vrot.slane %v9836_v45, 4  ;;  %v1120_v49 = vrot.slane %v9836_v45, 5 }
  0xa4   : > { %v386_v0 = vsel %vm13655_vm1, %v383_v58, %v13852_v37 }
  0xa5   : > { %8255 = vrot.lane.b32.xlu1 %v8254_v15, %s13524_s20  ;;  %v8269_v15 = vpack.i.bf16 %v731_v35, %v729_v56  ;;  %v8284_v34 = vpack.i.bf16 %v386_v0, %v384_v57  ;;  %v471_v56 = vsel %vm13653_vm0, %v468_v12, %v470_v48  ;;  %v645_v23 = vsel %vm13654_vm6, %v642_v30, %v644_v63 }
  0xa6   : > { %8250 = vrot.lane.b32.xlu0 %v8249_v59, %s13534_s21  ;;  %v13521_v59 = vrot.slane %v9291_v3, 4  ;;  %v8294_v58 = vpack.i.bf16 %v471_v56, %v469_v11  ;;  %v557_v12 = vrot.slane %v9836_v45, 3  ;;  %v732_v11 = vrot.slane %v9291_v3, 6 }
  0xa7   : > { %v1121_v57 = vsel %vm13645_vm3, %v1119_v52, %v1120_v49  ;;  %v13854_v0 = vrot.slane %v9756_v39, 3 }
  0xa8   : > { %v647_v10 = vsel %vm13654_vm6, %v644_v63, %v13521_v59 }
  0xa9   : > { %8265 = vrot.lane.b32.xlu1 %v8264_v36, %s13611_s23  ;;  %v8279_v36 = vpack.i.bf16 %v9836_v45, %v9756_v39  ;;  %v558_v63 = vsel %vm13669_vm2, %v13854_v0, %v557_v12  ;;  %v13856_v0 = vrot.slane %v9836_v45, 7 }
  0xaa   : > { %8260 = vrot.lane.b32.xlu0 %v8259_v62, %s13519_s22  ;;  %v13522_v62 = vrot.slane %v9291_v3, 5 }
  0xac   : > { %v1123_v37 = vsel %vm13645_vm3, %v1120_v49, %v13522_v62  ;;  %v733_v49 = vsel %vm13658_vm4, %v730_v43, %v732_v11 }
  0xad   : > { %8275 = vrot.lane.b32.xlu1 %v8274_v40, %s13541_s8  ;;  %v9922_v40 = vsel %vm13653_vm0, %v470_v48, %v13853_v20  ;;  %v8314_v52 = vpack.i.bf16 %v1123_v37, %v1121_v57 }
  0xae   : > { %8270 = vrot.lane.b32.xlu0 %v8269_v15, %s13607_s29  ;;  %v8304_v15 = vpack.i.bf16 %v647_v10, %v645_v23  ;;  %v8299_v30 = vpack.i.bf16 %v9922_v40, %v471_v56 }
  0xb1   : > { %8285 = vrot.lane.b32.xlu1 %v8284_v34, %s13562_s14 }
  0xb2   : > { %8280 = vrot.lane.b32.xlu0 %v8279_v36, %s13603_s9  ;;  %v13855_v36 = vrot.slane %v9291_v3, 3 }
  0xb5   : > { %8295 = vrot.lane.b32.xlu1 %v8294_v58, %s9137_s17  ;;  %v560_v58 = vsel %vm13669_vm2, %v557_v12, %v13855_v36  ;;  %v8324_v12 = vpack.i.bf16 %v733_v49, %v731_v35  ;;  %v8794_v35 = vld [vmem:[%s13464_s1 + $0x20] sm:$0x3f]   ;;  %v9140_v36 = vmov 65535  }
  0xb6   : > { %8290 = vrot.lane.b32.xlu0 %v8284_v34, %s13534_s21  ;;  %v819_v34 = vrot.slane %v9291_v3, 7  ;;  %v8309_v56 = vpack.i.bf16 %v560_v58, %v558_v63  ;;  %v1124_v63 = vrot.slane %v9293_v4, 5  ;;  %v2238_v58 = vsel %vm13669_vm2, 4294967295, %v9140_v36  ;;  %s13662_s21 = smov 45  }
  0xb7   : > { %v9933_v48 = vpop.permute.xlu1 %8020  ;;  %v13858_v36 = vrot.slane %v9293_v4, 7 }
  0xb8   : > { %v9941_v23 = vpop.permute.xlu0 %8010  ;;  %v820_v57 = vsel %vm13643_vm5, %v13856_v0, %v819_v34 }
  0xb9   : > { %8305 = vrot.lane.b32.xlu1 %v8304_v15, %s13674_s15  ;;  %v9979_v39 = vsel %vm13643_vm5, %v819_v34, %v13858_v36  ;;  %v8022_v36 = vunpack.i.l.bf16 %v9933_v48 }
  0xba   : > { %8300 = vrot.lane.b32.xlu0 %v8299_v30, %s13524_s20  ;;  %v13857_v30 = vrot.slane %v9293_v4, 6  ;;  %s13672_s20 = smov 42  }
  0xbb   : > { %v9947_v10 = vpop.permute.xlu1 %8025 }
  0xbc   : > { %v8016_v20 = vpop.permute.xlu0 %8015  ;;  %v9959_v43 = vsel %vm13658_vm4, %v732_v11, %v13857_v30  ;;  %v2239_v11 = vsel %vm13653_vm0, %v2238_v58, 0  ;;  %v13526_v30 = vmov 0.0   ;;  %v8013_v58 = vunpack.i.h.bf16 %v9941_v23 }
  0xbd   : > { %8315 = vrot.lane.b32.xlu1 %v8314_v52, %s13569_s16  ;;  %v8329_v0 = vpack.i.bf16 %v9959_v43, %v733_v49  ;;  %7528 = vmatprep.subr.bf16.mxu0 %v13526_v30  ;;  %v2241_v59 = vand.u32 %v8794_v35, %v2239_v11  ;;  %v8795_v49 = vld [vmem:[%s13464_s1 + $0x18] sm:$0xff]   ;;  %v8018_v34 = vunpack.i.h.bf16 %v8016_v20  ;;  %v8017_v35 = vunpack.i.l.bf16 %v8016_v20 }
  0xbe   : > { %8310 = vrot.lane.b32.xlu0 %v8309_v56, %s13519_s22  ;;  %s13574_s22 = smov 36   ;;  %v8334_v56 = vpack.i.bf16 %v820_v57, %v9889_v17  ;;  %v8012_v17 = vunpack.i.l.bf16 %v9941_v23  ;;  %v10010_v23 = vsel %vm13645_vm3, %v1124_v63, %v9374_v44  ;;  %v8028_v2 = vunpack.i.h.bf16 %v9947_v10  ;;  %v8796_v44 = vld [vmem:[%s13464_s1 + $0x10] sm:$0xff]  }
  0xbf   : > { %v9954_v37 = vpop.permute.xlu1 %8035  ;;  %7529 = vmatpush3.bf16.msra.mxu0 %v2241_v59  ;;  %v8339_v59 = vpack.i.bf16 %v9979_v39, %v820_v57  ;;  %v8023_v57 = vunpack.i.h.bf16 %v9933_v48  ;;  %v8027_v54 = vunpack.i.l.bf16 %v9947_v10  ;;  %v1434_v48 = vsel %vm13660_vm7, %v9297_v6, %v8018_v34 }
  0xc0   : > { %v9966_v52 = vpop.permute.xlu0 %8030  ;;  %7530 = vmatprep.subr.bf16.mxu0 %v13526_v30  ;;  %v1431_v41 = vsel %vm13660_vm7, %v9291_v3, %v8012_v17  ;;  %v8038_v17 = vunpack.i.h.bf16 %v9954_v37  ;;  %v8037_v10 = vunpack.i.l.bf16 %v9954_v37  ;;  %v1452_v27 = vsel %vm13671_vm8, %v1434_v48, %v8028_v2 }
  0xc1   : > { %8325 = vrot.lane.b32.xlu1 %v8324_v12, %s13574_s22  ;;  %v1449_v24 = vsel %vm13671_vm8, %v1431_v41, %v8022_v36  ;;  %v8797_v41 = vld [vmem:[%s13464_s1 + $0x8] sm:$0xff]  }
  0xc2   : > { %8320 = vrot.lane.b32.xlu0 %v8304_v15, %s13611_s23  ;;  %v8344_v15 = vpack.i.bf16 %v9291_v3, %v9836_v45  ;;  %v13860_v45 = vrot.slane %v9291_v3, 5 }
  0xc3   : > { %v9974_v62 = vpop.permute.xlu1 %8045  ;;  %7531 = vmatpush3.bf16.msra.mxu0 %v8795_v49  ;;  %v8032_v49 = vunpack.i.l.bf16 %v9966_v52 }
  0xc4   : > { %v9981_v12 = vpop.permute.xlu0 %8040  ;;  %v8047_v37 = vunpack.i.l.bf16 %v9974_v62  ;;  %v8048_v34 = vunpack.i.h.bf16 %v9974_v62 }
  0xc5   : > { %8335 = vrot.lane.b32.xlu1 %v8334_v56, %s13664_s18  ;;  %v8349_v56 = vpack.i.bf16 %v9293_v4, %v9291_v3  ;;  %v8042_v16 = vunpack.i.l.bf16 %v9981_v12  ;;  %v8043_v62 = vunpack.i.h.bf16 %v9981_v12 }
  0xc6   : > { %8330 = vrot.lane.b32.xlu0 %v8329_v0, %s13607_s29  ;;  %v10006_v0 = vsel %vm13645_vm3, %v13860_v45, %v1124_v63  ;;  %v13861_v45 = vmov 0.0   ;;  %v1433_v63 = vsel %vm13660_vm7, %v9295_v5, %v8017_v35  ;;  %v8033_v35 = vunpack.i.h.bf16 %v9966_v52 }
  0xc7   : > { %v9994_v11 = vpop.permute.xlu1 %8055  ;;  %7532 = vmatprep.subr.bf16.mxu0 %v13861_v45  ;;  %v1451_v1 = vsel %vm13671_vm8, %v1433_v63, %v8027_v54  ;;  %v10057_v54 = vsel %vm13668_vm9, %v1452_v27, %v8038_v17  ;;  %7538 = vmatprep.mubr.msk.bf16.mxu0 %vm13656_vm15, %v13861_v45  ;;  %vm1659_vm15 = vcmask 343040  }
  0xc8   : > { %13859 = vst [vmem:[#allocation59_spill] sm:$0xff] %v9994_v11  ;;  %v9999_v30 = vpop.permute.xlu0 %8050  ;;  %7533 = vmatpush3.bf16.msra.mxu0 %v8796_v44  ;;  %v10054_v52 = vsel %vm13668_vm9, %v1451_v1, %v8037_v10  ;;  %13863 = vst [vmem:[#allocation61_spill] sm:$0xff] %v10057_v54  ;;  %v8057_v36 = vunpack.i.l.bf16 %v9994_v11  ;;  %v1946_v63 = vsel %vm13667_vm10, %v10057_v54, %v8048_v34 }
  0xc9   : > { %8345 = vrot.lane.b32.xlu1 %v8344_v15, %s13672_s20  ;;  %v1432_v15 = vsel %vm13660_vm7, %v9293_v4, %v8013_v58  ;;  %7534 = vmatprep.subr.bf16.mxu0 %v13861_v45  ;;  %v13543_v44 = vunpack.i.h.bf16 %v9999_v30  ;;  %v13548_v48 = vunpack.i.l.bf16 %v9999_v30 }
  0xca   : > { %8340 = vrot.lane.b32.xlu0 %v8339_v59, %s13541_s8  ;;  %v1450_v2 = vsel %vm13671_vm8, %v1432_v15, %v8023_v57  ;;  %v1945_v57 = vsel %vm13667_vm10, %v10054_v52, %v8047_v37  ;;  %s13633_s8 = smov 48  }
  0xcb   : > { %v10032_v20 = vpop.permute.xlu1 %8065  ;;  %v10071_v27 = vsel %vm13668_vm9, %v1450_v2, %v8033_v35  ;;  %v1963_v58 = vsel %vm13666_vm11, %v1945_v57, %v13543_v44 }
  0xcc   : > { %13862 = vst [vmem:[#allocation60_spill] sm:$0xff] %v10032_v20  ;;  %v10039_v59 = vpop.permute.xlu0 %8060  ;;  %v8067_v12 = vunpack.i.l.bf16 %v10032_v20  ;;  %7535 = vmatpush3.bf16.msra.mxu0 %v8797_v41  ;;  %v1944_v35 = vsel %vm13667_vm10, %v10071_v27, %v8043_v62  ;;  %v13554_v62 = vunpack.i.h.bf16 %v10032_v20 }
  0xcd   : > { %8355 = vrot.lane.b32.xlu1 %v9327_v22, %s13662_s21  ;;  %v10063_v22 = vsel %vm13668_vm9, %v1449_v24, %v8032_v49  ;;  %v13546_v10 = vunpack.i.l.bf16 %v10039_v59  ;;  %7536 = vmatprep.subr.bf16.mxu0 %v13861_v45  ;;  %v8798_v49 = vld [vmem:[%s13464_s1] sm:$0xff]   ;;  %v1962_v2 = vsel %vm13666_vm11, %v1944_v35, %v13548_v48 }
  0xce   : > { %8350 = vrot.lane.b32.xlu0 %v8349_v56, %s13603_s9  ;;  %v13545_v56 = vunpack.i.h.bf16 %v10039_v59  ;;  %v1943_v17 = vsel %vm13667_vm10, %v10063_v22, %v8042_v16 }
  0xcf   : > { %v10068_v1 = vpop.permute.xlu1 %8075  ;;  %v1961_v16 = vsel %vm13666_vm11, %v1943_v17, %v8057_v36  ;;  %v1980_v35 = vsel %vm1515_vm12, %v1962_v2, %v13546_v10 }
  0xd0   : > { %13864 = vst [vmem:[#allocation62_spill] sm:$0xff] %v10068_v1  ;;  %v10077_v24 = vpop.permute.xlu0 %8070  ;;  %v13544_v15 = vunpack.i.l.bf16 %v10068_v1  ;;  %v1979_v34 = vsel %vm1515_vm12, %v1961_v16, %v8067_v12  ;;  %7537 = vmatpush3.bf16.msra.mxu0 %v8798_v49 }
  0xd1   : > { %v13551_v41 = vunpack.i.l.bf16 %v10077_v24  ;;  %v13866_v16 = vunpack.i.h.bf16 %v10077_v24 }
  0xd2   : > { %8360 = vrot.lane.b32.xlu0 %v9336_v26, %s13562_s14  ;;  %v1981_v26 = vsel %vm1515_vm12, %v1963_v58, %v13545_v56  ;;  %v13552_v58 = vunpack.i.h.bf16 %v10068_v1  ;;  %s13891_s14 = smov 3   ;;  %v13988_v1 = vld [vmem:[#allocation32_spill] sm:$0xff] }
  0xd3   : > { %v10104_v37 = vpop.permute.xlu1 %8085  ;;  %v1999_v57 = vsel %vm13659_vm13, %v1981_v26, %v13544_v15  ;;  %v1997_v49 = vsel %vm13659_vm13, %v1979_v34, %v13551_v41  ;;  %v1998_v2 = vsel %vm13659_vm13, %v1980_v35, %v13866_v16  ;;  %v13867_v15 = vpack.i.bf16 %v9318_v18, %v9922_v40 }
  0xd4   : > { %13865 = vst [vmem:[#allocation63_spill] sm:$0xff] %v10104_v37  ;;  %v13547_v36 = vunpack.i.l.bf16 %v10104_v37  ;;  %v10111_v17 = vpop.permute.xlu0 %8080  ;;  %v13553_v56 = vunpack.i.h.bf16 %v10104_v37  ;;  %v13870_v41 = vrot.slane %v9291_v3, 4 }
  0xd5   : > { %v13550_v44 = vunpack.i.h.bf16 %v10111_v17  ;;  %v13549_v12 = vunpack.i.l.bf16 %v10111_v17 }
  0xd6   : > { %v10133_v26 = vsel %vm1551_vm14, %v1999_v57, %v13547_v36  ;;  %8370 = vrot.lane.b32.xlu0 %v13867_v15, %s9137_s17  ;;  %v13868_v57 = vunpack.i.h.bf16 %v9994_v11 }
  0xd7   : > { %v2054_v10 = vrot.slane %v10133_v26, 3  ;;  %v2015_v34 = vsel %vm1551_vm14, %v1997_v49, %v13549_v12  ;;  %v2016_v35 = vsel %vm1551_vm14, %v1998_v2, %v13550_v44  ;;  %v10147_v16 = vpop.permute.xlu1 %8095  ;;  %v8389_v2 = vpack.i.bf16 %v9765_v61, %v9959_v43 }
  0xd8   : > { %v1964_v36 = vsel %vm13666_vm11, %v1946_v63, %v13868_v57  ;;  %v2051_v18 = vrot.slane %v2015_v34, 3  ;;  %v2052_v40 = vrot.slane %v2016_v35, 3  ;;  %v8097_v15 = vunpack.i.l.bf16 %v10147_v16  ;;  %v10153_v48 = vpop.permute.xlu0 %8090 }
  0xd9   : > { %v1982_v49 = vsel %vm1515_vm12, %v1964_v36, %v13554_v62  ;;  %v8092_v12 = vunpack.i.l.bf16 %v10153_v48  ;;  %v13869_v44 = vrot.slane %v9293_v4, 4  ;;  %v13871_v35 = vpack.i.bf16 %v10010_v23, %v10006_v0 }
  0xda   : > { %v2000_v34 = vsel %vm13659_vm13, %v1982_v49, %v13552_v58  ;;  %v2053_v36 = vsel %vm13669_vm2, %v2051_v18, %v2052_v40  ;;  %v2055_v43 = vsel %vm13669_vm2, %v2052_v40, %v2054_v10  ;;  %v13872_v57 = vrot.slane %v9295_v5, 4 }
  0xdb   : > { %v649_v63 = vsel %vm13654_vm6, %v13870_v41, %v13869_v44  ;;  %8380 = vrot.lane.b32.xlu0 %v13871_v35, %s13569_s16  ;;  %v13873_v3 = vmov %v13869_v44  ;;  %v2018_v41 = vsel %vm1551_vm14, %v2000_v34, %v13553_v56  ;;  %v1435_v0 = vsel %vm13660_vm7, %v9302_v8, %v8092_v12  ;;  %v10187_v23 = vpop.permute.xlu1 %8105 }
  0xdc   : > { %v651_v44 = vsel %vm13654_vm6, %v13873_v3, %v13872_v57  ;;  %v8364_v18 = vpack.i.bf16 %v2055_v43, %v2053_v36  ;;  %v652_v49 = vrot.slane %v9297_v6, 4  ;;  %v8107_v40 = vunpack.i.l.bf16 %v10187_v23  ;;  %v10191_v35 = vpop.permute.xlu0 %8100 }
  0xdd   : > { %v1453_v58 = vsel %vm13671_vm8, %v1435_v0, %v8097_v15  ;;  %v8102_v57 = vunpack.i.l.bf16 %v10191_v35  ;;  %v8374_v34 = vpack.i.bf16 %v651_v44, %v649_v63  ;;  %v2056_v3 = vrot.slane %v2018_v41, 3 }
  0xde   : > { %8365 = vrot.lane.b32.xlu1 %v8364_v18, %s13633_s8  ;;  %v8399_v12 = vpack.i.bf16 %v9771_v55, %v9979_v39  ;;  %v13567_v36 = vrot.slane %v9302_v8, 4  ;;  %v8409_v39 = vpack.i.bf16 %v9295_v5, %v9293_v4 }
  0xdf   : > { %8390 = vrot.lane.b32.xlu0 %v8389_v2, %s13574_s22  ;;  %v10201_v43 = vsel %vm13668_vm9, %v1453_v58, %v8102_v57  ;;  %v10203_v56 = vpop.permute.xlu1 %8115 }
  0xe0   : > { %13874 = vst [vmem:[#allocation64_spill] sm:$0xff] %v10201_v43  ;;  %13875 = vst [vmem:[#allocation65_spill] sm:$0xff] %v10203_v56  ;;  %v13556_v15 = vunpack.i.l.bf16 %v10203_v56  ;;  %v10206_v0 = vpop.permute.xlu0 %8110  ;;  %v1947_v63 = vsel %vm13667_vm10, %v10201_v43, %v8107_v40 }
  0xe1   : > { %13876 = vst [vmem:[#allocation66_spill] sm:$0xff] %v10206_v0  ;;  %v13558_v44 = vunpack.i.l.bf16 %v10206_v0 }
  0xe2   : > { %8375 = vrot.lane.b32.xlu1 %v8374_v34, %s13674_s15 }
  0xe3   : > { %8400 = vrot.lane.b32.xlu0 %v8399_v12, %s13664_s18  ;;  %v1965_v58 = vsel %vm13666_vm11, %v1947_v63, %v13558_v44  ;;  %v10218_v2 = vpop.permute.xlu1 %8125 }
  0xe4   : > { %13877 = vst [vmem:[#allocation67_spill] sm:$0xff] %v10218_v2  ;;  %v13557_v41 = vunpack.i.l.bf16 %v10218_v2  ;;  %v10221_v18 = vpop.permute.xlu0 %8120  ;;  %v1983_v40 = vsel %vm1515_vm12, %v1965_v58, %v13556_v15 }
  0xe5   : > { %13878 = vst [vmem:[#allocation68_spill] sm:$0xff] %v10221_v18  ;;  %v13555_v57 = vunpack.i.l.bf16 %v10221_v18 }
  0xe6   : > { %8385 = vrot.lane.b32.xlu1 %v8374_v34, %s13611_s23  ;;  %v13879_v34 = vpack.i.bf16 %v9778_v21, %v9765_v61  ;;  %v2057_v61 = vsel %vm13669_vm2, %v2054_v10, %v2056_v3  ;;  %v10267_v21 = vsel %vm13654_vm6, %v652_v49, %v13567_v36 }
  0xe7   : > { %8410 = vrot.lane.b32.xlu0 %v8409_v39, %s13672_s20  ;;  %v2001_v4 = vsel %vm13659_vm13, %v1983_v40, %v13555_v57  ;;  %v10232_v12 = vpop.permute.xlu1 %8135  ;;  %v8093_v40 = vunpack.i.h.bf16 %v10153_v48 }
  0xe8   : > { %v10234_v63 = vpop.permute.xlu0 %8130  ;;  %v10239_v62 = vsel %vm1551_vm14, %v2001_v4, %v13557_v41  ;;  %v8137_v57 = vunpack.i.l.bf16 %v10232_v12 }
  0xe9   : > { %v8132_v58 = vunpack.i.l.bf16 %v10234_v63  ;;  %v13560_v39 = vrot.slane %v10239_v62, 3  ;;  %v1436_v10 = vsel %vm13660_vm7, %v9305_v9, %v8093_v40 }
  0xea   : > { %8395 = vrot.lane.b32.xlu1 %v13879_v34, %s13607_s29  ;;  %v13880_v34 = vrot.slane %v9295_v5, 4 }
  0xeb   : > { %v10249_v15 = vpop.permute.xlu1 %8145  ;;  %v2059_v4 = vsel %vm13669_vm2, %v2056_v3, %v13560_v39  ;;  %v1437_v41 = vsel %vm13660_vm7, %v9409_v60, %v8132_v58  ;;  %v8098_v39 = vunpack.i.h.bf16 %v10147_v16  ;;  %v13882_v58 = vpack.i.bf16 %v9785_v51, %v9771_v55  ;;  %v13901_v51 = vld [vmem:[#allocation11_spill] sm:$0xff] }
  0xec   : > { %v10256_v44 = vpop.permute.xlu0 %8140  ;;  %v653_v48 = vsel %vm13654_vm6, %v13880_v34, %v652_v49  ;;  %v8419_v20 = vpack.i.bf16 %v2059_v4, %v2057_v61  ;;  %v1455_v26 = vsel %vm13671_vm8, %v1437_v41, %v8137_v57  ;;  %v8103_v16 = vunpack.i.h.bf16 %v10191_v35 }
  0xed   : > { %v8142_v5 = vunpack.i.l.bf16 %v10256_v44  ;;  %v8429_v49 = vpack.i.bf16 %v10267_v21, %v653_v48  ;;  %v1454_v55 = vsel %vm13671_vm8, %v1436_v10, %v8098_v39  ;;  %v8147_v4 = vunpack.i.l.bf16 %v10249_v15 }
  0xee   : > { %8405 = vrot.lane.b32.xlu1 %v13882_v58, %s13881_s13  ;;  %8420 = vrot.lane.b32.xlu0 %v8419_v20, %s13633_s8  ;;  %v8424_v41 = vpack.i.bf16 %v9334_v25, %v9321_v19  ;;  %v8108_v57 = vunpack.i.h.bf16 %v10187_v23  ;;  %v8439_v40 = vpack.i.bf16 %v9844_v53, %v653_v48  ;;  %v10300_v39 = vsel %vm13668_vm9, %v1454_v55, %v8103_v16 }
  0xef   : > { %v10279_v3 = vpop.permute.xlu1 %8155  ;;  %v10292_v20 = vsel %vm13668_vm9, %v1455_v26, %v8142_v5  ;;  %13887 = vst [vmem:[#allocation73_spill] sm:$0xff] %v10300_v39  ;;  %v496_v19 = vrot.slane %v9590_v33, 2  ;;  %v13565_v25 = vrot.slane %v9715_v28, 2  ;;  %v8434_v58 = vpack.i.bf16 %v9381_v47, %v9389_v50 }
  0xf0   : > { %13883 = vst [vmem:[#allocation69_spill] sm:$0xff] %v10279_v3  ;;  %v10283_v34 = vpop.permute.xlu0 %8150  ;;  %13885 = vst [vmem:[#allocation71_spill] sm:$0xff] %v10292_v20  ;;  %v1949_v23 = vsel %vm13667_vm10, %v10292_v20, %v8147_v4  ;;  %v13566_v48 = vunpack.i.h.bf16 %v10206_v0  ;;  %v1948_v10 = vsel %vm13667_vm10, %v10300_v39, %v8108_v57  ;;  %v13568_v5 = vunpack.i.l.bf16 %v10279_v3 }
  0xf1   : > { %13884 = vst [vmem:[#allocation70_spill] sm:$0xff] %v10283_v34  ;;  %v13564_v61 = vunpack.i.l.bf16 %v10283_v34  ;;  %v13889_v47 = vrot.slane %v9560_v13, 2  ;;  %v10333_v4 = vsel %vm13653_vm0, %v496_v19, %v13565_v25  ;;  %v13572_v57 = vunpack.i.h.bf16 %v10203_v56 }
  0xf2   : > { %8415 = vrot.lane.b32.xlu1 %v9348_v29, %s13662_s21  ;;  %8430 = vrot.lane.b32.xlu0 %v8429_v49, %s13674_s15  ;;  %v583_v49 = vrot.slane %v9590_v33, 3  ;;  %13890 = vst [vmem:[#allocation75_spill] sm:$0xff] %v10333_v4  ;;  %v13576_v25 = vunpack.i.h.bf16 %v10221_v18 }
  0xf3   : > { %v10296_v35 = vpop.permute.xlu1 %8165  ;;  %v1967_v16 = vsel %vm13666_vm11, %v1949_v23, %v13564_v61  ;;  %v10328_v50 = vsel %vm13653_vm0, %v13889_v47, %v496_v19  ;;  %v13892_v19 = vpack.i.bf16 %v9794_v46, %v9727_v31  ;;  %vm1605_vm0 = vcmask 269312  }
  0xf4   : > { %13886 = vst [vmem:[#allocation72_spill] sm:$0xff] %v10296_v35  ;;  %v10303_v29 = vpop.permute.xlu0 %8160  ;;  %v1985_v47 = vsel %vm1515_vm12, %v1967_v16, %v13568_v5  ;;  %v13577_v31 = vunpack.i.l.bf16 %v10296_v35 }
  0xf5   : > { %13888 = vst [vmem:[#allocation74_spill] sm:$0xff] %v10303_v29  ;;  %v13573_v23 = vunpack.i.l.bf16 %v10303_v29 }
  0xf6   : > { %8425 = vrot.lane.b32.xlu1 %v8424_v41, %s9137_s17  ;;  %8440 = vrot.lane.b32.xlu0 %v8439_v40, %s13611_s23  ;;  %v13571_v41 = vrot.slane %v9715_v28, 3  ;;  %v1966_v40 = vsel %vm13666_vm11, %v1948_v10, %v13566_v48  ;;  %v13894_v48 = vrot.slane %v9560_v13, 3 }
  0xf7   : > { %v10317_v26 = vpop.permute.xlu1 %8175  ;;  %v1984_v46 = vsel %vm1515_vm12, %v1966_v40, %v13572_v57 }
  0xf8   : > { %v10323_v55 = vpop.permute.xlu0 %8170  ;;  %v584_v36 = vsel %vm13669_vm2, %v13894_v48, %v583_v49  ;;  %v1738_v16 = vsel %vm13669_vm2, %v583_v49, %v13571_v41  ;;  %v13579_v48 = vunpack.i.h.bf16 %v10218_v2  ;;  %v2002_v40 = vsel %vm13659_vm13, %v1984_v46, %v13576_v25 }
  0xf9   : > { %v8172_v5 = vunpack.i.l.bf16 %v10323_v55  ;;  %v8469_v41 = vpack.i.bf16 %v1738_v16, %v584_v36  ;;  %v656_v25 = vrot.slane %v9305_v9, 4 }
  0xfa   : > { %8435 = vrot.lane.b32.xlu1 %v8434_v58, %s13569_s16  ;;  %8450 = vrot.lane.b32.xlu0 %v13892_v19, %s13891_s14  ;;  %v10353_v58 = vpack.i.bf16 %v10333_v4, %v10328_v50  ;;  %v2003_v19 = vsel %vm13659_vm13, %v1985_v47, %v13573_v23  ;;  %s13895_s16 = smov 6   ;;  %v8177_v47 = vunpack.i.l.bf16 %v10317_v26  ;;  %v8464_v23 = vpack.i.bf16 %v9302_v8, %v9297_v6  ;;  %v13921_v4 = vld [vmem:[#allocation21_spill] sm:$0xff] }
  0xfb   : > { %v10349_v61 = vpop.permute.xlu1 %8185  ;;  %v10393_v36 = vsel %vm1551_vm14, %v2003_v19, %v13577_v31  ;;  %v1439_v16 = vsel %vm13660_vm7, %v9460_v42, %v8172_v5  ;;  %v2020_v6 = vsel %vm1551_vm14, %v2002_v40, %v13579_v48 }
  0xfc   : > { %13893 = vst [vmem:[#allocation76_spill] sm:$0xff] %v10353_v58  ;;  %v10356_v10 = vpop.permute.xlu0 %8180  ;;  %v1457_v53 = vsel %vm13671_vm8, %v1439_v16, %v8177_v47  ;;  %v2060_v40 = vrot.slane %v2020_v6, 3  ;;  %v13905_v16 = vrot.slane %v9302_v8, 4 }
  0xfd   : > { %v8182_v5 = vunpack.i.l.bf16 %v10356_v10 }
  0xfe   : > { %8445 = vrot.lane.b32.xlu1 %v9423_v7, %s13574_s22  ;;  %8460 = vrot.lane.b32.xlu0 %v10353_v58, %s13895_s16  ;;  %v8133_v7 = vunpack.i.h.bf16 %v10234_v63  ;;  %v8138_v63 = vunpack.i.h.bf16 %v10232_v12  ;;  %s13898_s22 = smov 9   ;;  %v13902_v58 = vld [vmem:[#allocation20_spill] sm:$0xff] }
  0xff   : > { %v10377_v49 = vpop.permute.xlu1 %8195  ;;  %v8489_v12 = vpack.i.bf16 %v13902_v58, %v13901_v51  ;;  %v8148_v51 = vunpack.i.h.bf16 %v10249_v15 }
 0x100   : > { %13896 = vst [vmem:[#allocation77_spill] sm:$0xff] %v10377_v49  ;;  %v10383_v57 = vpop.permute.xlu0 %8190  ;;  %v1438_v19 = vsel %vm13660_vm7, %v9428_v14, %v8133_v7 }
 0x101   : > { %13897 = vst [vmem:[#allocation78_spill] sm:$0xff] %v10383_v57  ;;  %v1456_v48 = vsel %vm13671_vm8, %v1438_v19, %v8138_v63  ;;  %v657_v63 = vsel %vm13654_vm6, %v13905_v16, %v656_v25  ;;  %v13584_v19 = vunpack.i.l.bf16 %v10383_v57 }
 0x102   : > { %8455 = vrot.lane.b32.xlu1 %v9446_v32, %s13664_s18  ;;  %8470 = vrot.lane.b32.xlu0 %v8469_v41, %s13898_s22  ;;  %v8479_v32 = vpack.i.bf16 %v10267_v21, %v9849_v38  ;;  %v8143_v21 = vunpack.i.h.bf16 %v10256_v44  ;;  %v8187_v38 = vunpack.i.l.bf16 %v10349_v61  ;;  %v10425_v41 = vsel %vm13668_vm9, %v1457_v53, %v8182_v5  ;;  %v13907_v53 = vld [vmem:[#allocation27_spill] sm:$0xff] }
 0x103   : > { %v10399_v46 = vpop.permute.xlu1 %8205  ;;  %13903 = vst [vmem:[#allocation11_spill] sm:$0xff] %v10425_v41  ;;  %v13904_v44 = vrot.slane %v10393_v36, 3  ;;  %v13909_v5 = vrot.slane %v10239_v62, 3 }
 0x104   : > { %13899 = vst [vmem:[#allocation79_spill] sm:$0xff] %v10399_v46  ;;  %v10410_v31 = vpop.permute.xlu0 %8200  ;;  %v10442_v58 = vsel %vm13668_vm9, %v1456_v48, %v8143_v21  ;;  %v1951_v39 = vsel %vm13667_vm10, %v10425_v41, %v8187_v38  ;;  %v13588_v48 = vunpack.i.h.bf16 %v10283_v34 }
 0x105   : > { %13900 = vst [vmem:[#allocation80_spill] sm:$0xff] %v10410_v31  ;;  %13908 = vst [vmem:[#allocation20_spill] sm:$0xff] %v10442_v58  ;;  %v2061_v8 = vsel %vm13669_vm2, %v13909_v5, %v2060_v40  ;;  %v1950_v62 = vsel %vm13667_vm10, %v10442_v58, %v8148_v51 }
 0x106   : > { %8465 = vrot.lane.b32.xlu1 %v8464_v23, %s13672_s20  ;;  %8480 = vrot.lane.b32.xlu0 %v8479_v32, %s13611_s23  ;;  %v2063_v23 = vsel %vm13669_vm2, %v2060_v40, %v13904_v44  ;;  %v13906_v32 = vrot.slane %v9409_v60, 4  ;;  %v13910_v44 = vld [vmem:[#allocation55_spill] sm:$0xff]  ;;  %v13591_v40 = vunpack.i.l.bf16 %v10377_v49 }
 0x107   : > { %v10420_v7 = vpop.permute.xlu1 %8215  ;;  %v13585_v16 = vrot.slane %v13910_v44, 6  ;;  %v952_v58 = vrot.slane %v13910_v44, 1 }
 0x108   : > { %v10427_v47 = vpop.permute.xlu0 %8210  ;;  %v659_v6 = vsel %vm13654_vm6, %v656_v25, %v13906_v32  ;;  %v8484_v25 = vpack.i.bf16 %v2063_v23, %v2061_v8  ;;  %v8217_v38 = vunpack.i.l.bf16 %v10420_v7 }
 0x109   : > { %v8494_v32 = vpack.i.bf16 %v659_v6, %v657_v63  ;;  %v8212_v23 = vunpack.i.l.bf16 %v10427_v47  ;;  %v13911_v63 = vrot.slane %v9715_v28, 6 }
 0x10a   : > { %8475 = vrot.lane.b32.xlu1 %v13907_v53, %s13662_s21  ;;  %8490 = vrot.lane.b32.xlu0 %v8489_v12, %s9137_s17  ;;  %v10455_v53 = vld [vmem:[%s9283_s19 + $0x50] sm:$0xff]   ;;  %v1969_v12 = vsel %vm13666_vm11, %v1951_v39, %v13584_v19  ;;  %v10485_v39 = vpack.i.bf16 %v13910_v44, %v9715_v28  ;;  %v13918_v19 = vrot.slane %v9715_v28, 7 }
 0x10b   : > { %v10452_v15 = vpop.permute.xlu1 %8225  ;;  %v10474_v6 = vsel %vm13658_vm4, %v13911_v63, %v13585_v16  ;;  %v10477_v51 = vunpack.c.l.bf16 %v10455_v53  ;;  %v8173_v63 = vunpack.i.h.bf16 %v10323_v55  ;;  %v1987_v5 = vsel %vm1515_vm12, %v1969_v12, %v13591_v40 }
 0x10c   : > { %v10458_v21 = vpop.permute.xlu0 %8220  ;;  %13912 = vst [vmem:[#allocation27_spill] sm:$0xff] %v10474_v6  ;;  %13914 = vst [vmem:[#allocation81_spill] sm:$0xff] %v10485_v39  ;;  %v13920_v40 = vunpack.i.h.bf16 %v10279_v3 }
 0x10d   : > { %v1440_v2 = vsel %vm13660_vm7, %v13921_v4, %v8173_v63  ;;  %v8222_v12 = vunpack.i.l.bf16 %v10458_v21  ;;  %v8183_v63 = vunpack.i.h.bf16 %v10356_v10 }
 0x10e   : > { %8485 = vrot.lane.b32.xlu1 %v8484_v25, %s13633_s8  ;;  %8495 = vrot.lane.b32.xlu0 %v8494_v32, %s13674_s15  ;;  %v1968_v25 = vsel %vm13666_vm11, %v1950_v62, %v13588_v48  ;;  %v13916_v62 = vld [vmem:[#allocation28_spill] sm:$0xff]  ;;  %v13917_v48 = vrot.slane %v13910_v44, 7 }
 0x10f   : > { %v10481_v8 = vpop.permute.xlu1 %8235  ;;  %v1441_v55 = vsel %vm13660_vm7, %v13916_v62, %v8212_v23  ;;  %v1986_v20 = vsel %vm1515_vm12, %v1968_v25, %v13920_v40  ;;  %v13924_v25 = vunpack.i.h.bf16 %v10303_v29 }
 0x110   : > { %13913 = vst [vmem:[#allocation55_spill] sm:$0xff] %v10481_v8  ;;  %v10492_v16 = vpop.permute.xlu0 %8230  ;;  %v10509_v34 = vsel %vm13643_vm5, %v13918_v19, %v13917_v48  ;;  %v13922_v19 = vunpack.i.l.bf16 %v10410_v31  ;;  %v1459_v40 = vsel %vm13671_vm8, %v1441_v55, %v8217_v38  ;;  %v13927_v38 = vunpack.i.l.bf16 %v10399_v46 }
 0x111   : > { %13915 = vst [vmem:[#allocation82_spill] sm:$0xff] %v10492_v16  ;;  %13919 = vst [vmem:[#allocation28_spill] sm:$0xff] %v10509_v34  ;;  %v2004_v41 = vsel %vm13659_vm13, %v1986_v20, %v13924_v25  ;;  %v10554_v10 = vsel %vm13668_vm9, %v1459_v40, %v8222_v12  ;;  %v13932_v25 = vld [vmem:[#allocation12_spill] sm:$0xff]  ;;  %v13613_v40 = vunpack.i.l.bf16 %v10492_v16  ;;  %vm1569_vm5 = vcmask 220160  }
 0x112   : > { %1837 = vrot.lane.b32.xlu1 %v10474_v6, %s13607_s29  ;;  %v8178_v6 = vunpack.i.h.bf16 %v10317_v26  ;;  %8500 = vrot.lane.b32.xlu0 %v10485_v39, %s13603_s9  ;;  %v2005_v48 = vsel %vm13659_vm13, %v1987_v5, %v13922_v19  ;;  %v13925_v39 = vrot.slane %v9715_v28, 1  ;;  %v13926_v19 = vrot.slane %v10477_v51, 1  ;;  %13928 = vst [vmem:[#allocation83_spill] sm:$0xff] %v10554_v10  ;;  %s13930_s9 = smov 33   ;;  %s13935_s29 = smov 36  }
 0x113   : > { %v10519_v23 = vpop.permute.xlu1 %8245  ;;  %v10547_v55 = vsel %vm1551_vm14, %v2005_v48, %v13927_v38  ;;  %v13931_v48 = vld [vmem:[#allocation15_spill] sm:$0xff] }
 0x114   : > { %v10527_v3 = vpop.permute.xlu0 %8240  ;;  %v953_v5 = vsel %vm13655_vm1, %v13925_v39, %v952_v58  ;;  %v1696_v18 = vsel %vm13655_vm1, %v952_v58, %v13926_v19  ;;  %v1458_v26 = vsel %vm13671_vm8, %v1440_v2, %v8178_v6  ;;  %v13929_v58 = vunpack.i.h.bf16 %v10296_v35 }
 0x115   : > { %13923 = vst [vmem:[#allocation21_spill] sm:$0xff] %v10527_v3  ;;  %v8188_v6 = vunpack.i.h.bf16 %v10349_v61  ;;  %v13933_v19 = vpack.i.bf16 %v13931_v48, %v13932_v25  ;;  %v10566_v38 = vpack.i.bf16 %v1696_v18, %v953_v5  ;;  %v2066_v12 = vrot.slane %v10547_v55, 3  ;;  %v13937_v61 = vld [vmem:[#allocation13_spill] sm:$0xff] }
 0x116   : > { %1866 = vrot.lane.b32.xlu1 %v10509_v34, %s13881_s13  ;;  %v8227_v34 = vunpack.i.l.bf16 %v10452_v15  ;;  %8510 = vrot.lane.b32.xlu0 %v8494_v32, %s13611_s23  ;;  %v2022_v2 = vsel %vm1551_vm14, %v2004_v41, %v13929_v58  ;;  %v10569_v32 = vsel %vm13668_vm9, %v1458_v26, %v8183_v63  ;;  %v13936_v41 = vld [vmem:[#allocation17_spill] sm:$0xff]  ;;  %v8529_v18 = vpack.i.bf16 %v9409_v60, %v9305_v9  ;;  %s13939_s23 = smov 24  }
 0x117   : > { %v10551_v20 = vpop.permute.xlu1 %8255  ;;  %13934 = vst [vmem:[#allocation15_spill] sm:$0xff] %v10569_v32  ;;  %v13938_v58 = vpack.i.bf16 %v13936_v41, %v13937_v61  ;;  %v660_v26 = vrot.slane %v9428_v14, 4  ;;  %v2064_v63 = vrot.slane %v2022_v2, 3  ;;  %v13615_v5 = vunpack.i.h.bf16 %v10383_v57 }
 0x118   : > { %v10556_v39 = vpop.permute.xlu0 %8250  ;;  %v1953_v35 = vsel %vm13667_vm10, %v10554_v10, %v8227_v34  ;;  %v13617_v48 = vrot.slane %v9460_v42, 4  ;;  %v1952_v34 = vsel %vm13667_vm10, %v10569_v32, %v8188_v6  ;;  %v13940_v61 = vrot.slane %v9409_v60, 4  ;;  %v13944_v32 = vld [vmem:[#allocation16_spill] sm:$0xff] }
 0x119   : > { %v1971_v9 = vsel %vm13666_vm11, %v1953_v35, %v13613_v40  ;;  %v2067_v2 = vsel %vm13669_vm2, %v2064_v63, %v2066_v12  ;;  %v13941_v40 = vrot.slane %v10393_v36, 3  ;;  %v13943_v60 = vunpack.i.l.bf16 %v10481_v8 }
 0x11a   : > { %8505 = vrot.lane.b32.xlu1 %v13933_v19, %s13930_s9  ;;  %8520 = vrot.lane.b32.xlu0 %v13938_v58, %s13935_s29  ;;  %v10604_v6 = vsel %vm13654_vm6, %v13940_v61, %v660_v26  ;;  %v1970_v58 = vsel %vm13666_vm11, %v1952_v34, %v13615_v5  ;;  %v13945_v34 = vld [vmem:[#allocation14_spill] sm:$0xff]  ;;  %v13618_v10 = vunpack.i.h.bf16 %v10410_v31  ;;  %v13947_v36 = vunpack.i.h.bf16 %v10377_v49 }
 0x11b   : > { %v10579_v29 = vpop.permute.xlu1 %8265  ;;  %v2065_v19 = vsel %vm13669_vm2, %v13941_v40, %v2064_v63  ;;  %v1989_v61 = vsel %vm1515_vm12, %v1971_v9, %v13943_v60  ;;  %v13946_v5 = vpack.i.bf16 %v13944_v32, %v13945_v34  ;;  %v13619_v63 = vunpack.i.l.bf16 %v10519_v23  ;;  %v13951_v34 = vld [vmem:[#allocation35_spill] sm:$0xff] }
 0x11c   : > { %v10585_v55 = vpop.permute.xlu0 %8260  ;;  %v8539_v25 = vpack.i.bf16 %v2067_v2, %v2065_v19  ;;  %v1988_v40 = vsel %vm1515_vm12, %v1970_v58, %v13947_v36  ;;  %v13948_v60 = vunpack.i.l.bf16 %v10527_v3  ;;  %v13624_v2 = vunpack.i.h.bf16 %v10399_v46  ;;  %v13949_v19 = vld [vmem:[#allocation39_spill] sm:$0xff]  ;;  %v13950_v58 = vld [vmem:[#allocation22_spill] sm:$0xff] }
 0x11d   : > { %v8544_v36 = vpack.i.bf16 %v13951_v34, %v13950_v58  ;;  %v13954_v34 = vld [vmem:[#allocation25_spill] sm:$0xff]  ;;  %v8252_v46 = vunpack.i.l.bf16 %v10556_v39  ;;  %v8213_v58 = vunpack.i.h.bf16 %v10427_v47  ;;  %v8218_v57 = vunpack.i.h.bf16 %v10420_v7  ;;  %v13961_v47 = vld [vmem:[#allocation24_spill] sm:$0xff] }
 0x11e   : > { %8515 = vrot.lane.b32.xlu1 %v10566_v38, %s13939_s23  ;;  %8530 = vrot.lane.b32.xlu0 %v8529_v18, %s13672_s20  ;;  %v10618_v18 = vsel %vm13654_vm6, %v660_v26, %v13617_v48  ;;  %v2007_v32 = vsel %vm13659_vm13, %v1989_v61, %v13948_v60  ;;  %v8258_v11 = vunpack.i.h.bf16 %v10551_v20 }
 0x11f   : > { %v10599_v41 = vpop.permute.xlu1 %8275  ;;  %13942 = vst [vmem:[#allocation12_spill] sm:$0xff] %v10618_v18  ;;  %v8549_v9 = vpack.i.bf16 %v10618_v18, %v10604_v6  ;;  %v10653_v48 = vsel %vm1551_vm14, %v2007_v32, %v13619_v63 }
 0x120   : > { %v10610_v35 = vpop.permute.xlu0 %8270  ;;  %13952 = vst [vmem:[#allocation17_spill] sm:$0xff] %v10653_v48  ;;  %v8277_v0 = vunpack.i.l.bf16 %v10599_v41 }
 0x122   : > { %8525 = vrot.lane.b32.xlu1 %v13946_v5, %s13664_s18  ;;  %8540 = vrot.lane.b32.xlu0 %v8539_v25, %s13633_s8  ;;  %v2006_v25 = vsel %vm13659_vm13, %v1988_v40, %v13618_v10  ;;  %v13953_v40 = vld [vmem:[#allocation26_spill] sm:$0xff] }
 0x123   : > { %v10633_v26 = vpop.permute.xlu1 %8285  ;;  %v13955_v10 = vpack.i.bf16 %v13953_v40, %v13954_v34  ;;  %v13959_v40 = vrot.slane %v10653_v48, 3  ;;  %v13965_v48 = vrot.slane %v10477_v51, 5 }
 0x124   : > { %v10640_v5 = vpop.permute.xlu0 %8280 }
 0x126   : > { %8535 = vrot.lane.b32.xlu1 %v13949_v19, %s13662_s21  ;;  %8550 = vrot.lane.b32.xlu0 %v8549_v9, %s13674_s15  ;;  %v2024_v19 = vsel %vm1551_vm14, %v2006_v25, %v13624_v2  ;;  %v8569_v9 = vpack.i.bf16 %v9460_v42, %v9428_v14  ;;  %v13956_v25 = vld [vmem:[#allocation19_spill] sm:$0xff] }
 0x127   : > { %v10656_v61 = vpop.permute.xlu1 %8295  ;;  %v2068_v32 = vrot.slane %v2024_v19, 3  ;;  %v8257_v19 = vunpack.i.l.bf16 %v10551_v20  ;;  %v13964_v14 = vld [vmem:[#allocation47_spill] sm:$0xff] }
 0x128   : > { %v10658_v60 = vpop.permute.xlu0 %8290 }
 0x129   : > { %v2069_v49 = vsel %vm13669_vm2, %v2066_v12, %v2068_v32  ;;  %v13966_v12 = vrot.slane %v13910_v44, 5 }
 0x12a   : > { %8545 = vrot.lane.b32.xlu1 %v8544_v36, %s9137_s17  ;;  %8560 = vrot.lane.b32.xlu0 %v13955_v10, %s13935_s29  ;;  %v13957_v36 = vld [vmem:[#allocation18_spill] sm:$0xff]  ;;  %v2071_v10 = vsel %vm13669_vm2, %v2068_v32, %v13959_v40  ;;  %v8267_v32 = vunpack.i.l.bf16 %v10579_v29 }
 0x12b   : > { %v10671_v63 = vpop.permute.xlu1 %8305  ;;  %v13958_v2 = vpack.i.bf16 %v13956_v25, %v13957_v36  ;;  %v13960_v25 = vld [vmem:[#allocation48_spill] sm:$0xff]  ;;  %v13962_v36 = vld [vmem:[#allocation23_spill] sm:$0xff]  ;;  %v8579_v40 = vpack.i.bf16 %v2071_v10, %v2069_v49  ;;  %v10706_v7 = vsel %vm13645_vm3, %v13966_v12, %v13965_v48  ;;  %vm1587_vm3 = vcmask 244736  }
 0x12c   : > { %v10673_v31 = vpop.permute.xlu0 %8300  ;;  %v13963_v18 = vpack.i.bf16 %v13961_v47, %v13962_v36  ;;  %13967 = vst [vmem:[#allocation13_spill] sm:$0xff] %v10706_v7  ;;  %v13968_v49 = vld [vmem:[#allocation36_spill] sm:$0xff]  ;;  %v13970_v36 = vld [vmem:[#allocation46_spill] sm:$0xff]  ;;  %v8584_v12 = vpack.i.bf16 %v10706_v7, %v10604_v6  ;;  %v1741_v7 = vrot.slane %v10477_v51, 3 }
 0x12e   : > { %8555 = vrot.lane.b32.xlu1 %v13958_v2, %s13930_s9  ;;  %8570 = vrot.lane.b32.xlu0 %v8569_v9, %s13672_s20  ;;  %v1427_v2 = vsel %vm13660_vm7, %v13960_v25, %v8252_v46  ;;  %v1426_v9 = vsel %vm13660_vm7, %v13964_v14, %v8213_v58  ;;  %v664_v46 = vrot.slane %v13921_v4, 4  ;;  %v13969_v58 = vld [vmem:[#allocation44_spill] sm:$0xff]  ;;  %v8223_v14 = vunpack.i.h.bf16 %v10458_v21 }
 0x12f   : > { %v10699_v56 = vpop.permute.xlu1 %8315  ;;  %v8589_v10 = vpack.i.bf16 %v13969_v58, %v13968_v49  ;;  %v1445_v25 = vsel %vm13671_vm8, %v1427_v2, %v8257_v19  ;;  %v1444_v48 = vsel %vm13671_vm8, %v1426_v9, %v8218_v57  ;;  %v13972_v21 = vrot.slane %v13916_v62, 4  ;;  %v10735_v2 = vld [vmem:[%s9283_s19 + $0x58] sm:$0xff]  }
 0x130   : > { %v10687_v34 = vpop.permute.xlu0 %8310  ;;  %v8228_v57 = vunpack.i.h.bf16 %v10452_v15  ;;  %v1462_v6 = vsel %vm13668_vm9, %v1444_v48, %v8223_v14 }
 0x131   : > { %v10732_v19 = vsel %vm13654_vm6, %v664_v46, %v13972_v21  ;;  %v13976_v21 = vld [vmem:[#allocation29_spill] sm:$0xff] }
 0x132   : > { %8565 = vrot.lane.b32.xlu1 %v13963_v18, %s13664_s18  ;;  %v8262_v18 = vunpack.i.l.bf16 %v10585_v55  ;;  %8580 = vrot.lane.b32.xlu0 %v8579_v40, %s13633_s8  ;;  %v13971_v40 = vrot.slane %v9460_v42, 4  ;;  %13973 = vst [vmem:[#allocation16_spill] sm:$0xff] %v10732_v19  ;;  %s13974_s8 = smov 12   ;;  %v1480_v48 = vsel %vm13667_vm10, %v1462_v6, %v8228_v57  ;;  %v8238_v57 = vunpack.i.h.bf16 %v10481_v8  ;;  %v13978_v6 = vld [vmem:[#allocation51_spill] sm:$0xff] }
 0x133   : > { %v10741_v58 = vpop.permute.xlu1 %8325  ;;  %v13979_v8 = vrot.slane %v9715_v28, 3 }
 0x134   : > { %v10716_v47 = vpop.permute.xlu0 %8320  ;;  %v10727_v49 = vsel %vm13654_vm6, %v13971_v40, %v664_v46  ;;  %v1463_v9 = vsel %vm13668_vm9, %v1445_v25, %v8262_v18  ;;  %v8272_v46 = vunpack.i.l.bf16 %v10610_v35  ;;  %v10753_v18 = vunpack.c.l.bf16 %v10735_v2  ;;  %v13975_v40 = vld [vmem:[#allocation30_spill] sm:$0xff] }
 0x135   : > { %v8594_v15 = vpack.i.bf16 %v10732_v19, %v10727_v49  ;;  %v1481_v14 = vsel %vm13667_vm10, %v1463_v9, %v8267_v32  ;;  %v1739_v25 = vrot.slane %v13910_v44, 3  ;;  %v1207_v19 = vrot.slane %v10477_v51, 6 }
 0x136   : > { %8575 = vrot.lane.b32.xlu1 %v13970_v36, %s13662_s21  ;;  %8590 = vrot.lane.b32.xlu0 %v8589_v10, %s9137_s17  ;;  %v10746_v36 = vunpack.c.h.bf16 %v10455_v53  ;;  %v8233_v10 = vunpack.i.h.bf16 %v10492_v16  ;;  %v8253_v53 = vunpack.i.h.bf16 %v10556_v39  ;;  %v1499_v39 = vsel %vm13666_vm11, %v1481_v14, %v8272_v46 }
 0x137   : > { %v10781_v43 = vpop.permute.xlu1 %8335  ;;  %v8614_v32 = vpack.i.bf16 %v13916_v62, %v13921_v4  ;;  %v10788_v46 = vsel %vm13669_vm2, %v13979_v8, %v1739_v25  ;;  %v8282_v14 = vunpack.i.l.bf16 %v10640_v5  ;;  %v13984_v4 = vrot.slane %v13910_v44, 6 }
 0x138   : > { %v10743_v42 = vpop.permute.xlu0 %8330  ;;  %v1697_v9 = vrot.slane %v10746_v36, 1  ;;  %v8243_v8 = vunpack.i.h.bf16 %v10527_v3  ;;  %v13985_v37 = vrot.slane %v10746_v36, 6  ;;  %v13987_v3 = vld [vmem:[#allocation34_spill] sm:$0xff]  ;;  %v13661_v28 = vrot.slane %v10746_v36, 3 }
 0x139   : > { %v10803_v54 = vsel %vm13658_vm4, %v13984_v4, %v1207_v19  ;;  %v8263_v4 = vunpack.i.h.bf16 %v10585_v55  ;;  %vm1623_vm6 = vcmask 293888  }
 0x13a   : > { %8585 = vrot.lane.b32.xlu1 %v8584_v12, %s13974_s8  ;;  %v13977_v12 = vpack.i.bf16 %v13975_v40, %v13976_v21  ;;  %v8619_v40 = vpack.i.bf16 %v10328_v50, %v13978_v6  ;;  %v10777_v21 = vrot.slane %v10753_v18, 1  ;;  %v10798_v6 = vsel %vm13669_vm2, %v1739_v25, %v1741_v7 }
 0x13b   : > { %v13986_v25 = vrot.slane %v10477_v51, 1 }
 0x13c   : > { %8600 = vrot.lane.b32.xlu0 %v13977_v12, %s13930_s9  ;;  %v10767_v16 = vpop.permute.xlu0 %8340  ;;  %v1498_v12 = vsel %vm13666_vm11, %v1480_v48, %v8233_v10  ;;  %v13981_v10 = vld [vmem:[#allocation33_spill] sm:$0xff]  ;;  %v13982_v48 = vld [vmem:[#allocation31_spill] sm:$0xff] }
 0x13d   : > { %v13983_v20 = vpack.i.bf16 %v13981_v10, %v13982_v48  ;;  %v10812_v10 = vsel %vm13658_vm4, %v1207_v19, %v13985_v37  ;;  %v1698_v48 = vsel %vm13655_vm1, %v13986_v25, %v1697_v9  ;;  %v8287_v19 = vunpack.i.l.bf16 %v10633_v26 }
 0x13e   : > { %8595 = vrot.lane.b32.xlu1 %v8594_v15, %s13674_s15  ;;  %v13980_v15 = vld [vmem:[#allocation49_spill] sm:$0xff]  ;;  %v8292_v25 = vunpack.i.l.bf16 %v10658_v60  ;;  %vm1677_vm4 = vcmask 367616  }
 0x13f   : > { %v1428_v50 = vsel %vm13660_vm7, %v13980_v15, %v8253_v53  ;;  %v1517_v53 = vsel %vm1515_vm12, %v1499_v39, %v8277_v0  ;;  %v13989_v0 = vpack.i.bf16 %v13987_v3, %v13988_v1  ;;  %v1700_v39 = vsel %vm13655_vm1, %v1697_v9, %v10777_v21 }
 0x140   : > { %8610 = vrot.lane.b32.xlu0 %v13983_v20, %s13664_s18  ;;  %v10807_v15 = vpop.permute.xlu0 %8350  ;;  %v1516_v20 = vsel %vm1515_vm12, %v1498_v12, %v8238_v57  ;;  %v1446_v37 = vsel %vm13671_vm8, %v1428_v50, %v8258_v11  ;;  %v8248_v57 = vunpack.i.h.bf16 %v10519_v23  ;;  %v1535_v55 = vsel %vm13659_vm13, %v1517_v53, %v8282_v14  ;;  %v10838_v12 = vpop.permute.xlu1 %8345  ;;  %s13992_s18 = smov 21  }
 0x141   : > { %v8639_v1 = vpack.i.bf16 %v10798_v6, %v10788_v46  ;;  %v8649_v3 = vpack.i.bf16 %v10812_v10, %v10803_v54  ;;  %v1534_v11 = vsel %vm13659_vm13, %v1516_v20, %v8243_v8  ;;  %v8268_v9 = vunpack.i.h.bf16 %v10579_v29 }
 0x142   : > { %8605 = vrot.lane.b32.xlu1 %v13989_v0, %s13935_s29  ;;  %vm1641_vm1 = vcmask 318464   ;;  %v8659_v14 = vpack.i.bf16 %v10746_v36, %v10477_v51  ;;  %v10844_v53 = vpack.i.bf16 %v1700_v39, %v1698_v48  ;;  %v8298_v6 = vunpack.i.h.bf16 %v10656_v61  ;;  %v13990_v48 = vld [vmem:[#allocation52_spill] sm:$0xff] }
 0x143   : > { %v8302_v46 = vunpack.i.l.bf16 %v10673_v31  ;;  %v10853_v29 = vsel %vm13669_vm2, %v1741_v7, %v13661_v28  ;;  %v8297_v8 = vunpack.i.l.bf16 %v10656_v61  ;;  %v1553_v20 = vsel %vm1551_vm14, %v1535_v55, %v8287_v19 }
 0x144   : > { %8620 = vrot.lane.b32.xlu0 %v8619_v40, %s13662_s21  ;;  %v10840_v50 = vpop.permute.xlu0 %8360  ;;  %v1464_v40 = vsel %vm13668_vm9, %v1446_v37, %v8263_v4  ;;  %v1429_v0 = vsel %vm13660_vm7, %v13990_v48, %v8292_v25  ;;  %v1552_v39 = vsel %vm1551_vm14, %v1534_v11, %v8248_v57  ;;  %v8307_v37 = vunpack.i.l.bf16 %v10671_v63  ;;  %s13991_s21 = smov 15  }
 0x145   : > { %vm13676_vm13 = vcmask 392192   ;;  %v10865_v7 = vunpack.c.h.bf16 %v10735_v2  ;;  %v1482_v19 = vsel %vm13667_vm10, %v1464_v40, %v8268_v9  ;;  %v8308_v25 = vunpack.i.h.bf16 %v10671_v63  ;;  %v8356_v40 = vpop.permute.xlu1 %8355 }
 0x146   : > { %8615 = vrot.lane.b32.xlu1 %v8614_v32, %s13672_s20  ;;  %v8278_v32 = vunpack.i.h.bf16 %v10599_v41  ;;  %v8312_v55 = vunpack.i.l.bf16 %v10687_v34  ;;  %v1571_v11 = vsel %vm1569_vm5, %v1553_v20, %v8298_v6  ;;  %v8318_v48 = vunpack.i.h.bf16 %v10699_v56 }
 0x147   : > { %v8317_v2 = vunpack.i.l.bf16 %v10699_v56  ;;  %v8273_v61 = vunpack.i.h.bf16 %v10610_v35  ;;  %v1570_v41 = vsel %vm1569_vm5, %v1552_v39, %v8297_v8  ;;  %v8328_v9 = vunpack.i.h.bf16 %v10741_v58 }
 0x148   : > { %8630 = vrot.lane.b32.xlu0 %v10566_v38, %s13891_s14  ;;  %v10872_v57 = vpop.permute.xlu0 %8370  ;;  %v1447_v38 = vsel %vm13671_vm8, %v1429_v0, %v8302_v46  ;;  %v8327_v63 = vunpack.i.l.bf16 %v10741_v58  ;;  %vm13670_vm7 = vcmask 613376   ;;  %v1588_v28 = vsel %vm1587_vm3, %v1570_v41, %v8307_v37 }
 0x149   : > { %v8322_v6 = vunpack.i.l.bf16 %v10716_v47  ;;  %v8338_v46 = vunpack.i.h.bf16 %v10781_v43  ;;  %v8337_v20 = vunpack.i.l.bf16 %v10781_v43  ;;  %v1589_v56 = vsel %vm1587_vm3, %v1571_v11, %v8308_v25 }
 0x14a   : > { %v1465_v35 = vsel %vm13668_vm9, %v1447_v38, %v8312_v55  ;;  %v8348_v8 = vunpack.i.h.bf16 %v10838_v12  ;;  %v8347_v58 = vunpack.i.l.bf16 %v10838_v12  ;;  %v1606_v39 = vsel %vm1605_vm0, %v1588_v28, %v8317_v2 }
 0x14b   : > { %v1607_v37 = vsel %vm1605_vm0, %v1589_v56, %v8318_v48  ;;  %v8358_v41 = vunpack.i.h.bf16 %v8356_v40  ;;  %v8357_v4 = vunpack.i.l.bf16 %v8356_v40  ;;  %v1500_v43 = vsel %vm13666_vm11, %v1482_v19, %v8273_v61 }
 0x14c   : > { %8640 = vrot.lane.b32.xlu0 %v8639_v1, %s13898_s22  ;;  %v1624_v1 = vsel %vm1623_vm6, %v1606_v39, %v8327_v63  ;;  %v1625_v25 = vsel %vm1623_vm6, %v1607_v37, %v8328_v9  ;;  %v8332_v55 = vunpack.i.l.bf16 %v10743_v42  ;;  %v8283_v11 = vunpack.i.h.bf16 %v10640_v5 }
 0x14d   : > { %v10891_v0 = vpop.permute.xlu0 %8380  ;;  %v1483_v12 = vsel %vm13667_vm10, %v1465_v35, %v8322_v6  ;;  %v1642_v38 = vsel %vm1641_vm1, %v1624_v1, %v8337_v20  ;;  %v1643_v28 = vsel %vm1641_vm1, %v1625_v25, %v8338_v46  ;;  %v1518_v5 = vsel %vm1515_vm12, %v1500_v43, %v8278_v32 }
 0x14e   : > { %v1660_v19 = vsel %vm1659_vm15, %v1642_v38, %v8347_v58  ;;  %v1661_v48 = vsel %vm1659_vm15, %v1643_v28, %v8348_v8  ;;  %v8342_v63 = vunpack.i.l.bf16 %v10767_v16  ;;  %v1501_v20 = vsel %vm13666_vm11, %v1483_v12, %v8332_v55 }
 0x14f   : > { %v1678_v40 = vsel %vm1677_vm4, %v1660_v19, %v8357_v4  ;;  %v1679_v6 = vsel %vm1677_vm4, %v1661_v48, %v8358_v41  ;;  %v8352_v10 = vunpack.i.l.bf16 %v10807_v15  ;;  %v8288_v35 = vunpack.i.h.bf16 %v10633_v26 }
 0x150   : > { %8650 = vrot.lane.b32.xlu0 %v8649_v3, %s13991_s21  ;;  %v8366_v61 = vpop.permute.xlu1 %8365  ;;  %v8362_v8 = vunpack.i.l.bf16 %v10840_v50  ;;  %v1831_v58 = vrot.slane %v10865_v7, 6  ;;  %vm13993_vm11 = vcmask 171008   ;;  %v8373_v37 = vunpack.i.h.bf16 %v10872_v57 }
 0x151   : > { %v8368_v2 = vunpack.i.h.bf16 %v8366_v61  ;;  %v8367_v9 = vunpack.i.l.bf16 %v8366_v61  ;;  %v8391_v46 = vpop.permute.xlu0 %8390  ;;  %v1536_v39 = vsel %vm13993_vm11, %v1518_v5, %v8283_v11  ;;  %v8372_v41 = vunpack.i.l.bf16 %v10872_v57  ;;  %vm13996_vm10 = vmmov %vm13993_vm11 }
 0x152   : > { %v13994_v43 = vrot.slane %v10753_v18, 3  ;;  %v13995_v26 = vrot.slane %v10746_v36, 3  ;;  %v1519_v25 = vsel %vm1515_vm12, %v1501_v20, %v8342_v63  ;;  %v13997_v11 = vrot.slane %v10753_v18, 6 }
 0x153   : > { %v2138_v3 = vsel %vm13676_vm13, %v1678_v40, %v8367_v9  ;;  %v2139_v56 = vsel %vm13676_vm13, %v1679_v6, %v8368_v2  ;;  %v1537_v12 = vsel %vm13996_vm10, %v1519_v25, %v8352_v10  ;;  %v13998_v38 = vrot.slane %v10746_v36, 6 }
 0x154   : > { %8660 = vrot.lane.b32.xlu0 %v8659_v14, %s13992_s18  ;;  %v8376_v4 = vpop.permute.xlu1 %8375  ;;  %v2155_v32 = vpack.c.bf16 %v2139_v56, %v2138_v3  ;;  %v1746_v1 = vsel %vm13669_vm2, %v13995_v26, %v13994_v43  ;;  %vm13999_vm11 = vcmask 1041408   ;;  %vm14000_vm9 = vmmov 0  }
 0x155   : > { %v8378_v55 = vunpack.i.h.bf16 %v8376_v4  ;;  %v8377_v14 = vunpack.i.l.bf16 %v8376_v4  ;;  %v1830_v57 = vsel %vm13999_vm11, %v13998_v38, %v13997_v11  ;;  %v1555_v28 = vsel %vm1551_vm14, %v1537_v12, %v8362_v8  ;;  %v8401_v19 = vpop.permute.xlu0 %8400  ;;  %vm14002_vm10 = vmmov %vm13999_vm11 }
 0x156   : > { %7539 = vmatmul.mubr.msk.bf16.vlgmr.msra.gmra.mxu0 %vm13670_vm7, %v2155_v32  ;;  %v1554_v61 = vsel %vm1551_vm14, %v1536_v39, %v8288_v35  ;;  %v8679_v2 = vpack.i.bf16 %v1746_v1, %v10853_v29  ;;  %v14001_v9 = vmov %v13997_v11  ;;  %v1573_v40 = vsel %vm1569_vm5, %v1555_v28, %v8373_v37 }
 0x157   : > { %7542 = vmatprep.mubr.msk.bf16.mxu0 %vm14000_vm9, %v13861_v45  ;;  %v1832_v5 = vsel %vm14002_vm10, %v14001_v9, %v1831_v58  ;;  %v1572_v63 = vsel %vm1569_vm5, %v1554_v61, %v8372_v41  ;;  %v8383_v6 = vunpack.i.h.bf16 %v10891_v0  ;;  %v8382_v20 = vunpack.i.l.bf16 %v10891_v0 }
 0x158   : > { %8670 = vrot.lane.b32.xlu0 %v10844_v53, %s13891_s14  ;;  %v10946_v48 = vpop.permute.xlu1 %8385  ;;  %v1590_v10 = vsel %vm1587_vm3, %v1572_v63, %v8377_v14  ;;  %v1591_v3 = vsel %vm1587_vm3, %v1573_v40, %v8378_v55  ;;  %v8393_v56 = vunpack.i.h.bf16 %v8391_v46  ;;  %v8392_v29 = vunpack.i.l.bf16 %v8391_v46 }
 0x159   : > { %v8689_v8 = vpack.i.bf16 %v1832_v5, %v1830_v57  ;;  %v1608_v4 = vsel %vm1605_vm0, %v1590_v10, %v8382_v20  ;;  %v1609_v32 = vsel %vm1605_vm0, %v1591_v3, %v8383_v6  ;;  %v8411_v39 = vpop.permute.xlu0 %8410  ;;  %v8403_v37 = vunpack.i.h.bf16 %v8401_v19 }
 0x15a   : > { %v8402_v41 = vunpack.i.l.bf16 %v8401_v19  ;;  %v1626_v0 = vsel %vm1623_vm6, %v1608_v4, %v8392_v29  ;;  %v1627_v43 = vsel %vm1623_vm6, %v1609_v32, %v8393_v56  ;;  %v8699_v46 = vpack.i.bf16 %v10865_v7, %v10753_v18  ;;  %v14008_v56 = vld [vmem:[#allocation56_spill] sm:$0xff] }
 0x15b   : > { %v668_v1 = vrot.slane %v9560_v13, 4  ;;  %v670_v25 = vrot.slane %v9590_v33, 4  ;;  %v8413_v55 = vunpack.i.h.bf16 %v8411_v39  ;;  %v8412_v14 = vunpack.i.l.bf16 %v8411_v39 }
 0x15c   : > { %8680 = vrot.lane.b32.xlu0 %v8679_v2, %s13898_s22  ;;  %v10961_v35 = vpop.permute.xlu1 %8395  ;;  %v1644_v11 = vsel %vm1641_vm1, %v1626_v0, %v8402_v41  ;;  %v1645_v38 = vsel %vm1641_vm1, %v1627_v43, %v8403_v37  ;;  %v8293_v57 = vunpack.i.h.bf16 %v10658_v60  ;;  %v14005_v2 = vrot.slane %v13916_v62, 4 }
 0x15d   : > { %14003 = vst [vmem:[#allocation14_spill] sm:$0xff] %v10961_v35  ;;  %vm14006_vm11 = vcmask 1043456   ;;  %v1662_v63 = vsel %vm1659_vm15, %v1644_v11, %v8412_v14  ;;  %v1663_v40 = vsel %vm1659_vm15, %v1645_v38, %v8413_v55  ;;  %v8303_v10 = vunpack.i.h.bf16 %v10673_v31  ;;  %v14011_v38 = vld [vmem:[#allocation43_spill] sm:$0xff] }
 0x15e   : > { %v10981_v9 = vsel %vm14006_vm11, %v14005_v2, %v668_v1  ;;  %vm14007_vm10 = vmmov %vm14006_vm11  ;;  %vm14009_vm11 = vcmask 23552   ;;  %v8313_v31 = vunpack.i.h.bf16 %v10687_v34  ;;  %v8397_v34 = vunpack.i.l.bf16 %v10961_v35 }
 0x15f   : > { %v10986_v5 = vsel %vm14007_vm10, %v668_v1, %v670_v25  ;;  %v1430_v29 = vsel %vm14009_vm11, %v14008_v56, %v8293_v57  ;;  %vm14010_vm10 = vcmask 72704   ;;  %v14012_v57 = vld [vmem:[#allocation42_spill] sm:$0xff]  ;;  %vm14014_vm11 = vcmask 97280  }
 0x160   : > { %8690 = vrot.lane.b32.xlu0 %v8689_v8, %s13991_s21  ;;  %v10968_v26 = vpop.permute.xlu1 %8405  ;;  %v8421_v12 = vpop.permute.xlu0 %8420  ;;  %v8714_v39 = vpack.i.bf16 %v10986_v5, %v10981_v9  ;;  %v1448_v0 = vsel %vm13671_vm8, %v1430_v29, %v8303_v10  ;;  %vm14016_vm2 = vcmask 121856  }
 0x161   : > { %14004 = vst [vmem:[#allocation39_spill] sm:$0xff] %v10968_v26  ;;  %v8423_v60 = vunpack.i.h.bf16 %v8421_v12  ;;  %v8422_v6 = vunpack.i.l.bf16 %v8421_v12  ;;  %v1466_v1 = vsel %vm14010_vm10, %v1448_v0, %v8313_v31  ;;  %v8407_v14 = vunpack.i.l.bf16 %v10968_v26  ;;  %vm14015_vm10 = vmmov %vm14014_vm11 }
 0x162   : > { %v8333_v12 = vunpack.i.h.bf16 %v10743_v42  ;;  %v8343_v42 = vunpack.i.h.bf16 %v10767_v16  ;;  %v14021_v0 = vunpack.i.l.bf16 %v10111_v17 }
 0x164   : > { %8700 = vrot.lane.b32.xlu0 %v8699_v46, %s13992_s18  ;;  %v8416_v28 = vpop.permute.xlu1 %8415  ;;  %v10990_v20 = vpop.permute.xlu0 %8430  ;;  %v8387_v46 = vunpack.i.l.bf16 %v10946_v48 }
 0x165   : > { %v8418_v61 = vunpack.i.h.bf16 %v8416_v28  ;;  %v8417_v19 = vunpack.i.l.bf16 %v8416_v28  ;;  %v14013_v28 = vpack.i.bf16 %v14011_v38, %v14012_v57  ;;  %v8433_v31 = vunpack.i.h.bf16 %v10990_v20 }
 0x167   : > { %v1680_v62 = vsel %vm1677_vm4, %v1662_v63, %v8417_v19  ;;  %v1681_v3 = vsel %vm1677_vm4, %v1663_v40, %v8418_v61  ;;  %v1485_v19 = vsel %vm14015_vm10, %v10063_v22, %v8387_v46 }
 0x168   : > { %698 = vrot.lane.b32.xlu0 %v10727_v49, %s13974_s8  ;;  %v8426_v8 = vpop.permute.xlu1 %8425  ;;  %v2140_v4 = vsel %vm13676_vm13, %v1680_v62, %v8422_v6  ;;  %v2141_v32 = vsel %vm13676_vm13, %v1681_v3, %v8423_v60  ;;  %v11004_v41 = vpop.permute.xlu0 %8440  ;;  %v8323_v49 = vunpack.i.h.bf16 %v10716_v47  ;;  %v8734_v47 = vpack.i.bf16 %v9590_v33, %v9560_v13 }
 0x169   : > { %v2156_v37 = vpack.c.bf16 %v2141_v32, %v2140_v4  ;;  %v1503_v2 = vsel %vm14016_vm2, %v1485_v19, %v8397_v34  ;;  %v8353_v6 = vunpack.i.h.bf16 %v10807_v15  ;;  %v8363_v62 = vunpack.i.h.bf16 %v10840_v50 }
 0x16a   : > { %v1484_v61 = vsel %vm14014_vm11, %v1466_v1, %v8323_v49  ;;  %v1521_v40 = vsel %vm1515_vm12, %v1503_v2, %v8407_v14  ;;  %v14018_v3 = vunpack.i.l.bf16 %v10077_v24  ;;  %vm14019_vm11 = vcmask 171008  }
 0x16b   : > { %7543 = vmatmul.mubr.msk.bf16.gmra.mxu0 %vm13670_vm7, %v2156_v37  ;;  %vm14017_vm7 = vmmov %vm14016_vm2  ;;  %v8428_v56 = vunpack.i.h.bf16 %v8426_v8  ;;  %v8427_v29 = vunpack.i.l.bf16 %v8426_v8  ;;  %v8432_v50 = vunpack.i.l.bf16 %v10990_v20 }
 0x16c   : > { %v8436_v43 = vpop.permute.xlu1 %8435  ;;  %7546 = vmatprep.mubr.msk.bf16.mxu0 %vm14000_vm9, %v13861_v45  ;;  %8715 = vrot.lane.b32.xlu0 %v8714_v39, %s13674_s15  ;;  %v11015_v55 = vpop.permute.xlu0 %8450  ;;  %v1502_v60 = vsel %vm14017_vm7, %v1484_v61, %v8333_v12  ;;  %v1539_v22 = vsel %vm14019_vm11, %v1521_v40, %v14018_v3  ;;  %vm14020_vm2 = vmmov %vm14019_vm11  ;;  %v8388_v39 = vunpack.i.h.bf16 %v10946_v48  ;;  %v8442_v48 = vunpack.i.l.bf16 %v11004_v41  ;;  %s14107_s15 = smov 45  }
 0x16d   : > { %v1520_v16 = vsel %vm1515_vm12, %v1502_v60, %v8343_v42  ;;  %v1557_v49 = vsel %vm1551_vm14, %v1539_v22, %v14021_v0  ;;  %v8438_v1 = vunpack.i.h.bf16 %v8436_v43  ;;  %v8437_v34 = vunpack.i.l.bf16 %v8436_v43  ;;  %vm14022_vm7 = vmmov %vm14015_vm10 }
 0x16e   : > { %v1538_v32 = vsel %vm14020_vm2, %v1520_v16, %v8353_v6  ;;  %v1575_v46 = vsel %vm1569_vm5, %v1557_v49, %v8428_v56  ;;  %v1486_v57 = vsel %vm14022_vm7, %v10071_v27, %v8388_v39  ;;  %v8452_v20 = vunpack.i.l.bf16 %v11015_v55  ;;  %vm14023_vm10 = vmmov %vm14022_vm7 }
 0x16f   : > { %v1556_v37 = vsel %vm1551_vm14, %v1538_v32, %v8363_v62  ;;  %v1593_v2 = vsel %vm1587_vm3, %v1575_v46, %v8433_v31  ;;  %v1487_v27 = vsel %vm14023_vm10, %v10054_v52, %v8442_v48  ;;  %vm14024_vm11 = vcmask 23552  }
 0x170   : > { %v8446_v11 = vpop.permute.xlu1 %8445  ;;  %8725 = vrot.lane.b32.xlu0 %v14013_v28, %s13935_s29  ;;  %v11029_v63 = vpop.permute.xlu0 %8460  ;;  %v1574_v8 = vsel %vm1569_vm5, %v1556_v37, %v8427_v29  ;;  %v1611_v60 = vsel %vm1605_vm0, %v1593_v2, %v8438_v1  ;;  %v1442_v56 = vsel %vm14024_vm11, %v9560_v13, %v8452_v20  ;;  %v14025_v31 = vunpack.i.l.bf16 %v9999_v30  ;;  %vm14027_vm7 = vmmov %vm14024_vm11 }
 0x171   : > { %v8448_v12 = vunpack.i.h.bf16 %v8446_v11  ;;  %v8447_v38 = vunpack.i.l.bf16 %v8446_v11  ;;  %v1592_v19 = vsel %vm1587_vm3, %v1574_v8, %v8432_v50  ;;  %v8462_v29 = vunpack.i.l.bf16 %v11029_v63 }
 0x172   : > { %v1610_v40 = vsel %vm1605_vm0, %v1592_v19, %v8437_v34  ;;  %vm14026_vm2 = vcmask 121856   ;;  %v8463_v0 = vunpack.i.h.bf16 %v11029_v63  ;;  %v1007_v19 = vrot.slane %v13910_v44, 2 }
 0x173   : > { %v1628_v3 = vsel %vm1623_vm6, %v1610_v40, %v8447_v38  ;;  %v1629_v22 = vsel %vm1623_vm6, %v1611_v60, %v8448_v12  ;;  %v1504_v50 = vsel %vm14026_vm2, %v1486_v57, %v14025_v31  ;;  %v14028_v12 = vunpack.i.h.bf16 %v9999_v30  ;;  %vm14029_vm10 = vmmov %vm14026_vm2 }
 0x174   : > { %v8456_v10 = vpop.permute.xlu1 %8455  ;;  %8735 = vrot.lane.b32.xlu0 %v8734_v47, %s13672_s20  ;;  %v11040_v4 = vpop.permute.xlu0 %8470  ;;  %v1460_v63 = vsel %vm13671_vm8, %v1442_v56, %v8462_v29  ;;  %vm14032_vm11 = vcmask 613376   ;;  %v1368_v30 = vrot.slane %v10477_v51, 2  ;;  %vm14034_vm2 = vcmask 72704   ;;  %s14075_s20 = smov 48  }
 0x175   : > { %v8458_v28 = vunpack.i.h.bf16 %v8456_v10  ;;  %v8457_v47 = vunpack.i.l.bf16 %v8456_v10  ;;  %v8453_v10 = vunpack.i.h.bf16 %v11015_v55  ;;  %v8472_v1 = vunpack.i.l.bf16 %v11040_v4 }
 0x176   : > { %v1505_v38 = vsel %vm14029_vm10, %v1487_v27, %v14028_v12  ;;  %vm14038_vm10 = vmmov %vm14034_vm2  ;;  %v13680_v29 = vunpack.i.h.bf16 %v10961_v35  ;;  %v14244_v35 = vld [vmem:[#allocation11_spill] sm:$0xff] }
 0x177   : > { %v1646_v16 = vsel %vm1641_vm1, %v1628_v3, %v8457_v47  ;;  %v1647_v32 = vsel %vm1641_vm1, %v1629_v22, %v8458_v28  ;;  %v1925_v46 = vsel %vm14027_vm7, %v9590_v33, %v8453_v10  ;;  %v14030_v28 = vunpack.i.l.bf16 %v10039_v59  ;;  %v14116_v33 = vld [vmem:[#allocation81_spill] sm:$0xff] }
 0x178   : > { %v8466_v15 = vpop.permute.xlu1 %8465  ;;  %v11053_v14 = vpop.permute.xlu0 %8480  ;;  %v1931_v2 = vsel %vm13671_vm8, %v1925_v46, %v8463_v0  ;;  %v11106_v60 = vsel %vm14034_vm2, %v1460_v63, %v8472_v1  ;;  %vm14037_vm7 = vcmask 171008   ;;  %vm14042_vm2 = vcmask 97280  }
 0x179   : > { %v8468_v42 = vunpack.i.h.bf16 %v8466_v15  ;;  %v8467_v43 = vunpack.i.l.bf16 %v8466_v15  ;;  %v1522_v47 = vsel %vm1515_vm12, %v1504_v50, %v14030_v28  ;;  %14035 = vst [vmem:[#allocation35_spill] sm:$0xff] %v11106_v60  ;;  %vm14045_vm8 = vmmov %vm14037_vm7 }
 0x17b   : > { %v1664_v15 = vsel %vm1659_vm15, %v1646_v16, %v8467_v43  ;;  %v1665_v52 = vsel %vm1659_vm15, %v1647_v32, %v8468_v42  ;;  %v14033_v43 = vunpack.i.h.bf16 %v10039_v59  ;;  %v14039_v59 = vld [vmem:[#allocation50_spill] sm:$0xff] }
 0x17c   : > { %v8476_v61 = vpop.permute.xlu1 %8475  ;;  %v11063_v62 = vpop.permute.xlu0 %8490  ;;  %v14040_v22 = vrot.slane %v14039_v59, 2 }
 0x17d   : > { %v8478_v6 = vunpack.i.h.bf16 %v8476_v61  ;;  %v8477_v11 = vunpack.i.l.bf16 %v8476_v61  ;;  %v8473_v61 = vunpack.i.h.bf16 %v11040_v4  ;;  %v1523_v40 = vsel %vm1515_vm12, %v1505_v38, %v14033_v43 }
 0x17e   : > { %v8443_v4 = vunpack.i.h.bf16 %v11004_v41  ;;  %v14043_v41 = vld [vmem:[#allocation62_spill] sm:$0xff]  ;;  %v8493_v31 = vunpack.i.h.bf16 %v11063_v62  ;;  %v8492_v50 = vunpack.i.l.bf16 %v11063_v62 }
 0x17f   : > { %v1682_v13 = vsel %vm1677_vm4, %v1664_v15, %v8477_v11  ;;  %v1683_v49 = vsel %vm1677_vm4, %v1665_v52, %v8478_v6  ;;  %v8482_v6 = vunpack.i.l.bf16 %v11053_v14  ;;  %v14036_v11 = vunpack.i.h.bf16 %v10077_v24 }
 0x180   : > { %v8486_v39 = vpop.permute.xlu1 %8485  ;;  %v8496_v8 = vpop.permute.xlu0 %8495  ;;  %v1937_v3 = vsel %vm14038_vm10, %v1931_v2, %v8473_v61  ;;  %v1954_v16 = vsel %vm14042_vm2, %v11106_v60, %v8443_v4  ;;  %v14044_v32 = vunpack.i.l.bf16 %v14043_v41  ;;  %v8483_v52 = vunpack.i.h.bf16 %v11053_v14 }
 0x181   : > { %v8488_v37 = vunpack.i.h.bf16 %v8486_v39  ;;  %v8487_v55 = vunpack.i.l.bf16 %v8486_v39  ;;  %v1540_v27 = vsel %vm14037_vm7, %v1522_v47, %v14036_v11  ;;  %v8498_v0 = vunpack.i.h.bf16 %v8496_v8  ;;  %v14053_v47 = vld [vmem:[#allocation61_spill] sm:$0xff] }
 0x182   : > { %v1541_v39 = vsel %vm14045_vm8, %v1523_v40, %v14044_v32  ;;  %vm14048_vm8 = vmmov %vm14042_vm2  ;;  %vm14051_vm10 = vcmask 121856   ;;  %v1488_v61 = vsel %vm14042_vm2, %v14053_v47, %v8483_v52 }
 0x183   : > { %v2142_v34 = vsel %vm13676_vm13, %v1682_v13, %v8487_v55  ;;  %v2143_v48 = vsel %vm13676_vm13, %v1683_v49, %v8488_v37  ;;  %v14047_v37 = vunpack.i.h.bf16 %v10111_v17  ;;  %v8497_v13 = vunpack.i.l.bf16 %v8496_v8 }
 0x184   : > { %v2157_v57 = vpack.c.bf16 %v2143_v48, %v2142_v34  ;;  %v1838_v20 = vpop.permute.xlu1 %1837  ;;  %v11098_v42 = vpop.permute.xlu0 %8500  ;;  %v1955_v49 = vsel %vm14048_vm8, %v1937_v3, %v8482_v6  ;;  %v13679_v34 = vunpack.i.h.bf16 %v10968_v26  ;;  %v14049_v48 = vld [vmem:[#allocation63_spill] sm:$0xff]  ;;  %v14054_v6 = vld [vmem:[#allocation64_spill] sm:$0xff]  ;;  %vm14057_vm8 = vcmask 171008  }
 0x185   : > { %14031 = vst [vmem:[#allocation22_spill] sm:$0xff] %v11098_v42  ;;  %v1558_v55 = vsel %vm1551_vm14, %v1540_v27, %v14047_v37  ;;  %v14050_v12 = vunpack.i.l.bf16 %v14049_v48  ;;  %v1973_v17 = vsel %vm14051_vm10, %v1955_v49, %v1838_v20  ;;  %v8503_v62 = vunpack.i.h.bf16 %v11098_v42  ;;  %v14059_v49 = vld [vmem:[#allocation59_spill] sm:$0xff] }
 0x186   : > { %7547 = vmatmul.mubr.msk.bf16.gmra.mxu0 %vm14032_vm11, %v2157_v57  ;;  %vm14041_vm11 = vcmask 1045504   ;;  %v13678_v8 = vunpack.i.l.bf16 %v11098_v42 }
 0x187   : > { %7550 = vmatprep.mubr.msk.bf16.mxu0 %vm14000_vm9, %v13861_v45  ;;  %v11119_v56 = vsel %vm14041_vm11, %v14040_v22, %v1007_v19  ;;  %vm14046_vm7 = vmmov %vm14041_vm11  ;;  %v1559_v14 = vsel %vm1551_vm14, %v1541_v39, %v14050_v12  ;;  %v14061_v12 = vld [vmem:[#allocation66_spill] sm:$0xff] }
 0x188   : > { %v1867_v10 = vpop.permute.xlu1 %1866  ;;  %v11127_v24 = vpop.permute.xlu0 %8510  ;;  %v11132_v15 = vsel %vm14046_vm7, %v1007_v19, %v1368_v30  ;;  %vm14052_vm11 = vmmov %vm14051_vm10  ;;  %v1576_v19 = vsel %vm1569_vm5, %v1558_v55, %v8492_v50  ;;  %v1577_v2 = vsel %vm1569_vm5, %v1559_v14, %v8493_v31  ;;  %v14062_v14 = vunpack.i.l.bf16 %v14061_v12 }
 0x189   : > { %v8512_v46 = vunpack.i.l.bf16 %v11127_v24  ;;  %v1972_v38 = vsel %vm14052_vm11, %v1954_v16, %v13680_v29  ;;  %v1991_v20 = vsel %vm1515_vm12, %v1973_v17, %v1867_v10  ;;  %v1594_v43 = vsel %vm1587_vm3, %v1576_v19, %v8497_v13  ;;  %vm14055_vm7 = vmmov %vm14042_vm2 }
 0x18a   : > { %v1595_v40 = vsel %vm1587_vm3, %v1577_v2, %v8498_v0  ;;  %v1990_v4 = vsel %vm1515_vm12, %v1972_v38, %v13679_v34  ;;  %vm14058_vm10 = vmmov %vm14057_vm8  ;;  %v1766_v0 = vrot.slane %v10746_v36, 5  ;;  %v1768_v13 = vrot.slane %v10753_v18, 5  ;;  %v8863_v34 = vld [vmem:[#allocation2 + $0x178] sm:$0xff]  }
 0x18b   : > { %v1489_v11 = vsel %vm14055_vm7, %v14054_v6, %v8512_v46  ;;  %v2008_v10 = vsel %vm14057_vm8, %v1990_v4, %v13678_v8  ;;  %v2009_v39 = vsel %vm14058_vm10, %v1991_v20, %v8503_v62  ;;  %v14060_v46 = vunpack.i.h.bf16 %v14059_v49  ;;  %vm14063_vm2 = vmmov %vm14052_vm11  ;;  %6902 = vmatprep.subr.bf16.mxu0 %v8863_v34 }
 0x18c   : > { %v8506_v1 = vpop.permute.xlu1 %8505  ;;  %v8521_v28 = vpop.permute.xlu0 %8520  ;;  %v1507_v17 = vsel %vm14063_vm2, %v1489_v11, %v14062_v14  ;;  %vm14066_vm7 = vcmask 1044480   ;;  %vm14069_vm10 = vcmask 1042432   ;;  %vm14077_vm2 = vcmask 171008  }
 0x18d   : > { %v8508_v63 = vunpack.i.h.bf16 %v8506_v1  ;;  %v8507_v57 = vunpack.i.l.bf16 %v8506_v1  ;;  %v8523_v3 = vunpack.i.h.bf16 %v8521_v28  ;;  %v8522_v22 = vunpack.i.l.bf16 %v8521_v28  ;;  %vm14067_vm8 = vmmov %vm14066_vm7 }
 0x18e   : > { %v1506_v1 = vsel %vm14052_vm11, %v1488_v61, %v14060_v46  ;;  %vm14074_vm11 = vmmov %vm14069_vm10 }
 0x18f   : > { %v1612_v52 = vsel %vm1605_vm0, %v1594_v43, %v8507_v57  ;;  %v1613_v37 = vsel %vm1605_vm0, %v1595_v40, %v8508_v63  ;;  %v14064_v40 = vld [vmem:[#allocation17_spill] sm:$0xff] }
 0x190   : > { %v11164_v27 = vpop.permute.xlu1 %8515  ;;  %v8531_v55 = vpop.permute.xlu0 %8530  ;;  %v1630_v57 = vsel %vm1623_vm6, %v1612_v52, %v8522_v22  ;;  %v1631_v28 = vsel %vm1623_vm6, %v1613_v37, %v8523_v3  ;;  %v14065_v4 = vrot.slane %v14064_v40, 3  ;;  %v8634_v3 = vpack.i.bf16 %v11132_v15, %v11119_v56  ;;  %v14070_v52 = vld [vmem:[#allocation60_spill] sm:$0xff] }
 0x191   : > { %14056 = vst [vmem:[#allocation26_spill] sm:$0xff] %v11164_v27  ;;  %v8518_v16 = vunpack.i.h.bf16 %v11164_v27  ;;  %v13677_v32 = vunpack.i.l.bf16 %v11164_v27  ;;  %v8533_v2 = vunpack.i.h.bf16 %v8531_v55  ;;  %v8532_v20 = vunpack.i.l.bf16 %v8531_v55 }
 0x192   : > { %v14068_v22 = vrot.slane %v10477_v51, 5  ;;  %v14071_v37 = vunpack.i.h.bf16 %v14070_v52  ;;  %v1856_v40 = vrot.slane %v10746_v36, 7 }
 0x193   : > { %v2026_v31 = vsel %vm1551_vm14, %v2008_v10, %v13677_v32  ;;  %v11178_v50 = vsel %vm1551_vm14, %v2009_v39, %v8518_v16  ;;  %v8799_v39 = vld [vmem:[#allocation2 + $0x78] sm:$0xff]  }
 0x194   : > { %v2072_v38 = vrot.slane %v2026_v31, 3  ;;  %v2074_v62 = vrot.slane %v11178_v50, 3  ;;  %v8526_v63 = vpop.permute.xlu1 %8525  ;;  %v8541_v43 = vpop.permute.xlu0 %8540  ;;  %v1767_v10 = vsel %vm14069_vm10, %v14068_v22, %v1766_v0  ;;  %v1524_v55 = vsel %vm1515_vm12, %v1506_v1, %v14071_v37  ;;  %v14072_v31 = vld [vmem:[#allocation65_spill] sm:$0xff]  ;;  %6810 = vmatprep.subr.bf16.mxu1 %v8799_v39 }
 0x195   : > { %v8528_v47 = vunpack.i.h.bf16 %v8526_v63  ;;  %v8527_v19 = vunpack.i.l.bf16 %v8526_v63  ;;  %v14073_v49 = vunpack.i.l.bf16 %v14072_v31  ;;  %v1262_v63 = vrot.slane %v10477_v51, 7 }
 0x196   : > { %v2073_v61 = vsel %vm14066_vm7, %v14065_v4, %v2072_v38  ;;  %v2075_v6 = vsel %vm14067_vm8, %v2072_v38, %v2074_v62  ;;  %v8543_v4 = vunpack.i.h.bf16 %v8541_v43  ;;  %v8542_v1 = vunpack.i.l.bf16 %v8541_v43  ;;  %vm14080_vm7 = vmmov %vm14077_vm2 }
 0x197   : > { %v1648_v11 = vsel %vm1641_vm1, %v1630_v57, %v8527_v19  ;;  %v1649_v16 = vsel %vm1641_vm1, %v1631_v28, %v8528_v47  ;;  %v1525_v46 = vsel %vm1515_vm12, %v1507_v17, %v14073_v49  ;;  %v8624_v38 = vpack.i.bf16 %v2075_v6, %v2073_v61  ;;  %v8800_v57 = vld [vmem:[#allocation2 + $0x38] sm:$0xff]   ;;  %v14078_v49 = vld [vmem:[#allocation68_spill] sm:$0xff] }
 0x198   : > { %v8536_v14 = vpop.permute.xlu1 %8535  ;;  %v1769_v19 = vsel %vm14074_vm11, %v1766_v0, %v1768_v13  ;;  %v1666_v22 = vsel %vm1659_vm15, %v1648_v11, %v8532_v20  ;;  %v1667_v17 = vsel %vm1659_vm15, %v1649_v16, %v8533_v2  ;;  %v8551_v52 = vpop.permute.xlu0 %8550  ;;  %6811 = vmatpush3.bf16.msra.mxu1 %v8800_v57  ;;  %v14076_v37 = vunpack.i.h.bf16 %v14043_v41 }
 0x199   : > { %v8538_v28 = vunpack.i.h.bf16 %v8536_v14  ;;  %v8537_v47 = vunpack.i.l.bf16 %v8536_v14  ;;  %8625 = vrot.lane.b32.xlu1 %v8624_v38, %s14075_s20  ;;  %v14079_v39 = vunpack.i.l.bf16 %v14078_v49  ;;  %v8801_v14 = vld [vmem:[#allocation2 + $0x70] sm:$0xff]   ;;  %v8644_v16 = vpack.i.bf16 %v1769_v19, %v1767_v10  ;;  %v14085_v19 = vld [vmem:[#allocation67_spill] sm:$0xff] }
 0x19a   : > { %v1542_v0 = vsel %vm14077_vm2, %v1524_v55, %v14076_v37  ;;  %v14081_v38 = vrot.slane %v13910_v44, 7  ;;  %vm14082_vm8 = vcmask 1040384   ;;  %6812 = vmatprep.subr.bf16.mxu1 %v8801_v14  ;;  %vm14087_vm11 = vcmask 613376  }
 0x19b   : > { %v1684_v61 = vsel %vm1677_vm4, %v1666_v22, %v8537_v47  ;;  %v1685_v6 = vsel %vm1677_vm4, %v1667_v17, %v8538_v28  ;;  %v1543_v43 = vsel %vm14080_vm7, %v1525_v46, %v14079_v39  ;;  %v8802_v28 = vld [vmem:[#allocation2 + $0x30] sm:$0xff]   ;;  %vm14083_vm10 = vmmov %vm14082_vm8  ;;  %v8553_v22 = vunpack.i.h.bf16 %v8551_v52 }
 0x19c   : > { %v8546_v20 = vpop.permute.xlu1 %8545  ;;  %v2144_v2 = vsel %vm13676_vm13, %v1684_v61, %v8542_v1  ;;  %v2145_v11 = vsel %vm13676_vm13, %v1685_v6, %v8543_v4  ;;  %v11231_v57 = vsel %vm14082_vm8, %v14081_v38, %v1262_v63  ;;  %v1857_v46 = vsel %vm14083_vm10, %v1262_v63, %v1856_v40  ;;  %v8561_v6 = vpop.permute.xlu0 %8560  ;;  %6813 = vmatpush3.bf16.msra.mxu1 %v8802_v28  ;;  %v8803_v63 = vld [vmem:[#allocation2 + $0x68] sm:$0xff]   ;;  %vm14092_vm10 = vmmov %vm14087_vm11 }
 0x19d   : > { %v8548_v41 = vunpack.i.h.bf16 %v8546_v20  ;;  %v8547_v47 = vunpack.i.l.bf16 %v8546_v20  ;;  %v2158_v55 = vpack.c.bf16 %v2145_v11, %v2144_v2  ;;  %v8552_v17 = vunpack.i.l.bf16 %v8551_v52  ;;  %8635 = vrot.lane.b32.xlu1 %v8634_v3, %s13895_s16  ;;  %6814 = vmatprep.subr.bf16.mxu1 %v8803_v63 }
 0x19e   : > { %v14084_v1 = vunpack.i.h.bf16 %v14049_v48  ;;  %v14086_v4 = vunpack.i.l.bf16 %v14085_v19  ;;  %v1370_v48 = vrot.slane %v10746_v36, 2  ;;  %v8654_v20 = vpack.i.bf16 %v1857_v46, %v11231_v57 }
 0x19f   : > { %7551 = vmatmul.mubr.msk.bf16.gmra.mxu0 %vm14087_vm11, %v2158_v55  ;;  %v1372_v3 = vrot.slane %v10753_v18, 2  ;;  %v8563_v2 = vunpack.i.h.bf16 %v8561_v6  ;;  %v8562_v11 = vunpack.i.l.bf16 %v8561_v6  ;;  %vm14088_vm2 = vcmask 1045504  }
 0x1a0   : > { %v1560_v10 = vsel %vm1551_vm14, %v1542_v0, %v14084_v1  ;;  %v1561_v61 = vsel %vm1551_vm14, %v1543_v43, %v14086_v4  ;;  %v8556_v52 = vpop.permute.xlu1 %8555  ;;  %7554 = vmatprep.mubr.msk.bf16.mxu0 %vm14000_vm9, %v13861_v45  ;;  %v8804_v0 = vld [vmem:[#allocation2 + $0x28] sm:$0xff]   ;;  %v8805_v1 = vld [vmem:[#allocation2 + $0x60] sm:$0xff]   ;;  %v11259_v46 = vsel %vm14088_vm2, %v1368_v30, %v1370_v48  ;;  %vm14089_vm7 = vmmov %vm14088_vm2  ;;  %vm14090_vm8 = vcmask 1042432  }
 0x1a1   : > { %v1578_v37 = vsel %vm1569_vm5, %v1560_v10, %v8547_v47  ;;  %v1579_v39 = vsel %vm1569_vm5, %v1561_v61, %v8548_v41  ;;  %v8558_v14 = vunpack.i.h.bf16 %v8556_v52  ;;  %v8557_v43 = vunpack.i.l.bf16 %v8556_v52  ;;  %v8571_v41 = vpop.permute.xlu0 %8570  ;;  %8645 = vrot.lane.b32.xlu1 %v8644_v16, %s13974_s8  ;;  %6815 = vmatpush3.bf16.msra.mxu1 %v8804_v0  ;;  %v8806_v4 = vld [vmem:[#allocation2 + $0x20] sm:$0xff]  }
 0x1a2   : > { %v1596_v38 = vsel %vm1587_vm3, %v1578_v37, %v8552_v17  ;;  %v1597_v28 = vsel %vm1587_vm3, %v1579_v39, %v8553_v22  ;;  %v11264_v16 = vsel %vm14089_vm7, %v1370_v48, %v1372_v3  ;;  %v1770_v22 = vrot.slane %v10865_v7, 5  ;;  %6816 = vmatprep.subr.bf16.mxu1 %v8805_v1 }
 0x1a3   : > { %v1614_v47 = vsel %vm1605_vm0, %v1596_v38, %v8557_v43  ;;  %v1615_v55 = vsel %vm1605_vm0, %v1597_v28, %v8558_v14  ;;  %v8573_v6 = vunpack.i.h.bf16 %v8571_v41  ;;  %v8572_v37 = vunpack.i.l.bf16 %v8571_v41  ;;  %v8807_v14 = vld [vmem:[#allocation2 + $0x58] sm:$0xff]   ;;  %v331_v38 = vld [vmem:[%s9283_s19 + $0x60] sm:$0x3]  ;;  %s14102_s19 = smov 39  }
 0x1a4   : > { %v8566_v10 = vpop.permute.xlu1 %8565  ;;  %v1632_v39 = vsel %vm1623_vm6, %v1614_v47, %v8562_v11  ;;  %v1633_v63 = vsel %vm1623_vm6, %v1615_v55, %v8563_v2  ;;  %v8674_v43 = vpack.i.bf16 %v11264_v16, %v11259_v46  ;;  %v8808_v28 = vld [vmem:[#allocation2 + $0x18] sm:$0xff]   ;;  %v1858_v2 = vrot.slane %v10753_v18, 7 }
 0x1a5   : > { %v8568_v61 = vunpack.i.h.bf16 %v8566_v10  ;;  %v8567_v17 = vunpack.i.l.bf16 %v8566_v10  ;;  %8655 = vrot.lane.b32.xlu1 %v8654_v20, %s13881_s13  ;;  %6817 = vmatpush3.bf16.msra.mxu1 %v8806_v4  ;;  %v8581_v0 = vpop.permute.xlu0 %8580  ;;  %v1771_v20 = vsel %vm14090_vm8, %v1768_v13, %v1770_v22  ;;  %v11288_v13 = vunpack.c.l.bf16 %v331_v38 }
 0x1a6   : > { %6818 = vmatprep.subr.bf16.mxu1 %v8807_v14  ;;  %v8583_v11 = vunpack.i.h.bf16 %v8581_v0  ;;  %v8582_v47 = vunpack.i.l.bf16 %v8581_v0  ;;  %vm14093_vm11 = vcmask 1040384   ;;  %vm14095_vm7 = vcmask 1046528  }
 0x1a7   : > { %v1650_v30 = vsel %vm1641_vm1, %v1632_v39, %v8567_v17  ;;  %v1651_v52 = vsel %vm1641_vm1, %v1633_v63, %v8568_v61  ;;  %v1860_v17 = vrot.slane %v10865_v7, 7  ;;  %v8809_v39 = vld [vmem:[#allocation2 + $0x50] sm:$0xff]   ;;  %vm14094_vm2 = vmmov %vm14093_vm11  ;;  %v1905_v38 = vrot.slane %v11288_v13, 1 }
 0x1a8   : > { %v8576_v48 = vpop.permute.xlu1 %8575  ;;  %v1668_v55 = vsel %vm1659_vm15, %v1650_v30, %v8572_v37  ;;  %v1669_v10 = vsel %vm1659_vm15, %v1651_v52, %v8573_v6  ;;  %v8810_v37 = vld [vmem:[#allocation2 + $0x10] sm:$0xff]   ;;  %v1859_v52 = vsel %vm14093_vm11, %v1856_v40, %v1858_v2  ;;  %vm14096_vm8 = vmmov %vm14095_vm7  ;;  %vm14110_vm11 = vcmask 1043456  }
 0x1a9   : > { %v8578_v41 = vunpack.i.h.bf16 %v8576_v48  ;;  %v8577_v1 = vunpack.i.l.bf16 %v8576_v48  ;;  %8665 = vrot.lane.b32.xlu1 %v10844_v53, %s13939_s23  ;;  %6819 = vmatpush3.bf16.msra.mxu1 %v8808_v28  ;;  %v14091_v53 = vld [vmem:[#allocation12_spill] sm:$0xff]  ;;  %v1861_v14 = vsel %vm14094_vm2, %v1858_v2, %v1860_v17  ;;  %v1903_v48 = vrot.slane %v10865_v7, 1  ;;  %v8814_v2 = vld [vmem:[#allocation2] sm:$0xff]   ;;  %vm14111_vm2 = vmmov %vm14110_vm11 }
 0x1aa   : > { %6820 = vmatprep.subr.bf16.mxu1 %v8809_v39  ;;  %v8684_v6 = vpack.i.bf16 %v14091_v53, %v1771_v20  ;;  %v8811_v28 = vld [vmem:[#allocation2 + $0x48] sm:$0xff]   ;;  %v8813_v20 = vld [vmem:[#allocation2 + $0x40] sm:$0xff]  }
 0x1ab   : > { %v1686_v4 = vsel %vm1677_vm4, %v1668_v55, %v8577_v1  ;;  %v1687_v61 = vsel %vm1677_vm4, %v1669_v10, %v8578_v41  ;;  %v8694_v41 = vpack.i.bf16 %v1861_v14, %v1859_v52  ;;  %v1904_v40 = vsel %vm14095_vm7, %v10777_v21, %v1903_v48  ;;  %v14098_v55 = vld [vmem:[#allocation51_spill] sm:$0xff] }
 0x1ac   : > { %v2146_v63 = vsel %vm13676_vm13, %v1686_v4, %v8582_v47  ;;  %v2147_v0 = vsel %vm13676_vm13, %v1687_v61, %v8583_v11  ;;  %v1906_v1 = vsel %vm14096_vm8, %v1903_v48, %v1905_v38  ;;  %v14097_v47 = vld [vmem:[#allocation45_spill] sm:$0xff]  ;;  %v14099_v4 = vld [vmem:[#allocation38_spill] sm:$0xff]  ;;  %v14108_v52 = vrot.slane %v10753_v18, 3 }
 0x1ad   : > { %v2159_v30 = vpack.c.bf16 %v2147_v0, %v2146_v63  ;;  %8675 = vrot.lane.b32.xlu1 %v8674_v43, %s13895_s16  ;;  %6821 = vmatpush3.bf16.msra.mxu1 %v8810_v37  ;;  %v8812_v43 = vld [vmem:[#allocation2 + $0x8] sm:$0xff]   ;;  %v8704_v11 = vpack.i.bf16 %v1906_v1, %v1904_v40  ;;  %v8709_v10 = vpack.i.bf16 %v14098_v55, %v14097_v47  ;;  %v14100_v61 = vld [vmem:[#allocation37_spill] sm:$0xff]  ;;  %v1061_v48 = vrot.slane %v14039_v59, 4 }
 0x1ae   : > { %6822 = vmatprep.subr.bf16.mxu1 %v8811_v28  ;;  %v14101_v39 = vpack.i.bf16 %v14099_v4, %v14100_v61  ;;  %v14103_v63 = vld [vmem:[#allocation41_spill] sm:$0xff]  ;;  %v14104_v0 = vld [vmem:[#allocation40_spill] sm:$0xff]  ;;  %v1063_v28 = vrot.slane %v13910_v44, 4  ;;  %v14113_v40 = vld [vmem:[#allocation27_spill] sm:$0xff]  ;;  %vm14118_vm7 = vcmask 97280   ;;  %vm14121_vm8 = vcmask 121856  }
 0x1af   : > { %7555 = vmatmul.mubr.msk.bf16.gmra.mxu0 %vm14092_vm10, %v2159_v30  ;;  %v14105_v37 = vpack.i.bf16 %v14103_v63, %v14104_v0  ;;  %v14106_v30 = vld [vmem:[#allocation75_spill] sm:$0xff]  ;;  %vm14109_vm10 = vcmask 1041408   ;;  %v14119_v61 = vld [vmem:[#allocation70_spill] sm:$0xff]  ;;  %v14122_v0 = vld [vmem:[#allocation73_spill] sm:$0xff] }
 0x1b0   : > { %7558 = vmatprep.mubr.msk.bf16.mxu0 %vm14000_vm9, %v13861_v45  ;;  %v8739_v53 = vpack.i.bf16 %v11119_v56, %v14106_v30  ;;  %v14124_v30 = vld [vmem:[#allocation69_spill] sm:$0xff] }
 0x1b1   : > { %8685 = vrot.lane.b32.xlu1 %v8684_v6, %s13974_s8  ;;  %6823 = vmatpush3.bf16.msra.mxu1 %v8812_v43  ;;  %v1833_v6 = vrot.slane %v11288_v13, 6  ;;  %v1064_v43 = vsel %vm14111_vm2, %v1061_v48, %v1063_v28  ;;  %vm14130_vm2 = vcmask 171008  }
 0x1b2   : > { %6824 = vmatprep.subr.bf16.mxu1 %v8813_v20  ;;  %v8591_v20 = vpop.permute.xlu0 %8590 }
 0x1b3   : > { %v1834_v14 = vsel %vm14109_vm10, %v1831_v58, %v1833_v6  ;;  %vm14123_vm10 = vmmov %vm14118_vm7 }
 0x1b5   : > { %8695 = vrot.lane.b32.xlu1 %v8694_v41, %s13881_s13  ;;  %6825 = vmatpush3.bf16.msra.mxu1 %v8814_v2  ;;  %v14112_v41 = vld [vmem:[#allocation53_spill] sm:$0xff]  ;;  %v11353_v2 = vpop.permute.xlu1 %8585 }
 0x1b6   : > { %v8769_v1 = vpack.i.bf16 %v14113_v40, %v14112_v41  ;;  %v8601_v47 = vpop.permute.xlu0 %8600  ;;  %v8593_v41 = vunpack.i.h.bf16 %v8591_v20  ;;  %v14131_v40 = vunpack.i.h.bf16 %v14072_v31  ;;  %v14136_v31 = vunpack.i.h.bf16 %v14085_v19 }
 0x1b9   : > { %8705 = vrot.lane.b32.xlu1 %v8704_v11, %s13939_s23  ;;  %v8587_v11 = vunpack.i.l.bf16 %v11353_v2 }
 0x1ba   : > { %v8611_v4 = vpop.permute.xlu0 %8610 }
 0x1bd   : > { %8710 = vrot.lane.b32.xlu1 %v8709_v10, %s9137_s17  ;;  %v8513_v10 = vunpack.i.h.bf16 %v11127_v24 }
 0x1c1   : > { %8720 = vrot.lane.b32.xlu1 %v14101_v39, %s13930_s9  ;;  %v14120_v39 = vunpack.i.l.bf16 %v14119_v61 }
 0x1c5   : > { %8730 = vrot.lane.b32.xlu1 %v14105_v37, %s14102_s19  ;;  %v1490_v37 = vsel %vm14123_vm10, %v14122_v0, %v8513_v10 }
 0x1c9   : > { %8740 = vrot.lane.b32.xlu1 %v8739_v53, %s14107_s15  ;;  %v14125_v53 = vunpack.i.l.bf16 %v14124_v30 }
 0x1cd   : > { %1711 = vrot.lane.b32.xlu1 %v10777_v21, %s13891_s14  ;;  %v1062_v21 = vsel %vm14110_vm11, %v670_v25, %v1061_v48  ;;  %s14115_s14 = smov 42   ;;  %v8815_v25 = vld [vmem:[#allocation2 + $0xf8] sm:$0xff]   ;;  %vm14127_vm11 = vmmov %vm14121_vm8 }
 0x1ce   : > { %v8759_v58 = vpack.i.bf16 %v1064_v43, %v1062_v21  ;;  %6856 = vmatprep.subr.bf16.mxu1 %v8815_v25  ;;  %v8596_v21 = vpop.permute.xlu1 %8595  ;;  %v14128_v43 = vld [vmem:[#allocation74_spill] sm:$0xff] }
 0x1cf   : > { %v14129_v24 = vunpack.i.l.bf16 %v14128_v43 }
 0x1d1   : > { %1757 = vrot.lane.b32.xlu1 %v14108_v52, %s13898_s22  ;;  %s14114_s22 = smov 30   ;;  %v8621_v52 = vpop.permute.xlu0 %8620 }
 0x1d2   : > { %v8606_v0 = vpop.permute.xlu1 %8605 }
 0x1d5   : > { %1847 = vrot.lane.b32.xlu1 %v1834_v14, %s13991_s21  ;;  %v14126_v14 = vunpack.i.h.bf16 %v14061_v12  ;;  %v14134_v12 = vunpack.i.h.bf16 %v14078_v49  ;;  %v8608_v49 = vunpack.i.h.bf16 %v8606_v0 }
 0x1d7   : > { %v1508_v48 = vsel %vm14127_vm11, %v1490_v37, %v14126_v14  ;;  %v8597_v37 = vunpack.i.l.bf16 %v8596_v21  ;;  %vm14139_vm11 = vcmask 613376  }
 0x1d9   : > { %1895 = vrot.lane.b32.xlu1 %v11288_v13, %s13992_s18 }
 0x1dd   : > { %702 = vrot.lane.b32.xlu1 %v10981_v9, %s13974_s8  ;;  %v14117_v9 = vld [vmem:[#allocation71_spill] sm:$0xff] }
 0x1de   : > { %v1491_v55 = vsel %vm14118_vm7, %v14117_v9, %v8587_v11  ;;  %v8598_v9 = vunpack.i.h.bf16 %v8596_v21  ;;  %vm14135_vm7 = vmmov %vm14130_vm2  ;;  %v8612_v21 = vunpack.i.l.bf16 %v8611_v4 }
 0x1df   : > { %v1509_v63 = vsel %vm14121_vm8, %v1491_v55, %v14120_v39  ;;  %v8631_v55 = vpop.permute.xlu0 %8630  ;;  %v8592_v39 = vunpack.i.l.bf16 %v8591_v20  ;;  %vm14137_vm8 = vcmask 23552  }
 0x1e0   : > { %v1527_v6 = vsel %vm1515_vm12, %v1509_v63, %v14125_v53  ;;  %v8603_v53 = vunpack.i.h.bf16 %v8601_v47  ;;  %vm14138_vm10 = vmmov %vm14137_vm8 }
 0x1e1   : > { %8760 = vrot.lane.b32.xlu1 %v8759_v58, %s14114_s22  ;;  %v1545_v58 = vsel %vm14130_vm2, %v1527_v6, %v14129_v24  ;;  %v8602_v24 = vunpack.i.l.bf16 %v8601_v47  ;;  %v8623_v47 = vunpack.i.h.bf16 %v8621_v52  ;;  %vm14140_vm2 = vcmask 48128  }
 0x1e5   : > { %8770 = vrot.lane.b32.xlu1 %v8769_v1, %s13935_s29  ;;  %v1526_v1 = vsel %vm1515_vm12, %v1508_v48, %v14131_v40  ;;  %v8607_v40 = vunpack.i.l.bf16 %v8606_v0 }
 0x1e6   : > { %v1544_v10 = vsel %vm14135_vm7, %v1526_v1, %v14134_v12  ;;  %v8641_v1 = vpop.permute.xlu0 %8640  ;;  %vm14141_vm7 = vmmov %vm14140_vm2 }
 0x1e7   : > { %v1562_v6 = vsel %vm1551_vm14, %v1544_v10, %v14136_v31 }
 0x1e8   : > { %v1580_v48 = vsel %vm1569_vm5, %v1562_v6, %v8592_v39  ;;  %v8632_v6 = vunpack.i.l.bf16 %v8631_v55 }
 0x1e9   : > { %8780 = vrot.lane.b32.xlu1 %v14116_v33, %s14115_s14  ;;  %v14132_v33 = vld [vmem:[#allocation72_spill] sm:$0xff] }
 0x1ea   : > { %v14133_v25 = vunpack.i.l.bf16 %v14132_v33  ;;  %v8651_v39 = vpop.permute.xlu0 %8650 }
 0x1ec   : > { %v1563_v11 = vsel %vm1551_vm14, %v1545_v58, %v14133_v25  ;;  %v1598_v58 = vsel %vm1587_vm3, %v1580_v48, %v8597_v37  ;;  %v8613_v25 = vunpack.i.h.bf16 %v8611_v4  ;;  %v8633_v4 = vunpack.i.h.bf16 %v8631_v55 }
 0x1ed   : > { %v1581_v63 = vsel %vm1569_vm5, %v1563_v11, %v8593_v41  ;;  %v8616_v41 = vpop.permute.xlu1 %8615  ;;  %v1616_v11 = vsel %vm1605_vm0, %v1598_v58, %v8602_v24 }
 0x1ee   : > { %v1599_v14 = vsel %vm1587_vm3, %v1581_v63, %v8598_v9  ;;  %v1634_v19 = vsel %vm1623_vm6, %v1616_v11, %v8607_v40  ;;  %v8618_v9 = vunpack.i.h.bf16 %v8616_v41  ;;  %v8617_v10 = vunpack.i.l.bf16 %v8616_v41  ;;  %v8661_v40 = vpop.permute.xlu0 %8660 }
 0x1ef   : > { %v1617_v20 = vsel %vm1605_vm0, %v1599_v14, %v8603_v53  ;;  %v8622_v63 = vunpack.i.l.bf16 %v8621_v52  ;;  %v1652_v37 = vsel %vm1641_vm1, %v1634_v19, %v8612_v21  ;;  %v1927_v41 = vsel %vm14137_vm8, %v13910_v44, %v8633_v4 }
 0x1f0   : > { %v1635_v12 = vsel %vm1623_vm6, %v1617_v20, %v8608_v49  ;;  %v1670_v53 = vsel %vm1659_vm15, %v1652_v37, %v8617_v10  ;;  %v8642_v21 = vunpack.i.l.bf16 %v8641_v1  ;;  %v8652_v4 = vunpack.i.l.bf16 %v8651_v39 }
 0x1f1   : > { %v1653_v0 = vsel %vm1641_vm1, %v1635_v12, %v8613_v25  ;;  %v1688_v58 = vsel %vm1677_vm4, %v1670_v53, %v8622_v63  ;;  %v1926_v25 = vsel %vm14138_vm10, %v14039_v59, %v8632_v6  ;;  %v8588_v59 = vunpack.i.h.bf16 %v11353_v2 }
 0x1f2   : > { %v1671_v31 = vsel %vm1659_vm15, %v1653_v0, %v8618_v9  ;;  %v8643_v9 = vunpack.i.h.bf16 %v8641_v1  ;;  %v8671_v0 = vpop.permute.xlu0 %8670  ;;  %v11420_v1 = vld [vmem:[%s13465_s2] ss:$0 sm:$0xff]  ;;  %vm14144_vm10 = vcmask 97280  }
 0x1f3   : > { %v1689_v49 = vsel %vm1677_vm4, %v1671_v31, %v8623_v47  ;;  %v8653_v31 = vunpack.i.h.bf16 %v8651_v39 }
 0x20b   : > { %v8626_v14 = vpop.permute.xlu1 %8625 }
 0x20c   : > { %v8628_v48 = vunpack.i.h.bf16 %v8626_v14  ;;  %v8627_v24 = vunpack.i.l.bf16 %v8626_v14 }
 0x20e   : > { %v2148_v52 = vsel %vm13676_vm13, %v1688_v58, %v8627_v24  ;;  %v2149_v20 = vsel %vm13676_vm13, %v1689_v49, %v8628_v48  ;;  %vm14142_vm13 = vcmask 72704  }
 0x20f   : > { %v2160_v55 = vpack.c.bf16 %v2149_v20, %v2148_v52  ;;  %v8636_v11 = vpop.permute.xlu1 %8635  ;;  %vm14143_vm8 = vmmov %vm14142_vm13  ;;  %v8663_v52 = vunpack.i.h.bf16 %v8661_v40 }
 0x210   : > { %v8638_v19 = vunpack.i.h.bf16 %v8636_v11  ;;  %v8637_v12 = vunpack.i.l.bf16 %v8636_v11 }
 0x211   : > { %7559 = vmatmul.mubr.msk.bf16.gmra.mxu0 %vm14139_vm11, %v2160_v55  ;;  %vm14146_vm11 = vcmask 121856  }
 0x212   : > { %v1932_v10 = vsel %vm14140_vm2, %v1926_v25, %v8637_v12  ;;  %v1933_v47 = vsel %vm14141_vm7, %v1927_v41, %v8638_v19  ;;  %7562 = vmatprep.mubr.msk.bf16.mxu0 %vm14000_vm9, %v13861_v45  ;;  %v8662_v25 = vunpack.i.l.bf16 %v8661_v40  ;;  %vm14147_vm2 = vmmov %vm14146_vm11  ;;  %v8672_v19 = vunpack.i.l.bf16 %v8671_v0  ;;  %v8681_v12 = vpop.permute.xlu0 %8680 }
 0x213   : > { %v1938_v63 = vsel %vm14142_vm13, %v1932_v10, %v8642_v21  ;;  %v11413_v37 = vpop.permute.xlu1 %8645  ;;  %v1939_v6 = vsel %vm14143_vm8, %v1933_v47, %v8643_v9  ;;  %vm14145_vm13 = vmmov %vm14144_vm10  ;;  %v8673_v21 = vunpack.i.h.bf16 %v8671_v0  ;;  %vm14148_vm7 = vcmask 23552  }
 0x214   : > { %v8647_v53 = vunpack.i.l.bf16 %v11413_v37  ;;  %v1956_v24 = vsel %vm14145_vm13, %v1938_v63, %v8588_v59  ;;  %vm14149_vm8 = vcmask 171008   ;;  %vm14151_vm13 = vmmov %vm14148_vm7 }
 0x215   : > { %v1974_v55 = vsel %vm14146_vm11, %v1956_v24, %v8652_v4  ;;  %v1929_v4 = vsel %vm14148_vm7, %v10746_v36, %v8673_v21  ;;  %v8683_v24 = vunpack.i.h.bf16 %v8681_v12  ;;  %vm14152_vm11 = vcmask 1044480  }
 0x216   : > { %v2277_v14 = vpop.f32.mrf.mxu0  ;;  %v1957_v48 = vsel %vm14144_vm10, %v1939_v6, %v8647_v53  ;;  %vm14150_vm10 = vmmov %vm14149_vm8  ;;  %vm14154_vm7 = vcmask 48128  }
 0x217   : > { %v2278_v58 = vadd.f32 %v11420_v1, %v2277_v14  ;;  %v8656_v2 = vpop.permute.xlu1 %8655  ;;  %v1975_v39 = vsel %vm14147_vm2, %v1957_v48, %v8653_v31  ;;  %v1928_v48 = vsel %vm14151_vm13, %v10477_v51, %v8672_v19  ;;  %vm14153_vm2 = vmmov %vm14152_vm11  ;;  %vm14157_vm13 = vcmask 72704  }
 0x218   : > { %v7540_v49 = vpop.f32.mrf.mxu0  ;;  %v8658_v20 = vunpack.i.h.bf16 %v8656_v2  ;;  %v8657_v41 = vunpack.i.l.bf16 %v8656_v2 }
 0x219   : > { %v11430_v47 = vmax.f32 %v2278_v58, 0.0  ;;  %v8682_v49 = vunpack.i.l.bf16 %v8681_v12 }
 0x21a   : > { %v2280_v11 = vpop.f32.mrf.mxu0  ;;  %v1992_v9 = vsel %vm1515_vm12, %v1974_v55, %v8657_v41  ;;  %v1993_v10 = vsel %vm1515_vm12, %v1975_v39, %v8658_v20  ;;  %v8691_v55 = vpop.permute.xlu0 %8690 }
 0x21b   : > { %v2281_v63 = vadd.f32 %v11420_v1, %v2280_v11  ;;  %v8666_v59 = vpop.permute.xlu1 %8665  ;;  %v2010_v0 = vsel %vm14149_vm8, %v1992_v9, %v8662_v25  ;;  %v2011_v31 = vsel %vm14150_vm10, %v1993_v10, %v8663_v52  ;;  %v2432_v21 = vrot.slane %v11430_v47, 3  ;;  %vm14155_vm8 = vmmov %vm14154_vm7 }
 0x21c   : > { %v7541_v53 = vpop.f32.mrf.mxu0  ;;  %v8668_v6 = vunpack.i.h.bf16 %v8666_v59  ;;  %v8667_v40 = vunpack.i.l.bf16 %v8666_v59  ;;  %v2403_v19 = vrot.slane %v11430_v47, 2  ;;  %vm14156_vm10 = vmmov %vm14153_vm2 }
 0x21d   : > { %v11435_v14 = vmax.f32 %v2281_v63, 0.0 }
 0x21e   : > { %v2028_v58 = vsel %vm1551_vm14, %v2010_v0, %v8667_v40  ;;  %v11443_v2 = vsel %vm1551_vm14, %v2011_v31, %v8668_v6  ;;  %v8693_v6 = vunpack.i.h.bf16 %v8691_v55  ;;  %v2461_v31 = vrot.slane %v11430_v47, 4 }
 0x21f   : > { %v2076_v20 = vrot.slane %v2028_v58, 3  ;;  %v2078_v41 = vrot.slane %v11443_v2, 3  ;;  %v8676_v36 = vpop.permute.xlu1 %8675  ;;  %v2433_v52 = vrot.slane %v11435_v14, 3  ;;  %v2404_v11 = vrot.slane %v11435_v14, 2 }
 0x220   : > { %v8678_v25 = vunpack.i.h.bf16 %v8676_v36  ;;  %v8677_v39 = vunpack.i.l.bf16 %v8676_v36  ;;  %v2462_v58 = vrot.slane %v11435_v14, 4  ;;  %v2873_v2 = vpack.c.bf16 %v11435_v14, %v11430_v47 }
 0x221   : > { %v2077_v9 = vsel %vm14152_vm11, %v2074_v62, %v2076_v20  ;;  %v2079_v12 = vsel %vm14153_vm2, %v2076_v20, %v2078_v41  ;;  %v11461_v53 = vsel %vm14156_vm10, %v2432_v21, %v2433_v52  ;;  %vm14158_vm11 = vmmov %vm14157_vm13  ;;  %vm14159_vm2 = vcmask 1045504   ;;  %v8701_v20 = vpop.permute.xlu0 %8700 }
 0x222   : > { %v1934_v10 = vsel %vm14154_vm7, %v1928_v48, %v8677_v39  ;;  %v1935_v63 = vsel %vm14155_vm8, %v1929_v4, %v8678_v25  ;;  %v8744_v59 = vpack.i.bf16 %v2079_v12, %v2077_v9  ;;  %v11470_v0 = vsel %vm14159_vm2, %v2403_v19, %v2404_v11 }
 0x223   : > { %v1940_v40 = vsel %vm14157_vm13, %v1934_v10, %v8682_v49  ;;  %v11464_v50 = vpop.permute.xlu1 %8685  ;;  %v1941_v62 = vsel %vm14158_vm11, %v1935_v63, %v8683_v24  ;;  %v8648_v4 = vunpack.i.h.bf16 %v11413_v37  ;;  %v8692_v49 = vunpack.i.l.bf16 %v8691_v55  ;;  %v14165_v55 = vld [vmem:[#allocation16_spill] sm:$0xff] }
 0x224   : > { %v8687_v48 = vunpack.i.l.bf16 %v11464_v50  ;;  %8745 = vrot.lane.b32.xlu0 %v8744_v59, %s14075_s20  ;;  %vm14160_vm7 = vcmask 97280   ;;  %vm14162_vm10 = vcmask 1043456   ;;  %v8703_v37 = vunpack.i.h.bf16 %v8701_v20 }
 0x225   : > { %vm14161_vm8 = vmmov %vm14160_vm7  ;;  %v11482_v21 = vsel %vm14162_vm10, %v2461_v31, %v2462_v58  ;;  %vm14164_vm13 = vcmask 121856   ;;  %v8749_v12 = vpack.i.bf16 %v14165_v55, %v1770_v22  ;;  %v8702_v10 = vunpack.i.l.bf16 %v8701_v20 }
 0x226   : > { %v1959_v36 = vsel %vm14160_vm7, %v1941_v62, %v8687_v48  ;;  %v1958_v24 = vsel %vm14161_vm8, %v1940_v40, %v8648_v4  ;;  %14163 = vst [vmem:[#allocation25_spill] sm:$0xff] %v11482_v21  ;;  %vm14166_vm11 = vmmov %vm14164_vm13  ;;  %v1862_v59 = vrot.slane %v11288_v13, 7  ;;  %vm14167_vm2 = vcmask 171008  }
 0x227   : > { %v8696_v25 = vpop.permute.xlu1 %8695  ;;  %v1977_v39 = vsel %vm14164_vm13, %v1959_v36, %v8693_v6  ;;  %v1976_v63 = vsel %vm14166_vm11, %v1958_v24, %v8692_v49  ;;  %vm14168_vm7 = vmmov %vm14167_vm2  ;;  %vm14169_vm8 = vcmask 1040384   ;;  %vm14170_vm10 = vcmask 1044480  }
 0x228   : > { %v8698_v19 = vunpack.i.h.bf16 %v8696_v25  ;;  %v8697_v9 = vunpack.i.l.bf16 %v8696_v25  ;;  %1729 = vrot.lane.b32.xlu0 %v1372_v3, %s13895_s16  ;;  %v1863_v24 = vsel %vm14169_vm8, %v1860_v17, %v1862_v59  ;;  %v2375_v25 = vrot.slane %v11435_v14, 1  ;;  %vm14171_vm13 = vmmov %vm14170_vm10 }
 0x229   : > { %vm14172_vm11 = vcmask 1046528   ;;  %vm14175_vm8 = vcmask 1045504  }
 0x22a   : > { %v1994_v40 = vsel %vm1515_vm12, %v1976_v63, %v8697_v9  ;;  %v1995_v62 = vsel %vm1515_vm12, %v1977_v39, %v8698_v19  ;;  %v2374_v9 = vrot.slane %v11430_v47, 1 }
 0x22b   : > { %v2285_v6 = vpop.f32.mrf.mxu0  ;;  %v8706_v31 = vpop.permute.xlu1 %8705  ;;  %v2013_v48 = vsel %vm14167_vm2, %v1995_v62, %v8703_v37  ;;  %v2012_v49 = vsel %vm14168_vm7, %v1994_v40, %v8702_v10  ;;  %vm14173_vm2 = vmmov %vm14172_vm11 }
 0x22c   : > { %v2286_v4 = vadd.f32 %v11420_v1, %v2285_v6  ;;  %v8708_v3 = vunpack.i.h.bf16 %v8706_v31  ;;  %v8707_v36 = vunpack.i.l.bf16 %v8706_v31  ;;  %8750 = vrot.lane.b32.xlu0 %v8749_v12, %s13974_s8  ;;  %v2376_v6 = vsel %vm14172_vm11, %v2374_v9, %v2375_v25  ;;  %vm14174_vm7 = vmmov %vm14170_vm10 }
 0x22d   : > { %v7544_v22 = vpop.f32.mrf.mxu0 }
 0x22e   : > { %v11498_v20 = vmax.f32 %v2286_v4, 0.0  ;;  %v2030_v39 = vsel %vm1551_vm14, %v2012_v49, %v8707_v36  ;;  %v11507_v19 = vsel %vm1551_vm14, %v2013_v48, %v8708_v3  ;;  %v8816_v36 = vld [vmem:[#allocation2 + $0xb8] sm:$0xff]   ;;  %v8817_v49 = vld [vmem:[#allocation2 + $0xf0] sm:$0xff]  }
 0x22f   : > { %v2288_v37 = vpop.f32.mrf.mxu0  ;;  %v2080_v55 = vrot.slane %v2030_v39, 3  ;;  %v13681_v12 = vrot.slane %v11507_v19, 3  ;;  %v14176_v39 = vld [vmem:[#allocation76_spill] sm:$0xff] }
 0x230   : > { %v2289_v63 = vadd.f32 %v11420_v1, %v2288_v37  ;;  %v2377_v10 = vrot.slane %v11498_v20, 1  ;;  %1876 = vrot.lane.b32.xlu0 %v1863_v24, %s13881_s13  ;;  %v13683_v17 = vrot.slane %v11498_v20, 3  ;;  %v2406_v59 = vrot.slane %v11498_v20, 2  ;;  %s299_s13 = sand.u32 1, %s9113_s25  }
 0x231   : > { %v7545_v7 = vpop.f32.mrf.mxu0  ;;  %v2081_v40 = vsel %vm14170_vm10, %v2078_v41, %v2080_v55  ;;  %v2083_v62 = vsel %vm14171_vm13, %v2080_v55, %v13681_v12  ;;  %v2523_v24 = vrot.slane %v11435_v14, 7  ;;  %vm14177_vm10 = vmmov %vm14175_vm8  ;;  %vm14178_vm13 = vcmask 1040384   ;;  %v8819_v55 = vld [vmem:[#allocation2 + $0xe8] sm:$0xff]  }
 0x232   : > { %v2378_v4 = vsel %vm14173_vm2, %v2375_v25, %v2377_v10  ;;  %v11526_v31 = vmax.f32 %v2289_v63, 0.0  ;;  %v8789_v48 = vpack.i.bf16 %v2083_v62, %v2081_v40  ;;  %v11539_v41 = vsel %vm14174_vm7, %v2433_v52, %v13683_v17  ;;  %v8818_v25 = vld [vmem:[#allocation2 + $0xb0] sm:$0xff]   ;;  %vm14180_vm11 = vmmov %vm14178_vm13 }
 0x233   : > { %v2874_v3 = vpack.c.bf16 %v2378_v4, %v2376_v6  ;;  %v11544_v22 = vsel %vm14175_vm8, %v2404_v11, %v2406_v59  ;;  %v2524_v52 = vrot.slane %v11498_v20, 7  ;;  %v2492_v40 = vrot.slane %v11435_v14, 6  ;;  %v8820_v6 = vld [vmem:[#allocation2 + $0xa8] sm:$0xff]   ;;  %v8823_v14 = vld [vmem:[#allocation2 + $0xd8] sm:$0xff]  }
 0x234   : > { %8790 = vrot.lane.b32.xlu1 %v8789_v48, %s14075_s20  ;;  %1917 = vrot.lane.b32.xlu0 %v1905_v38, %s13939_s23  ;;  %v2408_v47 = vrot.slane %v11526_v31, 2  ;;  %v2526_v11 = vrot.slane %v11526_v31, 7  ;;  %v2466_v7 = vrot.slane %v11526_v31, 4  ;;  %v2495_v62 = vrot.slane %v11526_v31, 6 }
 0x235   : > { %4609 = vmatprep.mubr.bf16.mxu1 %v2874_v3  ;;  %v11564_v9 = vsel %vm14178_vm13, %v2523_v24, %v2524_v52  ;;  %vm14181_vm2 = vcmask 1041408   ;;  %v2464_v48 = vrot.slane %v11498_v20, 4  ;;  %v14183_v3 = vld [vmem:[#allocation54_spill] sm:$0xff]  ;;  %v14186_v24 = vld [vmem:[#allocation57_spill] sm:$0xff]  ;;  %vm14191_vm8 = vcmask 1043456  }
 0x236   : > { %4610 = vmatmul.mubr.bf16.vlgmr.msra.gmra.mxu1 %v2873_v2  ;;  %v11561_v37 = vsel %vm14177_vm10, %v2406_v59, %v2408_v47  ;;  %14179 = vst [vmem:[#allocation19_spill] sm:$0xff] %v11564_v9  ;;  %v11569_v63 = vsel %vm14180_vm11, %v2524_v52, %v2526_v11  ;;  %vm14189_vm7 = vmmov %vm14181_vm2  ;;  %vm14196_vm11 = vcmask 1046528  }
 0x237   : > { %6857 = vmatpush3.bf16.msra.mxu1 %v8816_v36  ;;  %v14184_v36 = vld [vmem:[#allocation28_spill] sm:$0xff]  ;;  %vm14193_vm10 = vmmov %vm14191_vm8 }
 0x238   : > { %8755 = vrot.lane.b32.xlu0 %v14176_v39, %s9137_s17  ;;  %1041 = vrot.lane.b32.xlu1 %v11119_v56, %s9137_s17  ;;  %v2493_v56 = vrot.slane %v11498_v20, 6  ;;  %v8774_v2 = vpack.i.bf16 %v14184_v36, %v14183_v3  ;;  %v14188_v39 = vld [vmem:[#allocation13_spill] sm:$0xff]  ;;  %v11599_v3 = vsel %vm14191_vm8, %v2462_v58, %v2464_v48  ;;  %v11604_v36 = vsel %vm14193_vm10, %v2464_v48, %v2466_v7  ;;  %vm14195_vm13 = vmmov %vm14191_vm8 }
 0x239   : > { %6858 = vmatprep.subr.bf16.mxu1 %v8817_v49  ;;  %v14185_v49 = vld [vmem:[#allocation58_spill] sm:$0xff]  ;;  %14192 = vst [vmem:[#allocation24_spill] sm:$0xff] %v11599_v3  ;;  %14194 = vst [vmem:[#allocation23_spill] sm:$0xff] %v11604_v36  ;;  %v8825_v48 = vld [vmem:[#allocation2 + $0xd0] sm:$0xff]   ;;  %vm14200_vm8 = vcmask 1040384   ;;  %vm14201_vm10 = vcmask 1042432  }
 0x23a   : > { %v11578_v4 = vsel %vm14181_vm2, %v2492_v40, %v2493_v56  ;;  %v14187_v52 = vpack.i.bf16 %v14185_v49, %v14186_v24  ;;  %v8821_v40 = vld [vmem:[#allocation2 + $0xe0] sm:$0xff]   ;;  %v8824_v58 = vld [vmem:[#allocation2 + $0x98] sm:$0xff]   ;;  %v1065_v24 = vrot.slane %v10477_v51, 4  ;;  %vm14197_vm2 = vmmov %vm14196_vm11 }
 0x23b   : > { %6859 = vmatpush3.bf16.msra.mxu1 %v8818_v25  ;;  %14182 = vst [vmem:[#allocation18_spill] sm:$0xff] %v11578_v4  ;;  %v11592_v25 = vsel %vm14189_vm7, %v2493_v56, %v2495_v62  ;;  %v8822_v56 = vld [vmem:[#allocation2 + $0xa0] sm:$0xff]   ;;  %vm14198_vm7 = vcmask 1045504  }
 0x23c   : > { %8765 = vrot.lane.b32.xlu0 %v14187_v52, %s13930_s9  ;;  %1186 = vrot.lane.b32.xlu1 %v14188_v39, %s13930_s9  ;;  %14190 = vst [vmem:[#allocation48_spill] sm:$0xff] %v11592_v25  ;;  %v2379_v52 = vrot.slane %v11526_v31, 1  ;;  %v8827_v39 = vld [vmem:[#allocation2 + $0xc8] sm:$0xff]  }
 0x23d   : > { %6860 = vmatprep.subr.bf16.mxu1 %v8819_v55  ;;  %v8784_v55 = vpack.i.bf16 %v11259_v46, %v11132_v15  ;;  %v8826_v46 = vld [vmem:[#allocation2 + $0x90] sm:$0xff]  }
 0x23e   : > { %v2380_v44 = vsel %vm14196_vm11, %v2377_v10, %v2379_v52  ;;  %vm14204_vm11 = vmmov %vm14200_vm8 }
 0x23f   : > { %6861 = vmatpush3.bf16.msra.mxu1 %v8820_v6 }
 0x240   : > { %8775 = vrot.lane.b32.xlu0 %v8774_v2, %s14102_s19  ;;  %1296 = vrot.lane.b32.xlu1 %v11231_v57, %s14102_s19  ;;  %s6734_s19 = sshll.u32 %s9210_s28, 4  ;;  %s9148_s28 = smov [#allocation7]  }
 0x241   : > { %6862 = vmatprep.subr.bf16.mxu1 %v8821_v40  ;;  %v1066_v40 = vsel %vm14195_vm13, %v1063_v28, %v1065_v24  ;;  %s13428_s23 = scalar_lea.hbm %s13470_s7, %s6734_s19  ;;  %s9057_s17 = sshll.u32 %s9148_s28, 4  ;;  %s9058_s17 = int_to_ptr.vmem [resolvable:$false] %s9057_s17 }
 0x243   : > { %6863 = vmatpush3.bf16.msra.mxu1 %v8822_v56 }
 0x244   : > { %8785 = vrot.lane.b32.xlu0 %v8784_v55, %s14107_s15  ;;  %1406 = vrot.lane.b32.xlu1 %v11264_v16, %s14107_s15  ;;  %s9059_s15 = scalar_lea.vmem %s9058_s17, 32 }
 0x245   : > { %6864 = vmatprep.subr.bf16.mxu1 %v8823_v14 }
 0x246   : > { %v2293_v6 = vpop.f32.mrf.mxu0 }
 0x247   : > { %v2294_v2 = vadd.f32 %v11420_v1, %v2293_v6  ;;  %6865 = vmatpush3.bf16.msra.mxu1 %v8824_v58  ;;  %v8828_v6 = vld [vmem:[#allocation2 + $0x88] sm:$0xff]  }
 0x248   : > { %v7548_v15 = vpop.f32.mrf.mxu0  ;;  %704 = vrot.lane.b32.xlu0 %v10986_v5, %s13974_s8  ;;  %6866 = vmatprep.subr.bf16.mxu1 %v8825_v48 }
 0x249   : > { %v11618_v57 = vmax.f32 %v2294_v2, 0.0 }
 0x24a   : > { %v2296_v16 = vpop.f32.mrf.mxu0 }
 0x24b   : > { %v2297_v56 = vadd.f32 %v11420_v1, %v2296_v16  ;;  %v2381_v55 = vrot.slane %v11618_v57, 1  ;;  %v13682_v14 = vrot.slane %v11618_v57, 2  ;;  %6867 = vmatpush3.bf16.msra.mxu1 %v8826_v46  ;;  %v2528_v5 = vrot.slane %v11618_v57, 7  ;;  %v8829_v16 = vld [vmem:[#allocation2 + $0xc0] sm:$0xff]  }
 0x24c   : > { %v7549_v58 = vpop.f32.mrf.mxu0  ;;  %v2581_v2 = vrot.slane %v11618_v57, 5  ;;  %v2468_v48 = vrot.slane %v11618_v57, 4  ;;  %1099 = vrot.lane.b32.xlu0 %v1066_v40, %s14114_s22  ;;  %6868 = vmatprep.subr.bf16.mxu1 %v8827_v39  ;;  %v2497_v39 = vrot.slane %v11618_v57, 6  ;;  %s300_s22 = scalar_lea.vmem [#allocation7], %s299_s13 }
 0x24d   : > { %v11632_v15 = vmax.f32 %v2297_v56, 0.0  ;;  %v2382_v28 = vsel %vm14197_vm2, %v2379_v52, %v2381_v55  ;;  %v2411_v24 = vsel %vm14198_vm7, %v2408_v47, %v13682_v14  ;;  %v2529_v10 = vsel %vm14200_vm8, %v2526_v11, %v2528_v5  ;;  %v8830_v47 = vld [vmem:[#allocation2 + $0x80] sm:$0xff]   ;;  %vm14205_vm2 = vmmov %vm14201_vm10 }
 0x24e   : > { %v11646_v46 = vpack.c.bf16 %v2382_v28, %v2380_v44  ;;  %v11649_v40 = vpack.c.bf16 %v2411_v24, %v11561_v37  ;;  %v2580_v56 = vrot.slane %v11526_v31, 5  ;;  %v11657_v52 = vpack.c.bf16 %v11526_v31, %v11498_v20  ;;  %v8831_v28 = vld [vmem:[#allocation2 + $0x1f8] sm:$0xff]   ;;  %vm14208_vm7 = vmmov %vm14195_vm13 }
 0x24f   : > { %6869 = vmatpush3.bf16.msra.mxu1 %v8828_v6  ;;  %v2530_v58 = vrot.slane %v11632_v15, 7  ;;  %v2583_v44 = vrot.slane %v11632_v15, 5  ;;  %v11669_v11 = vsel %vm14195_vm13, %v2466_v7, %v2468_v48  ;;  %v2470_v6 = vrot.slane %v11632_v15, 4 }
 0x250   : > { %14199 = vst [vmem:[#allocation47_spill] sm:$0xff] %v11646_v46  ;;  %4617 = vmatprep.mubr.bf16.mxu1 %v11646_v46  ;;  %v11663_v37 = vsel %vm14201_vm10, %v2580_v56, %v2581_v2  ;;  %14203 = vst [vmem:[#allocation44_spill] sm:$0xff] %v11669_v11  ;;  %1241 = vrot.lane.b32.xlu0 %v10803_v54, %s13935_s29  ;;  %vm14210_vm8 = vcmask 1041408   ;;  %vm14213_vm13 = vcmask 1046528   ;;  %s6420_s29 = scalar_lea.sflag [#allocation4], %s299_s13 }
 0x251   : > { %14202 = vst [vmem:[#allocation36_spill] sm:$0xff] %v11663_v37  ;;  %4618 = vmatmul.mubr.bf16.gmra.mxu1 %v11657_v52  ;;  %6870 = vmatprep.subr.bf16.mxu1 %v8829_v16  ;;  %v2531_v24 = vsel %vm14204_vm11, %v2528_v5, %v2530_v58  ;;  %v11677_v56 = vsel %vm14205_vm2, %v2581_v2, %v2583_v44  ;;  %v13684_v5 = vrot.slane %v11632_v15, 6  ;;  %vm14211_vm10 = vmmov %vm14210_vm8  ;;  %vm14217_vm2 = vcmask 1044480  }
 0x252   : > { %14206 = vst [vmem:[#allocation46_spill] sm:$0xff] %v11677_v56  ;;  %v11679_v49 = vpack.c.bf16 %v2531_v24, %v2529_v10  ;;  %v11684_v32 = vsel %vm14208_vm7, %v2468_v48, %v2470_v6  ;;  %v2498_v16 = vsel %vm14210_vm8, %v2495_v62, %v2497_v39  ;;  %v2383_v62 = vrot.slane %v11632_v15, 1  ;;  %vm14214_vm11 = vmmov %vm14213_vm13 }
 0x253   : > { %14209 = vst [vmem:[#allocation29_spill] sm:$0xff] %v11684_v32  ;;  %6871 = vmatpush3.bf16.msra.mxu1 %v8830_v47  ;;  %v2500_v48 = vsel %vm14211_vm10, %v2497_v39, %v13684_v5  ;;  %vm14219_vm7 = vcmask 1045504   ;;  %vm14220_vm8 = vcmask 1040384   ;;  %v8865_v5 = vld [vmem:[#allocation2 + $0x170] sm:$0xff]   ;;  %vm14221_vm10 = vmmov %vm14214_vm11 }
 0x254   : > { %14207 = vst [vmem:[#allocation30_spill] sm:$0xff] %v11679_v49  ;;  %1347 = vrot.lane.b32.xlu0 %v10477_v51, %s14115_s14  ;;  %6948 = vmatprep.subr.bf16.mxu1 %v8831_v28  ;;  %v11699_v10 = vpack.c.bf16 %v2500_v48, %v2498_v16  ;;  %v8864_v51 = vld [vmem:[#allocation2 + $0x138] sm:$0xff]   ;;  %s6432_s14 = sshll.u32 %s300_s22, 4  ;;  %s6433_s14 = int_to_ptr.vmem [resolvable:$true] %s6432_s14 }
 0x255   : > { %6903 = vmatpush3.bf16.msra.mxu0 %v8864_v51  ;;  %v8688_v51 = vunpack.i.h.bf16 %v11464_v50  ;;  %s9053_s9 = scalar_lea.vmem %s6433_s14, 16  ;;  %p9060_p11 = scmp.lt.s32.totalorder %s6433_s14, %s9058_s17 }
 0x256   : > { %14212 = vst [vmem:[#allocation49_spill] sm:$0xff] %v11699_v10  ;;  %6904 = vmatprep.subr.bf16.mxu0 %v8865_v5  ;;  %v11785_v5 = vpop.permute.xlu1 %8710  ;;  %p9054_p10 = scmp.ne.s32.totalorder %s6433_s14, %s9053_s9  ;;  %p9061_p0 = scmp.lt.s32.totalorder %s9059_s15, %s9053_s9 }
 0x258   : > { %p9055_p12 = pnand %p9054_p10, %p9227_p5  ;;  %p9062_p1 = por %p9061_p0, %p9060_p11 }
 0x25a   : > { %p9056_p8 = pneg %p9055_p12 }
 0x25c   : > { %p9063_p3 = pnand %p9062_p1, %p9056_p8 }
 0x25f   : > { %v2301_v47 = vpop.f32.mrf.mxu0 }
 0x260   : > { %v2302_v24 = vadd.f32 %v11420_v1, %v2301_v47  ;;  %v13685_v47 = vrot.slane %v11632_v15, 3 }
 0x261   : > { %v7552_v8 = vpop.f32.mrf.mxu0 }
 0x262   : > { %v11703_v29 = vmax.f32 %v2302_v24, 0.0  ;;  %v2384_v8 = vsel %vm14213_vm13, %v2381_v55, %v2383_v62  ;;  %v13686_v24 = vrot.slane %v11632_v15, 2  ;;  %v11725_v55 = vpack.c.bf16 %v11632_v15, %v11618_v57 }
 0x263   : > { %v2304_v28 = vpop.f32.mrf.mxu0  ;;  %vm14222_vm13 = vcmask 1042432  }
 0x264   : > { %v2305_v2 = vadd.f32 %v11420_v1, %v2304_v28  ;;  %v2385_v54 = vrot.slane %v11703_v29, 1  ;;  %v2443_v39 = vrot.slane %v11703_v29, 3  ;;  %v2414_v16 = vrot.slane %v11703_v29, 2  ;;  %14216 = vst [vmem:[#allocation31_spill] sm:$0xff] %v11725_v55 }
 0x265   : > { %v7553_v48 = vpop.f32.mrf.mxu0  ;;  %v2532_v34 = vrot.slane %v11703_v29, 7  ;;  %v2585_v59 = vrot.slane %v11703_v29, 5  ;;  %v2472_v12 = vrot.slane %v11703_v29, 4  ;;  %v2501_v14 = vrot.slane %v11703_v29, 6 }
 0x266   : > { %v11715_v7 = vmax.f32 %v2305_v2, 0.0  ;;  %v2386_v28 = vsel %vm14214_vm11, %v2383_v62, %v2385_v54  ;;  %v11732_v62 = vsel %vm14217_vm2, %v13685_v47, %v2443_v39  ;;  %v11737_v50 = vsel %vm14219_vm7, %v13686_v24, %v2414_v16 }
 0x267   : > { %v11721_v48 = vpack.c.bf16 %v2386_v28, %v2384_v8  ;;  %v2678_v38 = vrot.slane %v2386_v28, 3  ;;  %14218 = vst [vmem:[#allocation34_spill] sm:$0xff] %v11732_v62  ;;  %v2533_v28 = vsel %vm14220_vm8, %v2530_v58, %v2532_v34  ;;  %v11751_v24 = vsel %vm14222_vm13, %v2583_v44, %v2585_v59 }
 0x268   : > { %v2387_v2 = vrot.slane %v11715_v7, 1  ;;  %v11744_v13 = vrot.slane %v11715_v7, 7  ;;  %14223 = vst [vmem:[#allocation32_spill] sm:$0xff] %v11751_v24  ;;  %vm14224_vm11 = vcmask 1043456   ;;  %v14226_v17 = vrot.slane %v11715_v7, 3 }
 0x269   : > { %14215 = vst [vmem:[#allocation33_spill] sm:$0xff] %v11721_v48  ;;  %4625 = vmatprep.mubr.bf16.mxu1 %v11721_v48  ;;  %v11754_v48 = vrot.slane %v11715_v7, 5  ;;  %v11757_v8 = vsel %vm14224_vm11, %v2470_v6, %v2472_v12  ;;  %v14228_v36 = vrot.slane %v11715_v7, 2  ;;  %v2684_v10 = vrot.slane %v11732_v62, 3 }
 0x26a   : > { %4626 = vmatmul.mubr.bf16.gmra.mxu1 %v11725_v55  ;;  %v11748_v47 = vsel %vm14221_vm10, %v2385_v54, %v2387_v2  ;;  %14225 = vst [vmem:[#allocation52_spill] sm:$0xff] %v11757_v8  ;;  %v11763_v46 = vsel %vm14217_vm2, %v2443_v39, %v14226_v17  ;;  %v2535_v44 = vsel %vm14220_vm8, %v2532_v34, %v11744_v13  ;;  %v2681_v17 = vrot.slane %v11737_v50, 3  ;;  %vm14230_vm10 = vmmov %vm14222_vm13  ;;  %v11832_v8 = vpop.permute.xlu1 %8720 }
 0x26b   : > { %14227 = vst [vmem:[#allocation56_spill] sm:$0xff] %v11763_v46  ;;  %v11768_v54 = vsel %vm14219_vm7, %v2414_v16, %v14228_v36  ;;  %v11778_v39 = vpack.c.bf16 %v2535_v44, %v2533_v28  ;;  %v11782_v36 = vsel %vm14230_vm10, %v2585_v59, %v11754_v48  ;;  %v13697_v16 = vrot.slane %v11715_v7, 4  ;;  %v699_v44 = vpop.permute.xlu0 %698  ;;  %vm14237_vm7 = vmmov %vm14217_vm2 }
 0x26c   : > { %14231 = vst [vmem:[#allocation42_spill] sm:$0xff] %v11782_v36  ;;  %v14232_v6 = vrot.slane %v11632_v15, 6  ;;  %vm14233_vm13 = vcmask 1041408   ;;  %v11793_v21 = vrot.slane %v11715_v7, 6  ;;  %v14234_v4 = vrot.slane %v11763_v46, 3  ;;  %vm14241_vm10 = vmmov %vm14217_vm2 }
 0x26d   : > { %14229 = vst [vmem:[#allocation43_spill] sm:$0xff] %v11778_v39  ;;  %v11800_v3 = vsel %vm14224_vm11, %v2472_v12, %v13697_v16  ;;  %v14236_v25 = vrot.slane %v11748_v47, 3  ;;  %v8866_v12 = vld [vmem:[#allocation2 + $0x130] sm:$0xff]   ;;  %vm14239_vm8 = vmmov %vm14233_vm13  ;;  %v14240_v34 = vrot.slane %v11768_v54, 3 }
 0x26e   : > { %v2502_v58 = vsel %vm14233_vm13, %v14232_v6, %v2501_v14  ;;  %v11807_v6 = vsel %vm14217_vm2, %v2684_v10, %v14234_v4  ;;  %v2504_v16 = vsel %vm14239_vm8, %v2501_v14, %v11793_v21  ;;  %vm14245_vm13 = vcmask 97280   ;;  %6905 = vmatpush3.bf16.msra.mxu0 %v8866_v12  ;;  %v11889_v11 = vpop.permute.xlu1 %8730 }
 0x26f   : > { %v2309_v59 = vpop.f32.mrf.mxu0  ;;  %14235 = vst [vmem:[#allocation50_spill] sm:$0xff] %v11807_v6  ;;  %v11812_v27 = vsel %vm14237_vm7, %v2678_v38, %v14236_v25  ;;  %v11822_v26 = vsel %vm14241_vm10, %v2681_v17, %v14240_v34  ;;  %v11824_v10 = vpack.c.bf16 %v2504_v16, %v2502_v58  ;;  %v1493_v38 = vsel %vm14245_vm13, %v14244_v35, %v699_v44  ;;  %vm14247_vm11 = vmmov %vm14245_vm13  ;;  %v14248_v58 = vld [vmem:[#allocation78_spill] sm:$0xff] }
 0x270   : > { %14238 = vst [vmem:[#allocation62_spill] sm:$0xff] %v11812_v27  ;;  %v2310_v28 = vadd.f32 %v11420_v1, %v2309_v59  ;;  %14242 = vst [vmem:[#allocation63_spill] sm:$0xff] %v11822_v26  ;;  %v14246_v59 = vld [vmem:[#allocation20_spill] sm:$0xff]  ;;  %v14249_v16 = vunpack.i.l.bf16 %v14248_v58  ;;  %vm14250_vm2 = vcmask 121856   ;;  %vm14253_vm8 = vcmask 1046528  }
 0x271   : > { %v7556_v4 = vpop.f32.mrf.mxu0  ;;  %14243 = vst [vmem:[#allocation61_spill] sm:$0xff] %v11824_v10  ;;  %v1492_v42 = vsel %vm14247_vm11, %v14246_v59, %v8688_v51  ;;  %v14251_v51 = vunpack.i.h.bf16 %v14119_v61  ;;  %vm14252_vm7 = vmmov %vm14250_vm2  ;;  %v14259_v61 = vrot.slane %v11715_v7, 2  ;;  %vm14260_vm13 = vcmask 1045504   ;;  %v14315_v27 = vld [vmem:[#allocation80_spill] sm:$0xff] }
 0x272   : > { %v11828_v25 = vmax.f32 %v2310_v28, 0.0  ;;  %v11840_v4 = vsel %vm14250_vm2, %v1493_v38, %v14249_v16  ;;  %v11861_v16 = vpack.c.bf16 %v11715_v7, %v11703_v29  ;;  %vm14261_vm11 = vcmask 1040384   ;;  %vm14262_vm2 = vmmov %vm14253_vm8 }
 0x273   : > { %v2312_v60 = vpop.f32.mrf.mxu0  ;;  %v11847_v12 = vsel %vm14252_vm7, %v1492_v42, %v14251_v51  ;;  %v2693_v42 = vrot.slane %v11744_v13, 3  ;;  %v2687_v51 = vrot.slane %v11754_v48, 3  ;;  %vm14264_vm7 = vcmask 1042432  }
 0x274   : > { %v2313_v14 = vadd.f32 %v11420_v1, %v2312_v60  ;;  %v2389_v17 = vrot.slane %v11828_v25, 1  ;;  %v2447_v34 = vrot.slane %v11828_v25, 3  ;;  %v2536_v44 = vrot.slane %v11828_v25, 7  ;;  %14255 = vst [vmem:[#allocation59_spill] sm:$0xff] %v11861_v16 }
 0x275   : > { %v7557_v35 = vpop.f32.mrf.mxu0  ;;  %v2589_v59 = vrot.slane %v11828_v25, 5  ;;  %v2476_v28 = vrot.slane %v11828_v25, 4  ;;  %v14258_v29 = vrot.slane %v11828_v25, 2  ;;  %v2505_v56 = vrot.slane %v11828_v25, 6 }
 0x276   : > { %v11849_v60 = vmax.f32 %v2313_v14, 0.0  ;;  %v11852_v1 = vsel %vm14253_vm8, %v2387_v2, %v2389_v17  ;;  %v14257_v2 = vrot.slane %v11715_v7, 3  ;;  %vm14266_vm8 = vmmov %vm14241_vm10 }
 0x277   : > { %v11857_v38 = vpack.c.bf16 %v11852_v1, %v11748_v47  ;;  %v11881_v10 = vsel %vm14260_vm13, %v14259_v61, %v14258_v29  ;;  %v11898_v61 = vsel %vm14264_vm7, %v11754_v48, %v2589_v59  ;;  %vm14270_vm13 = vmmov %vm14266_vm8 }
 0x278   : > { %v11866_v14 = vrot.slane %v11849_v60, 1  ;;  %v11871_v35 = vsel %vm14241_vm10, %v14257_v2, %v2447_v34  ;;  %v11884_v24 = vrot.slane %v11849_v60, 3  ;;  %v2537_v2 = vsel %vm14261_vm11, %v11744_v13, %v2536_v44  ;;  %14265 = vst [vmem:[#allocation60_spill] sm:$0xff] %v11898_v61  ;;  %vm14268_vm10 = vmmov %vm14261_vm11 }
 0x279   : > { %14254 = vst [vmem:[#allocation64_spill] sm:$0xff] %v11857_v38  ;;  %4633 = vmatprep.mubr.bf16.mxu1 %v11857_v38  ;;  %v2694_v32 = vrot.slane %v2537_v2, 3  ;;  %v2702_v36 = vrot.slane %v11871_v35, 3  ;;  %v14267_v29 = vrot.slane %v11849_v60, 7  ;;  %v14272_v39 = vrot.slane %v11849_v60, 5  ;;  %vm14273_vm11 = vmmov %vm14264_vm7 }
 0x27a   : > { %14256 = vst [vmem:[#allocation66_spill] sm:$0xff] %v11866_v14  ;;  %4634 = vmatmul.mubr.bf16.gmra.mxu1 %v11861_v16  ;;  %v11894_v38 = vsel %vm14262_vm2, %v2389_v17, %v11866_v14  ;;  %v11908_v17 = vpack.c.bf16 %v11849_v60, %v11828_v25  ;;  %v11913_v48 = vsel %vm14266_vm8, %v2447_v34, %v11884_v24  ;;  %v2688_v9 = vrot.slane %v11898_v61, 3  ;;  %vm14276_vm7 = vmmov %vm14266_vm8  ;;  %v8870_v61 = vld [vmem:[#allocation2 + $0x120] sm:$0xff]  }
 0x27b   : > { %14263 = vst [vmem:[#allocation17_spill] sm:$0xff] %v11894_v38  ;;  %v2949_v13 = vpack.c.bf16 %v11866_v14, %v11894_v38  ;;  %v11918_v37 = vsel %vm14268_vm10, %v2536_v44, %v14267_v29  ;;  %v8867_v14 = vld [vmem:[#allocation2 + $0x168] sm:$0xff]   ;;  %v11921_v16 = vsel %vm14270_vm13, %v2693_v42, %v2694_v32  ;;  %v11930_v34 = vsel %vm14273_vm11, %v2589_v59, %v14272_v39  ;;  %v11952_v44 = vpop.permute.xlu1 %8740  ;;  %vm14279_vm10 = vmmov %vm14276_vm7 }
 0x27c   : > { %14269 = vst [vmem:[#allocation65_spill] sm:$0xff] %v11918_v37  ;;  %v8868_v38 = vld [vmem:[#allocation2 + $0x128] sm:$0xff]   ;;  %14271 = vst [vmem:[#allocation68_spill] sm:$0xff] %v11921_v16  ;;  %v13723_v49 = vrot.slane %v11918_v37, 3  ;;  %v11925_v55 = vpack.c.bf16 %v11918_v37, %v2537_v2  ;;  %v14274_v42 = vrot.slane %v11715_v7, 4  ;;  %vm14275_vm2 = vcmask 1043456   ;;  %6906 = vmatprep.subr.bf16.mxu0 %v8867_v14 }
 0x27d   : > { %4641 = vmatprep.mubr.bf16.mxu1 %v2949_v13  ;;  %v11947_v39 = vrot.slane %v11849_v60, 4  ;;  %6907 = vmatpush3.bf16.msra.mxu0 %v8868_v38  ;;  %vm14278_vm8 = vcmask 1041408   ;;  %vm14282_vm13 = vmmov %vm14276_vm7  ;;  %v8869_v38 = vld [vmem:[#allocation2 + $0x160] sm:$0xff]   ;;  %v8871_v37 = vld [vmem:[#allocation2 + $0x158] sm:$0xff]   ;;  %v14285_v14 = vrot.slane %v11849_v60, 6  ;;  %v14288_v16 = vrot.slane %v11763_v46, 3 }
 0x27e   : > { %v11939_v13 = vsel %vm14275_vm2, %v14274_v42, %v2476_v28  ;;  %v11944_v2 = vsel %vm14276_vm7, %v2694_v32, %v13723_v49  ;;  %v2506_v59 = vsel %vm14278_vm8, %v11793_v21, %v2505_v56  ;;  %v11958_v42 = vsel %vm14279_vm10, %v2687_v51, %v2688_v9  ;;  %vm14284_vm11 = vmmov %vm14275_vm2  ;;  %6908 = vmatprep.subr.bf16.mxu0 %v8869_v38 }
 0x27f   : > { %14277 = vst [vmem:[#allocation67_spill] sm:$0xff] %v11944_v2  ;;  %14280 = vst [vmem:[#allocation12_spill] sm:$0xff] %v11958_v42  ;;  %v14281_v32 = vrot.slane %v11930_v34, 3  ;;  %v11969_v7 = vsel %vm14284_vm11, %v2476_v28, %v11947_v39  ;;  %v14287_v42 = vpack.c.bf16 %v11539_v41, %v11461_v53  ;;  %v14289_v38 = vrot.slane %v11852_v1, 3  ;;  %v8716_v53 = vpop.permute.xlu0 %8715  ;;  %v12032_v2 = vpop.permute.xlu1 %1711 }
 0x280   : > { %vm14286_vm2 = vmmov %vm14278_vm8  ;;  %v2690_v29 = vrot.slane %v11793_v21, 3  ;;  %v14300_v21 = vunpack.i.h.bf16 %v14124_v30  ;;  %v12026_v41 = vpack.c.bf16 %v11913_v48, %v11871_v35 }
 0x281   : > { %v11963_v49 = vsel %vm14282_vm13, %v2688_v9, %v14281_v32  ;;  %v11974_v51 = vsel %vm14286_vm2, %v2505_v56, %v14285_v14  ;;  %v2691_v32 = vrot.slane %v2506_v59, 3  ;;  %v2437_v56 = vrot.slane %v11526_v31, 3  ;;  %6909 = vmatpush3.bf16.msra.mxu0 %v8870_v61  ;;  %v8872_v14 = vld [vmem:[#allocation2 + $0x118] sm:$0xff]   ;;  %vm14291_vm8 = vmmov %vm14276_vm7 }
 0x282   : > { %14283 = vst [vmem:[#allocation45_spill] sm:$0xff] %v11963_v49  ;;  %4642 = vmatmul.mubr.bf16.gmra.mxu1 %v11908_v17  ;;  %v11983_v28 = vpack.c.bf16 %v11974_v51, %v2506_v59  ;;  %v11992_v49 = vsel %vm14276_vm7, %v14288_v16, %v2702_v36  ;;  %v14290_v9 = vrot.slane %v11748_v47, 3  ;;  %6910 = vmatprep.subr.bf16.mxu0 %v8871_v37  ;;  %v14293_v16 = vrot.slane %v11881_v10, 3  ;;  %vm14295_vm10 = vmmov %vm14276_vm7  ;;  %v14302_v31 = vld [vmem:[#allocation77_spill] sm:$0xff] }
 0x283   : > { %4682 = vmatprep.mubr.bf16.mxu1 %v14287_v42  ;;  %v14294_v61 = vrot.slane %v11768_v54, 3  ;;  %v14297_v47 = vrot.slane %v11913_v48, 3  ;;  %vm14298_vm13 = vmmov %vm14276_vm7  ;;  %v1528_v37 = vsel %vm1515_vm12, %v11847_v12, %v14300_v21  ;;  %14301 = vst [vmem:[#allocation41_spill] sm:$0xff] %v12026_v41  ;;  %v8726_v6 = vpop.permute.xlu0 %8725  ;;  %v14318_v41 = vpack.c.bf16 %v11544_v22, %v11470_v0  ;;  %v8835_v0 = vld [vmem:[#allocation2 + $0x1e8] sm:$0xff]  }
 0x284   : > { %v11999_v59 = vsel %vm14291_vm8, %v14290_v9, %v14289_v38  ;;  %vm14305_vm11 = vmmov %vm14276_vm7  ;;  %v8832_v38 = vld [vmem:[#allocation2 + $0x1b8] sm:$0xff]   ;;  %vm14312_vm8 = vcmask 171008  }
 0x285   : > { %14292 = vst [vmem:[#allocation51_spill] sm:$0xff] %v11999_v59  ;;  %v12011_v42 = vsel %vm14295_vm10, %v14294_v61, %v14293_v16  ;;  %v12016_v9 = vsel %vm14298_vm13, %v2702_v36, %v14297_v47  ;;  %v14303_v16 = vunpack.i.l.bf16 %v14302_v31  ;;  %v14304_v36 = vrot.slane %v11618_v57, 3  ;;  %vm14306_vm2 = vmmov %vm14276_vm7  ;;  %6911 = vmatpush3.bf16.msra.mxu0 %v8872_v14 }
 0x286   : > { %14296 = vst [vmem:[#allocation38_spill] sm:$0xff] %v12011_v42  ;;  %14299 = vst [vmem:[#allocation37_spill] sm:$0xff] %v12016_v9  ;;  %v12038_v12 = vsel %vm14306_vm2, %v2690_v29, %v2691_v32  ;;  %v14308_v47 = vrot.slane %v11974_v51, 3  ;;  %v8833_v42 = vld [vmem:[#allocation2 + $0x1f0] sm:$0xff]   ;;  %v14316_v59 = vunpack.i.l.bf16 %v14315_v27  ;;  %v8713_v14 = vunpack.i.h.bf16 %v11785_v5  ;;  %v14465_v9 = vld [vmem:[#allocation47_spill] sm:$0xff] }
 0x287   : > { %v1529_v61 = vsel %vm1515_vm12, %v11840_v4, %v14303_v16  ;;  %v2440_v30 = vsel %vm14305_vm11, %v2437_v56, %v14304_v36  ;;  %14307 = vst [vmem:[#allocation40_spill] sm:$0xff] %v12038_v12  ;;  %vm14309_vm7 = vmmov %vm14306_vm2  ;;  %v8712_v4 = vunpack.i.l.bf16 %v11785_v5  ;;  %v14311_v16 = vunpack.i.h.bf16 %v14128_v43 }
 0x288   : > { %v12043_v21 = vsel %vm14309_vm7, %v2691_v32, %v14308_v47  ;;  %v14313_v36 = vrot.slane %v11498_v20, 3  ;;  %vm14314_vm10 = vmmov %vm14306_vm2  ;;  %v14319_v43 = vunpack.i.h.bf16 %v14132_v33  ;;  %v8717_v20 = vunpack.i.l.bf16 %v8716_v53 }
 0x289   : > { %14310 = vst [vmem:[#allocation75_spill] sm:$0xff] %v12043_v21  ;;  %v1546_v26 = vsel %vm14312_vm8, %v1528_v37, %v14311_v16  ;;  %vm14317_vm13 = vmmov %vm14312_vm8  ;;  %v14320_v16 = vld [vmem:[#allocation79_spill] sm:$0xff]  ;;  %vm14328_vm7 = vcmask 392192   ;;  %v8899_v21 = vld [vmem:[#allocation2 + $0x3f0] sm:$0xff]  }
 0x28a   : > { %v2438_v29 = vsel %vm14314_vm10, %v14313_v36, %v2437_v56  ;;  %v1547_v32 = vsel %vm14317_vm13, %v1529_v61, %v14316_v59  ;;  %4683 = vmatmul.mubr.bf16.vlgmr.msra.gmra.mxu1 %v14318_v41  ;;  %v1564_v37 = vsel %vm1551_vm14, %v1546_v26, %v14319_v43  ;;  %v8834_v56 = vld [vmem:[#allocation2 + $0x1b0] sm:$0xff]   ;;  %v14321_v36 = vunpack.i.l.bf16 %v14320_v16  ;;  %v8736_v43 = vpop.permute.xlu0 %8735  ;;  %vm14324_vm11 = vmmov %vm14306_vm2 }
 0x28b   : > { %v2898_v47 = vpack.c.bf16 %v2440_v30, %v2438_v29  ;;  %6949 = vmatpush3.bf16.msra.mxu1 %v8832_v38  ;;  %v1582_v5 = vsel %vm1569_vm5, %v1564_v37, %v8712_v4  ;;  %v8718_v61 = vunpack.i.h.bf16 %v8716_v53  ;;  %v8722_v30 = vunpack.i.l.bf16 %v11832_v8  ;;  %v12069_v29 = vpop.permute.xlu1 %1757  ;;  %vm14329_vm8 = vmmov %vm14328_vm7 }
 0x28c   : > { %v1565_v59 = vsel %vm1551_vm14, %v1547_v32, %v14321_v36  ;;  %6950 = vmatprep.subr.bf16.mxu1 %v8833_v42  ;;  %v8723_v26 = vunpack.i.h.bf16 %v11832_v8  ;;  %v1600_v22 = vsel %vm1587_vm3, %v1582_v5, %v8717_v20  ;;  %v8728_v41 = vunpack.i.h.bf16 %v8726_v6  ;;  %v8837_v8 = vld [vmem:[#allocation2 + $0x1e0] sm:$0xff]  }
 0x28d   : > { %4690 = vmatprep.mubr.bf16.mxu1 %v2898_v47  ;;  %v1583_v33 = vsel %vm1569_vm5, %v1565_v59, %v8713_v14  ;;  %v8727_v38 = vunpack.i.l.bf16 %v8726_v6  ;;  %v8836_v47 = vld [vmem:[#allocation2 + $0x1a8] sm:$0xff]   ;;  %v1618_v53 = vsel %vm1605_vm0, %v1600_v22, %v8722_v30  ;;  %v8732_v4 = vunpack.i.l.bf16 %v11889_v11 }
 0x28e   : > { %v1601_v32 = vsel %vm1587_vm3, %v1583_v33, %v8718_v61  ;;  %v14322_v42 = vrot.slane %v11632_v15, 3  ;;  %v14323_v37 = vrot.slane %v11618_v57, 3  ;;  %v8733_v6 = vunpack.i.h.bf16 %v11889_v11  ;;  %v8838_v61 = vld [vmem:[#allocation2 + $0x1a0] sm:$0xff]  }
 0x28f   : > { %6951 = vmatpush3.bf16.msra.mxu1 %v8834_v56  ;;  %v1619_v20 = vsel %vm1605_vm0, %v1601_v32, %v8723_v26  ;;  %v12085_v36 = vpop.permute.xlu1 %1847  ;;  %v1636_v59 = vsel %vm1623_vm6, %v1618_v53, %v8727_v38  ;;  %v8737_v5 = vunpack.i.l.bf16 %v8736_v43  ;;  %v8738_v33 = vunpack.i.h.bf16 %v8736_v43  ;;  %v8839_v26 = vld [vmem:[#allocation2 + $0x1d8] sm:$0xff]  }
 0x290   : > { %v2442_v14 = vsel %vm14324_vm11, %v14323_v37, %v14322_v42  ;;  %6952 = vmatprep.subr.bf16.mxu1 %v8835_v0  ;;  %v1637_v30 = vsel %vm1623_vm6, %v1619_v20, %v8728_v41  ;;  %v1654_v0 = vsel %vm1641_vm1, %v1636_v59, %v8732_v4  ;;  %v8743_v22 = vunpack.i.h.bf16 %v11952_v44  ;;  %v8873_v42 = vld [vmem:[#allocation2 + $0x150] sm:$0xff]   ;;  %v8840_v43 = vld [vmem:[#allocation2 + $0x198] sm:$0xff]  }
 0x291   : > { %v2915_v56 = vpack.c.bf16 %v11732_v62, %v2442_v14  ;;  %v1655_v11 = vsel %vm1641_vm1, %v1637_v30, %v8733_v6  ;;  %v8742_v32 = vunpack.i.l.bf16 %v11952_v44  ;;  %v8874_v37 = vld [vmem:[#allocation2 + $0x110] sm:$0xff]   ;;  %v1672_v38 = vsel %vm1659_vm15, %v1654_v0, %v8737_v5  ;;  %6912 = vmatprep.subr.bf16.mxu0 %v8873_v42  ;;  %v8875_v30 = vld [vmem:[#allocation2 + $0x148] sm:$0xff]   ;;  %v8893_v62 = vld [vmem:[#allocation2 + $0x240] sm:$0xff]  }
 0x292   : > { %4691 = vmatmul.mubr.bf16.gmra.mxu1 %v11649_v40  ;;  %v14326_v41 = vrot.slane %v11618_v57, 2  ;;  %vm14327_vm2 = vcmask 1045504   ;;  %v1673_v14 = vsel %vm1659_vm15, %v1655_v11, %v8738_v33  ;;  %v2932_v59 = vpack.c.bf16 %v11871_v35, %v11763_v46  ;;  %6913 = vmatpush3.bf16.msra.mxu0 %v8874_v37  ;;  %v8876_v0 = vld [vmem:[#allocation2 + $0x108] sm:$0xff]  }
 0x293   : > { %4698 = vmatprep.mubr.bf16.mxu1 %v2915_v56  ;;  %6953 = vmatpush3.bf16.msra.mxu1 %v8836_v47  ;;  %v14325_v47 = vrot.slane %v11632_v15, 2  ;;  %v8841_v56 = vld [vmem:[#allocation2 + $0x1d0] sm:$0xff]   ;;  %v1690_v15 = vsel %vm1677_vm4, %v1672_v38, %v8742_v32  ;;  %v1691_v57 = vsel %vm1677_vm4, %v1673_v14, %v8743_v22  ;;  %vm14330_vm10 = vcmask 23552   ;;  %v8843_v35 = vld [vmem:[#allocation2 + $0x1c8] sm:$0xff]  }
 0x294   : > { %6954 = vmatprep.subr.bf16.mxu1 %v8837_v8  ;;  %v12101_v8 = vpop.permute.xlu1 %1895  ;;  %v1930_v33 = vsel %vm14330_vm10, %v10753_v18, %v12032_v2  ;;  %v8842_v22 = vld [vmem:[#allocation2 + $0x190] sm:$0xff]   ;;  %6914 = vmatprep.subr.bf16.mxu0 %v8875_v30  ;;  %vm14331_vm13 = vcmask 613376   ;;  %vm14332_vm11 = vcmask 48128   ;;  %v8844_v18 = vld [vmem:[#allocation2 + $0x188] sm:$0xff]   ;;  %v2951_v14 = vpack.c.bf16 %v11884_v24, %v11913_v48  ;;  %v14340_v30 = vld [vmem:[#allocation82_spill] sm:$0xff] }
 0x295   : > { %v2413_v4 = vsel %vm14327_vm2, %v14326_v41, %v14325_v47  ;;  %v8845_v47 = vld [vmem:[#allocation2 + $0x1c0] sm:$0xff]   ;;  %vm14334_vm2 = vcmask 97280  }
 0x296   : > { %v8746_v53 = vpop.permute.xlu0 %8745  ;;  %v12104_v44 = vpack.c.bf16 %v11737_v50, %v2413_v4  ;;  %6915 = vmatpush3.bf16.msra.mxu0 %v8876_v0  ;;  %v14333_v41 = vld [vmem:[#allocation83_spill] sm:$0xff]  ;;  %vm14338_vm10 = vmmov %vm14334_vm2  ;;  %v14341_v0 = vunpack.i.l.bf16 %v14340_v30 }
 0x297   : > { %6955 = vmatpush3.bf16.msra.mxu1 %v8838_v61  ;;  %v8748_v20 = vunpack.i.h.bf16 %v8746_v53  ;;  %v8747_v6 = vunpack.i.l.bf16 %v8746_v53  ;;  %v12122_v53 = vpack.c.bf16 %v11881_v10, %v11768_v54 }
 0x298   : > { %6956 = vmatprep.subr.bf16.mxu1 %v8839_v26  ;;  %v703_v32 = vpop.permute.xlu1 %702 }
 0x299   : > { %v2151_v5 = vsel %vm14328_vm7, %v1691_v57, %v8748_v20  ;;  %v2150_v61 = vsel %vm14329_vm8, %v1690_v15, %v8747_v6  ;;  %v1495_v4 = vsel %vm14334_vm2, %v14333_v41, %v703_v32  ;;  %vm14335_vm7 = vcmask 72704   ;;  %v14336_v6 = vld [vmem:[#allocation15_spill] sm:$0xff]  ;;  %vm14337_vm8 = vmmov %vm14334_vm2  ;;  %v8847_v32 = vld [vmem:[#allocation2 + $0x2f8] sm:$0xff]  }
 0x29a   : > { %4699 = vmatmul.mubr.bf16.gmra.mxu1 %v12104_v44  ;;  %v2161_v26 = vpack.c.bf16 %v2151_v5, %v2150_v61  ;;  %v1730_v11 = vpop.permute.xlu0 %1729  ;;  %v12131_v20 = vrot.slane %v11849_v60, 2  ;;  %v8877_v5 = vld [vmem:[#allocation2 + $0x140] sm:$0xff]  }
 0x29b   : > { %4706 = vmatprep.mubr.bf16.mxu1 %v2932_v59  ;;  %6957 = vmatpush3.bf16.msra.mxu1 %v8840_v43  ;;  %v1936_v42 = vsel %vm14332_vm11, %v1930_v33, %v1730_v11  ;;  %v8878_v61 = vld [vmem:[#allocation2 + $0x100] sm:$0xff]   ;;  %v14343_v11 = vunpack.i.h.bf16 %v14248_v58  ;;  %v14349_v58 = vunpack.i.h.bf16 %v14302_v31  ;;  %v14354_v31 = vunpack.i.h.bf16 %v14315_v27 }
 0x29c   : > { %6958 = vmatprep.subr.bf16.mxu1 %v8841_v56  ;;  %7563 = vmatmul.mubr.msk.bf16.gmra.mxu0 %vm14331_vm13, %v2161_v26  ;;  %v1942_v43 = vsel %vm14335_vm7, %v1936_v42, %v12069_v29  ;;  %vm14339_vm13 = vcmask 121856   ;;  %v8846_v29 = vld [vmem:[#allocation2 + $0x180] sm:$0xff]   ;;  %v8761_v26 = vpop.permute.xlu1 %8760  ;;  %vm14346_vm7 = vcmask 1045504  }
 0x29d   : > { %7566 = vmatprep.mubr.msk.bf16.mxu0 %vm14000_vm9, %v13861_v45  ;;  %vm14342_vm11 = vmmov %vm14339_vm13  ;;  %6916 = vmatprep.subr.bf16.mxu0 %v8877_v5  ;;  %v8763_v30 = vunpack.i.h.bf16 %v8761_v26 }
 0x29e   : > { %v8751_v37 = vpop.permute.xlu0 %8750  ;;  %v1513_v33 = vsel %vm14342_vm11, %v1495_v4, %v14341_v0  ;;  %vm14344_vm2 = vmmov %vm14342_vm11  ;;  %6917 = vmatpush3.bf16.msra.mxu0 %v8878_v61  ;;  %vm14357_vm11 = vcmask 1044480   ;;  %v8762_v0 = vunpack.i.l.bf16 %v8761_v26 }
 0x29f   : > { %6959 = vmatpush3.bf16.msra.mxu1 %v8842_v22  ;;  %v8753_v2 = vunpack.i.h.bf16 %v8751_v37  ;;  %v8752_v38 = vunpack.i.l.bf16 %v8751_v37  ;;  %v14347_v37 = vld [vmem:[#allocation55_spill] sm:$0xff] }
 0x2a0   : > { %6960 = vmatprep.subr.bf16.mxu1 %v8843_v35 }
 0x2a1   : > { %v1494_v56 = vsel %vm14337_vm8, %v14336_v6, %v8753_v2  ;;  %v1960_v15 = vsel %vm14338_vm10, %v1942_v43, %v8752_v38  ;;  %vm14350_vm8 = vcmask 171008  }
 0x2a2   : > { %4707 = vmatmul.mubr.bf16.gmra.mxu1 %v12122_v53  ;;  %v1877_v57 = vpop.permute.xlu0 %1876  ;;  %v1978_v59 = vsel %vm14339_vm13, %v1960_v15, %v12085_v36  ;;  %v1512_v22 = vsel %vm14344_vm2, %v1494_v56, %v14343_v11  ;;  %v14345_v36 = vrot.slane %v11828_v25, 2  ;;  %vm14353_vm10 = vmmov %vm14350_vm8  ;;  %v8771_v15 = vpop.permute.xlu1 %8770  ;;  %v14359_v11 = vunpack.i.h.bf16 %v14320_v16 }
 0x2a3   : > { %4714 = vmatprep.mubr.bf16.mxu1 %v2951_v14  ;;  %6961 = vmatpush3.bf16.msra.mxu1 %v8844_v18  ;;  %v1996_v35 = vsel %vm1515_vm12, %v1978_v59, %v1877_v57  ;;  %v14348_v18 = vunpack.i.l.bf16 %v14347_v37  ;;  %v1530_v38 = vsel %vm1515_vm12, %v1512_v22, %v14349_v58  ;;  %v14351_v14 = vld [vmem:[#allocation21_spill] sm:$0xff]  ;;  %vm14355_vm13 = vmmov %vm14350_vm8  ;;  %v8773_v26 = vunpack.i.h.bf16 %v8771_v15 }
 0x2a4   : > { %6962 = vmatprep.subr.bf16.mxu1 %v8845_v47  ;;  %v12150_v42 = vsel %vm14346_vm7, %v14345_v36, %v12131_v20  ;;  %v2014_v47 = vsel %vm14350_vm8, %v1996_v35, %v12101_v8  ;;  %v14352_v6 = vunpack.i.l.bf16 %v14351_v14  ;;  %v1548_v57 = vsel %vm14355_vm13, %v1530_v38, %v14354_v31  ;;  %v8879_v36 = vld [vmem:[#allocation2 + $0x278] sm:$0xff]   ;;  %v8849_v58 = vld [vmem:[#allocation2 + $0x2f0] sm:$0xff]   ;;  %v14362_v14 = vld [vmem:[#allocation31_spill] sm:$0xff] }
 0x2a5   : > { %v1531_v2 = vsel %vm1515_vm12, %v1513_v33, %v14348_v18  ;;  %v2950_v4 = vpack.c.bf16 %v12131_v20, %v12150_v42  ;;  %v14356_v8 = vrot.slane %v11507_v19, 3  ;;  %v14358_v33 = vunpack.i.l.bf16 %v10519_v23  ;;  %6994 = vmatprep.subr.bf16.mxu0 %v8879_v36  ;;  %v8851_v31 = vld [vmem:[#allocation2 + $0x2e8] sm:$0xff]  }
 0x2a6   : > { %v1918_v41 = vpop.permute.xlu0 %1917  ;;  %v1549_v56 = vsel %vm14353_vm10, %v1531_v2, %v14352_v6  ;;  %v1566_v22 = vsel %vm1551_vm14, %v1548_v57, %v14359_v11  ;;  %v8781_v37 = vpop.permute.xlu1 %8780  ;;  %v8772_v38 = vunpack.i.l.bf16 %v8771_v15  ;;  %v8850_v6 = vld [vmem:[#allocation2 + $0x2b0] sm:$0xff]   ;;  %v8853_v11 = vld [vmem:[#allocation2 + $0x2e0] sm:$0xff]   ;;  %vm14365_vm2 = vcmask 392192  }
 0x2a7   : > { %6963 = vmatpush3.bf16.msra.mxu1 %v8846_v29  ;;  %v2032_v25 = vsel %vm1551_vm14, %v2014_v47, %v1918_v41  ;;  %v1567_v27 = vsel %vm1551_vm14, %v1549_v56, %v14358_v33  ;;  %v8783_v57 = vunpack.i.h.bf16 %v8781_v37  ;;  %vm14366_vm7 = vmmov %vm14365_vm2  ;;  %vm14367_vm8 = vcmask 613376  }
 0x2a8   : > { %7040 = vmatprep.subr.bf16.mxu1 %v8847_v32  ;;  %v2084_v43 = vrot.slane %v2032_v25, 3  ;;  %v14360_v25 = vld [vmem:[#allocation19_spill] sm:$0xff]  ;;  %vm14371_vm10 = vcmask 1040384   ;;  %vm14373_vm13 = vcmask 1041408  }
 0x2aa   : > { %4715 = vmatmul.mubr.bf16.gmra.mxu1 %v2950_v4  ;;  %v8756_v59 = vpop.permute.xlu0 %8755  ;;  %v2085_v29 = vsel %vm14357_vm11, %v14356_v8, %v2084_v43  ;;  %v14361_v4 = vpack.c.bf16 %v11569_v63, %v14360_v25  ;;  %v8858_v25 = vld [vmem:[#allocation2 + $0x290] sm:$0xff]   ;;  %vm14374_vm11 = vcmask 1045504  }
 0x2ab   : > { %4828 = vmatprep.mubr.bf16.mxu1 %v11657_v52  ;;  %v8758_v5 = vunpack.i.h.bf16 %v8756_v59  ;;  %v8757_v61 = vunpack.i.l.bf16 %v8756_v59  ;;  %2118 = vrot.lane.b32.xlu0 %v2085_v29, %s14075_s20  ;;  %v8848_v52 = vld [vmem:[#allocation2 + $0x2b8] sm:$0xff]   ;;  %v8782_v59 = vunpack.i.l.bf16 %v8781_v37 }
 0x2ac   : > { %v14363_v37 = vld [vmem:[#allocation30_spill] sm:$0xff] }
 0x2ad   : > { %v1585_v19 = vsel %vm1569_vm5, %v1567_v27, %v8758_v5  ;;  %v1584_v35 = vsel %vm1569_vm5, %v1566_v22, %v8757_v61  ;;  %v8791_v5 = vpop.permute.xlu1 %8790 }
 0x2ae   : > { %v8766_v32 = vpop.permute.xlu0 %8765  ;;  %v1602_v23 = vsel %vm1587_vm3, %v1584_v35, %v8762_v0  ;;  %v1603_v41 = vsel %vm1587_vm3, %v1585_v19, %v8763_v30  ;;  %v8852_v0 = vld [vmem:[#allocation2 + $0x2a8] sm:$0xff]   ;;  %v8793_v22 = vunpack.i.h.bf16 %v8791_v5  ;;  %v8792_v19 = vunpack.i.l.bf16 %v8791_v5 }
 0x2af   : > { %v8768_v18 = vunpack.i.h.bf16 %v8766_v32  ;;  %v8767_v2 = vunpack.i.l.bf16 %v8766_v32 }
 0x2b1   : > { %v1620_v16 = vsel %vm1605_vm0, %v1602_v23, %v8767_v2  ;;  %v1621_v47 = vsel %vm1605_vm0, %v1603_v41, %v8768_v18  ;;  %v14364_v18 = vld [vmem:[#allocation59_spill] sm:$0xff]  ;;  %v8855_v23 = vld [vmem:[#allocation2 + $0x2d8] sm:$0xff]  }
 0x2b2   : > { %4829 = vmatmul.mubr.bf16.vlgmr.msra.gmra.mxu1 %v14361_v4  ;;  %v8776_v43 = vpop.permute.xlu0 %8775  ;;  %v1638_v8 = vsel %vm1623_vm6, %v1620_v16, %v8772_v38  ;;  %v1639_v29 = vsel %vm1623_vm6, %v1621_v47, %v8773_v26  ;;  %v8854_v26 = vld [vmem:[#allocation2 + $0x2a0] sm:$0xff]   ;;  %v8856_v41 = vld [vmem:[#allocation2 + $0x298] sm:$0xff]   ;;  %v8857_v16 = vld [vmem:[#allocation2 + $0x2d0] sm:$0xff]  }
 0x2b3   : > { %4836 = vmatprep.mubr.bf16.mxu1 %v14362_v14  ;;  %7041 = vmatpush3.bf16.msra.mxu1 %v8848_v52  ;;  %v8778_v56 = vunpack.i.h.bf16 %v8776_v43  ;;  %v8777_v15 = vunpack.i.l.bf16 %v8776_v43  ;;  %v14368_v47 = vld [vmem:[#allocation43_spill] sm:$0xff] }
 0x2b4   : > { %7042 = vmatprep.subr.bf16.mxu1 %v8849_v58  ;;  %v8859_v4 = vld [vmem:[#allocation2 + $0x2c8] sm:$0xff]  }
 0x2b5   : > { %v1656_v61 = vsel %vm1641_vm1, %v1638_v8, %v8777_v15  ;;  %v1657_v63 = vsel %vm1641_vm1, %v1639_v29, %v8778_v56  ;;  %v8860_v43 = vld [vmem:[#allocation2 + $0x288] sm:$0xff]   ;;  %v8862_v56 = vld [vmem:[#allocation2 + $0x280] sm:$0xff]  }
 0x2b6   : > { %v8786_v30 = vpop.permute.xlu0 %8785  ;;  %v1674_v35 = vsel %vm1659_vm15, %v1656_v61, %v8782_v59  ;;  %v1675_v32 = vsel %vm1659_vm15, %v1657_v63, %v8783_v57  ;;  %v8895_v59 = vld [vmem:[#allocation2 + $0x3f8] sm:$0xff]  }
 0x2b7   : > { %7043 = vmatpush3.bf16.msra.mxu1 %v8850_v6  ;;  %v8788_v33 = vunpack.i.h.bf16 %v8786_v30  ;;  %v8787_v27 = vunpack.i.l.bf16 %v8786_v30  ;;  %v8861_v6 = vld [vmem:[#allocation2 + $0x2c0] sm:$0xff]  }
 0x2b8   : > { %7044 = vmatprep.subr.bf16.mxu1 %v8851_v31  ;;  %v12211_v31 = vld [vmem:[%s13465_s2] ss:$0 sm:$0xff] }
 0x2b9   : > { %v1692_v52 = vsel %vm1677_vm4, %v1674_v35, %v8787_v27  ;;  %v1693_v36 = vsel %vm1677_vm4, %v1675_v32, %v8788_v33 }
 0x2ba   : > { %4837 = vmatmul.mubr.bf16.gmra.mxu1 %v14363_v37  ;;  %v2152_v2 = vsel %vm14365_vm2, %v1692_v52, %v8792_v19  ;;  %v2153_v58 = vsel %vm14366_vm7, %v1693_v36, %v8793_v22  ;;  %v2712_v19 = vrot.slane %v12150_v42, 3  ;;  %v14370_v52 = vrot.slane %v11849_v60, 7 }
 0x2bb   : > { %4844 = vmatprep.mubr.bf16.mxu1 %v14364_v18  ;;  %7045 = vmatpush3.bf16.msra.mxu1 %v8852_v0  ;;  %v2162_v38 = vpack.c.bf16 %v2153_v58, %v2152_v2  ;;  %v14369_v0 = vld [vmem:[#allocation17_spill] sm:$0xff]  ;;  %v14372_v2 = vrot.slane %v11849_v60, 6  ;;  %vm14376_vm2 = vcmask 1042432   ;;  %vm14378_vm7 = vcmask 1044480  }
 0x2bc   : > { %7046 = vmatprep.subr.bf16.mxu1 %v8853_v11  ;;  %v2697_v33 = vrot.slane %v14369_v0, 3 }
 0x2bd   : > { %7567 = vmatmul.mubr.msk.bf16.gmra.mxu0 %vm14367_vm8, %v2162_v38  ;;  %vm14380_vm8 = vmmov %vm14378_vm7 }
 0x2be   : > { %7570 = vmatprep.mubr.msk.bf16.mxu0 %vm14000_vm9, %v13861_v45 }
 0x2bf   : > { %7047 = vmatpush3.bf16.msra.mxu1 %v8854_v26 }
 0x2c0   : > { %7048 = vmatprep.subr.bf16.mxu1 %v8855_v23 }
 0x2c2   : > { %4845 = vmatmul.mubr.bf16.gmra.mxu1 %v14368_v47 }
 0x2c3   : > { %4852 = vmatprep.mubr.bf16.mxu1 %v11908_v17  ;;  %7049 = vmatpush3.bf16.msra.mxu1 %v8856_v41  ;;  %v14375_v41 = vrot.slane %v11849_v60, 5 }
 0x2c4   : > { %7050 = vmatprep.subr.bf16.mxu1 %v8857_v16 }
 0x2c7   : > { %7051 = vmatpush3.bf16.msra.mxu1 %v8858_v25 }
 0x2c8   : > { %7052 = vmatprep.subr.bf16.mxu1 %v8859_v4 }
 0x2ca   : > { %4853 = vmatmul.mubr.bf16.gmra.mxu1 %v11925_v55 }
 0x2cb   : > { %7053 = vmatpush3.bf16.msra.mxu1 %v8860_v43 }
 0x2cc   : > { %7054 = vmatprep.subr.bf16.mxu1 %v8861_v6 }
 0x2cf   : > { %7055 = vmatpush3.bf16.msra.mxu1 %v8862_v56  ;;  %v14379_v56 = vrot.slane %v11881_v10, 3 }
 0x2d0   : > { %7132 = vmatprep.subr.bf16.mxu1 %v8895_v59  ;;  %v14384_v59 = vld [vmem:[#allocation66_spill] sm:$0xff] }
 0x2d1   : > { %v2317_v15 = vpop.f32.mrf.mxu0 }
 0x2d2   : > { %v2318_v57 = vadd.f32 %v12211_v31, %v2317_v15  ;;  %v12255_v15 = vsel %vm14380_vm8, %v14379_v56, %v2712_v19  ;;  %vm14391_vm8 = vmmov %vm14378_vm7 }
 0x2d3   : > { %v7560_v8 = vpop.f32.mrf.mxu0  ;;  %14381 = vst [vmem:[#allocation53_spill] sm:$0xff] %v12255_v15 }
 0x2d4   : > { %v12214_v29 = vmax.f32 %v2318_v57, 0.0 }
 0x2d5   : > { %v2320_v5 = vpop.f32.mrf.mxu0 }
 0x2d6   : > { %v2321_v61 = vadd.f32 %v12211_v31, %v2320_v5  ;;  %v2540_v63 = vrot.slane %v12214_v29, 7  ;;  %v2593_v30 = vrot.slane %v12214_v29, 5  ;;  %v2509_v11 = vrot.slane %v12214_v29, 6 }
 0x2d7   : > { %v7561_v27 = vpop.f32.mrf.mxu0  ;;  %v2561_v22 = vrot.slane %v12214_v29, 2  ;;  %v2554_v32 = vrot.slane %v12214_v29, 1  ;;  %v2643_v43 = vrot.slane %v12214_v29, 3 }
 0x2d8   : > { %v12223_v35 = vmax.f32 %v2321_v61, 0.0  ;;  %v2541_v36 = vsel %vm14371_vm10, %v14370_v52, %v2540_v63  ;;  %v2510_v58 = vsel %vm14373_vm13, %v14372_v2, %v2509_v11  ;;  %v12244_v16 = vsel %vm14376_vm2, %v14375_v41, %v2593_v30  ;;  %vm14383_vm13 = vmmov %vm14376_vm2 }
 0x2d9   : > { %v12234_v26 = vsel %vm14374_vm11, %v12131_v20, %v2561_v22  ;;  %v14377_v20 = vrot.slane %v11852_v1, 3  ;;  %vm14385_vm11 = vcmask 1046528   ;;  %v2720_v5 = vrot.slane %v2541_v36, 3 }
 0x2da   : > { %v12238_v38 = vpack.c.bf16 %v12223_v35, %v12214_v29  ;;  %v13736_v23 = vrot.slane %v12223_v35, 7  ;;  %v13737_v25 = vrot.slane %v12223_v35, 5  ;;  %v13738_v4 = vrot.slane %v12223_v35, 6 }
 0x2db   : > { %v2698_v6 = vsel %vm14378_vm7, %v14377_v20, %v2697_v33  ;;  %v2724_v1 = vrot.slane %v12234_v26, 3  ;;  %v12271_v8 = vsel %vm14385_vm11, %v14384_v59, %v2554_v32  ;;  %v2716_v27 = vrot.slane %v12244_v16, 3 }
 0x2dc   : > { %4860 = vmatprep.mubr.bf16.mxu1 %v12238_v38  ;;  %v12261_v60 = vsel %vm14371_vm10, %v2540_v63, %v13736_v23  ;;  %v12266_v57 = vsel %vm14383_vm13, %v2593_v30, %v13737_v25  ;;  %v2718_v52 = vrot.slane %v2510_v58, 3  ;;  %vm14386_vm2 = vcmask 1041408   ;;  %v14388_v23 = vld [vmem:[#allocation46_spill] sm:$0xff]  ;;  %v14389_v25 = vld [vmem:[#allocation36_spill] sm:$0xff]  ;;  %vm14392_vm10 = vmmov %vm14378_vm7 }
 0x2dd   : > { %14382 = vst [vmem:[#allocation27_spill] sm:$0xff] %v12261_v60  ;;  %v12274_v61 = vpack.c.bf16 %v12261_v60, %v2541_v36  ;;  %v12282_v30 = vsel %vm14386_vm2, %v2509_v11, %v13738_v4  ;;  %v2710_v41 = vrot.slane %v12271_v8, 3  ;;  %v12291_v56 = vrot.slane %v12223_v35, 2  ;;  %vm14397_vm2 = vmmov %vm14378_vm7 }
 0x2de   : > { %14387 = vst [vmem:[#allocation81_spill] sm:$0xff] %v12282_v30  ;;  %v12288_v36 = vpack.c.bf16 %v12282_v30, %v2510_v58  ;;  %v12294_v59 = vrot.slane %v12223_v35, 1  ;;  %v14390_v2 = vpack.c.bf16 %v14388_v23, %v14389_v25  ;;  %v2644_v11 = vsel %vm14378_vm7, %v11884_v24, %v2643_v43  ;;  %vm14400_vm7 = vmmov %vm14397_vm2  ;;  %v8896_v24 = vld [vmem:[#allocation2 + $0x3b8] sm:$0xff]  }
 0x2df   : > { %4861 = vmatmul.mubr.bf16.gmra.mxu1 %v12274_v61  ;;  %v2711_v4 = vsel %vm14391_vm8, %v2697_v33, %v2710_v41  ;;  %v12303_v63 = vsel %vm14392_vm10, %v2712_v19, %v2724_v1  ;;  %vm14394_vm13 = vcmask 1045504   ;;  %v2726_v23 = vrot.slane %v2644_v11, 3  ;;  %vm14402_vm8 = vmmov %vm14397_vm2 }
 0x2e0   : > { %4974 = vmatprep.mubr.bf16.mxu1 %v14390_v2  ;;  %14393 = vst [vmem:[#allocation71_spill] sm:$0xff] %v12303_v63  ;;  %v12308_v20 = vsel %vm14394_vm13, %v2561_v22, %v12291_v56  ;;  %v12312_v12 = vsel %vm14385_vm11, %v2554_v32, %v12294_v59  ;;  %v12314_v25 = vpack.c.bf16 %v2711_v4, %v2698_v6  ;;  %v14396_v58 = vrot.slane %v11913_v48, 3  ;;  %vm14404_vm10 = vmmov %vm14397_vm2 }
 0x2e1   : > { %v14399_v6 = vrot.slane %v12223_v35, 3  ;;  %v14401_v22 = vrot.slane %v12312_v12, 3  ;;  %vm14407_vm13 = vmmov %vm14397_vm2  ;;  %v14409_v19 = vrot.slane %v12282_v30, 3 }
 0x2e2   : > { %14395 = vst [vmem:[#allocation70_spill] sm:$0xff] %v12314_v25  ;;  %v12327_v32 = vsel %vm14397_vm2, %v14396_v58, %v2726_v23  ;;  %v14403_v58 = vrot.slane %v12308_v20, 3  ;;  %vm14410_vm11 = vmmov %vm14397_vm2 }
 0x2e3   : > { %14398 = vst [vmem:[#allocation73_spill] sm:$0xff] %v12327_v32  ;;  %v12334_v33 = vsel %vm14400_vm7, %v2643_v43, %v14399_v6  ;;  %v12342_v48 = vsel %vm14402_vm8, %v2710_v41, %v14401_v22  ;;  %v14406_v6 = vrot.slane %v11974_v51, 3  ;;  %v12360_v45 = vsel %vm14410_vm11, %v2718_v52, %v14409_v19  ;;  %v14412_v41 = vld [vmem:[#allocation65_spill] sm:$0xff]  ;;  %vm14416_vm7 = vmmov %vm14397_vm2 }
 0x2e4   : > { %v12347_v4 = vsel %vm14404_vm10, %v2724_v1, %v14403_v58  ;;  %v12350_v43 = vpack.c.bf16 %v12334_v33, %v2644_v11  ;;  %14411 = vst [vmem:[#allocation72_spill] sm:$0xff] %v12360_v45  ;;  %v14413_v22 = vrot.slane %v14412_v41, 3  ;;  %v14415_v1 = vrot.slane %v12334_v33, 3  ;;  %vm14418_vm8 = vmmov %vm14397_vm2  ;;  %v14423_v41 = vld [vmem:[#allocation29_spill] sm:$0xff]  ;;  %v8902_v45 = vld [vmem:[#allocation2 + $0x3e8] sm:$0xff]  }
 0x2e5   : > { %v12355_v2 = vsel %vm14407_vm13, %v14406_v6, %v2718_v52  ;;  %v14417_v58 = vrot.slane %v12261_v60, 3  ;;  %v14420_v52 = vrot.slane %v11930_v34, 3  ;;  %vm14421_vm10 = vmmov %vm14397_vm2  ;;  %v14429_v60 = vld [vmem:[#allocation42_spill] sm:$0xff]  ;;  %vm14437_vm11 = vcmask 1043456  }
 0x2e6   : > { %14405 = vst [vmem:[#allocation69_spill] sm:$0xff] %v12350_v43  ;;  %14408 = vst [vmem:[#allocation74_spill] sm:$0xff] %v12355_v2  ;;  %v12365_v15 = vsel %vm14397_vm2, %v14413_v22, %v2720_v5  ;;  %v12370_v11 = vsel %vm14416_vm7, %v2726_v23, %v14415_v1  ;;  %v14424_v22 = vld [vmem:[#allocation44_spill] sm:$0xff]  ;;  %v14426_v1 = vrot.slane %v12266_v57, 3  ;;  %v8905_v23 = vld [vmem:[#allocation2 + $0x3e0] sm:$0xff]   ;;  %vm14440_vm7 = vcmask 97280  }
 0x2e7   : > { %14414 = vst [vmem:[#allocation16_spill] sm:$0xff] %v12365_v15  ;;  %v12377_v6 = vsel %vm14418_vm8, %v2720_v5, %v14417_v58  ;;  %v12382_v19 = vsel %vm14421_vm10, %v14420_v52, %v2716_v27  ;;  %v14425_v30 = vpack.c.bf16 %v14423_v41, %v14424_v22  ;;  %vm14427_vm13 = vmmov %vm14397_vm2  ;;  %v14430_v5 = vld [vmem:[#allocation32_spill] sm:$0xff]  ;;  %vm14443_vm8 = vcmask 121856  }
 0x2e8   : > { %14419 = vst [vmem:[#allocation76_spill] sm:$0xff] %v12377_v6  ;;  %14422 = vst [vmem:[#allocation54_spill] sm:$0xff] %v12382_v19  ;;  %v12392_v51 = vsel %vm14427_vm13, %v2716_v27, %v14426_v1  ;;  %v14431_v58 = vpack.c.bf16 %v14429_v60, %v14430_v5  ;;  %v8900_v2 = vld [vmem:[#allocation2 + $0x3b0] sm:$0xff]   ;;  %v8907_v60 = vld [vmem:[#allocation2 + $0x3a0] sm:$0xff]   ;;  %vm14448_vm10 = vcmask 171008  }
 0x2e9   : > { %4975 = vmatmul.mubr.bf16.vlgmr.msra.gmra.mxu1 %v14425_v30  ;;  %14428 = vst [vmem:[#allocation28_spill] sm:$0xff] %v12392_v51  ;;  %v8904_v30 = vld [vmem:[#allocation2 + $0x3a8] sm:$0xff]   ;;  %v8910_v5 = vld [vmem:[#allocation2 + $0x398] sm:$0xff]   ;;  %vm14438_vm2 = vmmov %vm14437_vm11 }
 0x2ea   : > { %4982 = vmatprep.mubr.bf16.mxu1 %v14431_v58  ;;  %7133 = vmatpush3.bf16.msra.mxu1 %v8896_v24  ;;  %v14432_v15 = vld [vmem:[#allocation52_spill] sm:$0xff]  ;;  %v8909_v24 = vld [vmem:[#allocation2 + $0x3d8] sm:$0xff]   ;;  %v13750_v58 = vrot.slane %v12223_v35, 4  ;;  %v14444_v51 = vld [vmem:[#allocation39_spill] sm:$0xff] }
 0x2eb   : > { %7134 = vmatprep.subr.bf16.mxu1 %v8899_v21  ;;  %v14433_v6 = vpack.c.bf16 %v11800_v3, %v14432_v15  ;;  %v14434_v27 = vld [vmem:[#allocation60_spill] sm:$0xff]  ;;  %v14445_v43 = vunpack.i.h.bf16 %v14444_v51 }
 0x2ec   : > { %v14435_v1 = vpack.c.bf16 %v11930_v34, %v14434_v27  ;;  %v8913_v21 = vld [vmem:[#allocation2 + $0x3d0] sm:$0xff]  }
 0x2ee   : > { %7135 = vmatpush3.bf16.msra.mxu1 %v8900_v2 }
 0x2ef   : > { %7136 = vmatprep.subr.bf16.mxu1 %v8902_v45  ;;  %v2937_v45 = vpack.c.bf16 %v12266_v57, %v12244_v16 }
 0x2f1   : > { %4983 = vmatmul.mubr.bf16.gmra.mxu1 %v14433_v6  ;;  %v14436_v6 = vpack.c.bf16 %v11969_v7, %v11939_v13 }
 0x2f2   : > { %4990 = vmatprep.mubr.bf16.mxu1 %v14435_v1  ;;  %7137 = vmatpush3.bf16.msra.mxu1 %v8904_v30  ;;  %v2569_v30 = vrot.slane %v12214_v29, 4  ;;  %v8917_v1 = vld [vmem:[#allocation2 + $0x3c8] sm:$0xff]  }
 0x2f3   : > { %7138 = vmatprep.subr.bf16.mxu1 %v8905_v23  ;;  %v8914_v23 = vld [vmem:[#allocation2 + $0x390] sm:$0xff]   ;;  %v14439_v29 = vld [vmem:[#allocation35_spill] sm:$0xff] }
 0x2f4   : > { %v2572_v16 = vsel %vm14437_vm11, %v2569_v30, %v13750_v58  ;;  %v8927_v58 = vld [vmem:[#allocation2 + $0x4f8] sm:$0xff]  }
 0x2f6   : > { %7139 = vmatpush3.bf16.msra.mxu1 %v8907_v60  ;;  %v6826_v2 = vpop.f32.mrf.mxu1  ;;  %v705_v60 = vpop.permute.xlu0 %704 }
 0x2f7   : > { %7140 = vmatprep.subr.bf16.mxu1 %v8909_v24  ;;  %v2570_v24 = vsel %vm14438_vm2, %v11947_v39, %v2569_v30 }
 0x2f8   : > { %v6827_v34 = vpop.f32.mrf.mxu1  ;;  %v2936_v52 = vpack.c.bf16 %v2572_v16, %v2570_v24 }
 0x2f9   : > { %4991 = vmatmul.mubr.bf16.gmra.mxu1 %v14436_v6  ;;  %v12412_v27 = vadd.f32 %v6827_v34, %v6826_v2  ;;  %v8918_v6 = vld [vmem:[#allocation2 + $0x388] sm:$0xff]   ;;  %v14441_v2 = vld [vmem:[#allocation14_spill] sm:$0xff] }
 0x2fa   : > { %4998 = vmatprep.mubr.bf16.mxu1 %v2937_v45  ;;  %7141 = vmatpush3.bf16.msra.mxu1 %v8910_v5  ;;  %v8921_v45 = vld [vmem:[#allocation2 + $0x3c0] sm:$0xff]   ;;  %v1496_v5 = vsel %vm14440_vm7, %v14439_v29, %v705_v60  ;;  %v14442_v34 = vunpack.i.h.bf16 %v14441_v2  ;;  %v1042_v60 = vpop.permute.xlu1 %1041  ;;  %v12433_v29 = vpop.f32.mrf.mxu1 }
 0x2fb   : > { %7142 = vmatprep.subr.bf16.mxu1 %v8913_v21  ;;  %v8922_v21 = vld [vmem:[#allocation2 + $0x380] sm:$0xff]  }
 0x2fc   : > { %v1514_v19 = vsel %vm14443_vm8, %v1496_v5, %v14442_v34  ;;  %v1100_v5 = vpop.permute.xlu0 %1099  ;;  %v12436_v51 = vpop.f32.mrf.mxu1 }
 0x2fd   : > { %v1532_v30 = vsel %vm1515_vm12, %v1514_v19, %v14445_v43  ;;  %vm14478_vm12 = vmmov %vm14427_vm13 }
 0x2fe   : > { %7143 = vmatpush3.bf16.msra.mxu1 %v8914_v23  ;;  %v14446_v23 = vld [vmem:[#allocation22_spill] sm:$0xff]  ;;  %v1187_v2 = vpop.permute.xlu1 %1186  ;;  %vm14483_vm13 = vmmov %vm14478_vm12 }
 0x2ff   : > { %7144 = vmatprep.subr.bf16.mxu1 %v8917_v1  ;;  %v14447_v1 = vunpack.i.l.bf16 %v14446_v23  ;;  %vm14486_vm11 = vmmov %vm14478_vm12 }
 0x300   : > { %vm14489_vm7 = vmmov %vm14486_vm11 }
 0x301   : > { %4999 = vmatmul.mubr.bf16.gmra.mxu1 %v2936_v52  ;;  %v1550_v16 = vsel %vm14448_vm10, %v1532_v30, %v14447_v1  ;;  %v14449_v52 = vld [vmem:[#allocation26_spill] sm:$0xff]  ;;  %vm14490_vm8 = vmmov %vm14489_vm7 }
 0x302   : > { %7145 = vmatpush3.bf16.msra.mxu1 %v8918_v6  ;;  %v14450_v24 = vunpack.i.l.bf16 %v14449_v52  ;;  %v1297_v23 = vpop.permute.xlu1 %1296  ;;  %vm14493_vm10 = vmmov %vm14489_vm7 }
 0x303   : > { %7146 = vmatprep.subr.bf16.mxu1 %v8921_v45 }
 0x304   : > { %v1568_v6 = vsel %vm1551_vm14, %v1550_v16, %v14450_v24  ;;  %vm14480_vm14 = vmmov %vm14478_vm12 }
 0x305   : > { %v1586_v45 = vsel %vm1569_vm5, %v1568_v6, %v1042_v60  ;;  %vm14452_vm5 = vcmask 613376  }
 0x306   : > { %7147 = vmatpush3.bf16.msra.mxu1 %v8922_v21  ;;  %v1604_v43 = vsel %vm1587_vm3, %v1586_v45, %v1100_v5  ;;  %v1407_v24 = vpop.permute.xlu1 %1406  ;;  %vm14451_vm3 = vcmask 392192  }
 0x307   : > { %7224 = vmatprep.subr.bf16.mxu1 %v8927_v58  ;;  %v1242_v58 = vpop.permute.xlu0 %1241  ;;  %v1622_v34 = vsel %vm1605_vm0, %v1604_v43, %v1187_v2  ;;  %v14453_v2 = vld [vmem:[#allocation48_spill] sm:$0xff]  ;;  %v14454_v43 = vld [vmem:[#allocation18_spill] sm:$0xff]  ;;  %vm14468_vm0 = vcmask 1045504  }
 0x308   : > { %v1640_v1 = vsel %vm1623_vm6, %v1622_v34, %v1242_v58  ;;  %v8880_v58 = vld [vmem:[#allocation2 + $0x238] sm:$0xff]  }
 0x309   : > { %v1658_v52 = vsel %vm1641_vm1, %v1640_v1, %v1297_v23  ;;  %v8881_v23 = vld [vmem:[#allocation2 + $0x270] sm:$0xff]   ;;  %vm14471_vm1 = vmmov %vm14438_vm2 }
 0x30a   : > { %v14456_v1 = vld [vmem:[#allocation24_spill] sm:$0xff] }
 0x30b   : > { %v1348_v16 = vpop.permute.xlu0 %1347 }
 0x30c   : > { %v1676_v60 = vsel %vm1659_vm15, %v1658_v52, %v1348_v16  ;;  %v14457_v16 = vld [vmem:[#allocation25_spill] sm:$0xff]  ;;  %vm14482_vm15 = vcmask 1046528  }
 0x30d   : > { %v1694_v6 = vsel %vm1677_vm4, %v1676_v60, %v1407_v24  ;;  %v14458_v52 = vpack.c.bf16 %v14456_v1, %v14457_v16  ;;  %v14459_v24 = vld [vmem:[#allocation49_spill] sm:$0xff]  ;;  %v8886_v16 = vld [vmem:[#allocation2 + $0x220] sm:$0xff]   ;;  %vm14473_vm4 = vcmask 1042432   ;;  %vm14487_vm2 = vmmov %vm14482_vm15 }
 0x30e   : > { %v14462_v1 = vld [vmem:[#allocation61_spill] sm:$0xff]  ;;  %vm14474_vm6 = vmmov %vm14473_vm4 }
 0x311   : > { %v6832_v19 = vpop.f32.mrf.mxu1 }
 0x313   : > { %v6833_v21 = vpop.f32.mrf.mxu1 }
 0x314   : > { %v12440_v30 = vadd.f32 %v6833_v21, %v6832_v19  ;;  %v14455_v19 = vpack.c.bf16 %v14453_v2, %v14454_v43  ;;  %v8884_v2 = vld [vmem:[#allocation2 + $0x228] sm:$0xff]   ;;  %v8885_v43 = vld [vmem:[#allocation2 + $0x260] sm:$0xff]  }
 0x315   : > { %v12451_v21 = vpop.f32.mrf.mxu1 }
 0x317   : > { %v12453_v34 = vpop.f32.mrf.mxu1 }
 0x31d   : > { %v2119_v63 = vpop.permute.xlu0 %2118 }
 0x31e   : > { %v2154_v5 = vsel %vm14451_vm3, %v1694_v6, %v2119_v63  ;;  %v8882_v63 = vld [vmem:[#allocation2 + $0x230] sm:$0xff]   ;;  %vm14495_vm3 = vmmov %vm14489_vm7 }
 0x31f   : > { %v2163_v45 = vpack.c.bf16 %v2154_v5, %v2154_v5  ;;  %v8883_v5 = vld [vmem:[#allocation2 + $0x268] sm:$0xff]  }
 0x321   : > { %7571 = vmatmul.mubr.msk.bf16.gmra.mxu0 %vm14452_vm5, %v2163_v45  ;;  %vm14496_vm5 = vmmov %vm14495_vm3 }
 0x322   : > { %4755 = vmatprep.mubr.bf16.mxu0 %v14455_v19  ;;  %v14460_v19 = vld [vmem:[#allocation23_spill] sm:$0xff] }
 0x323   : > { %v14461_v25 = vpack.c.bf16 %v14424_v22, %v14460_v19 }
 0x329   : > { %4756 = vmatmul.mubr.bf16.vlgmr.msra.gmra.mxu0 %v14458_v52 }
 0x32a   : > { %v6838_v60 = vpop.f32.mrf.mxu1  ;;  %4763 = vmatprep.mubr.bf16.mxu0 %v14459_v24  ;;  %6995 = vmatpush3.bf16.msra.mxu0 %v8880_v58  ;;  %v8887_v58 = vld [vmem:[#allocation2 + $0x258] sm:$0xff]  }
 0x32b   : > { %6996 = vmatprep.subr.bf16.mxu0 %v8881_v23  ;;  %v8888_v23 = vld [vmem:[#allocation2 + $0x218] sm:$0xff]  }
 0x32c   : > { %v6839_v6 = vpop.f32.mrf.mxu1 }
 0x32d   : > { %v12459_v45 = vadd.f32 %v6839_v6, %v6838_v60  ;;  %v14463_v6 = vpack.c.bf16 %v14432_v15, %v14423_v41  ;;  %v14464_v15 = vpack.c.bf16 %v11939_v13, %v11800_v3  ;;  %v12494_v3 = vld [vmem:[%s13467_s4] ss:$0 sm:$0xff] }
 0x32e   : > { %6997 = vmatpush3.bf16.msra.mxu0 %v8882_v63  ;;  %v12465_v52 = vpop.f32.mrf.mxu1  ;;  %v8889_v63 = vld [vmem:[#allocation2 + $0x250] sm:$0xff]  }
 0x32f   : > { %6998 = vmatprep.subr.bf16.mxu0 %v8883_v5 }
 0x330   : > { %v12467_v60 = vpop.f32.mrf.mxu1 }
 0x331   : > { %4764 = vmatmul.mubr.bf16.gmra.mxu0 %v14461_v25  ;;  %v8890_v25 = vld [vmem:[#allocation2 + $0x210] sm:$0xff]  }
 0x332   : > { %4771 = vmatprep.mubr.bf16.mxu0 %v14462_v1  ;;  %6999 = vmatpush3.bf16.msra.mxu0 %v8884_v2  ;;  %v8891_v2 = vld [vmem:[#allocation2 + $0x248] sm:$0xff]  }
 0x333   : > { %7000 = vmatprep.subr.bf16.mxu0 %v8885_v43 }
 0x336   : > { %7001 = vmatpush3.bf16.msra.mxu0 %v8886_v16  ;;  %v8892_v16 = vld [vmem:[#allocation2 + $0x208] sm:$0xff]  }
 0x337   : > { %7002 = vmatprep.subr.bf16.mxu0 %v8887_v58 }
 0x339   : > { %4772 = vmatmul.mubr.bf16.gmra.mxu0 %v14463_v6  ;;  %v8897_v6 = vld [vmem:[#allocation2 + $0x378] sm:$0xff]  }
 0x33a   : > { %v6844_v22 = vpop.f32.mrf.mxu1  ;;  %4779 = vmatprep.mubr.bf16.mxu0 %v11983_v28  ;;  %7003 = vmatpush3.bf16.msra.mxu0 %v8888_v23  ;;  %v8894_v23 = vld [vmem:[#allocation2 + $0x200] sm:$0xff]  }
 0x33b   : > { %7004 = vmatprep.subr.bf16.mxu0 %v8889_v63 }
 0x33c   : > { %v6845_v5 = vpop.f32.mrf.mxu1 }
 0x33d   : > { %v12473_v43 = vadd.f32 %v6845_v5, %v6844_v22 }
 0x33e   : > { %v12475_v19 = vpop.f32.mrf.mxu1  ;;  %7005 = vmatpush3.bf16.msra.mxu0 %v8890_v25 }
 0x33f   : > { %7006 = vmatprep.subr.bf16.mxu0 %v8891_v2  ;;  %v2952_v2 = vpack.c.bf16 %v11947_v39, %v11969_v7  ;;  %v8898_v7 = vld [vmem:[#allocation2 + $0x338] sm:$0xff]  }
 0x340   : > { %v12477_v58 = vpop.f32.mrf.mxu1 }
 0x341   : > { %4780 = vmatmul.mubr.bf16.gmra.mxu0 %v14464_v15  ;;  %v6831_v15 = vadd.f32 %v12436_v51, %v12433_v29  ;;  %v8906_v51 = vld [vmem:[#allocation2 + $0x368] sm:$0xff]  }
 0x342   : > { %v6850_v41 = vpop.f32.mrf.mxu1  ;;  %4787 = vmatprep.mubr.bf16.mxu0 %v12288_v36  ;;  %7007 = vmatpush3.bf16.msra.mxu0 %v8892_v16  ;;  %v4612_v16 = vadd.f32 %v12412_v27, %v12494_v3  ;;  %v8903_v27 = vld [vmem:[#allocation2 + $0x330] sm:$0xff]  }
 0x343   : > { %7008 = vmatprep.subr.bf16.mxu0 %v8893_v62  ;;  %v4615_v46 = vadd.f32 %v6831_v15, %v12494_v3 }
 0x344   : > { %v6851_v63 = vpop.f32.mrf.mxu1 }
 0x345   : > { %v12483_v22 = vadd.f32 %v6851_v63, %v6850_v41 }
 0x346   : > { %v12485_v25 = vpop.f32.mrf.mxu1  ;;  %7009 = vmatpush3.bf16.msra.mxu0 %v8894_v23 }
 0x347   : > { %7086 = vmatprep.subr.bf16.mxu0 %v8897_v6  ;;  %v8901_v6 = vld [vmem:[#allocation2 + $0x370] sm:$0xff]  }
 0x348   : > { %v12487_v5 = vpop.f32.mrf.mxu1 }
 0x349   : > { %4788 = vmatmul.mubr.bf16.gmra.mxu0 %v2952_v2 }
 0x34a   : > { %v6872_v13 = vpop.f32.mrf.mxu1  ;;  %4901 = vmatprep.mubr.bf16.mxu0 %v11649_v40 }
 0x34c   : > { %v6873_v62 = vpop.f32.mrf.mxu1 }
 0x34d   : > { %v6874_v41 = vadd.f32 %v6873_v62, %v6872_v13  ;;  %v4620_v13 = vadd.f32 %v12440_v30, %v12494_v3  ;;  %v6837_v62 = vadd.f32 %v12453_v34, %v12451_v21  ;;  %v8912_v30 = vld [vmem:[#allocation2 + $0x320] sm:$0xff]   ;;  %v8915_v34 = vld [vmem:[#allocation2 + $0x358] sm:$0xff]  }
 0x34e   : > { %v6875_v23 = vpop.f32.mrf.mxu1 }
 0x34f   : > { %v12501_v39 = vadd.f32 %v6874_v41, %v4612_v16 }
 0x350   : > { %v6876_v63 = vpop.f32.mrf.mxu1 }
 0x351   : > { %v6877_v2 = vadd.f32 %v6876_v63, %v6875_v23  ;;  %4902 = vmatmul.mubr.bf16.vlgmr.msra.gmra.mxu0 %v14465_v9  ;;  %v4623_v23 = vadd.f32 %v6837_v62, %v12494_v3  ;;  %v14466_v63 = vld [vmem:[#allocation33_spill] sm:$0xff] }
 0x352   : > { %v6878_v40 = vpop.f32.mrf.mxu1  ;;  %4909 = vmatprep.mubr.bf16.mxu0 %v12104_v44  ;;  %7087 = vmatpush3.bf16.msra.mxu0 %v8898_v7  ;;  %v8911_v44 = vld [vmem:[#allocation2 + $0x360] sm:$0xff]  }
 0x353   : > { %v12505_v32 = vadd.f32 %v6877_v2, %v4615_v46  ;;  %7088 = vmatprep.subr.bf16.mxu0 %v8901_v6  ;;  %v8908_v46 = vld [vmem:[#allocation2 + $0x328] sm:$0xff]  }
 0x354   : > { %v6879_v29 = vpop.f32.mrf.mxu1 }
 0x355   : > { %v6880_v16 = vadd.f32 %v6879_v29, %v6878_v40  ;;  %v4628_v40 = vadd.f32 %v12459_v45, %v12494_v3 }
 0x356   : > { %v6881_v15 = vpop.f32.mrf.mxu1  ;;  %7089 = vmatpush3.bf16.msra.mxu0 %v8903_v27  ;;  %v6843_v27 = vadd.f32 %v12467_v60, %v12465_v52  ;;  %v2935_v52 = vpack.c.bf16 %v12234_v26, %v12150_v42 }
 0x357   : > { %v12512_v41 = vadd.f32 %v6880_v16, %v4620_v13  ;;  %7090 = vmatprep.subr.bf16.mxu0 %v8906_v51 }
 0x358   : > { %v6882_v9 = vpop.f32.mrf.mxu1  ;;  %v4631_v45 = vadd.f32 %v6843_v27, %v12494_v3  ;;  %v8920_v27 = vld [vmem:[#allocation2 + $0x310] sm:$0xff]  }
 0x359   : > { %v6883_v7 = vadd.f32 %v6882_v9, %v6881_v15  ;;  %4910 = vmatmul.mubr.bf16.gmra.mxu0 %v14466_v63  ;;  %v14467_v63 = vld [vmem:[#allocation64_spill] sm:$0xff] }
 0x35a   : > { %v6884_v6 = vpop.f32.mrf.mxu1  ;;  %4917 = vmatprep.mubr.bf16.mxu0 %v12122_v53  ;;  %7091 = vmatpush3.bf16.msra.mxu0 %v8908_v46  ;;  %v8916_v53 = vld [vmem:[#allocation2 + $0x318] sm:$0xff]  }
 0x35b   : > { %v12516_v2 = vadd.f32 %v6883_v7, %v4623_v23  ;;  %7092 = vmatprep.subr.bf16.mxu0 %v8911_v44  ;;  %v8919_v44 = vld [vmem:[#allocation2 + $0x350] sm:$0xff]  }
 0x35c   : > { %v6885_v21 = vpop.f32.mrf.mxu1  ;;  %v2325_v29 = vpop.f32.mrf.mxu0 }
 0x35d   : > { %v6886_v51 = vadd.f32 %v6885_v21, %v6884_v6  ;;  %v2326_v13 = vadd.f32 %v12211_v31, %v2325_v29 }
 0x35e   : > { %v6887_v62 = vpop.f32.mrf.mxu1  ;;  %v7564_v15 = vpop.f32.mrf.mxu0  ;;  %7093 = vmatpush3.bf16.msra.mxu0 %v8912_v30 }
 0x35f   : > { %v12524_v16 = vadd.f32 %v6886_v51, %v4628_v40  ;;  %v12526_v46 = vmax.f32 %v2326_v13, 0.0  ;;  %7094 = vmatprep.subr.bf16.mxu0 %v8915_v34  ;;  %v4636_v15 = vadd.f32 %v12473_v43, %v12494_v3  ;;  %v14470_v43 = vrot.slane %v12223_v35, 4 }
 0x360   : > { %v6888_v9 = vpop.f32.mrf.mxu1  ;;  %v2328_v23 = vpop.f32.mrf.mxu0 }
 0x361   : > { %v6889_v7 = vadd.f32 %v6888_v9, %v6887_v62  ;;  %v2329_v60 = vadd.f32 %v12211_v31, %v2328_v23  ;;  %4918 = vmatmul.mubr.bf16.gmra.mxu0 %v14467_v63  ;;  %v13760_v30 = vrot.slane %v12526_v46, 2  ;;  %v2573_v34 = vrot.slane %v12526_v46, 4  ;;  %v8923_v62 = vld [vmem:[#allocation2 + $0x348] sm:$0xff]  }
 0x362   : > { %v6890_v6 = vpop.f32.mrf.mxu1  ;;  %v7565_v40 = vpop.f32.mrf.mxu0  ;;  %4925 = vmatprep.mubr.bf16.mxu0 %v2935_v52  ;;  %7095 = vmatpush3.bf16.msra.mxu0 %v8916_v53  ;;  %v2597_v13 = vrot.slane %v12526_v46, 5  ;;  %v6849_v9 = vadd.f32 %v12477_v58, %v12475_v19  ;;  %v14472_v58 = vrot.slane %v12223_v35, 5 }
 0x363   : > { %v12534_v21 = vadd.f32 %v6889_v7, %v4631_v45  ;;  %v12537_v29 = vmax.f32 %v2329_v60, 0.0  ;;  %7096 = vmatprep.subr.bf16.mxu0 %v8919_v44  ;;  %v12548_v53 = vsel %vm14468_vm0, %v12291_v56, %v13760_v30  ;;  %v2934_v44 = vpack.c.bf16 %v12271_v8, %v14369_v0  ;;  %v8924_v40 = vld [vmem:[#allocation2 + $0x308] sm:$0xff]  }
 0x364   : > { %v6891_v51 = vpop.f32.mrf.mxu1  ;;  %v2574_v60 = vsel %vm14471_vm1, %v14470_v43, %v2573_v34  ;;  %v12561_v63 = vsel %vm14473_vm4, %v14472_v58, %v2597_v13  ;;  %v13761_v0 = vrot.slane %v12548_v53, 3  ;;  %v2647_v8 = vrot.slane %v12526_v46, 3  ;;  %vm14499_vm1 = vmmov %vm14495_vm3 }
 0x365   : > { %v6892_v45 = vadd.f32 %v6891_v51, %v6890_v6  ;;  %v13759_v7 = vrot.slane %v12537_v29, 5  ;;  %v4639_v51 = vadd.f32 %v6849_v9, %v12494_v3  ;;  %v6855_v43 = vadd.f32 %v12487_v5, %v12485_v25  ;;  %vm14500_vm4 = vmmov %vm14487_vm2 }
 0x366   : > { %v6893_v23 = vpop.f32.mrf.mxu1  ;;  %7097 = vmatpush3.bf16.msra.mxu0 %v8920_v27  ;;  %v14476_v30 = vpack.c.bf16 %v12291_v56, %v12308_v20  ;;  %v2634_v5 = vrot.slane %v12526_v46, 1  ;;  %v2649_v56 = vrot.slane %v12537_v29, 3 }
 0x367   : > { %v12551_v52 = vadd.f32 %v6892_v45, %v4636_v15  ;;  %v12566_v6 = vsel %vm14474_vm6, %v2597_v13, %v13759_v7  ;;  %7098 = vmatprep.subr.bf16.mxu0 %v8923_v62  ;;  %v8925_v45 = vld [vmem:[#allocation2 + $0x340] sm:$0xff]   ;;  %v2955_v13 = vpack.c.bf16 %v2573_v34, %v2574_v60  ;;  %v4644_v62 = vadd.f32 %v12483_v22, %v12494_v3  ;;  %v8929_v60 = vld [vmem:[#allocation2 + $0x478] sm:$0xff]   ;;  %vm14501_vm6 = vmmov %vm14468_vm0 }
 0x368   : > { %v6894_v19 = vpop.f32.mrf.mxu1  ;;  %v2956_v15 = vpack.c.bf16 %v12566_v6, %v12561_v63  ;;  %v14479_v22 = vrot.slane %v12308_v20, 3 }
 0x369   : > { %14469 = vst [vmem:[#allocation58_spill] sm:$0xff] %v12551_v52  ;;  %v6895_v27 = vadd.f32 %v6894_v19, %v6893_v23  ;;  %4926 = vmatmul.mubr.bf16.gmra.mxu0 %v2934_v44  ;;  %v8926_v23 = vld [vmem:[#allocation2 + $0x300] sm:$0xff]   ;;  %v14477_v19 = vrot.slane %v12223_v35, 3  ;;  %v14481_v44 = vpack.c.bf16 %v11768_v54, %v11737_v50  ;;  %v12607_v50 = vsel %vm14483_vm13, %v2647_v8, %v2649_v56 }
 0x36a   : > { %v6896_v58 = vpop.f32.mrf.mxu1  ;;  %4933 = vmatprep.mubr.bf16.mxu0 %v14476_v30  ;;  %5006 = vmatprep.mubr.bf16.mxu1 %v2956_v15  ;;  %v12591_v34 = vsel %vm14480_vm14, %v14479_v22, %v13761_v0  ;;  %v4647_v15 = vadd.f32 %v6855_v43, %v12494_v3  ;;  %v2762_v3 = vrot.slane %v12607_v50, 3  ;;  %vm14504_vm14 = vmmov %vm14499_vm1 }
 0x36b   : > { %v12577_v7 = vadd.f32 %v6895_v27, %v4639_v51  ;;  %5007 = vmatmul.mubr.bf16.gmra.mxu1 %v2955_v13  ;;  %7099 = vmatpush3.bf16.msra.mxu0 %v8924_v40  ;;  %v2648_v25 = vsel %vm14478_vm12, %v14477_v19, %v2647_v8  ;;  %v2636_v27 = vrot.slane %v12537_v29, 1  ;;  %v2740_v13 = vrot.slane %v12561_v63, 3  ;;  %v8931_v51 = vld [vmem:[#allocation2 + $0x4f0] sm:$0xff]   ;;  %vm14502_vm12 = vmmov %vm14499_vm1 }
 0x36c   : > { %v6897_v9 = vpop.f32.mrf.mxu1  ;;  %5120 = vmatprep.mubr.bf16.mxu1 %v14481_v44  ;;  %7100 = vmatprep.subr.bf16.mxu0 %v8925_v45  ;;  %v2750_v40 = vrot.slane %v2648_v25, 3  ;;  %v14485_v45 = vrot.slane %v12334_v33, 3  ;;  %v13763_v63 = vrot.slane %v12566_v6, 3  ;;  %v12626_v33 = vpack.c.bf16 %v12607_v50, %v2648_v25 }
 0x36d   : > { %14475 = vst [vmem:[#allocation57_spill] sm:$0xff] %v12577_v7  ;;  %v6898_v30 = vadd.f32 %v6897_v9, %v6896_v58  ;;  %v2635_v58 = vsel %vm14482_vm15, %v12294_v59, %v2634_v5  ;;  %v12623_v8 = vsel %vm14487_vm2, %v2634_v5, %v2636_v27  ;;  %v14491_v5 = vpack.c.bf16 %v12294_v59, %v12312_v12 }
 0x36e   : > { %v6899_v19 = vpop.f32.mrf.mxu1  ;;  %v12614_v9 = vsel %vm14486_vm11, %v14485_v45, %v2750_v40  ;;  %v2734_v22 = vrot.slane %v2635_v58, 3  ;;  %v14488_v58 = vrot.slane %v12312_v12, 3  ;;  %v2746_v0 = vrot.slane %v12623_v8, 3 }
 0x36f   : > { %v12609_v54 = vadd.f32 %v6898_v30, %v4644_v62  ;;  %7101 = vmatpush3.bf16.msra.mxu0 %v8926_v23  ;;  %v8928_v30 = vld [vmem:[#allocation2 + $0x4b8] sm:$0xff]   ;;  %v12634_v23 = vsel %vm14490_vm8, %v2750_v40, %v2762_v3  ;;  %v14494_v12 = vrot.slane %v12266_v57, 3  ;;  %vm14505_vm15 = vcmask 1040384   ;;  %vm14515_vm8 = vmmov %vm14499_vm1 }
 0x370   : > { %v6900_v43 = vpop.f32.mrf.mxu1  ;;  %7178 = vmatprep.subr.bf16.mxu0 %v8929_v60  ;;  %v2735_v45 = vsel %vm14489_vm7, %v14488_v58, %v2734_v22  ;;  %v12651_v40 = vsel %vm14493_vm10, %v2734_v22, %v2746_v0  ;;  %v8934_v22 = vld [vmem:[#allocation2 + $0x4e8] sm:$0xff]   ;;  %vm14507_vm13 = vmmov %vm14505_vm15  ;;  %vm14512_vm7 = vcmask 1042432  }
 0x371   : > { %14484 = vst [vmem:[#allocation13_spill] sm:$0xff] %v12609_v54  ;;  %v6901_v62 = vadd.f32 %v6900_v43, %v6899_v19  ;;  %4934 = vmatmul.mubr.bf16.gmra.mxu0 %v14491_v5  ;;  %v12641_v19 = vpack.c.bf16 %v2735_v45, %v12342_v48  ;;  %v2907_v43 = vpack.c.bf16 %v12150_v42, %v11881_v10  ;;  %v8932_v10 = vld [vmem:[#allocation2 + $0x4b0] sm:$0xff]   ;;  %v8936_v5 = vld [vmem:[#allocation2 + $0x4a8] sm:$0xff]   ;;  %v14498_v42 = vrot.slane %v12526_v46, 2  ;;  %vm14509_vm11 = vmmov %vm14507_vm13 }
 0x372   : > { %v6964_v25 = vpop.f32.mrf.mxu1  ;;  %5047 = vmatprep.mubr.bf16.mxu0 %v14363_v37  ;;  %v12656_v59 = vsel %vm14495_vm3, %v14494_v12, %v2740_v13  ;;  %v12662_v37 = vsel %vm14496_vm5, %v2740_v13, %v13763_v63  ;;  %v8938_v12 = vld [vmem:[#allocation2 + $0x468] sm:$0xff]   ;;  %vm14510_vm2 = vmmov %vm14509_vm11 }
 0x373   : > { %v12643_v60 = vadd.f32 %v6901_v62, %v4647_v15  ;;  %5121 = vmatmul.mubr.bf16.vlgmr.msra.gmra.mxu1 %v14362_v14  ;;  %v8930_v62 = vld [vmem:[#allocation2 + $0x438] sm:$0xff]   ;;  %v8933_v14 = vld [vmem:[#allocation2 + $0x470] sm:$0xff]   ;;  %vm14516_vm10 = vmmov %vm14499_vm1 }
 0x374   : > { %v6965_v48 = vpop.f32.mrf.mxu1  ;;  %5128 = vmatprep.mubr.bf16.mxu1 %v2907_v43  ;;  %7225 = vmatpush3.bf16.msra.mxu1 %v8928_v30  ;;  %v8935_v30 = vld [vmem:[#allocation2 + $0x430] sm:$0xff]   ;;  %v2626_v43 = vrot.slane %v12537_v29, 2  ;;  %vm14517_vm3 = vmmov %vm14512_vm7 }
 0x375   : > { %14492 = vst [vmem:[#allocation11_spill] sm:$0xff] %v12643_v60  ;;  %v12664_v15 = vadd.f32 %v6965_v48, %v6964_v25  ;;  %7226 = vmatprep.subr.bf16.mxu1 %v8931_v51  ;;  %v8937_v25 = vld [vmem:[#allocation2 + $0x4e0] sm:$0xff]   ;;  %vm14519_vm5 = vmmov %vm14499_vm1 }
 0x376   : > { %v6967_v57 = vpop.f32.mrf.mxu1 }
 0x378   : > { %v6968_v58 = vpop.f32.mrf.mxu1  ;;  %7227 = vmatpush3.bf16.msra.mxu1 %v8932_v10  ;;  %v14497_v10 = vpack.c.bf16 %v12308_v20, %v12234_v26  ;;  %v8943_v26 = vld [vmem:[#allocation2 + $0x460] sm:$0xff]  }
 0x379   : > { %v12668_v45 = vadd.f32 %v6968_v58, %v6967_v57  ;;  %5048 = vmatmul.mubr.bf16.vlgmr.msra.gmra.mxu0 %v14459_v24  ;;  %7228 = vmatprep.subr.bf16.mxu1 %v8934_v22  ;;  %v8939_v24 = vld [vmem:[#allocation2 + $0x4a0] sm:$0xff]  }
 0x37a   : > { %v6970_v13 = vpop.f32.mrf.mxu1  ;;  %5055 = vmatprep.mubr.bf16.mxu0 %v14368_v47  ;;  %7179 = vmatpush3.bf16.msra.mxu0 %v8930_v62  ;;  %v8941_v47 = vld [vmem:[#allocation2 + $0x4d8] sm:$0xff]  }
 0x37b   : > { %5129 = vmatmul.mubr.bf16.gmra.mxu1 %v14364_v18  ;;  %7180 = vmatprep.subr.bf16.mxu0 %v8933_v14  ;;  %v8940_v18 = vld [vmem:[#allocation2 + $0x428] sm:$0xff]  }
 0x37c   : > { %v6971_v51 = vpop.f32.mrf.mxu1  ;;  %5136 = vmatprep.mubr.bf16.mxu1 %v14497_v10  ;;  %7229 = vmatpush3.bf16.msra.mxu1 %v8936_v5  ;;  %v8945_v10 = vld [vmem:[#allocation2 + $0x4d0] sm:$0xff]  }
 0x37d   : > { %v12674_v48 = vadd.f32 %v6971_v51, %v6970_v13  ;;  %v2333_v57 = vpop.f32.mrf.mxu0  ;;  %7230 = vmatprep.subr.bf16.mxu1 %v8937_v25  ;;  %v12683_v13 = vsel %vm14468_vm0, %v14498_v42, %v2626_v43  ;;  %v8942_v25 = vld [vmem:[#allocation2 + $0x498] sm:$0xff]   ;;  %vm14520_vm0 = vmmov %vm14500_vm4 }
 0x37e   : > { %v6973_v22 = vpop.f32.mrf.mxu1  ;;  %v2334_v62 = vadd.f32 %v12211_v31, %v2333_v57  ;;  %7181 = vmatpush3.bf16.msra.mxu0 %v8935_v30  ;;  %v2941_v42 = vpack.c.bf16 %v12683_v13, %v12548_v53 }
 0x37f   : > { %v7568_v58 = vpop.f32.mrf.mxu0  ;;  %7182 = vmatprep.subr.bf16.mxu0 %v8938_v12  ;;  %v8944_v12 = vld [vmem:[#allocation2 + $0x420] sm:$0xff]  }
 0x380   : > { %v6974_v14 = vpop.f32.mrf.mxu1  ;;  %v12685_v20 = vmax.f32 %v2334_v62, 0.0  ;;  %7231 = vmatpush3.bf16.msra.mxu1 %v8939_v24 }
 0x381   : > { %v12687_v5 = vadd.f32 %v6974_v14, %v6973_v22  ;;  %v2336_v51 = vpop.f32.mrf.mxu0  ;;  %5056 = vmatmul.mubr.bf16.gmra.mxu0 %v14462_v1  ;;  %7232 = vmatprep.subr.bf16.mxu1 %v8941_v47 }
 0x382   : > { %v6976_v30 = vpop.f32.mrf.mxu1  ;;  %5063 = vmatprep.mubr.bf16.mxu0 %v11925_v55  ;;  %7183 = vmatpush3.bf16.msra.mxu0 %v8940_v18  ;;  %v12694_v57 = vrot.slane %v12685_v20, 3  ;;  %v12697_v22 = vrot.slane %v12685_v20, 1  ;;  %v12701_v47 = vrot.slane %v12685_v20, 2  ;;  %v8947_v55 = vld [vmem:[#allocation2 + $0x458] sm:$0xff]   ;;  %v2337_v62 = vadd.f32 %v12211_v31, %v2336_v51  ;;  %v8946_v18 = vld [vmem:[#allocation2 + $0x490] sm:$0xff]  }
 0x383   : > { %v7569_v24 = vpop.f32.mrf.mxu0  ;;  %5137 = vmatmul.mubr.bf16.gmra.mxu1 %v11908_v17  ;;  %7184 = vmatprep.subr.bf16.mxu0 %v8943_v26  ;;  %v8948_v26 = vld [vmem:[#allocation2 + $0x418] sm:$0xff]   ;;  %v2656_v8 = vrot.slane %v12685_v20, 5 }
 0x384   : > { %v6977_v1 = vpop.f32.mrf.mxu1  ;;  %5144 = vmatprep.mubr.bf16.mxu1 %v2941_v42  ;;  %7233 = vmatpush3.bf16.msra.mxu1 %v8942_v25  ;;  %v12710_v14 = vsel %vm14499_vm1, %v2649_v56, %v12694_v57  ;;  %v8949_v24 = vld [vmem:[#allocation2 + $0x4c8] sm:$0xff]   ;;  %v2639_v31 = vsel %vm14500_vm4, %v2636_v27, %v12697_v22  ;;  %v2619_v56 = vrot.slane %v12537_v29, 7  ;;  %v2668_v27 = vrot.slane %v12685_v20, 7  ;;  %vm14525_vm4 = vmmov %vm14519_vm5 }
 0x385   : > { %v12704_v58 = vadd.f32 %v6977_v1, %v6976_v30  ;;  %7234 = vmatprep.subr.bf16.mxu1 %v8945_v10  ;;  %v13762_v44 = vrot.slane %v12710_v14, 3  ;;  %v12717_v25 = vrot.slane %v2639_v31, 3  ;;  %v12721_v30 = vsel %vm14501_vm6, %v2626_v43, %v12701_v47  ;;  %v8951_v10 = vld [vmem:[#allocation2 + $0x450] sm:$0xff]   ;;  %v8950_v43 = vld [vmem:[#allocation2 + $0x488] sm:$0xff]   ;;  %vm14526_vm6 = vmmov %vm14525_vm4 }
 0x386   : > { %v6979_v17 = vpop.f32.mrf.mxu1  ;;  %7185 = vmatpush3.bf16.msra.mxu0 %v8944_v12  ;;  %v12732_v12 = vmax.f32 %v2337_v62, 0.0  ;;  %vm14524_vm1 = vcmask 1041408  }
 0x387   : > { %7186 = vmatprep.subr.bf16.mxu0 %v8947_v55  ;;  %v12729_v42 = vsel %vm14502_vm12, %v2762_v3, %v13762_v44  ;;  %v2759_v31 = vsel %vm14504_vm14, %v2746_v0, %v12717_v25  ;;  %v8953_v3 = vld [vmem:[#allocation2 + $0x4c0] sm:$0xff]   ;;  %v8955_v0 = vld [vmem:[#allocation2 + $0x448] sm:$0xff]   ;;  %v8959_v55 = vld [vmem:[#allocation2 + $0x5f8] sm:$0xff]  }
 0x388   : > { %v6980_v51 = vpop.f32.mrf.mxu1  ;;  %7235 = vmatpush3.bf16.msra.mxu1 %v8946_v18  ;;  %v12744_v62 = vpack.c.bf16 %v2759_v31, %v12651_v40  ;;  %v2960_v18 = vpack.c.bf16 %v12701_v47, %v12721_v30  ;;  %v8954_v31 = vld [vmem:[#allocation2 + $0x480] sm:$0xff]   ;;  %vm14528_vm12 = vmmov %vm14524_vm1 }
 0x389   : > { %v12734_v1 = vadd.f32 %v6980_v51, %v6979_v17  ;;  %5064 = vmatmul.mubr.bf16.gmra.mxu0 %v11983_v28  ;;  %7236 = vmatprep.subr.bf16.mxu1 %v8949_v24  ;;  %v2617_v17 = vrot.slane %v12526_v46, 7  ;;  %v8952_v51 = vld [vmem:[#allocation2 + $0x410] sm:$0xff]   ;;  %v2669_v24 = vsel %vm14505_vm15, %v2619_v56, %v2668_v27  ;;  %vm14546_vm14 = vmmov %vm14525_vm4 }
 0x38a   : > { %v6982_v50 = vpop.f32.mrf.mxu1  ;;  %5071 = vmatprep.mubr.bf16.mxu0 %v12274_v61  ;;  %7187 = vmatpush3.bf16.msra.mxu0 %v8948_v26  ;;  %v13764_v26 = vrot.slane %v12732_v12, 7  ;;  %v2768_v63 = vrot.slane %v2669_v24, 3  ;;  %v2611_v24 = vrot.slane %v12526_v46, 6  ;;  %vm14552_vm15 = vmmov %vm14525_vm4 }
 0x38b   : > { %14503 = vst [vmem:[#allocation20_spill] sm:$0xff] %v12734_v1  ;;  %5145 = vmatmul.mubr.bf16.gmra.mxu1 %v12238_v38  ;;  %7188 = vmatprep.subr.bf16.mxu0 %v8951_v10  ;;  %v12756_v61 = vsel %vm14507_vm13, %v2617_v17, %v2619_v56  ;;  %v14508_v38 = vrot.slane %v12223_v35, 7  ;;  %v14545_v1 = vpack.c.bf16 %v12614_v9, %v12370_v11  ;;  %v8974_v9 = vld [vmem:[#allocation2 + $0x598] sm:$0xff]   ;;  %vm14554_vm13 = vmmov %vm14525_vm4 }
 0x38c   : > { %v6983_v28 = vpop.f32.mrf.mxu1  ;;  %5152 = vmatprep.mubr.bf16.mxu1 %v2960_v18  ;;  %7237 = vmatpush3.bf16.msra.mxu1 %v8950_v43  ;;  %v8956_v18 = vld [vmem:[#allocation2 + $0x408] sm:$0xff]   ;;  %v12769_v56 = vsel %vm14510_vm2, %v2668_v27, %v13764_v26  ;;  %v14511_v43 = vrot.slane %v12537_v29, 5  ;;  %vm14557_vm2 = vmmov %vm14525_vm4 }
 0x38d   : > { %v12753_v40 = vadd.f32 %v6983_v28, %v6982_v50  ;;  %7238 = vmatprep.subr.bf16.mxu1 %v8953_v3  ;;  %v12762_v10 = vsel %vm14509_vm11, %v14508_v38, %v2617_v17  ;;  %v2959_v50 = vpack.c.bf16 %v12537_v29, %v12526_v46  ;;  %v8957_v38 = vld [vmem:[#allocation2 + $0x440] sm:$0xff]   ;;  %v13765_v60 = vrot.slane %v12769_v56, 3 }
 0x38e   : > { %v6985_v44 = vpop.f32.mrf.mxu1  ;;  %7189 = vmatpush3.bf16.msra.mxu0 %v8952_v51  ;;  %v2657_v3 = vsel %vm14512_vm7, %v14511_v43, %v2656_v8  ;;  %v13768_v51 = vrot.slane %v12732_v12, 5  ;;  %v2958_v27 = vpack.c.bf16 %v12756_v61, %v12762_v10  ;;  %v13767_v43 = vrot.slane %v12732_v12, 1  ;;  %vm14559_vm7 = vmmov %vm14557_vm2 }
 0x38f   : > { %14506 = vst [vmem:[#allocation78_spill] sm:$0xff] %v12753_v40  ;;  %7190 = vmatprep.subr.bf16.mxu0 %v8955_v0  ;;  %v2764_v26 = vrot.slane %v2657_v3, 3  ;;  %v14514_v0 = vrot.slane %v12756_v61, 3  ;;  %v8968_v40 = vld [vmem:[#allocation2 + $0x5a8] sm:$0xff]   ;;  %vm14555_vm11 = vcmask 1045504  }
 0x390   : > { %v6986_v28 = vpop.f32.mrf.mxu1  ;;  %7239 = vmatpush3.bf16.msra.mxu1 %v8954_v31  ;;  %v12798_v31 = vsel %vm14517_vm3, %v2656_v8, %v13768_v51  ;;  %v8961_v8 = vld [vmem:[#allocation2 + $0x578] sm:$0xff]   ;;  %vm14579_vm3 = vmmov %vm14557_vm2 }
 0x391   : > { %v12778_v54 = vadd.f32 %v6986_v28, %v6985_v44  ;;  %5072 = vmatmul.mubr.bf16.gmra.mxu0 %v12288_v36  ;;  %7316 = vmatprep.subr.bf16.mxu1 %v8959_v55  ;;  %v12788_v17 = vsel %vm14515_vm8, %v14514_v0, %v2768_v63  ;;  %v12793_v44 = vsel %vm14516_vm10, %v2768_v63, %v13765_v60  ;;  %v8958_v36 = vld [vmem:[#allocation2 + $0x400] sm:$0xff]   ;;  %v14518_v55 = vrot.slane %v12566_v6, 3  ;;  %vm14560_vm8 = vmmov %vm14557_vm2 }
 0x392   : > { %5079 = vmatprep.mubr.bf16.mxu0 %v2958_v27  ;;  %7191 = vmatpush3.bf16.msra.mxu0 %v8956_v18  ;;  %v13766_v28 = vrot.slane %v12798_v31, 3  ;;  %v12812_v63 = vsel %vm14520_vm0, %v12697_v22, %v13767_v43  ;;  %v14521_v27 = vld [vmem:[#allocation50_spill] sm:$0xff]  ;;  %v14523_v6 = vrot.slane %v12537_v29, 6  ;;  %vm14577_vm10 = vmmov %vm14557_vm2 }
 0x393   : > { %14513 = vst [vmem:[#allocation77_spill] sm:$0xff] %v12778_v54  ;;  %v12805_v3 = vsel %vm14519_vm5, %v14518_v55, %v2764_v26  ;;  %5153 = vmatmul.mubr.bf16.gmra.mxu1 %v2959_v50  ;;  %7192 = vmatprep.subr.bf16.mxu0 %v8957_v38  ;;  %v13769_v18 = vrot.slane %v12812_v63, 3  ;;  %v14522_v0 = vpack.c.bf16 %v11992_v49, %v14521_v27  ;;  %v14527_v49 = vrot.slane %v12223_v35, 6  ;;  %v14530_v43 = vld [vmem:[#allocation62_spill] sm:$0xff]  ;;  %v14535_v35 = vld [vmem:[#allocation73_spill] sm:$0xff]  ;;  %vm14580_vm5 = vmmov %vm14524_vm1 }
 0x394   : > { %v12821_v55 = vsel %vm14524_vm1, %v2611_v24, %v14523_v6  ;;  %v12826_v60 = vsel %vm14525_vm4, %v2764_v26, %v13766_v28  ;;  %v8960_v26 = vld [vmem:[#allocation2 + $0x5b8] sm:$0xff]   ;;  %v8963_v6 = vld [vmem:[#allocation2 + $0x5f0] sm:$0xff]   ;;  %v14529_v28 = vld [vmem:[#allocation51_spill] sm:$0xff] }
 0x395   : > { %5266 = vmatprep.mubr.bf16.mxu1 %v14522_v0  ;;  %v12834_v38 = vsel %vm14526_vm6, %v12717_v25, %v13769_v18  ;;  %v12839_v27 = vsel %vm14528_vm12, %v14527_v49, %v2611_v24  ;;  %v14531_v51 = vpack.c.bf16 %v14529_v28, %v14530_v43  ;;  %v14532_v50 = vld [vmem:[#allocation38_spill] sm:$0xff]  ;;  %v14533_v18 = vld [vmem:[#allocation63_spill] sm:$0xff]  ;;  %v14536_v54 = vld [vmem:[#allocation37_spill] sm:$0xff] }
 0x396   : > { %7193 = vmatpush3.bf16.msra.mxu0 %v8958_v36  ;;  %v2957_v0 = vpack.c.bf16 %v12821_v55, %v12839_v27  ;;  %v14534_v46 = vpack.c.bf16 %v14532_v50, %v14533_v18  ;;  %v14537_v24 = vpack.c.bf16 %v14535_v35, %v14536_v54  ;;  %v8964_v36 = vld [vmem:[#allocation2 + $0x5b0] sm:$0xff]   ;;  %v8966_v49 = vld [vmem:[#allocation2 + $0x5e8] sm:$0xff]   ;;  %v14541_v54 = vld [vmem:[#allocation70_spill] sm:$0xff] }
 0x397   : > { %7270 = vmatprep.subr.bf16.mxu0 %v8961_v8  ;;  %v8962_v8 = vld [vmem:[#allocation2 + $0x538] sm:$0xff]   ;;  %v14538_v43 = vld [vmem:[#allocation56_spill] sm:$0xff]  ;;  %vm14583_vm0 = vmmov %vm14557_vm2 }
 0x398   : > { %v8967_v50 = vld [vmem:[#allocation2 + $0x530] sm:$0xff]   ;;  %vm14586_vm1 = vmmov %vm14583_vm0 }
 0x399   : > { %5080 = vmatmul.mubr.bf16.gmra.mxu0 %v2957_v0  ;;  %v8965_v0 = vld [vmem:[#allocation2 + $0x570] sm:$0xff]   ;;  %vm14588_vm4 = vmmov %vm14580_vm5 }
 0x39a   : > { %5193 = vmatprep.mubr.bf16.mxu0 %v14531_v51  ;;  %v14539_v51 = vld [vmem:[#allocation34_spill] sm:$0xff]  ;;  %v14543_v35 = vld [vmem:[#allocation53_spill] sm:$0xff]  ;;  %vm14592_vm6 = vmmov %vm14583_vm0 }
 0x39b   : > { %5267 = vmatmul.mubr.bf16.vlgmr.msra.gmra.mxu1 %v14534_v46  ;;  %v14540_v28 = vpack.c.bf16 %v14538_v43, %v14539_v51  ;;  %v8969_v46 = vld [vmem:[#allocation2 + $0x5e0] sm:$0xff]   ;;  %v8973_v43 = vld [vmem:[#allocation2 + $0x5d8] sm:$0xff]   ;;  %v8972_v51 = vld [vmem:[#allocation2 + $0x528] sm:$0xff]  }
 0x39c   : > { %5274 = vmatprep.mubr.bf16.mxu1 %v14537_v24  ;;  %7317 = vmatpush3.bf16.msra.mxu1 %v8960_v26  ;;  %vm14593_vm12 = vmmov %vm14583_vm0 }
 0x39d   : > { %7318 = vmatprep.subr.bf16.mxu1 %v8963_v6  ;;  %v14542_v6 = vld [vmem:[#allocation71_spill] sm:$0xff] }
 0x39e   : > { %v14544_v24 = vpack.c.bf16 %v14542_v6, %v14543_v35  ;;  %v8975_v6 = vld [vmem:[#allocation2 + $0x560] sm:$0xff]  }
 0x39f   : > { %v6988_v7 = vpop.f32.mrf.mxu1 }
 0x3a0   : > { %7319 = vmatpush3.bf16.msra.mxu1 %v8964_v36  ;;  %v8970_v36 = vld [vmem:[#allocation2 + $0x568] sm:$0xff]  }
 0x3a1   : > { %v6989_v52 = vpop.f32.mrf.mxu1  ;;  %5194 = vmatmul.mubr.bf16.vlgmr.msra.gmra.mxu0 %v14540_v28  ;;  %7320 = vmatprep.subr.bf16.mxu1 %v8966_v49  ;;  %v8971_v49 = vld [vmem:[#allocation2 + $0x5a0] sm:$0xff]  }
 0x3a2   : > { %v12855_v18 = vadd.f32 %v6989_v52, %v6988_v7  ;;  %5201 = vmatprep.mubr.bf16.mxu0 %v14541_v54  ;;  %7271 = vmatpush3.bf16.msra.mxu0 %v8962_v8  ;;  %v13770_v7 = vrot.slane %v12732_v12, 3 }
 0x3a3   : > { %v6991_v26 = vpop.f32.mrf.mxu1  ;;  %5275 = vmatmul.mubr.bf16.gmra.mxu1 %v14544_v24  ;;  %7272 = vmatprep.subr.bf16.mxu0 %v8965_v0  ;;  %v8977_v0 = vld [vmem:[#allocation2 + $0x5d0] sm:$0xff]   ;;  %v14549_v24 = vpack.c.bf16 %v12591_v34, %v12347_v4  ;;  %v8980_v34 = vld [vmem:[#allocation2 + $0x518] sm:$0xff]  }
 0x3a4   : > { %5282 = vmatprep.mubr.bf16.mxu1 %v14545_v1  ;;  %7321 = vmatpush3.bf16.msra.mxu1 %v8968_v40  ;;  %v12871_v11 = vsel %vm14546_vm14, %v12694_v57, %v13770_v7  ;;  %v14547_v40 = vld [vmem:[#allocation41_spill] sm:$0xff]  ;;  %vm14598_vm14 = vmmov %vm14583_vm0 }
 0x3a5   : > { %v6992_v52 = vpop.f32.mrf.mxu1  ;;  %7322 = vmatprep.subr.bf16.mxu1 %v8969_v46  ;;  %v2772_v46 = vrot.slane %v12721_v30, 3  ;;  %v14550_v30 = vpack.c.bf16 %v12729_v42, %v12634_v23  ;;  %v8983_v42 = vld [vmem:[#allocation2 + $0x550] sm:$0xff]  }
 0x3a6   : > { %v12865_v8 = vadd.f32 %v6992_v52, %v6991_v26  ;;  %7273 = vmatpush3.bf16.msra.mxu0 %v8967_v50  ;;  %v8976_v26 = vld [vmem:[#allocation2 + $0x520] sm:$0xff]   ;;  %v2641_v52 = vrot.slane %v12732_v12, 2 }
 0x3a7   : > { %7274 = vmatprep.subr.bf16.mxu0 %v8970_v36  ;;  %v2788_v36 = vrot.slane %v12871_v11, 3 }
 0x3a8   : > { %7323 = vmatpush3.bf16.msra.mxu1 %v8971_v49  ;;  %v8979_v49 = vld [vmem:[#allocation2 + $0x558] sm:$0xff]   ;;  %v2642_v23 = vsel %vm14555_vm11, %v12701_v47, %v2641_v52  ;;  %vm14604_vm11 = vcmask 1046528  }
 0x3a9   : > { %v7056_v28 = vpop.f32.mrf.mxu1  ;;  %5202 = vmatmul.mubr.bf16.gmra.mxu0 %v14547_v40  ;;  %7324 = vmatprep.subr.bf16.mxu1 %v8973_v43  ;;  %v2760_v43 = vrot.slane %v12683_v13, 3 }
 0x3aa   : > { %5209 = vmatprep.mubr.bf16.mxu0 %v12641_v19  ;;  %7275 = vmatpush3.bf16.msra.mxu0 %v8972_v51  ;;  %v8978_v51 = vld [vmem:[#allocation2 + $0x590] sm:$0xff]  }
 0x3ab   : > { %v7057_v1 = vpop.f32.mrf.mxu1  ;;  %5283 = vmatmul.mubr.bf16.gmra.mxu1 %v14549_v24  ;;  %7276 = vmatprep.subr.bf16.mxu0 %v8975_v6  ;;  %v2773_v4 = vsel %vm14552_vm15, %v2760_v43, %v2772_v46  ;;  %v14553_v24 = vrot.slane %v12710_v14, 3  ;;  %vm14600_vm15 = vcmask 1040384  }
 0x3ac   : > { %v12875_v50 = vadd.f32 %v7057_v1, %v7056_v28  ;;  %5290 = vmatprep.mubr.bf16.mxu1 %v14550_v30  ;;  %7325 = vmatpush3.bf16.msra.mxu1 %v8974_v9  ;;  %v8981_v1 = vld [vmem:[#allocation2 + $0x5c8] sm:$0xff]   ;;  %v14556_v9 = vrot.slane %v12548_v53, 3  ;;  %v8984_v53 = vld [vmem:[#allocation2 + $0x510] sm:$0xff]  }
 0x3ad   : > { %v7059_v35 = vpop.f32.mrf.mxu1  ;;  %7326 = vmatprep.subr.bf16.mxu1 %v8977_v0  ;;  %v2789_v13 = vsel %vm14554_vm13, %v14553_v24, %v2788_v36  ;;  %vm14602_vm13 = vcmask 1042432  }
 0x3ae   : > { %14548 = vst [vmem:[#allocation80_spill] sm:$0xff] %v12875_v50  ;;  %7277 = vmatpush3.bf16.msra.mxu0 %v8976_v26  ;;  %v2761_v0 = vsel %vm14557_vm2, %v14556_v9, %v2760_v43  ;;  %v8985_v50 = vld [vmem:[#allocation2 + $0x5c0] sm:$0xff]   ;;  %v2964_v47 = vpack.c.bf16 %v2788_v36, %v2789_v13  ;;  %v8987_v43 = vld [vmem:[#allocation2 + $0x548] sm:$0xff]   ;;  %vm14605_vm2 = vmmov %vm14588_vm4 }
 0x3af   : > { %v7060_v28 = vpop.f32.mrf.mxu1  ;;  %7278 = vmatprep.subr.bf16.mxu0 %v8979_v49  ;;  %v2942_v26 = vpack.c.bf16 %v2773_v4, %v2761_v0  ;;  %v2786_v49 = vrot.slane %v2642_v23, 3  ;;  %v8988_v36 = vld [vmem:[#allocation2 + $0x508] sm:$0xff]   ;;  %v8989_v13 = vld [vmem:[#allocation2 + $0x540] sm:$0xff]   ;;  %v14561_v0 = vmov 0.0  }
 0x3b0   : > { %v12887_v7 = vadd.f32 %v7060_v28, %v7059_v35  ;;  %7327 = vmatpush3.bf16.msra.mxu1 %v8978_v51  ;;  %v8982_v35 = vld [vmem:[#allocation2 + $0x588] sm:$0xff]   ;;  %v14558_v28 = vld [vmem:[#allocation69_spill] sm:$0xff]  ;;  %v8986_v51 = vld [vmem:[#allocation2 + $0x580] sm:$0xff]  }
 0x3b1   : > { %v7062_v6 = vpop.f32.mrf.mxu1  ;;  %5210 = vmatmul.mubr.bf16.gmra.mxu0 %v14558_v28  ;;  %7328 = vmatprep.subr.bf16.mxu1 %v8981_v1 }
 0x3b2   : > { %14551 = vst [vmem:[#allocation79_spill] sm:$0xff] %v12887_v7  ;;  %v2784_v7 = vrot.slane %v12697_v22, 3  ;;  %5217 = vmatprep.mubr.bf16.mxu0 %v12744_v62  ;;  %7279 = vmatpush3.bf16.msra.mxu0 %v8980_v34 }
 0x3b3   : > { %v7063_v30 = vpop.f32.mrf.mxu1  ;;  %5291 = vmatmul.mubr.bf16.gmra.mxu1 %v2942_v26  ;;  %7280 = vmatprep.subr.bf16.mxu0 %v8983_v42  ;;  %v2961_v26 = vpack.c.bf16 %v12694_v57, %v12710_v14  ;;  %v14568_v57 = vld [vmem:[#allocation45_spill] sm:$0xff] }
 0x3b4   : > { %v12900_v24 = vadd.f32 %v7063_v30, %v7062_v6  ;;  %5298 = vmatprep.mubr.bf16.mxu1 %v2964_v47  ;;  %7329 = vmatpush3.bf16.msra.mxu1 %v8982_v35  ;;  %v2785_v22 = vsel %vm14559_vm7, %v12717_v25, %v2784_v7  ;;  %v2787_v6 = vsel %vm14560_vm8, %v2772_v46, %v2786_v49  ;;  %v8990_v25 = vld [vmem:[#allocation2 + $0x500] sm:$0xff]   ;;  %vm14607_vm7 = vmmov %vm14583_vm0 }
 0x3b5   : > { %v7065_v52 = vpop.f32.mrf.mxu1  ;;  %7330 = vmatprep.subr.bf16.mxu1 %v8985_v50  ;;  %v2962_v23 = vpack.c.bf16 %v2784_v7, %v2785_v22  ;;  %v2963_v9 = vpack.c.bf16 %v2786_v49, %v2787_v6  ;;  %v8991_v22 = vld [vmem:[#allocation2 + $0x638] sm:$0xff]   ;;  %v2754_v6 = vrot.slane %v12821_v55, 3  ;;  %v2744_v55 = vrot.slane %v12762_v10, 3  ;;  %vm14609_vm8 = vmmov %vm14583_vm0 }
 0x3b6   : > { %7281 = vmatpush3.bf16.msra.mxu0 %v8984_v53  ;;  %v14562_v53 = vld [vmem:[#allocation75_spill] sm:$0xff] }
 0x3b7   : > { %v7066_v4 = vpop.f32.mrf.mxu1  ;;  %7282 = vmatprep.subr.bf16.mxu0 %v8987_v43 }
 0x3b8   : > { %v12905_v1 = vadd.f32 %v7066_v4, %v7065_v52  ;;  %7331 = vmatpush3.bf16.msra.mxu1 %v8986_v51  ;;  %v14563_v52 = vld [vmem:[#allocation40_spill] sm:$0xff]  ;;  %v14565_v51 = vld [vmem:[#allocation67_spill] sm:$0xff] }
 0x3b9   : > { %v7068_v34 = vpop.f32.mrf.mxu1  ;;  %5218 = vmatmul.mubr.bf16.gmra.mxu0 %v12626_v33  ;;  %7610 = vmatprep.subr.mxu1 %v14561_v0  ;;  %v14564_v43 = vpack.c.bf16 %v14562_v53, %v14563_v52  ;;  %v14578_v53 = vrot.slane %v12756_v61, 3 }
 0x3ba   : > { %5225 = vmatprep.mubr.bf16.mxu0 %v2962_v23  ;;  %7283 = vmatpush3.bf16.msra.mxu0 %v8988_v36  ;;  %v14569_v36 = vld [vmem:[#allocation12_spill] sm:$0xff]  ;;  %v14572_v23 = vld [vmem:[#allocation74_spill] sm:$0xff] }
 0x3bb   : > { %v7069_v42 = vpop.f32.mrf.mxu1  ;;  %5299 = vmatmul.mubr.bf16.gmra.mxu1 %v2963_v9  ;;  %7284 = vmatprep.subr.bf16.mxu0 %v8989_v13  ;;  %v14571_v13 = vld [vmem:[#allocation72_spill] sm:$0xff]  ;;  %v2757_v52 = vsel %vm14579_vm3, %v2744_v55, %v14578_v53  ;;  %v14596_v53 = vpack.c.bf16 %v12826_v60, %v12805_v3  ;;  %vm14612_vm3 = vmmov %vm14583_vm0 }
 0x3bc   : > { %v12910_v35 = vadd.f32 %v7069_v42, %v7068_v34  ;;  %5412 = vmatprep.mubr.bf16.mxu1 %v14547_v40  ;;  %v14566_v40 = vld [vmem:[#allocation68_spill] sm:$0xff]  ;;  %v14570_v34 = vpack.c.bf16 %v14568_v57, %v14569_v36  ;;  %v14573_v42 = vpack.c.bf16 %v14571_v13, %v14572_v23 }
 0x3bd   : > { %v7071_v50 = vpop.f32.mrf.mxu1  ;;  %v14567_v4 = vpack.c.bf16 %v14565_v51, %v14566_v40  ;;  %v8992_v9 = vld [vmem:[#allocation2 + $0x630] sm:$0xff]  }
 0x3be   : > { %7285 = vmatpush3.bf16.msra.mxu0 %v8990_v25  ;;  %v2664_v25 = vrot.slane %v12732_v12, 6  ;;  %v14581_v51 = vld [vmem:[#allocation81_spill] sm:$0xff]  ;;  %v14589_v36 = vld [vmem:[#allocation28_spill] sm:$0xff] }
 0x3bf   : > { %v7072_v46 = vpop.f32.mrf.mxu1  ;;  %7574 = vmatprep.subr.bf16.mxu0 %v14561_v0  ;;  %v14582_v40 = vrot.slane %v14581_v51, 3 }
 0x3c0   : > { %v12913_v30 = vadd.f32 %v7072_v46, %v7071_v50  ;;  %v2742_v50 = vrot.slane %v12839_v27, 3  ;;  %v14574_v46 = vld [vmem:[#allocation76_spill] sm:$0xff] }
 0x3c1   : > { %v7074_v7 = vpop.f32.mrf.mxu1  ;;  %5226 = vmatmul.mubr.bf16.gmra.mxu0 %v2961_v26  ;;  %v2662_v26 = vrot.slane %v12685_v20, 6  ;;  %v8993_v27 = vld [vmem:[#allocation2 + $0x628] sm:$0xff]  }
 0x3c2   : > { %5339 = vmatprep.mubr.bf16.mxu0 %v14564_v43  ;;  %v2743_v10 = vsel %vm14583_vm0, %v14582_v40, %v2742_v50  ;;  %v14584_v20 = vld [vmem:[#allocation27_spill] sm:$0xff] }
 0x3c3   : > { %v7075_v47 = vpop.f32.mrf.mxu1  ;;  %5413 = vmatmul.mubr.bf16.vlgmr.msra.gmra.mxu1 %v14567_v4  ;;  %v12950_v43 = vsel %vm14580_vm5, %v2662_v26, %v2664_v25  ;;  %v14585_v4 = vrot.slane %v14584_v20, 3  ;;  %vm14620_vm5 = vmmov %vm14583_vm0 }
 0x3c4   : > { %v12918_v49 = vadd.f32 %v7075_v47, %v7074_v7  ;;  %5420 = vmatprep.mubr.bf16.mxu1 %v14558_v28  ;;  %v14575_v7 = vld [vmem:[#allocation16_spill] sm:$0xff]  ;;  %v2755_v47 = vsel %vm14577_vm10, %v2742_v50, %v2754_v6  ;;  %v8994_v50 = vld [vmem:[#allocation2 + $0x620] sm:$0xff]   ;;  %vm14610_vm10 = vmmov %vm14583_vm0 }
 0x3c5   : > { %v14576_v28 = vpack.c.bf16 %v14574_v46, %v14575_v7  ;;  %v2745_v61 = vsel %vm14586_vm1, %v14585_v4, %v2744_v55  ;;  %v8995_v7 = vld [vmem:[#allocation2 + $0x618] sm:$0xff]   ;;  %v14599_v4 = vrot.slane %v12732_v12, 7  ;;  %vm14623_vm0 = vmmov %vm14604_vm11 }
 0x3c6   : > { %v2929_v23 = vpack.c.bf16 %v2757_v52, %v2745_v61  ;;  %v8998_v52 = vld [vmem:[#allocation2 + $0x600] sm:$0xff]   ;;  %vm14624_vm1 = vmmov %vm14623_vm0 }
 0x3c9   : > { %5340 = vmatmul.mubr.bf16.vlgmr.msra.gmra.mxu0 %v14570_v34  ;;  %v14590_v34 = vld [vmem:[#allocation54_spill] sm:$0xff] }
 0x3ca   : > { %5347 = vmatprep.mubr.bf16.mxu0 %v14573_v42  ;;  %7575 = vmatpush3.bf16.msra.mxu0 %v8991_v22  ;;  %v14587_v22 = vrot.slane %v12537_v29, 6  ;;  %v14591_v13 = vpack.c.bf16 %v14589_v36, %v14590_v34  ;;  %v2778_v42 = vrot.slane %v12950_v43, 3  ;;  %v14603_v36 = vrot.slane %v12732_v12, 1 }
 0x3cb   : > { %5421 = vmatmul.mubr.bf16.gmra.mxu1 %v14576_v28  ;;  %7576 = vmatprep.subr.bf16.mxu0 %v14561_v0 }
 0x3cc   : > { %5428 = vmatprep.mubr.bf16.mxu1 %v12626_v33  ;;  %v2928_v33 = vpack.c.bf16 %v2755_v47, %v2743_v10  ;;  %v2663_v57 = vsel %vm14588_vm4, %v14587_v22, %v2662_v26  ;;  %v14594_v26 = vpack.c.bf16 %v12662_v37, %v12656_v59  ;;  %v8997_v47 = vld [vmem:[#allocation2 + $0x608] sm:$0xff]   ;;  %v9000_v59 = vld [vmem:[%s13465_s2] ss:$0 sm:$0xff]  ;;  %v14601_v22 = vrot.slane %v12732_v12, 5  ;;  %vm14625_vm4 = vmmov %vm14623_vm0 }
 0x3cd   : > { %v2766_v46 = vrot.slane %v2663_v57, 3 }
 0x3ce   : > { %7577 = vmatpush3.bf16.msra.mxu0 %v8992_v9  ;;  %v2947_v9 = vpack.c.bf16 %v12871_v11, %v12710_v14  ;;  %v8996_v14 = vld [vmem:[#allocation2 + $0x610] sm:$0xff]   ;;  %v14595_v11 = vpack.c.bf16 %v12793_v44, %v12788_v17 }
 0x3cf   : > { %7578 = vmatprep.subr.bf16.mxu0 %v14561_v0  ;;  %v2779_v29 = vsel %vm14592_vm6, %v2766_v46, %v2778_v42  ;;  %v2767_v28 = vsel %vm14593_vm12, %v2754_v6, %v2766_v46  ;;  %vm14626_vm6 = vmmov %vm14623_vm0 }
 0x3d0   : > { %v2945_v55 = vpack.c.bf16 %v2779_v29, %v2767_v28  ;;  %vm14627_vm12 = vmmov %vm14605_vm2 }
 0x3d1   : > { %5348 = vmatmul.mubr.bf16.gmra.mxu0 %v14591_v13 }
 0x3d2   : > { %5355 = vmatprep.mubr.bf16.mxu0 %v2928_v33  ;;  %7579 = vmatpush3.bf16.msra.mxu0 %v8993_v27  ;;  %v14597_v33 = vrot.slane %v12732_v12, 3 }
 0x3d3   : > { %5429 = vmatmul.mubr.bf16.gmra.mxu1 %v2929_v23  ;;  %7580 = vmatprep.subr.bf16.mxu0 %v14561_v0 }
 0x3d4   : > { %5436 = vmatprep.mubr.bf16.mxu1 %v2947_v9 }
 0x3d6   : > { %7581 = vmatpush3.bf16.msra.mxu0 %v8994_v50 }
 0x3d7   : > { %7582 = vmatprep.subr.bf16.mxu0 %v14561_v0 }
 0x3d9   : > { %5356 = vmatmul.mubr.bf16.gmra.mxu0 %v14594_v26 }
 0x3da   : > { %5363 = vmatprep.mubr.bf16.mxu0 %v2945_v55  ;;  %7583 = vmatpush3.bf16.msra.mxu0 %v8995_v7  ;;  %v14606_v55 = vrot.slane %v12769_v56, 3 }
 0x3db   : > { %5437 = vmatmul.mubr.bf16.gmra.mxu1 %v14595_v11  ;;  %7584 = vmatprep.subr.bf16.mxu0 %v14561_v0 }
 0x3de   : > { %7585 = vmatpush3.bf16.msra.mxu0 %v8996_v14  ;;  %v14608_v14 = vrot.slane %v12798_v31, 3 }
 0x3df   : > { %7586 = vmatprep.subr.bf16.mxu0 %v14561_v0 }
 0x3e1   : > { %v2341_v6 = vpop.f32.mrf.mxu0  ;;  %5364 = vmatmul.mubr.bf16.gmra.mxu0 %v14596_v53 }
 0x3e2   : > { %v2342_v37 = vadd.f32 %v9000_v59, %v2341_v6  ;;  %7587 = vmatpush3.bf16.msra.mxu0 %v8997_v47 }
 0x3e3   : > { %v7572_v17 = vpop.f32.mrf.mxu0  ;;  %7588 = vmatprep.subr.bf16.mxu0 %v14561_v0 }
 0x3e4   : > { %v12987_v44 = vmax.f32 %v2342_v37, 0.0  ;;  %v14611_v37 = vrot.slane %v12812_v63, 3 }
 0x3e5   : > { %v2344_v27 = vpop.f32.mrf.mxu0 }
 0x3e6   : > { %v2660_v43 = vrot.slane %v12987_v44, 5  ;;  %v2672_v51 = vrot.slane %v12987_v44, 7  ;;  %v2676_v60 = vrot.slane %v12987_v44, 1  ;;  %v2796_v3 = vrot.slane %v12987_v44, 3  ;;  %7589 = vmatpush3.bf16.msra.mxu0 %v8998_v52 }
 0x3e7   : > { %v7573_v40 = vpop.f32.mrf.mxu0  ;;  %v2666_v10 = vrot.slane %v12987_v44, 6  ;;  %7645 = vmatprep.subr.mxu0 %v14561_v0 }
 0x3e8   : > { %v2797_v20 = vsel %vm14598_vm14, %v14597_v33, %v2796_v3  ;;  %v2673_v61 = vsel %vm14600_vm15, %v14599_v4, %v2672_v51  ;;  %v2661_v57 = vsel %vm14602_vm13, %v14601_v22, %v2660_v43  ;;  %v13009_v34 = vsel %vm14604_vm11, %v14603_v36, %v2676_v60  ;;  %vm14628_vm14 = vmmov %vm14623_vm0 }
 0x3e9   : > { %v6918_v13 = vpop.f32.mrf.mxu0  ;;  %v2968_v23 = vpack.c.bf16 %v2796_v3, %v2797_v20  ;;  %v2667_v9 = vsel %vm14605_vm2, %v2664_v25, %v2666_v10  ;;  %v2794_v50 = vrot.slane %v2673_v61, 3  ;;  %v2790_v46 = vrot.slane %v2661_v57, 3  ;;  %vm14629_vm15 = vmmov %vm14623_vm0 }
 0x3ea   : > { %v2792_v29 = vrot.slane %v2667_v9, 3  ;;  %v2782_v7 = vrot.slane %v13009_v34, 3  ;;  %v14613_v9 = vld [vmem:[#allocation20_spill] sm:$0xff]  ;;  %vm14630_vm13 = vmmov %vm14623_vm0 }
 0x3eb   : > { %v6919_v28 = vpop.f32.mrf.mxu0  ;;  %5444 = vmatprep.mubr.bf16.mxu1 %v2968_v23  ;;  %v2795_v26 = vsel %vm14607_vm7, %v14606_v55, %v2794_v50  ;;  %v2791_v11 = vsel %vm14609_vm8, %v14608_v14, %v2790_v46  ;;  %vm14631_vm11 = vmmov %vm14605_vm2 }
 0x3ec   : > { %v6920_v47 = vadd.f32 %v6919_v28, %v6918_v13  ;;  %v2793_v12 = vsel %vm14610_vm10, %v2778_v42, %v2792_v29  ;;  %v2967_v6 = vpack.c.bf16 %v2794_v50, %v2795_v26  ;;  %v2965_v25 = vpack.c.bf16 %v2790_v46, %v2791_v11  ;;  %v14614_v46 = vld [vmem:[#allocation58_spill] sm:$0xff]  ;;  %v14616_v26 = vld [vmem:[#allocation57_spill] sm:$0xff]  ;;  %vm14632_vm2 = vmmov %vm14623_vm0 }
 0x3ed   : > { %v6921_v53 = vpop.f32.mrf.mxu0  ;;  %v2966_v59 = vpack.c.bf16 %v2792_v29, %v2793_v12  ;;  %v2783_v52 = vsel %vm14612_vm3, %v14611_v37, %v2782_v7  ;;  %vm14633_vm7 = vmmov %vm14631_vm11 }
 0x3ee   : > { %v4758_v56 = vadd.f32 %v6920_v47, %v12501_v39  ;;  %5445 = vmatmul.mubr.bf16.gmra.mxu1 %v2967_v6  ;;  %v2948_v31 = vpack.c.bf16 %v2783_v52, %v12834_v38  ;;  %v14617_v47 = vld [vmem:[#allocation77_spill] sm:$0xff]  ;;  %vm14634_vm8 = vmmov %vm14623_vm0 }
 0x3ef   : > { %5371 = vmatprep.mubr.bf16.mxu0 %v2966_v59  ;;  %v6922_v17 = vpop.f32.mrf.mxu0  ;;  %7642 = vmatprep.mubr.msk.f32.mxu1 %vm14000_vm9, %v14561_v0  ;;  %vm14635_vm10 = vmmov %vm14633_vm7 }
 0x3f0   : > { %v6923_v42 = vadd.f32 %v6922_v17, %v6921_v53  ;;  %5372 = vmatmul.mubr.bf16.gmra.mxu0 %v2965_v25  ;;  %v4831_v27 = vadd.f32 %v12664_v15, %v4758_v56  ;;  %v14618_v25 = vld [vmem:[#allocation13_spill] sm:$0xff]  ;;  %v14619_v17 = vld [vmem:[#allocation11_spill] sm:$0xff] }
 0x3f1   : > { %v6924_v43 = vpop.f32.mrf.mxu0  ;;  %7590 = vmatprep.mubr.msk.bf16.mxu0 %vm14000_vm9, %v14561_v0 }
 0x3f2   : > { %v4761_v63 = vadd.f32 %v6923_v42, %v12505_v32 }
 0x3f3   : > { %v6925_v51 = vpop.f32.mrf.mxu0 }
 0x3f4   : > { %v6926_v39 = vadd.f32 %v6925_v51, %v6924_v43  ;;  %v4834_v3 = vadd.f32 %v12668_v45, %v4761_v63 }
 0x3f5   : > { %v6927_v38 = vpop.f32.mrf.mxu0 }
 0x3f6   : > { %v4766_v40 = vadd.f32 %v6926_v39, %v12512_v41 }
 0x3f7   : > { %v6928_v10 = vpop.f32.mrf.mxu0 }
 0x3f8   : > { %v6929_v33 = vadd.f32 %v6928_v10, %v6927_v38  ;;  %7591 = vmatmul.mubr.bf16.vlgmr.msra.gmra.mxu0 %v14541_v54  ;;  %v4839_v20 = vadd.f32 %v12674_v48, %v4766_v40  ;;  %v14621_v40 = vld [vmem:[#allocation80_spill] sm:$0xff] }
 0x3f9   : > { %v6930_v15 = vpop.f32.mrf.mxu0  ;;  %7594 = vmatprep.mubr.msk.bf16.mxu0 %vm14000_vm9, %v14561_v0 }
 0x3fa   : > { %v4769_v4 = vadd.f32 %v6929_v33, %v12516_v2 }
 0x3fb   : > { %v6931_v32 = vpop.f32.mrf.mxu0 }
 0x3fc   : > { %v6932_v61 = vadd.f32 %v6931_v32, %v6930_v15  ;;  %v4842_v22 = vadd.f32 %v12687_v5, %v4769_v4  ;;  %v14622_v4 = vld [vmem:[#allocation79_spill] sm:$0xff] }
 0x3fd   : > { %v6933_v45 = vpop.f32.mrf.mxu0 }
 0x3fe   : > { %v4774_v57 = vadd.f32 %v6932_v61, %v12524_v16 }
 0x3ff   : > { %v6934_v41 = vpop.f32.mrf.mxu0 }
 0x400   : > { %v6935_v36 = vadd.f32 %v6934_v41, %v6933_v45  ;;  %7595 = vmatmul.mubr.bf16.gmra.mxu0 %v12641_v19  ;;  %v4847_v54 = vadd.f32 %v12704_v58, %v4774_v57  ;;  %v14615_v19 = vld [vmem:[#allocation78_spill] sm:$0xff] }
 0x401   : > { %v6936_v48 = vpop.f32.mrf.mxu0  ;;  %7598 = vmatprep.mubr.msk.bf16.mxu0 %vm14000_vm9, %v14561_v0 }
 0x402   : > { %v4777_v13 = vadd.f32 %v6935_v36, %v12534_v21 }
 0x403   : > { %v6937_v2 = vpop.f32.mrf.mxu0 }
 0x404   : > { %v6938_v23 = vadd.f32 %v6937_v2, %v6936_v48  ;;  %v4850_v50 = vadd.f32 %v14613_v9, %v4777_v13 }
 0x405   : > { %v6939_v5 = vpop.f32.mrf.mxu0 }
 0x406   : > { %v4782_v29 = vadd.f32 %v6938_v23, %v14614_v46 }
 0x407   : > { %v6940_v16 = vpop.f32.mrf.mxu0 }
 0x408   : > { %v6941_v28 = vadd.f32 %v6940_v16, %v6939_v5  ;;  %7599 = vmatmul.mubr.bf16.gmra.mxu0 %v12744_v62  ;;  %v13053_v55 = vadd.f32 %v14615_v19, %v4782_v29  ;;  %v2798_v62 = vrot.slane %v2676_v60, 3  ;;  %v5626_v19 = vld [vmem:[#allocation5 + $0x70] sm:$0xff] }
 0x409   : > { %v6942_v58 = vpop.f32.mrf.mxu0  ;;  %7602 = vmatprep.mubr.msk.bf16.mxu0 %vm14000_vm9, %v14561_v0 }
 0x40a   : > { %v4785_v21 = vadd.f32 %v6941_v28, %v14616_v26  ;;  %v2799_v63 = vsel %vm14620_vm5, %v2782_v7, %v2798_v62 }
 0x40b   : > { %v6943_v14 = vpop.f32.mrf.mxu0  ;;  %v2969_v39 = vpack.c.bf16 %v2798_v62, %v2799_v63 }
 0x40c   : > { %v6944_v11 = vadd.f32 %v6943_v14, %v6942_v58  ;;  %v13059_v12 = vadd.f32 %v14617_v47, %v4785_v21 }
 0x40d   : > { %v6945_v6 = vpop.f32.mrf.mxu0 }
 0x40e   : > { %v4790_v53 = vadd.f32 %v6944_v11, %v14618_v25  ;;  %v5625_v25 = vld [vmem:[#allocation5 + $0x68] sm:$0xff] }
 0x40f   : > { %v6946_v59 = vpop.f32.mrf.mxu0 }
 0x410   : > { %v6947_v37 = vadd.f32 %v6946_v59, %v6945_v6  ;;  %7603 = vmatmul.mubr.bf16.gmra.mxu0 %v2948_v31  ;;  %v13065_v52 = vadd.f32 %v12855_v18, %v4790_v53 }
 0x411   : > { %v7010_v56 = vpop.f32.mrf.mxu0  ;;  %7606 = vmatprep.mubr.msk.bf16.mxu0 %vm14000_vm9, %v14561_v0 }
 0x412   : > { %v4793_v42 = vadd.f32 %v6947_v37, %v14619_v17 }
 0x413   : > { %v7011_v43 = vpop.f32.mrf.mxu0 }
 0x414   : > { %v7012_v51 = vadd.f32 %v7011_v43, %v7010_v56  ;;  %v13074_v44 = vadd.f32 %v12865_v8, %v4793_v42 }
 0x415   : > { %v7013_v60 = vpop.f32.mrf.mxu0 }
 0x416   : > { %v4904_v31 = vadd.f32 %v7012_v51, %v4831_v27  ;;  %v5624_v51 = vld [vmem:[#allocation5 + $0x60] sm:$0xff] }
 0x417   : > { %v7014_v18 = vpop.f32.mrf.mxu0 }
 0x418   : > { %v7015_v38 = vadd.f32 %v7014_v18, %v7013_v60  ;;  %7607 = vmatmul.mubr.bf16.gmra.mxu0 %v2969_v39  ;;  %v13077_v10 = vadd.f32 %v14621_v40, %v4904_v31  ;;  %v5715_v60 = vld [vmem:[#allocation5 + $0xf8] sm:$0xff] }
 0x419   : > { %v7016_v33 = vpop.f32.mrf.mxu0  ;;  %7677 = vmatprep.mubr.msk.f32.mxu0 %vm14000_vm9, %v14561_v0  ;;  %7646 = vmatpush3.msra.mxu0 %v5715_v60 }
 0x41a   : > { %v4907_v34 = vadd.f32 %v7015_v38, %v4834_v3  ;;  %v7077_v3 = vpop.f32.mrf.mxu1  ;;  %7647 = vmatprep.subr.mxu0 %v14561_v0 }
 0x41b   : > { %v7017_v15 = vpop.f32.mrf.mxu0 }
 0x41c   : > { %v7018_v7 = vadd.f32 %v7017_v15, %v7016_v33  ;;  %v13082_v32 = vadd.f32 %v14622_v4, %v4907_v34  ;;  %v5714_v15 = vld [vmem:[#allocation5 + $0xf0] sm:$0xff] }
 0x41d   : > { %v7019_v8 = vpop.f32.mrf.mxu0  ;;  %7648 = vmatpush3.msra.mxu0 %v5714_v15 }
 0x41e   : > { %v4912_v61 = vadd.f32 %v7018_v7, %v4839_v20  ;;  %v7078_v20 = vpop.f32.mrf.mxu1  ;;  %7649 = vmatprep.subr.mxu0 %v14561_v0 }
 0x41f   : > { %v7020_v27 = vpop.f32.mrf.mxu0  ;;  %v7079_v59 = vadd.f32 %v7078_v20, %v7077_v3 }
 0x420   : > { %v7021_v45 = vadd.f32 %v7020_v27, %v7019_v8  ;;  %v13085_v57 = vadd.f32 %v12900_v24, %v4912_v61  ;;  %v5627_v24 = vld [vmem:[#allocation5 + $0x78] sm:$0xff] }
 0x421   : > { %v7022_v41 = vpop.f32.mrf.mxu0  ;;  %7611 = vmatpush3.msra.mxu1 %v5627_v24 }
 0x422   : > { %v4915_v36 = vadd.f32 %v7021_v45, %v4842_v22  ;;  %7612 = vmatprep.subr.mxu1 %v14561_v0 }
 0x423   : > { %v7023_v48 = vpop.f32.mrf.mxu0  ;;  %7613 = vmatpush3.msra.mxu1 %v5626_v19 }
 0x424   : > { %v7024_v13 = vadd.f32 %v7023_v48, %v7022_v41  ;;  %v13088_v2 = vadd.f32 %v12905_v1, %v4915_v36  ;;  %7614 = vmatprep.subr.mxu1 %v14561_v0  ;;  %v5622_v36 = vld [vmem:[#allocation5 + $0x50] sm:$0xff]  ;;  %v5713_v48 = vld [vmem:[#allocation5 + $0xe8] sm:$0xff] }
 0x425   : > { %v7025_v23 = vpop.f32.mrf.mxu0  ;;  %7615 = vmatpush3.msra.mxu1 %v5625_v25  ;;  %7650 = vmatpush3.msra.mxu0 %v5713_v48 }
 0x426   : > { %v4920_v9 = vadd.f32 %v7024_v13, %v4847_v54  ;;  %7616 = vmatprep.subr.mxu1 %v14561_v0  ;;  %v5621_v13 = vld [vmem:[#allocation5 + $0x48] sm:$0xff]  ;;  %7651 = vmatprep.subr.mxu0 %v14561_v0 }
 0x427   : > { %v7026_v5 = vpop.f32.mrf.mxu0  ;;  %7617 = vmatpush3.msra.mxu1 %v5624_v51 }
 0x428   : > { %v7027_v46 = vadd.f32 %v7026_v5, %v7025_v23  ;;  %v13091_v29 = vadd.f32 %v12910_v35, %v4920_v9  ;;  %7618 = vmatprep.subr.mxu1 %v14561_v0 }
 0x429   : > { %v7028_v16 = vpop.f32.mrf.mxu0 }
 0x42a   : > { %v4923_v28 = vadd.f32 %v7027_v46, %v4850_v50 }
 0x42b   : > { %v7029_v58 = vpop.f32.mrf.mxu0  ;;  %v7080_v22 = vpop.f32.mrf.mxu1 }
 0x42c   : > { %v7030_v26 = vadd.f32 %v7029_v58, %v7028_v16  ;;  %v13094_v1 = vadd.f32 %v12913_v30, %v4923_v28 }
 0x42d   : > { %v7031_v54 = vpop.f32.mrf.mxu0  ;;  %v7081_v21 = vpop.f32.mrf.mxu1 }
 0x42e   : > { %v4928_v35 = vadd.f32 %v7030_v26, %v13053_v55  ;;  %v7082_v14 = vadd.f32 %v7081_v21, %v7080_v22  ;;  %v5711_v21 = vld [vmem:[#allocation5 + $0xd8] sm:$0xff] }
 0x42f   : > { %v7032_v50 = vpop.f32.mrf.mxu0  ;;  %v7083_v11 = vpop.f32.mrf.mxu1 }
 0x430   : > { %v7033_v47 = vadd.f32 %v7032_v50, %v7031_v54  ;;  %v13100_v6 = vadd.f32 %v12918_v49, %v4928_v35  ;;  %v5623_v49 = vld [vmem:[#allocation5 + $0x58] sm:$0xff]  ;;  %v5620_v54 = vld [vmem:[#allocation5 + $0x40] sm:$0xff] }
 0x431   : > { %v7034_v53 = vpop.f32.mrf.mxu0  ;;  %v7084_v30 = vpop.f32.mrf.mxu1  ;;  %7619 = vmatpush3.msra.mxu1 %v5623_v49  ;;  %v5619_v35 = vld [vmem:[#allocation5 + $0x38] sm:$0xff] }
 0x432   : > { %v4931_v62 = vadd.f32 %v7033_v47, %v13059_v12  ;;  %v7085_v37 = vadd.f32 %v7084_v30, %v7083_v11  ;;  %7620 = vmatprep.subr.mxu1 %v14561_v0  ;;  %v5710_v11 = vld [vmem:[#allocation5 + $0xd0] sm:$0xff] }
 0x433   : > { %v7035_v55 = vpop.f32.mrf.mxu0  ;;  %v7148_v56 = vpop.f32.mrf.mxu1  ;;  %7621 = vmatpush3.msra.mxu1 %v5622_v36 }
 0x434   : > { %v7036_v17 = vadd.f32 %v7035_v55, %v7034_v53  ;;  %v13104_v42 = vadd.f32 %v7079_v59, %v4931_v62  ;;  %7622 = vmatprep.subr.mxu1 %v14561_v0 }
 0x435   : > { %v7037_v43 = vpop.f32.mrf.mxu0  ;;  %v7149_v63 = vpop.f32.mrf.mxu1  ;;  %7623 = vmatpush3.msra.mxu1 %v5621_v13  ;;  %v5615_v13 = vld [vmem:[#allocation5 + $0x18] sm:$0xff] }
 0x436   : > { %v4936_v31 = vadd.f32 %v7036_v17, %v13065_v52  ;;  %v7150_v39 = vadd.f32 %v7149_v63, %v7148_v56  ;;  %7624 = vmatprep.subr.mxu1 %v14561_v0  ;;  %v5709_v56 = vld [vmem:[#allocation5 + $0xc8] sm:$0xff]  ;;  %v5618_v17 = vld [vmem:[#allocation5 + $0x30] sm:$0xff] }
 0x437   : > { %v7038_v18 = vpop.f32.mrf.mxu0  ;;  %v7151_v12 = vpop.f32.mrf.mxu1  ;;  %7625 = vmatpush3.msra.mxu1 %v5620_v54 }
 0x438   : > { %v7039_v38 = vadd.f32 %v7038_v18, %v7037_v43  ;;  %v13109_v40 = vadd.f32 %v7082_v14, %v4936_v31  ;;  %7626 = vmatprep.subr.mxu1 %v14561_v0  ;;  %v5708_v43 = vld [vmem:[#allocation5 + $0xc0] sm:$0xff] }
 0x439   : > { %v7102_v33 = vpop.f32.mrf.mxu0  ;;  %v7152_v34 = vpop.f32.mrf.mxu1  ;;  %7627 = vmatpush3.msra.mxu1 %v5619_v35 }
 0x43a   : > { %v4939_v52 = vadd.f32 %v7039_v38, %v13074_v44  ;;  %v7153_v7 = vadd.f32 %v7152_v34, %v7151_v12  ;;  %v5712_v44 = vld [vmem:[#allocation5 + $0xe0] sm:$0xff]  ;;  %7628 = vmatprep.subr.mxu1 %v14561_v0 }
 0x43b   : > { %v7103_v4 = vpop.f32.mrf.mxu0  ;;  %v7154_v8 = vpop.f32.mrf.mxu1  ;;  %7652 = vmatpush3.msra.mxu0 %v5712_v44  ;;  %7629 = vmatpush3.msra.mxu1 %v5618_v17 }
 0x43c   : > { %v7104_v61 = vadd.f32 %v7103_v4, %v7102_v33  ;;  %v13114_v27 = vadd.f32 %v7085_v37, %v4939_v52  ;;  %7653 = vmatprep.subr.mxu0 %v14561_v0  ;;  %7630 = vmatprep.subr.mxu1 %v14561_v0  ;;  %v5707_v33 = vld [vmem:[#allocation5 + $0xb8] sm:$0xff]  ;;  %v5617_v4 = vld [vmem:[#allocation5 + $0x28] sm:$0xff] }
 0x43d   : > { %v7105_v45 = vpop.f32.mrf.mxu0  ;;  %v7155_v41 = vpop.f32.mrf.mxu1  ;;  %7654 = vmatpush3.msra.mxu0 %v5711_v21  ;;  %7631 = vmatpush3.msra.mxu1 %v5617_v4 }
 0x43e   : > { %v5050_v3 = vadd.f32 %v7104_v61, %v13077_v10  ;;  %v7156_v23 = vadd.f32 %v7155_v41, %v7154_v8  ;;  %7655 = vmatprep.subr.mxu0 %v14561_v0  ;;  %v5616_v8 = vld [vmem:[#allocation5 + $0x20] sm:$0xff]  ;;  %v5706_v61 = vld [vmem:[#allocation5 + $0xb0] sm:$0xff]  ;;  %v5705_v41 = vld [vmem:[#allocation5 + $0xa8] sm:$0xff]  ;;  %7632 = vmatprep.subr.mxu1 %v14561_v0 }
 0x43f   : > { %v7106_v9 = vpop.f32.mrf.mxu0  ;;  %v7157_v5 = vpop.f32.mrf.mxu1  ;;  %7656 = vmatpush3.msra.mxu0 %v5710_v11  ;;  %7633 = vmatpush3.msra.mxu1 %v5616_v8 }
 0x440   : > { %v7107_v46 = vadd.f32 %v7106_v9, %v7105_v45  ;;  %v13119_v20 = vadd.f32 %v7150_v39, %v5050_v3  ;;  %7657 = vmatprep.subr.mxu0 %v14561_v0  ;;  %v5704_v3 = vld [vmem:[#allocation5 + $0xa0] sm:$0xff]  ;;  %7634 = vmatprep.subr.mxu1 %v14561_v0 }
 0x441   : > { %v7108_v16 = vpop.f32.mrf.mxu0  ;;  %v7158_v28 = vpop.f32.mrf.mxu1  ;;  %7658 = vmatpush3.msra.mxu0 %v5709_v56  ;;  %7635 = vmatpush3.msra.mxu1 %v5615_v13 }
 0x442   : > { %v5053_v10 = vadd.f32 %v7107_v46, %v13082_v32  ;;  %v7159_v24 = vadd.f32 %v7158_v28, %v7157_v5  ;;  %7659 = vmatprep.subr.mxu0 %v14561_v0  ;;  %v5703_v28 = vld [vmem:[#allocation5 + $0x98] sm:$0xff]  ;;  %7636 = vmatprep.subr.mxu1 %v14561_v0 }
 0x443   : > { %v7109_v19 = vpop.f32.mrf.mxu0  ;;  %v7160_v58 = vpop.f32.mrf.mxu1  ;;  %7660 = vmatpush3.msra.mxu0 %v5708_v43 }
 0x444   : > { %v7110_v22 = vadd.f32 %v7109_v19, %v7108_v16  ;;  %v13124_v26 = vadd.f32 %v7153_v7, %v5053_v10  ;;  %7661 = vmatprep.subr.mxu0 %v14561_v0  ;;  %v5614_v16 = vld [vmem:[#allocation5 + $0x10] sm:$0xff]  ;;  %v5613_v19 = vld [vmem:[#allocation5 + $0x8] sm:$0xff] }
 0x445   : > { %v7111_v14 = vpop.f32.mrf.mxu0  ;;  %v7161_v50 = vpop.f32.mrf.mxu1  ;;  %7662 = vmatpush3.msra.mxu0 %v5707_v33  ;;  %7637 = vmatpush3.msra.mxu1 %v5614_v16 }
 0x446   : > { %v5058_v47 = vadd.f32 %v7110_v22, %v13085_v57  ;;  %v7162_v25 = vadd.f32 %v7161_v50, %v7160_v58  ;;  %7663 = vmatprep.subr.mxu0 %v14561_v0  ;;  %v5702_v58 = vld [vmem:[#allocation5 + $0x90] sm:$0xff]  ;;  %7638 = vmatprep.subr.mxu1 %v14561_v0 }
 0x447   : > { %v7112_v32 = vpop.f32.mrf.mxu0  ;;  %v7163_v53 = vpop.f32.mrf.mxu1  ;;  %7664 = vmatpush3.msra.mxu0 %v5706_v61  ;;  %7639 = vmatpush3.msra.mxu1 %v5613_v19 }
 0x448   : > { %v7113_v30 = vadd.f32 %v7112_v32, %v7111_v14  ;;  %v13129_v59 = vadd.f32 %v7156_v23, %v5058_v47  ;;  %7665 = vmatprep.subr.mxu0 %v14561_v0  ;;  %7640 = vmatprep.subr.mxu1 %v14561_v0  ;;  %v5612_v47 = vld [vmem:[#allocation5] sm:$0xff] }
 0x449   : > { %v7114_v62 = vpop.f32.mrf.mxu0  ;;  %v7164_v37 = vpop.f32.mrf.mxu1  ;;  %7666 = vmatpush3.msra.mxu0 %v5705_v41  ;;  %7641 = vmatpush3.msra.mxu1 %v5612_v47 }
 0x44a   : > { %v5061_v57 = vadd.f32 %v7113_v30, %v13088_v2  ;;  %v7165_v55 = vadd.f32 %v7164_v37, %v7163_v53  ;;  %7667 = vmatprep.subr.mxu0 %v14561_v0  ;;  %v5700_v30 = vld [vmem:[#allocation5 + $0x80] sm:$0xff]  ;;  %7680 = vmatprep.subr.mxu1 %v14561_v0 }
 0x44b   : > { %v7115_v63 = vpop.f32.mrf.mxu0  ;;  %v7166_v51 = vpop.f32.mrf.mxu1  ;;  %7668 = vmatpush3.msra.mxu0 %v5704_v3 }
 0x44c   : > { %v7116_v49 = vadd.f32 %v7115_v63, %v7114_v62  ;;  %v13134_v60 = vadd.f32 %v7159_v24, %v5061_v57  ;;  %7669 = vmatprep.subr.mxu0 %v14561_v0 }
 0x44d   : > { %v7117_v31 = vpop.f32.mrf.mxu0  ;;  %v7167_v39 = vpop.f32.mrf.mxu1  ;;  %7670 = vmatpush3.msra.mxu0 %v5703_v28 }
 0x44e   : > { %v5066_v2 = vadd.f32 %v7116_v49, %v13091_v29  ;;  %v7168_v18 = vadd.f32 %v7167_v39, %v7166_v51  ;;  %7671 = vmatprep.subr.mxu0 %v14561_v0 }
 0x44f   : > { %v7118_v12 = vpop.f32.mrf.mxu0  ;;  %v7169_v38 = vpop.f32.mrf.mxu1  ;;  %7672 = vmatpush3.msra.mxu0 %v5702_v58 }
 0x450   : > { %v7119_v34 = vadd.f32 %v7118_v12, %v7117_v31  ;;  %v13140_v15 = vadd.f32 %v7162_v25, %v5066_v2  ;;  %7673 = vmatprep.subr.mxu0 %v14561_v0  ;;  %v5701_v25 = vld [vmem:[#allocation5 + $0x88] sm:$0xff] }
 0x451   : > { %v7120_v52 = vpop.f32.mrf.mxu0  ;;  %v7170_v7 = vpop.f32.mrf.mxu1  ;;  %7674 = vmatpush3.msra.mxu0 %v5701_v25 }
 0x452   : > { %v5069_v45 = vadd.f32 %v7119_v34, %v13094_v1  ;;  %v7171_v29 = vadd.f32 %v7170_v7, %v7169_v38  ;;  %7675 = vmatprep.subr.mxu0 %v14561_v0 }
 0x453   : > { %v7121_v36 = vpop.f32.mrf.mxu0  ;;  %v7172_v48 = vpop.f32.mrf.mxu1  ;;  %7676 = vmatpush3.msra.mxu0 %v5700_v30 }
 0x454   : > { %v7122_v23 = vadd.f32 %v7121_v36, %v7120_v52  ;;  %v13146_v44 = vadd.f32 %v7165_v55, %v5069_v45  ;;  %7715 = vmatprep.subr.mxu0 %v14561_v0 }
 0x455   : > { %v7123_v9 = vpop.f32.mrf.mxu0  ;;  %v7173_v5 = vpop.f32.mrf.mxu1 }
 0x456   : > { %v5074_v1 = vadd.f32 %v7122_v23, %v13100_v6  ;;  %v7174_v46 = vadd.f32 %v7173_v5, %v7172_v48 }
 0x457   : > { %v7124_v10 = vpop.f32.mrf.mxu0  ;;  %v7175_v24 = vpop.f32.mrf.mxu1 }
 0x458   : > { %v7125_v22 = vadd.f32 %v7124_v10, %v7123_v9  ;;  %v13153_v54 = vadd.f32 %v7168_v18, %v5074_v1 }
 0x459   : > { %v7126_v21 = vpop.f32.mrf.mxu0  ;;  %v7176_v6 = vpop.f32.mrf.mxu1 }
 0x45a   : > { %v5077_v35 = vadd.f32 %v7125_v22, %v13104_v42  ;;  %v7177_v14 = vadd.f32 %v7176_v6, %v7175_v24 }
 0x45b   : > { %v7127_v50 = vpop.f32.mrf.mxu0  ;;  %v13158_v11 = vpop.f32.mrf.mxu1 }
 0x45c   : > { %v7128_v32 = vadd.f32 %v7127_v50, %v7126_v21  ;;  %v13162_v53 = vadd.f32 %v7171_v29, %v5077_v35 }
 0x45d   : > { %v7129_v62 = vpop.f32.mrf.mxu0  ;;  %v13164_v42 = vpop.f32.mrf.mxu1 }
 0x45e   : > { %v5082_v37 = vadd.f32 %v7128_v32, %v13109_v40 }
 0x45f   : > { %v7130_v57 = vpop.f32.mrf.mxu0  ;;  %v13169_v55 = vpop.f32.mrf.mxu1 }
 0x460   : > { %v7131_v56 = vadd.f32 %v7130_v57, %v7129_v62  ;;  %v5155_v17 = vadd.f32 %v7174_v46, %v5082_v37 }
 0x461   : > { %v7194_v43 = vpop.f32.mrf.mxu0  ;;  %v13172_v63 = vpop.f32.mrf.mxu1 }
 0x462   : > { %v5085_v51 = vadd.f32 %v7131_v56, %v13114_v27 }
 0x463   : > { %v7195_v49 = vpop.f32.mrf.mxu0  ;;  %v13175_v31 = vpop.f32.mrf.mxu1 }
 0x464   : > { %v7196_v39 = vadd.f32 %v7195_v49, %v7194_v43  ;;  %v5158_v2 = vadd.f32 %v7177_v14, %v5085_v51 }
 0x465   : > { %v7197_v18 = vpop.f32.mrf.mxu0  ;;  %v13177_v40 = vpop.f32.mrf.mxu1 }
 0x466   : > { %v13180_v12 = vadd.f32 %v7196_v39, %v13119_v20 }
 0x467   : > { %v7198_v38 = vpop.f32.mrf.mxu0  ;;  %v13182_v33 = vpop.f32.mrf.mxu1 }
 0x468   : > { %v7199_v34 = vadd.f32 %v7198_v38, %v7197_v18 }
 0x469   : > { %v7200_v52 = vpop.f32.mrf.mxu0  ;;  %v13184_v7 = vpop.f32.mrf.mxu1 }
 0x46a   : > { %v13187_v27 = vadd.f32 %v7199_v34, %v13124_v26 }
 0x46b   : > { %v7201_v4 = vpop.f32.mrf.mxu0  ;;  %v7252_v8 = vpop.f32.mrf.mxu1 }
 0x46c   : > { %v7202_v61 = vadd.f32 %v7201_v4, %v7200_v52 }
 0x46d   : > { %v7203_v45 = vpop.f32.mrf.mxu0  ;;  %v7253_v29 = vpop.f32.mrf.mxu1 }
 0x46e   : > { %v13190_v41 = vadd.f32 %v7202_v61, %v13129_v59  ;;  %v7254_v20 = vadd.f32 %v7253_v29, %v7252_v8 }
 0x46f   : > { %v7204_v36 = vpop.f32.mrf.mxu0  ;;  %v13192_v48 = vpop.f32.mrf.mxu1 }
 0x470   : > { %v7205_v13 = vadd.f32 %v7204_v36, %v7203_v45 }
 0x471   : > { %v7206_v3 = vpop.f32.mrf.mxu0  ;;  %v13194_v23 = vpop.f32.mrf.mxu1 }
 0x472   : > { %v13197_v9 = vadd.f32 %v7205_v13, %v13134_v60 }
 0x473   : > { %v7207_v26 = vpop.f32.mrf.mxu0  ;;  %v13199_v5 = vpop.f32.mrf.mxu1 }
 0x474   : > { %v7208_v1 = vadd.f32 %v7207_v26, %v7206_v3 }
 0x475   : > { %v7209_v46 = vpop.f32.mrf.mxu0  ;;  %v13201_v16 = vpop.f32.mrf.mxu1 }
 0x476   : > { %v5212_v59 = vadd.f32 %v7208_v1, %v13140_v15 }
 0x477   : > { %v7210_v28 = vpop.f32.mrf.mxu0  ;;  %v7261_v10 = vpop.f32.mrf.mxu1 }
 0x478   : > { %v7211_v24 = vadd.f32 %v7210_v28, %v7209_v46  ;;  %v13204_v19 = vadd.f32 %v7254_v20, %v5212_v59 }
 0x479   : > { %v7212_v58 = vpop.f32.mrf.mxu0  ;;  %v7262_v22 = vpop.f32.mrf.mxu1 }
 0x47a   : > { %v13207_v21 = vadd.f32 %v7211_v24, %v13146_v44  ;;  %v7263_v60 = vadd.f32 %v7262_v22, %v7261_v10 }
 0x47b   : > { %v7213_v6 = vpop.f32.mrf.mxu0  ;;  %v7264_v35 = vpop.f32.mrf.mxu1 }
 0x47c   : > { %v7214_v14 = vadd.f32 %v7213_v6, %v7212_v58 }
 0x47d   : > { %v7215_v50 = vpop.f32.mrf.mxu0  ;;  %v7265_v47 = vpop.f32.mrf.mxu1 }
 0x47e   : > { %v13210_v25 = vadd.f32 %v7214_v14, %v13153_v54  ;;  %v7266_v15 = vadd.f32 %v7265_v47, %v7264_v35 }
 0x47f   : > { %v7216_v32 = vpop.f32.mrf.mxu0  ;;  %v7267_v30 = vpop.f32.mrf.mxu1 }
 0x480   : > { %v7217_v62 = vadd.f32 %v7216_v32, %v7215_v50  ;;  %v7242_v32 = vadd.f32 %v13164_v42, %v13158_v11  ;;  %v7248_v11 = vadd.f32 %v13177_v40, %v13175_v31 }
 0x481   : > { %v7218_v37 = vpop.f32.mrf.mxu0  ;;  %v7268_v57 = vpop.f32.mrf.mxu1 }
 0x482   : > { %v5223_v56 = vadd.f32 %v7217_v62, %v13162_v53  ;;  %v7269_v43 = vadd.f32 %v7268_v57, %v7267_v30  ;;  %v5269_v57 = vadd.f32 %v7242_v32, %v13180_v12 }
 0x483   : > { %v7219_v44 = vpop.f32.mrf.mxu0  ;;  %v7332_v61 = vpop.f32.mrf.mxu1 }
 0x484   : > { %v7220_v51 = vadd.f32 %v7219_v44, %v7218_v37  ;;  %v5296_v49 = vadd.f32 %v7263_v60, %v5223_v56 }
 0x485   : > { %v7221_v39 = vpop.f32.mrf.mxu0  ;;  %v7333_v36 = vpop.f32.mrf.mxu1 }
 0x486   : > { %v5228_v18 = vadd.f32 %v7220_v51, %v5155_v17 }
 0x487   : > { %v7222_v38 = vpop.f32.mrf.mxu0  ;;  %v7335_v53 = vpop.f32.mrf.mxu1 }
 0x488   : > { %v7223_v34 = vadd.f32 %v7222_v38, %v7221_v39  ;;  %v5301_v52 = vadd.f32 %v7266_v15, %v5228_v18  ;;  %v7334_v38 = vadd.f32 %v7333_v36, %v7332_v61 }
 0x489   : > { %v7286_v4 = vpop.f32.mrf.mxu0  ;;  %v7336_v46 = vpop.f32.mrf.mxu1 }
 0x48a   : > { %v5231_v54 = vadd.f32 %v7223_v34, %v5158_v2 }
 0x48b   : > { %v7287_v8 = vpop.f32.mrf.mxu0  ;;  %v7338_v17 = vpop.f32.mrf.mxu1 }
 0x48c   : > { %v5304_v45 = vadd.f32 %v7269_v43, %v5231_v54  ;;  %v7288_v30 = vadd.f32 %v7287_v8, %v7286_v4  ;;  %v7245_v43 = vadd.f32 %v13172_v63, %v13169_v55 }
 0x48d   : > { %v7289_v29 = vpop.f32.mrf.mxu0  ;;  %v7339_v2 = vpop.f32.mrf.mxu1 }
 0x48e   : > { %v5342_v44 = vadd.f32 %v7288_v30, %v5269_v57  ;;  %v5272_v34 = vadd.f32 %v7245_v43, %v13187_v27  ;;  %v7251_v27 = vadd.f32 %v13184_v7, %v13182_v33 }
 0x48f   : > { %v7290_v20 = vpop.f32.mrf.mxu0  ;;  %v7341_v60 = vpop.f32.mrf.mxu1 }
 0x490   : > { %v7291_v51 = vadd.f32 %v7290_v20, %v7289_v29  ;;  %v7337_v29 = vadd.f32 %v7336_v46, %v7335_v53  ;;  %v5277_v20 = vadd.f32 %v7248_v11, %v13190_v41 }
 0x491   : > { %v7292_v13 = vpop.f32.mrf.mxu0  ;;  %v7342_v14 = vpop.f32.mrf.mxu1 }
 0x492   : > { %v5345_v12 = vadd.f32 %v7291_v51, %v5272_v34 }
 0x493   : > { %v7293_v3 = vpop.f32.mrf.mxu0  ;;  %v7344_v15 = vpop.f32.mrf.mxu1 }
 0x494   : > { %v7294_v4 = vadd.f32 %v7293_v3, %v7292_v13  ;;  %v5418_v31 = vadd.f32 %v7337_v29, %v5345_v12  ;;  %v7340_v13 = vadd.f32 %v7339_v2, %v7338_v17  ;;  %v5280_v3 = vadd.f32 %v7251_v27, %v13197_v9 }
 0x495   : > { %v7295_v26 = vpop.f32.mrf.mxu0  ;;  %v7345_v62 = vpop.f32.mrf.mxu1 }
 0x497   : > { %v7296_v1 = vpop.f32.mrf.mxu0  ;;  %v13228_v18 = vpop.f32.mrf.mxu1 }
 0x499   : > { %v7298_v59 = vpop.f32.mrf.mxu0  ;;  %v7348_v55 = vpop.f32.mrf.mxu1 }
 0x49b   : > { %v7299_v28 = vpop.f32.mrf.mxu0  ;;  %v7350_v40 = vpop.f32.mrf.mxu1 }
 0x49c   : > { %v7300_v53 = vadd.f32 %v7299_v28, %v7298_v59 }
 0x49d   : > { %v13213_v10 = vpop.f32.mrf.mxu0 }
 0x49f   : > { %v13215_v24 = vpop.f32.mrf.mxu0 }
 0x4a0   : > { %v7303_v9 = vadd.f32 %v13215_v24, %v13213_v10 }
 0x4a1   : > { %v13217_v58 = vpop.f32.mrf.mxu0 }
 0x4a3   : > { %v13219_v22 = vpop.f32.mrf.mxu0 }
 0x4a4   : > { %v7306_v10 = vadd.f32 %v13219_v22, %v13217_v58 }
 0x4a5   : > { %v7307_v6 = vpop.f32.mrf.mxu0 }
 0x4a7   : > { %v7308_v35 = vpop.f32.mrf.mxu0 }
 0x4a8   : > { %v7309_v50 = vadd.f32 %v7308_v35, %v7307_v6  ;;  %v5415_v6 = vadd.f32 %v7334_v38, %v5342_v44  ;;  %v7343_v44 = vadd.f32 %v7342_v14, %v7341_v60 }
 0x4aa   : > { %v13221_v47 = vadd.f32 %v7309_v50, %v5296_v49  ;;  %v7297_v50 = vadd.f32 %v7296_v1, %v7295_v26  ;;  %v7257_v26 = vadd.f32 %v13194_v23, %v13192_v48  ;;  %v5358_v1 = vadd.f32 %v7300_v53, %v13204_v19 }
 0x4ab   : > { %v7260_v48 = vadd.f32 %v13201_v16, %v13199_v5 }
 0x4ac   : > { %v5353_v41 = vadd.f32 %v7297_v50, %v5280_v3  ;;  %v5288_v14 = vadd.f32 %v7257_v26, %v13207_v21  ;;  %v5805_v26 = vld [vmem:[#allocation5 + $0x170] sm:$0xff] }
 0x4ad   : > { %v5293_v21 = vadd.f32 %v7260_v48, %v13210_v25  ;;  %v5894_v48 = vld [vmem:[#allocation5 + $0x1e8] sm:$0xff] }
 0x4ae   : > { %v5426_v2 = vadd.f32 %v7343_v44, %v5353_v41 }
 0x4af   : > { %v5366_v16 = vadd.f32 %v7306_v10, %v5293_v21 }
 0x4b0   : > { %v7310_v37 = vpop.f32.mrf.mxu0 }
 0x4b2   : > { %v7311_v56 = vpop.f32.mrf.mxu0 }
 0x4b3   : > { %v7312_v39 = vadd.f32 %v7311_v56, %v7310_v37  ;;  %v7351_v56 = vpop.f32.mrf.mxu1 }
 0x4b4   : > { %v7313_v49 = vpop.f32.mrf.mxu0  ;;  %v7352_v27 = vadd.f32 %v7351_v56, %v7350_v40 }
 0x4b5   : > { %v13231_v54 = vadd.f32 %v7312_v39, %v5301_v52  ;;  %v5350_v52 = vadd.f32 %v7294_v4, %v5277_v20  ;;  %v7346_v39 = vadd.f32 %v7345_v62, %v7344_v15 }
 0x4b6   : > { %v7314_v42 = vpop.f32.mrf.mxu0  ;;  %v5439_v3 = vadd.f32 %v7352_v27, %v5366_v16 }
 0x4b7   : > { %v7315_v8 = vadd.f32 %v7314_v42, %v7313_v49  ;;  %v5423_v57 = vadd.f32 %v7340_v13, %v5350_v52  ;;  %v7353_v49 = vpop.f32.mrf.mxu1  ;;  %v5431_v19 = vadd.f32 %v7346_v39, %v5358_v1  ;;  %v5361_v42 = vadd.f32 %v7303_v9, %v5288_v14  ;;  %v5896_v1 = vld [vmem:[#allocation5 + $0x1f8] sm:$0xff]  ;;  %v5804_v39 = vld [vmem:[#allocation5 + $0x168] sm:$0xff] }
 0x4b8   : > { %v5487_v63 = vpop.f32.mrf.mxu0 }
 0x4b9   : > { %v13236_v35 = vadd.f32 %v7315_v8, %v5304_v45  ;;  %v5488_v61 = vadd.f32 %v5487_v63, %v5415_v6  ;;  %v7354_v15 = vpop.f32.mrf.mxu1  ;;  %v7349_v8 = vadd.f32 %v7348_v55, %v13228_v18 }
 0x4ba   : > { %v7592_v36 = vpop.f32.mrf.mxu0 }
 0x4bb   : > { %v5526_v30 = vmax.f32 %v5488_v61, 0.0  ;;  %v7356_v29 = vpop.f32.mrf.mxu1  ;;  %v5434_v36 = vadd.f32 %v7349_v8, %v5361_v42 }
 0x4bc   : > { %v5490_v32 = vpop.f32.mrf.mxu0 }
 0x4bd   : > { %v5491_v37 = vadd.f32 %v5490_v32, %v5418_v31  ;;  %v5546_v51 = vrot.slane %v5526_v30, 1  ;;  %v7357_v31 = vpop.f32.mrf.mxu1 }
 0x4be   : > { %v7593_v46 = vpop.f32.mrf.mxu0 }
 0x4bf   : > { %v5527_v45 = vmax.f32 %v5491_v37, 0.0  ;;  %v7355_v46 = vadd.f32 %v7354_v15, %v7353_v49  ;;  %v7359_v56 = vpop.f32.mrf.mxu1  ;;  %v5895_v49 = vld [vmem:[#allocation5 + $0x1f0] sm:$0xff]  ;;  %v5893_v15 = vld [vmem:[#allocation5 + $0x1e0] sm:$0xff] }
 0x4c0   : > { %v5495_v43 = vpop.f32.mrf.mxu0 }
 0x4c1   : > { %v5547_v33 = vrot.slane %v5527_v45, 1  ;;  %v5496_v7 = vadd.f32 %v5495_v43, %v5423_v57  ;;  %v5806_v57 = vld [vmem:[#allocation5 + $0x178] sm:$0xff] }
 0x4c2   : > { %v7596_v17 = vpop.f32.mrf.mxu0 }
 0x4c3   : > { %v5548_v59 = vsel %vm14623_vm0, %v5546_v51, %v5547_v33  ;;  %v5528_v28 = vmax.f32 %v5496_v7, 0.0 }
 0x4c4   : > { %v5575_v38 = vmax.f32 %v5526_v30, %v5548_v59  ;;  %v5498_v60 = vpop.f32.mrf.mxu0  ;;  %v7358_v59 = vadd.f32 %v7357_v31, %v7356_v29  ;;  %v5892_v29 = vld [vmem:[#allocation5 + $0x1d8] sm:$0xff] }
 0x4c5   : > { %v5549_v34 = vrot.slane %v5528_v28, 1  ;;  %v5499_v11 = vadd.f32 %v5498_v60, %v5426_v2 }
 0x4c6   : > { %v7597_v23 = vpop.f32.mrf.mxu0 }
 0x4c7   : > { %v5550_v24 = vsel %vm14624_vm1, %v5547_v33, %v5549_v34  ;;  %v5529_v12 = vmax.f32 %v5499_v11, 0.0  ;;  %v5442_v33 = vadd.f32 %v7355_v46, %v13221_v47  ;;  %v7360_v47 = vpop.f32.mrf.mxu1  ;;  %v5803_v11 = vld [vmem:[#allocation5 + $0x160] sm:$0xff] }
 0x4c8   : > { %v5576_v62 = vmax.f32 %v5527_v45, %v5550_v24  ;;  %v5503_v4 = vpop.f32.mrf.mxu0  ;;  %v7361_v42 = vadd.f32 %v7360_v47, %v7359_v56  ;;  %v5791_v47 = vld [vmem:[#allocation5 + $0x100] sm:$0xff] }
 0x4c9   : > { %v5551_v6 = vrot.slane %v5529_v12, 1  ;;  %v5504_v63 = vadd.f32 %v5503_v4, %v5431_v19 }
 0x4ca   : > { %v7600_v5 = vpop.f32.mrf.mxu0  ;;  %v5592_v32 = vrot.slane %v5576_v62, 6 }
 0x4cb   : > { %v5552_v20 = vsel %vm14625_vm4, %v5549_v34, %v5551_v6  ;;  %v5530_v61 = vmax.f32 %v5504_v63, 0.0  ;;  %v5447_v34 = vadd.f32 %v7358_v59, %v13231_v54  ;;  %v5801_v63 = vld [vmem:[#allocation5 + $0x150] sm:$0xff]  ;;  %v5885_v59 = vld [vmem:[#allocation5 + $0x1a0] sm:$0xff] }
 0x4cc   : > { %v5577_v58 = vmax.f32 %v5528_v28, %v5552_v20  ;;  %v5506_v22 = vpop.f32.mrf.mxu0 }
 0x4cd   : > { %v5553_v52 = vrot.slane %v5530_v61, 1  ;;  %v5507_v50 = vadd.f32 %v5506_v22, %v5434_v36  ;;  %v5891_v22 = vld [vmem:[#allocation5 + $0x1d0] sm:$0xff] }
 0x4ce   : > { %v5593_v13 = vrot.slane %v5577_v58, 6  ;;  %v7601_v18 = vpop.f32.mrf.mxu0  ;;  %v5800_v58 = vld [vmem:[#allocation5 + $0x148] sm:$0xff] }
 0x4cf   : > { %v5554_v25 = vsel %vm14626_vm6, %v5551_v6, %v5553_v52  ;;  %v5531_v55 = vmax.f32 %v5507_v50, 0.0  ;;  %v5450_v6 = vadd.f32 %v7361_v42, %v13236_v35  ;;  %v5984_v42 = vld [vmem:[#allocation5 + $0x260] sm:$0xff] }
 0x4d0   : > { %v5594_v30 = vsel %vm14627_vm12, %v5592_v32, %v5593_v13  ;;  %v13258_v37 = vmax.f32 %v5529_v12, %v5554_v25  ;;  %v5511_v53 = vpop.f32.mrf.mxu0  ;;  %v5802_v12 = vld [vmem:[#allocation5 + $0x158] sm:$0xff]  ;;  %v5799_v32 = vld [vmem:[#allocation5 + $0x140] sm:$0xff]  ;;  %v5890_v13 = vld [vmem:[#allocation5 + $0x1c8] sm:$0xff] }
 0x4d1   : > { %v13260_v41 = vmax.f32 %v5575_v38, %v5594_v30  ;;  %v5555_v45 = vrot.slane %v5531_v55, 1  ;;  %v5512_v40 = vadd.f32 %v5511_v53, %v5439_v3  ;;  %v5798_v3 = vld [vmem:[#allocation5 + $0x138] sm:$0xff]  ;;  %v5889_v30 = vld [vmem:[#allocation5 + $0x1c0] sm:$0xff] }
 0x4d2   : > { %v7604_v43 = vpop.f32.mrf.mxu0 }
 0x4d3   : > { %v5556_v44 = vsel %vm14628_vm14, %v5553_v52, %v5555_v45  ;;  %v5532_v51 = vmax.f32 %v5512_v40, 0.0  ;;  %7643 = vmatmul.mubr.f32.vlgmr.msra.gmra.mxu1 %v13260_v41  ;;  %v5717_v7 = vrot.slane %v13260_v41, 2  ;;  %v5888_v40 = vld [vmem:[#allocation5 + $0x1b8] sm:$0xff]  ;;  %v5796_v43 = vld [vmem:[#allocation5 + $0x128] sm:$0xff] }
 0x4d4   : > { %v13266_v17 = vmax.f32 %v5530_v61, %v5556_v44  ;;  %7681 = vmatpush3.msra.mxu1 %v5806_v57  ;;  %v5514_v9 = vpop.f32.mrf.mxu0  ;;  %7712 = vmatprep.mubr.msk.f32.mxu1 %vm14000_vm9, %v14561_v0  ;;  %v5887_v44 = vld [vmem:[#allocation5 + $0x1b0] sm:$0xff] }
 0x4d5   : > { %v5557_v28 = vrot.slane %v5532_v51, 1  ;;  %v5515_v2 = vadd.f32 %v5514_v9, %v5442_v33  ;;  %7682 = vmatprep.subr.mxu1 %v14561_v0  ;;  %7678 = vmatmul.mubr.f32.vlgmr.msra.gmra.mxu0 %v5717_v7  ;;  %v5795_v33 = vld [vmem:[#allocation5 + $0x120] sm:$0xff]  ;;  %v5886_v7 = vld [vmem:[#allocation5 + $0x1a8] sm:$0xff]  ;;  %v5794_v9 = vld [vmem:[#allocation5 + $0x118] sm:$0xff] }
 0x4d6   : > { %7683 = vmatpush3.msra.mxu1 %v5805_v26  ;;  %7716 = vmatpush3.msra.mxu0 %v5896_v1  ;;  %v7605_v38 = vpop.f32.mrf.mxu0  ;;  %v5595_v62 = vrot.slane %v13266_v17, 6 }
 0x4d7   : > { %v5558_v60 = vsel %vm14629_vm15, %v5555_v45, %v5557_v28  ;;  %v5533_v14 = vmax.f32 %v5515_v2, 0.0  ;;  %7684 = vmatprep.subr.mxu1 %v14561_v0  ;;  %7717 = vmatprep.subr.mxu0 %v14561_v0  ;;  %v5797_v45 = vld [vmem:[#allocation5 + $0x130] sm:$0xff]  ;;  %v5884_v2 = vld [vmem:[#allocation5 + $0x198] sm:$0xff]  ;;  %v5882_v38 = vld [vmem:[#allocation5 + $0x188] sm:$0xff] }
 0x4d8   : > { %v5580_v23 = vmax.f32 %v5531_v55, %v5558_v60  ;;  %7685 = vmatpush3.msra.mxu1 %v5804_v39  ;;  %7718 = vmatpush3.msra.mxu0 %v5895_v49  ;;  %v5519_v19 = vpop.f32.mrf.mxu0  ;;  %v5792_v39 = vld [vmem:[#allocation5 + $0x108] sm:$0xff]  ;;  %v5883_v49 = vld [vmem:[#allocation5 + $0x190] sm:$0xff]  ;;  %v5807_v60 = vrot.slane %v13260_v41, 4 }
 0x4d9   : > { %v5559_v10 = vrot.slane %v5533_v14, 1  ;;  %v5520_v24 = vadd.f32 %v5519_v19, %v5447_v34  ;;  %7686 = vmatprep.subr.mxu1 %v14561_v0  ;;  %7719 = vmatprep.subr.mxu0 %v14561_v0  ;;  %v5987_v34 = vld [vmem:[#allocation5 + $0x278] sm:$0xff]  ;;  %v5985_v41 = vld [vmem:[#allocation5 + $0x268] sm:$0xff]  ;;  %v6076_v19 = vld [vmem:[#allocation5 + $0x2f0] sm:$0xff] }
 0x4da   : > { %v5596_v4 = vrot.slane %v5580_v23, 6  ;;  %7687 = vmatpush3.msra.mxu1 %v5803_v11  ;;  %7720 = vmatpush3.msra.mxu0 %v5894_v48  ;;  %v7608_v54 = vpop.f32.mrf.mxu0  ;;  %v5986_v48 = vld [vmem:[#allocation5 + $0x270] sm:$0xff]  ;;  %v6077_v23 = vld [vmem:[#allocation5 + $0x2f8] sm:$0xff] }
 0x4db   : > { %v5560_v8 = vsel %vm14630_vm13, %v5557_v28, %v5559_v10  ;;  %v5534_v21 = vmax.f32 %v5520_v24, 0.0  ;;  %7688 = vmatprep.subr.mxu1 %v14561_v0  ;;  %7721 = vmatprep.subr.mxu0 %v14561_v0  ;;  %v5793_v28 = vld [vmem:[#allocation5 + $0x110] sm:$0xff]  ;;  %v5983_v24 = vld [vmem:[#allocation5 + $0x258] sm:$0xff] }
 0x4dc   : > { %v5597_v5 = vsel %vm14631_vm11, %v5595_v62, %v5596_v4  ;;  %v5581_v16 = vmax.f32 %v5532_v51, %v5560_v8  ;;  %7689 = vmatpush3.msra.mxu1 %v5802_v12  ;;  %7722 = vmatpush3.msra.mxu0 %v5893_v15  ;;  %v5522_v20 = vpop.f32.mrf.mxu0  ;;  %v6074_v12 = vld [vmem:[#allocation5 + $0x2e0] sm:$0xff]  ;;  %v5982_v15 = vld [vmem:[#allocation5 + $0x250] sm:$0xff]  ;;  %v6073_v62 = vld [vmem:[#allocation5 + $0x2d8] sm:$0xff] }
 0x4dd   : > { %v5561_v61 = vrot.slane %v5534_v21, 1  ;;  %v5523_v36 = vadd.f32 %v5522_v20, %v5450_v6  ;;  %7690 = vmatprep.subr.mxu1 %v14561_v0  ;;  %7723 = vmatprep.subr.mxu0 %v14561_v0  ;;  %v13286_v27 = vmax.f32 %v13258_v37, %v5597_v5  ;;  %v6072_v54 = vld [vmem:[#allocation5 + $0x2d0] sm:$0xff]  ;;  %v5980_v8 = vld [vmem:[#allocation5 + $0x240] sm:$0xff]  ;;  %v5979_v6 = vld [vmem:[#allocation5 + $0x238] sm:$0xff] }
 0x4de   : > { %v5598_v35 = vrot.slane %v5581_v16, 6  ;;  %7691 = vmatpush3.msra.mxu1 %v5801_v63  ;;  %7724 = vmatpush3.msra.mxu0 %v5892_v29  ;;  %v7609_v52 = vpop.f32.mrf.mxu0  ;;  %v6070_v63 = vld [vmem:[#allocation5 + $0x2c0] sm:$0xff]  ;;  %v5978_v29 = vld [vmem:[#allocation5 + $0x230] sm:$0xff]  ;;  %v6069_v5 = vld [vmem:[#allocation5 + $0x2b8] sm:$0xff] }
 0x4df   : > { %v5562_v50 = vsel %vm14632_vm2, %v5559_v10, %v5561_v61  ;;  %v5535_v31 = vmax.f32 %v5523_v36, 0.0  ;;  %7692 = vmatprep.subr.mxu1 %v14561_v0  ;;  %7725 = vmatprep.subr.mxu0 %v14561_v0  ;;  %v5898_v11 = vrot.slane %v13286_v27, 4  ;;  %v6075_v10 = vld [vmem:[#allocation5 + $0x2e8] sm:$0xff]  ;;  %v6068_v20 = vld [vmem:[#allocation5 + $0x2b0] sm:$0xff]  ;;  %v6065_v52 = vld [vmem:[#allocation5 + $0x298] sm:$0xff] }
 0x4e0   : > { %v5582_v18 = vmax.f32 %v5533_v14, %v5562_v50  ;;  %7693 = vmatpush3.msra.mxu1 %v5800_v58  ;;  %7726 = vmatpush3.msra.mxu0 %v5891_v22  ;;  %v13292_v25 = vsel %vm14633_vm7, %v5596_v4, %v5598_v35  ;;  %v5881_v14 = vld [vmem:[#allocation5 + $0x180] sm:$0xff]  ;;  %v5981_v4 = vld [vmem:[#allocation5 + $0x248] sm:$0xff]  ;;  %v5975_v58 = vld [vmem:[#allocation5 + $0x218] sm:$0xff] }
 0x4e1   : > { %v5563_v55 = vrot.slane %v5535_v31, 1  ;;  %7694 = vmatprep.subr.mxu1 %v14561_v0  ;;  %7727 = vmatprep.subr.mxu0 %v14561_v0  ;;  %v5609_v37 = vmax.f32 %v13266_v17, %v13292_v25  ;;  %v5977_v16 = vld [vmem:[#allocation5 + $0x228] sm:$0xff]  ;;  %v6066_v22 = vld [vmem:[#allocation5 + $0x2a0] sm:$0xff]  ;;  %v5974_v35 = vld [vmem:[#allocation5 + $0x210] sm:$0xff] }
 0x4e2   : > { %7695 = vmatpush3.msra.mxu1 %v5799_v32  ;;  %7728 = vmatpush3.msra.mxu0 %v5890_v13  ;;  %v6067_v36 = vld [vmem:[#allocation5 + $0x2a8] sm:$0xff]  ;;  %v5972_v32 = vld [vmem:[#allocation5 + $0x200] sm:$0xff]  ;;  %v6161_v17 = vld [vmem:[#allocation5 + $0x358] sm:$0xff] }
 0x4e3   : > { %v5564_v53 = vsel %vm14634_vm8, %v5561_v61, %v5563_v55  ;;  %v5584_v46 = vmax.f32 %v5535_v31, %v5563_v55  ;;  %7696 = vmatprep.subr.mxu1 %v14561_v0  ;;  %7729 = vmatprep.subr.mxu0 %v14561_v0  ;;  %v5976_v61 = vld [vmem:[#allocation5 + $0x220] sm:$0xff]  ;;  %v5973_v50 = vld [vmem:[#allocation5 + $0x208] sm:$0xff]  ;;  %v6064_v31 = vld [vmem:[#allocation5 + $0x290] sm:$0xff] }
 0x4e4   : > { %v5583_v57 = vmax.f32 %v5534_v21, %v5564_v53  ;;  %7697 = vmatpush3.msra.mxu1 %v5798_v3  ;;  %7730 = vmatpush3.msra.mxu0 %v5889_v30  ;;  %v6071_v21 = vld [vmem:[#allocation5 + $0x2c8] sm:$0xff]  ;;  %v6062_v55 = vld [vmem:[#allocation5 + $0x280] sm:$0xff]  ;;  %v6165_v3 = vld [vmem:[#allocation5 + $0x378] sm:$0xff] }
 0x4e5   : > { %v5601_v56 = vrot.slane %v5584_v46, 6  ;;  %7698 = vmatprep.subr.mxu1 %v14561_v0  ;;  %7731 = vmatprep.subr.mxu0 %v14561_v0  ;;  %v6063_v13 = vld [vmem:[#allocation5 + $0x288] sm:$0xff]  ;;  %v6164_v30 = vld [vmem:[#allocation5 + $0x370] sm:$0xff]  ;;  %v6253_v53 = vld [vmem:[#allocation5 + $0x3f8] sm:$0xff] }
 0x4e6   : > { %v5600_v51 = vrot.slane %v5583_v57, 6  ;;  %7699 = vmatpush3.msra.mxu1 %v5797_v45  ;;  %7732 = vmatpush3.msra.mxu0 %v5888_v40  ;;  %v6252_v46 = vld [vmem:[#allocation5 + $0x3f0] sm:$0xff]  ;;  %v6162_v45 = vld [vmem:[#allocation5 + $0x360] sm:$0xff]  ;;  %v6251_v40 = vld [vmem:[#allocation5 + $0x3e8] sm:$0xff] }
 0x4e7   : > { %7700 = vmatprep.subr.mxu1 %v14561_v0  ;;  %7733 = vmatprep.subr.mxu0 %v14561_v0  ;;  %v6250_v25 = vld [vmem:[#allocation5 + $0x3e0] sm:$0xff]  ;;  %v6249_v57 = vld [vmem:[#allocation5 + $0x3d8] sm:$0xff] }
 0x4e8   : > { %v5602_v26 = vsel %vm14635_vm10, %v5600_v51, %v5601_v56  ;;  %7701 = vmatpush3.msra.mxu1 %v5796_v43  ;;  %7734 = vmatpush3.msra.mxu0 %v5887_v44  ;;  %v6159_v56 = vld [vmem:[#allocation5 + $0x348] sm:$0xff]  ;;  %v6248_v43 = vld [vmem:[#allocation5 + $0x3d0] sm:$0xff]  ;;  %v6158_v44 = vld [vmem:[#allocation5 + $0x340] sm:$0xff] }
 0x4e9   : > { %v13306_v1 = vmax.f32 %v5582_v18, %v5602_v26  ;;  %7702 = vmatprep.subr.mxu1 %v14561_v0  ;;  %7735 = vmatprep.subr.mxu0 %v14561_v0  ;;  %v5988_v18 = vrot.slane %v13286_v27, 6  ;;  %v6163_v27 = vld [vmem:[#allocation5 + $0x368] sm:$0xff]  ;;  %v6156_v26 = vld [vmem:[#allocation5 + $0x330] sm:$0xff] }
 0x4ea   : > { %7703 = vmatpush3.msra.mxu1 %v5795_v33  ;;  %7736 = vmatpush3.msra.mxu0 %v5886_v7  ;;  %v6247_v51 = vld [vmem:[#allocation5 + $0x3c8] sm:$0xff]  ;;  %v6157_v33 = vld [vmem:[#allocation5 + $0x338] sm:$0xff]  ;;  %v6246_v7 = vld [vmem:[#allocation5 + $0x3c0] sm:$0xff] }
 0x4eb   : > { %7704 = vmatprep.subr.mxu1 %v14561_v0  ;;  %7737 = vmatprep.subr.mxu0 %v14561_v0 }
 0x4ec   : > { %7705 = vmatpush3.msra.mxu1 %v5794_v9  ;;  %7738 = vmatpush3.msra.mxu0 %v5885_v59  ;;  %v6245_v9 = vld [vmem:[#allocation5 + $0x3b8] sm:$0xff]  ;;  %v6155_v59 = vld [vmem:[#allocation5 + $0x328] sm:$0xff] }
 0x4ed   : > { %7706 = vmatprep.subr.mxu1 %v14561_v0  ;;  %7739 = vmatprep.subr.mxu0 %v14561_v0 }
 0x4ee   : > { %7707 = vmatpush3.msra.mxu1 %v5793_v28  ;;  %7740 = vmatpush3.msra.mxu0 %v5884_v2  ;;  %v6244_v28 = vld [vmem:[#allocation5 + $0x3b0] sm:$0xff]  ;;  %v6154_v2 = vld [vmem:[#allocation5 + $0x320] sm:$0xff] }
 0x4ef   : > { %7708 = vmatprep.subr.mxu1 %v14561_v0  ;;  %7741 = vmatprep.subr.mxu0 %v14561_v0 }
 0x4f0   : > { %7709 = vmatpush3.msra.mxu1 %v5792_v39  ;;  %7742 = vmatpush3.msra.mxu0 %v5883_v49  ;;  %v6243_v39 = vld [vmem:[#allocation5 + $0x3a8] sm:$0xff]  ;;  %v6153_v49 = vld [vmem:[#allocation5 + $0x318] sm:$0xff] }
 0x4f1   : > { %7710 = vmatprep.subr.mxu1 %v14561_v0  ;;  %7743 = vmatprep.subr.mxu0 %v14561_v0 }
 0x4f2   : > { %7711 = vmatpush3.msra.mxu1 %v5791_v47  ;;  %7744 = vmatpush3.msra.mxu0 %v5882_v38  ;;  %v6242_v47 = vld [vmem:[#allocation5 + $0x3a0] sm:$0xff]  ;;  %v6152_v38 = vld [vmem:[#allocation5 + $0x310] sm:$0xff] }
 0x4f3   : > { %7713 = vmatmul.mubr.f32.vlgmr.msra.gmra.mxu1 %v5807_v60  ;;  %7745 = vmatprep.subr.mxu0 %v14561_v0  ;;  %v6241_v60 = vld [vmem:[#allocation5 + $0x398] sm:$0xff] }
 0x4f4   : > { %7750 = vmatprep.subr.mxu1 %v14561_v0  ;;  %7746 = vmatpush3.msra.mxu0 %v5881_v14  ;;  %v6151_v14 = vld [vmem:[#allocation5 + $0x308] sm:$0xff] }
 0x4f5   : > { %7747 = vmatprep.mubr.msk.f32.mxu0 %vm14000_vm9, %v14561_v0  ;;  %7751 = vmatpush3.msra.mxu1 %v5987_v34  ;;  %v6240_v34 = vld [vmem:[#allocation5 + $0x390] sm:$0xff] }
 0x4f6   : > { %7748 = vmatmul.mubr.f32.vlgmr.msra.gmra.mxu0 %v5898_v11  ;;  %7752 = vmatprep.subr.mxu1 %v14561_v0  ;;  %v6150_v11 = vld [vmem:[#allocation5 + $0x300] sm:$0xff] }
 0x4f7   : > { %7785 = vmatprep.subr.mxu0 %v14561_v0  ;;  %7753 = vmatpush3.msra.mxu1 %v5986_v48  ;;  %v6239_v48 = vld [vmem:[#allocation5 + $0x388] sm:$0xff] }
 0x4f8   : > { %7786 = vmatpush3.msra.mxu0 %v6077_v23  ;;  %7754 = vmatprep.subr.mxu1 %v14561_v0  ;;  %v6238_v23 = vld [vmem:[#allocation5 + $0x380] sm:$0xff] }
 0x4f9   : > { %7787 = vmatprep.subr.mxu0 %v14561_v0  ;;  %7755 = vmatpush3.msra.mxu1 %v5985_v41  ;;  %v6344_v41 = vld [vmem:[#allocation5 + $0x478] sm:$0xff] }
 0x4fa   : > { %7788 = vmatpush3.msra.mxu0 %v6076_v19  ;;  %7756 = vmatprep.subr.mxu1 %v14561_v0  ;;  %v6255_v19 = vrot.slane %v13306_v1, 2 }
 0x4fb   : > { %7789 = vmatprep.subr.mxu0 %v14561_v0  ;;  %7757 = vmatpush3.msra.mxu1 %v5984_v42  ;;  %v6343_v42 = vld [vmem:[#allocation5 + $0x470] sm:$0xff] }
 0x4fc   : > { %7790 = vmatpush3.msra.mxu0 %v6075_v10  ;;  %7758 = vmatprep.subr.mxu1 %v14561_v0  ;;  %v6342_v10 = vld [vmem:[#allocation5 + $0x468] sm:$0xff] }
 0x4fd   : > { %7791 = vmatprep.subr.mxu0 %v14561_v0  ;;  %7759 = vmatpush3.msra.mxu1 %v5983_v24  ;;  %v6341_v24 = vld [vmem:[#allocation5 + $0x460] sm:$0xff] }
 0x4fe   : > { %7792 = vmatpush3.msra.mxu0 %v6074_v12  ;;  %7760 = vmatprep.subr.mxu1 %v14561_v0  ;;  %v6340_v12 = vld [vmem:[#allocation5 + $0x458] sm:$0xff] }
 0x4ff   : > { %7793 = vmatprep.subr.mxu0 %v14561_v0  ;;  %7761 = vmatpush3.msra.mxu1 %v5982_v15  ;;  %v6339_v15 = vld [vmem:[#allocation5 + $0x450] sm:$0xff] }
 0x500   : > { %7794 = vmatpush3.msra.mxu0 %v6073_v62  ;;  %7762 = vmatprep.subr.mxu1 %v14561_v0  ;;  %v6338_v62 = vld [vmem:[#allocation5 + $0x448] sm:$0xff] }
 0x501   : > { %7795 = vmatprep.subr.mxu0 %v14561_v0  ;;  %7763 = vmatpush3.msra.mxu1 %v5981_v4  ;;  %v6337_v4 = vld [vmem:[#allocation5 + $0x440] sm:$0xff] }
 0x502   : > { %7796 = vmatpush3.msra.mxu0 %v6072_v54  ;;  %7764 = vmatprep.subr.mxu1 %v14561_v0  ;;  %v6336_v54 = vld [vmem:[#allocation5 + $0x438] sm:$0xff] }
 0x503   : > { %7797 = vmatprep.subr.mxu0 %v14561_v0  ;;  %7765 = vmatpush3.msra.mxu1 %v5980_v8  ;;  %v6335_v8 = vld [vmem:[#allocation5 + $0x430] sm:$0xff] }
 0x504   : > { %7798 = vmatpush3.msra.mxu0 %v6071_v21  ;;  %7766 = vmatprep.subr.mxu1 %v14561_v0  ;;  %v6334_v21 = vld [vmem:[#allocation5 + $0x428] sm:$0xff] }
 0x505   : > { %7799 = vmatprep.subr.mxu0 %v14561_v0  ;;  %7767 = vmatpush3.msra.mxu1 %v5979_v6  ;;  %v6333_v6 = vld [vmem:[#allocation5 + $0x420] sm:$0xff] }
 0x506   : > { %7800 = vmatpush3.msra.mxu0 %v6070_v63  ;;  %7768 = vmatprep.subr.mxu1 %v14561_v0  ;;  %v6332_v63 = vld [vmem:[#allocation5 + $0x418] sm:$0xff] }
 0x507   : > { %7801 = vmatprep.subr.mxu0 %v14561_v0  ;;  %7769 = vmatpush3.msra.mxu1 %v5978_v29  ;;  %v6331_v29 = vld [vmem:[#allocation5 + $0x410] sm:$0xff] }
 0x508   : > { %7802 = vmatpush3.msra.mxu0 %v6069_v5  ;;  %7770 = vmatprep.subr.mxu1 %v14561_v0  ;;  %v6330_v5 = vld [vmem:[#allocation5 + $0x408] sm:$0xff] }
 0x509   : > { %7803 = vmatprep.subr.mxu0 %v14561_v0  ;;  %7771 = vmatpush3.msra.mxu1 %v5977_v16  ;;  %v6329_v16 = vld [vmem:[#allocation5 + $0x400] sm:$0xff] }
 0x50a   : > { %7804 = vmatpush3.msra.mxu0 %v6068_v20  ;;  %7772 = vmatprep.subr.mxu1 %v14561_v0  ;;  %v6345_v20 = vrot.slane %v13306_v1, 4 }
 0x50b   : > { %7805 = vmatprep.subr.mxu0 %v14561_v0  ;;  %7773 = vmatpush3.msra.mxu1 %v5976_v61  ;;  %v5611_v61 = vld [vmem:[%s13469_s6] sm:$0x1] }
 0x50c   : > { %7806 = vmatpush3.msra.mxu0 %v6067_v36  ;;  %7774 = vmatprep.subr.mxu1 %v14561_v0 }
 0x50d   : > { %7807 = vmatprep.subr.mxu0 %v14561_v0  ;;  %7775 = vmatpush3.msra.mxu1 %v5975_v58 }
 0x50e   : > { %7808 = vmatpush3.msra.mxu0 %v6066_v22  ;;  %7776 = vmatprep.subr.mxu1 %v14561_v0 }
 0x50f   : > { %7809 = vmatprep.subr.mxu0 %v14561_v0  ;;  %7777 = vmatpush3.msra.mxu1 %v5974_v35 }
 0x510   : > { %7810 = vmatpush3.msra.mxu0 %v6065_v52  ;;  %7778 = vmatprep.subr.mxu1 %v14561_v0 }
 0x511   : > { %7811 = vmatprep.subr.mxu0 %v14561_v0  ;;  %7779 = vmatpush3.msra.mxu1 %v5973_v50 }
 0x512   : > { %7812 = vmatpush3.msra.mxu0 %v6064_v31  ;;  %7780 = vmatprep.subr.mxu1 %v14561_v0 }
 0x513   : > { %7813 = vmatprep.subr.mxu0 %v14561_v0  ;;  %7781 = vmatpush3.msra.mxu1 %v5972_v32 }
 0x514   : > { %7782 = vmatprep.mubr.msk.f32.mxu1 %vm14000_vm9, %v14561_v0  ;;  %7814 = vmatpush3.msra.mxu0 %v6063_v13 }
 0x515   : > { %7783 = vmatmul.mubr.f32.vlgmr.msra.gmra.mxu1 %v5988_v18  ;;  %7815 = vmatprep.subr.mxu0 %v14561_v0 }
 0x516   : > { %7820 = vmatprep.subr.mxu1 %v14561_v0  ;;  %7816 = vmatpush3.msra.mxu0 %v6062_v55 }
 0x517   : > { %7817 = vmatprep.mubr.msk.f32.mxu0 %vm14000_vm9, %v14561_v0  ;;  %7821 = vmatpush3.msra.mxu1 %v6165_v3 }
 0x518   : > { %7818 = vmatmul.mubr.f32.vlgmr.msra.gmra.mxu0 %v5609_v37  ;;  %7822 = vmatprep.subr.mxu1 %v14561_v0  ;;  %v6160_v37 = vld [vmem:[#allocation5 + $0x350] sm:$0xff] }
 0x519   : > { %7855 = vmatprep.subr.mxu0 %v14561_v0  ;;  %7823 = vmatpush3.msra.mxu1 %v6164_v30 }
 0x51a   : > { %7856 = vmatpush3.msra.mxu0 %v6253_v53  ;;  %7824 = vmatprep.subr.mxu1 %v14561_v0 }
 0x51b   : > { %7857 = vmatprep.subr.mxu0 %v14561_v0  ;;  %7825 = vmatpush3.msra.mxu1 %v6163_v27 }
 0x51c   : > { %7858 = vmatpush3.msra.mxu0 %v6252_v46  ;;  %7826 = vmatprep.subr.mxu1 %v14561_v0 }
 0x51d   : > { %7859 = vmatprep.subr.mxu0 %v14561_v0  ;;  %7827 = vmatpush3.msra.mxu1 %v6162_v45 }
 0x51e   : > { %7860 = vmatpush3.msra.mxu0 %v6251_v40  ;;  %7828 = vmatprep.subr.mxu1 %v14561_v0 }
 0x51f   : > { %7861 = vmatprep.subr.mxu0 %v14561_v0  ;;  %7829 = vmatpush3.msra.mxu1 %v6161_v17 }
 0x520   : > { %7862 = vmatpush3.msra.mxu0 %v6250_v25  ;;  %7830 = vmatprep.subr.mxu1 %v14561_v0 }
 0x521   : > { %7863 = vmatprep.subr.mxu0 %v14561_v0  ;;  %7831 = vmatpush3.msra.mxu1 %v6160_v37 }
 0x522   : > { %7864 = vmatpush3.msra.mxu0 %v6249_v57  ;;  %7832 = vmatprep.subr.mxu1 %v14561_v0 }
 0x523   : > { %7865 = vmatprep.subr.mxu0 %v14561_v0  ;;  %7833 = vmatpush3.msra.mxu1 %v6159_v56 }
 0x524   : > { %7866 = vmatpush3.msra.mxu0 %v6248_v43  ;;  %7834 = vmatprep.subr.mxu1 %v14561_v0 }
 0x525   : > { %7867 = vmatprep.subr.mxu0 %v14561_v0  ;;  %7835 = vmatpush3.msra.mxu1 %v6158_v44 }
 0x526   : > { %7868 = vmatpush3.msra.mxu0 %v6247_v51  ;;  %7836 = vmatprep.subr.mxu1 %v14561_v0 }
 0x527   : > { %7869 = vmatprep.subr.mxu0 %v14561_v0  ;;  %7837 = vmatpush3.msra.mxu1 %v6157_v33 }
 0x528   : > { %7870 = vmatpush3.msra.mxu0 %v6246_v7  ;;  %7838 = vmatprep.subr.mxu1 %v14561_v0 }
 0x529   : > { %7871 = vmatprep.subr.mxu0 %v14561_v0  ;;  %7839 = vmatpush3.msra.mxu1 %v6156_v26 }
 0x52a   : > { %7872 = vmatpush3.msra.mxu0 %v6245_v9  ;;  %7840 = vmatprep.subr.mxu1 %v14561_v0 }
 0x52b   : > { %7873 = vmatprep.subr.mxu0 %v14561_v0  ;;  %7841 = vmatpush3.msra.mxu1 %v6155_v59 }
 0x52c   : > { %7874 = vmatpush3.msra.mxu0 %v6244_v28  ;;  %7842 = vmatprep.subr.mxu1 %v14561_v0 }
 0x52d   : > { %7875 = vmatprep.subr.mxu0 %v14561_v0  ;;  %7843 = vmatpush3.msra.mxu1 %v6154_v2 }
 0x52e   : > { %7876 = vmatpush3.msra.mxu0 %v6243_v39  ;;  %7844 = vmatprep.subr.mxu1 %v14561_v0 }
 0x52f   : > { %7877 = vmatprep.subr.mxu0 %v14561_v0  ;;  %7845 = vmatpush3.msra.mxu1 %v6153_v49 }
 0x530   : > { %7878 = vmatpush3.msra.mxu0 %v6242_v47  ;;  %7846 = vmatprep.subr.mxu1 %v14561_v0 }
 0x531   : > { %7879 = vmatprep.subr.mxu0 %v14561_v0  ;;  %7847 = vmatpush3.msra.mxu1 %v6152_v38 }
 0x532   : > { %7880 = vmatpush3.msra.mxu0 %v6241_v60  ;;  %7848 = vmatprep.subr.mxu1 %v14561_v0 }
 0x533   : > { %7881 = vmatprep.subr.mxu0 %v14561_v0  ;;  %7849 = vmatpush3.msra.mxu1 %v6151_v14 }
 0x534   : > { %7882 = vmatpush3.msra.mxu0 %v6240_v34  ;;  %7850 = vmatprep.subr.mxu1 %v14561_v0 }
 0x535   : > { %7883 = vmatprep.subr.mxu0 %v14561_v0  ;;  %7851 = vmatpush3.msra.mxu1 %v6150_v11 }
 0x536   : > { %7852 = vmatprep.mubr.msk.f32.mxu1 %vm14000_vm9, %v14561_v0  ;;  %7884 = vmatpush3.msra.mxu0 %v6239_v48 }
 0x537   : > { %7853 = vmatmul.mubr.f32.vlgmr.msra.gmra.mxu1 %v13306_v1  ;;  %7885 = vmatprep.subr.mxu0 %v14561_v0 }
 0x538   : > { %7890 = vmatprep.subr.mxu1 %v14561_v0  ;;  %7886 = vmatpush3.msra.mxu0 %v6238_v23 }
 0x539   : > { %7887 = vmatprep.mubr.msk.f32.mxu0 %vm14000_vm9, %v14561_v0  ;;  %7891 = vmatpush3.msra.mxu1 %v6344_v41 }
 0x53a   : > { %7888 = vmatmul.mubr.f32.vlgmr.msra.gmra.mxu0 %v6255_v19  ;;  %7892 = vmatprep.subr.mxu1 %v14561_v0 }
 0x53b   : > { %7893 = vmatpush3.msra.mxu1 %v6343_v42  ;;  %7922 = vmatprep.mubr.msk.f32.mxu1 %vm14000_vm9, %v14561_v0 }
 0x53c   : > { %7894 = vmatprep.subr.mxu1 %v14561_v0 }
 0x53d   : > { %7895 = vmatpush3.msra.mxu1 %v6342_v10 }
 0x53e   : > { %7896 = vmatprep.subr.mxu1 %v14561_v0 }
 0x53f   : > { %7897 = vmatpush3.msra.mxu1 %v6341_v24 }
 0x540   : > { %7898 = vmatprep.subr.mxu1 %v14561_v0 }
 0x541   : > { %7899 = vmatpush3.msra.mxu1 %v6340_v12 }
 0x542   : > { %7900 = vmatprep.subr.mxu1 %v14561_v0 }
 0x543   : > { %7901 = vmatpush3.msra.mxu1 %v6339_v15 }
 0x544   : > { %7902 = vmatprep.subr.mxu1 %v14561_v0 }
 0x545   : > { %7903 = vmatpush3.msra.mxu1 %v6338_v62 }
 0x546   : > { %7904 = vmatprep.subr.mxu1 %v14561_v0 }
 0x547   : > { %7905 = vmatpush3.msra.mxu1 %v6337_v4 }
 0x548   : > { %7906 = vmatprep.subr.mxu1 %v14561_v0 }
 0x549   : > { %7907 = vmatpush3.msra.mxu1 %v6336_v54 }
 0x54a   : > { %7908 = vmatprep.subr.mxu1 %v14561_v0 }
 0x54b   : > { %7909 = vmatpush3.msra.mxu1 %v6335_v8 }
 0x54c   : > { %7910 = vmatprep.subr.mxu1 %v14561_v0 }
 0x54d   : > { %7911 = vmatpush3.msra.mxu1 %v6334_v21 }
 0x54e   : > { %7912 = vmatprep.subr.mxu1 %v14561_v0 }
 0x54f   : > { %7913 = vmatpush3.msra.mxu1 %v6333_v6 }
 0x550   : > { %7914 = vmatprep.subr.mxu1 %v14561_v0 }
 0x551   : > { %7915 = vmatpush3.msra.mxu1 %v6332_v63 }
 0x552   : > { %7916 = vmatprep.subr.mxu1 %v14561_v0 }
 0x553   : > { %7917 = vmatpush3.msra.mxu1 %v6331_v29 }
 0x554   : > { %7918 = vmatprep.subr.mxu1 %v14561_v0 }
 0x555   : > { %7919 = vmatpush3.msra.mxu1 %v6330_v5 }
 0x556   : > { %7920 = vmatprep.subr.mxu1 %v14561_v0 }
 0x557   : > { %7921 = vmatpush3.msra.mxu1 %v6329_v16 }
 0x558   : > { %7923 = vmatmul.mubr.f32.vlgmr.msra.gmra.mxu1 %v6345_v20 }
 0x593   : > { %v5694_v36 = vpop.f32.mrf.mxu1 }
 0x594   : > { %v5698_v58 = vadd.f32 %v5694_v36, %v5611_v61 }
 0x595   : > { %v7644_v22 = vpop.f32.mrf.mxu1  ;;  %v5785_v35 = vpop.f32.mrf.mxu0 }
 0x596   : > { %v5789_v52 = vadd.f32 %v5785_v35, %v5698_v58 }
 0x597   : > { %v7679_v50 = vpop.f32.mrf.mxu0 }
 0x5b3   : > { %v5875_v31 = vpop.f32.mrf.mxu1 }
 0x5b4   : > { %v5879_v32 = vadd.f32 %v5875_v31, %v5789_v52 }
 0x5b5   : > { %v7714_v13 = vpop.f32.mrf.mxu1 }
 0x5b6   : > { %v5966_v0 = vpop.f32.mrf.mxu0 }
 0x5b7   : > { %v5970_v18 = vadd.f32 %v5966_v0, %v5879_v32 }
 0x5b8   : > { %v7749_v1 = vpop.f32.mrf.mxu0 }
 0x5d5   : > { %v6056_v55 = vpop.f32.mrf.mxu1 }
 0x5d6   : > { %v6060_v17 = vadd.f32 %v6056_v55, %v5970_v18 }
 0x5d7   : > { %v7784_v3 = vpop.f32.mrf.mxu1 }
 0x5d8   : > { %v6144_v30 = vpop.f32.mrf.mxu0 }
 0x5d9   : > { %v6148_v25 = vadd.f32 %v6144_v30, %v6060_v17 }
 0x5da   : > { %v7819_v53 = vpop.f32.mrf.mxu0 }
 0x5f7   : > { %v6232_v27 = vpop.f32.mrf.mxu1 }
 0x5f8   : > { %v6236_v37 = vadd.f32 %v6232_v27, %v6148_v25 }
 0x5f9   : > { %v7854_v46 = vpop.f32.mrf.mxu1 }
 0x5fa   : > { %v6323_v45 = vpop.f32.mrf.mxu0 }
 0x5fb   : > { %v6327_v57 = vadd.f32 %v6323_v45, %v6236_v37 }
 0x5fc   : > { %v7889_v40 = vpop.f32.mrf.mxu0 }
 0x618   : > { %v6413_v56 = vpop.f32.mrf.mxu1 }
 0x619   : > { %v6417_v43 = vadd.f32 %v6413_v56, %v6327_v57 }
 0x61a   : > { %v7924_v44 = vpop.f32.mrf.mxu1 }
 0x61b   : > { %6418 = vst [vmem:[%s300_s22] sm:$0x1] %v6417_v43 }
 0x61c   : > { %9066 = shalt.err (!%p9063_p3)
}
 0x61d   : > { %s9067_s16 = scalar_lea.hbm %s13428_s23, 16  ;;  %s9071_s13 = scalar_lea.hbm %s13470_s7, 32 }
 0x61e   : > { %p9068_p2 = scmp.ne.s32.totalorder %s13428_s23, %s9067_s16  ;;  %p9072_p6 = scmp.lt.s32.totalorder %s13428_s23, %s13470_s7 }
 0x61f   : > { %p9073_p9 = scmp.lt.s32.totalorder %s9071_s13, %s9067_s16 }
 0x620   : > { %p9069_p4 = pnand %p9068_p2, %p9227_p5 }
 0x621   : > { %p9074_p7 = por %p9073_p9, %p9072_p6 }
 0x622   : > { %p9070_p13 = pneg %p9069_p4 }
 0x624   : > { %p9075_p10 = pnand %p9074_p7, %p9070_p13 }
 0x626   : > { %9078 = shalt.err (!%p9075_p10)
}
 0x627   : > { %7934 = dma.vmem_to_hbm [thread:$0]  (%p9227_p5), %s6433_s14, 16, %s13428_s23, %s6420_s29  }
 0x628 PF: > { %p7951_p12 = scmp.ge.s32.totalorder %s9121_s27, 2  ;;  %s6444_s18 = sand.u32 1, %s9109_s24  }
 0x629   : > { %p14636_p8 = scmp.ne.s32.totalorder %s13772_s12, 0  ;;  %s6445_s21 = scalar_lea.sflag [#allocation4], %s6444_s18 }
 0x62b   : > { %p7944_p11 = pnand %p7951_p12, %p14636_p8 }
 0x62d   : > { %p7945_p0 = pneg %p7944_p11 }
 0x62f   : > { %9104 = dma.done.wait (%p7945_p0), %s6445_s21, 16  }
 0x630   : > { %9106 = vsyncadd (%p7945_p0), %s6445_s21, 4294967280  ;;  %p19_p1 = scmp.ge.s32.totalorder %s9214_s30, 4   ;;  %s14637_s24 = smov %s9113_s25 }
 0x631   : > { %s14638_s25 = smov %s9117_s26  ;;  %s14639_s26 = smov %s9225_s10 }
 0x632   : > { %s14640_s27 = smov %s9214_s30  ;;  %21 = sbr.rel (!%p19_p1) target bundleno = 5 (0x5), region = 100 }
 0x637   :  { %6449 = vsyncpa [#allocation3], 1 }
 0x638   :  { %6451 = vsyncpa [#allocation3 + $0x1], 1 }
 0x639   :  { %6452 = vsyncpa [#allocation6], 1 }
 0x63a   :  { %6453 = vsyncpa [#allocation4], 1 }
 0x63b   :  { %6455 = vsyncpa [#allocation4 + $0x1], 1 }

</bundles_post_ra>
